<compile_context>
chip_gen: v6e
topology: v6e:2x2x1
jax: 0.10.0
libtpu: 0.0.40
codegen_flags: <defaults>
</compile_context>

<pallas_src>
import numpy as np
import jax
import jax.numpy as jnp
from jax.experimental import pallas as pl
from jax.experimental.pallas import tpu as pltpu

IMG_SIZE = 32
PATCH = 2
IN_CHANS = 3
EMBED_DIM = 768
GRID = IMG_SIZE // PATCH              # 16
NUM_PATCHES = GRID * GRID             # 256
PATCH_DIM = IN_CHANS * PATCH * PATCH  # 12

# Explicit scoped-VMEM limit so tm=2048 (≈16 MB of double-buffered pipeline
# state) is safe on every generation, including v5e's 16 MiB default.
_VMEM_LIMIT_BYTES = 32 * 1024 * 1024


def _patch_embed_kernel(p_ref, w_ref, b_ref, o_ref):
    # p_ref: (tm, 12), w_ref: (12, 768), b_ref: (1, 768), o_ref: (tm, 768)
    acc = jnp.dot(p_ref[...], w_ref[...],
                  preferred_element_type=jnp.float32,
                  precision=jax.lax.Precision.HIGHEST)
    o_ref[...] = (acc + b_ref[...]).astype(o_ref.dtype)


def _select_tile(M):
    """Row-tile selection.

    Preference order:
      1. largest tm dividing M with >= 2 grid steps (no pad/slice tail, and
         both v7x TensorCores get work via the 'parallel' grid axis),
      2. largest tm dividing M (single step; only for tiny M),
      3. pad fallback (never hit for M = B*256; kept for robustness).
    Returns (tm, needs_pad).
    """
    candidates = (2048, 1024, 768, 512, 256, 128, 64, 32, 16, 8)
    for tm in candidates:
        if M % tm == 0 and M // tm >= 2:
            return tm, False
    for tm in candidates:
        if M % tm == 0:
            return tm, False
    return min(1024, max(8, ((M + 7) // 8) * 8)), True


def patch_embed_pallas(patches, w, b, *, out_dtype=None):
    """patches: (M, 12), w: (12, 768), b: (768,) -> (M, 768) in out_dtype."""
    M = patches.shape[0]
    out_dtype = patches.dtype if out_dtype is None else jnp.dtype(out_dtype)

    tm, needs_pad = _select_tile(M)
    grid = pl.cdiv(M, tm)
    m_pad = grid * tm
    if needs_pad and m_pad != M:
        # Fallback only (M not a multiple of 8); pads the tiny (M, 12) input.
        patches = jnp.pad(patches, ((0, m_pad - M), (0, 0)))

    b2 = b.reshape(1, EMBED_DIM)

    in_bytes = np.dtype(patches.dtype).itemsize
    out_bytes = np.dtype(out_dtype).itemsize
    cost = pl.CostEstimate(
        flops=2 * M * PATCH_DIM * EMBED_DIM,
        transcendentals=0,
        bytes_accessed=(in_bytes * (M * PATCH_DIM + PATCH_DIM * EMBED_DIM + EMBED_DIM)
                        + out_bytes * M * EMBED_DIM),
    )

    out = pl.pallas_call(
        _patch_embed_kernel,
        out_shape=jax.ShapeDtypeStruct((m_pad, EMBED_DIM), out_dtype),
        grid_spec=pltpu.PrefetchScalarGridSpec(
            num_scalar_prefetch=0,
            grid=(grid,),
            in_specs=[
                pl.BlockSpec((tm, PATCH_DIM), lambda i: (i, 0)),
                # Grid-invariant operands: constant index_map -> DMA'd once.
                pl.BlockSpec((PATCH_DIM, EMBED_DIM), lambda i: (0, 0)),
                pl.BlockSpec((1, EMBED_DIM), lambda i: (0, 0)),
            ],
            out_specs=pl.BlockSpec((tm, EMBED_DIM), lambda i: (i, 0)),
        ),
        compiler_params=pltpu.CompilerParams(
            dimension_semantics=("parallel",),      # shards across v7x's 2 TCs
            vmem_limit_bytes=_VMEM_LIMIT_BYTES),
        cost_estimate=cost,
    )(patches, w, b2)

    return out[:M] if m_pad != M else out


def label_embedding(y):
    # LabelEmbedding.forward(x) == x  (identity; nothing to kernelize).
    return y


def timestep_embedding(t):
    # TimestepEmbedding.forward(x) == x  (identity; nothing to kernelize).
    return t


def dit_forward(x_nchw, y, t, conv_w, conv_b, *, out_dtype=None):
    """DiT.forward equivalent: returns patch-embedded x, shape (B, 256, 768).

    x_nchw : (B, 3, 32, 32) float32
    conv_w : (768, 3, 2, 2)  (PyTorch Conv2d OIHW layout)
    conv_b : (768,)
    """
    B, C, H, W = x_nchw.shape
    assert H == IMG_SIZE and W == IMG_SIZE and C == IN_CHANS
    y = label_embedding(y)        # identity
    t = timestep_embedding(t)     # identity
    del y, t                      # unused downstream of the embedding (see header)

    # Patch extraction: keep the minor (W / kw) axis minor so the activation
    # transpose is as cheap as possible; the (c, kh, kw) row ordering is folded
    # into w_mat (built once from the 36 KB weight, effectively free).
    xp = x_nchw.reshape(B, C, GRID, PATCH, GRID, PATCH)
    xp = jnp.transpose(xp, (0, 2, 4, 1, 3, 5))           # (B, gh, gw, c, kh, kw)
    patches = xp.reshape(B * NUM_PATCHES, PATCH_DIM)      # (B*256, 12)

    w_mat = conv_w.reshape(EMBED_DIM, PATCH_DIM).T        # (12, 768)

    out = patch_embed_pallas(patches, w_mat, conv_b, out_dtype=out_dtype)
    return out.reshape(B, NUM_PATCHES, EMBED_DIM)          # (B, 256, 768)


def _reference_forward(x_nchw, conv_w, conv_b):
    """Plain-JAX reference (lax conv) for validation."""
    y = jax.lax.conv_general_dilated(
        x_nchw, conv_w, window_strides=(PATCH, PATCH), padding="VALID",
        dimension_numbers=("NCHW", "OIHW", "NCHW"),
        precision=jax.lax.Precision.HIGHEST)
    y = y + conv_b.reshape(1, EMBED_DIM, 1, 1)
    B = x_nchw.shape[0]
    return jnp.transpose(y.reshape(B, EMBED_DIM, NUM_PATCHES), (0, 2, 1))


if __name__ == "__main__":
    key = jax.random.PRNGKey(0)
    kx, ky, kt, kw, kb = jax.random.split(key, 5)

    # Deterministic synthetic Conv2d parameters (nn.Conv2d(3, 768, 2, 2) shapes).
    conv_w = jax.random.normal(kw, (EMBED_DIM, IN_CHANS, PATCH, PATCH),
                               dtype=jnp.float32) * 0.02
    conv_b = jax.random.normal(kb, (EMBED_DIM,), dtype=jnp.float32) * 0.02

    fwd_f32 = jax.jit(lambda x, y, t: dit_forward(x, y, t, conv_w, conv_b))
    fwd_bf16 = jax.jit(lambda x, y, t: dit_forward(x, y, t, conv_w, conv_b,
                                                   out_dtype=jnp.bfloat16))

    def run_case(B):
        x = jax.random.normal(kx, (B, IN_CHANS, IMG_SIZE, IMG_SIZE),
                              dtype=jnp.float32)
        y = jax.random.randint(ky, (B,), 0, 10)
        t = jax.random.uniform(kt, (B,), dtype=jnp.float32)
        out = jax.block_until_ready(fwd_f32(x, y, t))
        ref = jax.block_until_ready(_reference_forward(x, conv_w, conv_b))
        assert out.shape == (B, NUM_PATCHES, EMBED_DIM)
        assert jnp.allclose(out, ref, atol=1e-4, rtol=1e-4), f"mismatch at B={B}"
        return x, y, t, ref

    # B=2  -> M=512,  tm=256,  grid=2 (both TCs busy, no pad).
    x2, y2, t2, ref2 = run_case(2)
    # B=1  -> M=256,  tm=128,  grid=2 (small-batch megacore split, no pad).
    run_case(1)
    # B=5  -> M=1280, tm=256,  grid=5 (formerly the pad+slice path; now divisor).
    run_case(5)
    # B=16 -> M=4096, tm=2048, grid=2 (largest tile; exercises the VMEM limit).
    run_case(16)

    # Optional bf16-output path (review item: halve the output-write bytes).
    out_bf16 = jax.block_until_ready(fwd_bf16(x2, y2, t2))
    assert out_bf16.dtype == jnp.bfloat16
    assert jnp.allclose(out_bf16.astype(jnp.float32), ref2, atol=1e-2, rtol=5e-2)

    # LabelEmbedding semantics: identity pass-through.
    assert jnp.array_equal(label_embedding(y2), y2)

    print("KERNEL_OK")
</pallas_src>

<mosaic_0001>
module attributes {stable_mosaic.version = 11 : i64} {
  func.func @_patch_embed_kernel(%arg0: i32, %arg1: memref<256x12xf32, #tpu.memory_space<vmem>>, %arg2: memref<12x768xf32, #tpu.memory_space<vmem>>, %arg3: memref<1x768xf32, #tpu.memory_space<vmem>>, %arg4: memref<256x768xf32, #tpu.memory_space<vmem>>) attributes {dimension_semantics = [#tpu.dimension_semantics<parallel>], iteration_bounds = array<i64: 2>, scalar_prefetch = 0 : i64, scratch_operands = 0 : i64, tpu.core_type = #tpu.core_type<tc>, window_params = [{transform_indices = @transform_0, window_bounds = array<i64: 256, 12>}, {pipeline_mode = #tpu.pipeline_mode<synchronous>, transform_indices = @transform_1, window_bounds = array<i64: 12, 768>}, {pipeline_mode = #tpu.pipeline_mode<synchronous>, transform_indices = @transform_2, window_bounds = array<i64: 1, 768>}, {transform_indices = @transform_3, window_bounds = array<i64: 256, 768>}]} {
    %c0 = arith.constant 0 : index
    %c0_0 = arith.constant 0 : index
    %0 = vector.load %arg1[%c0, %c0_0] : memref<256x12xf32, #tpu.memory_space<vmem>>, vector<256x12xf32>
    %c0_1 = arith.constant 0 : index
    %c0_2 = arith.constant 0 : index
    %1 = vector.load %arg2[%c0_1, %c0_2] : memref<12x768xf32, #tpu.memory_space<vmem>>, vector<12x768xf32>
    %cst = arith.constant dense<0.000000e+00> : vector<256x768xf32>
    %2 = tpu.matmul %0, %1, %cst {dimension_numbers = #tpu.dot_dimension_numbers<[1], [0], [0], [1], [0, 0, 1, 1], [], []>, precision = #tpu.contract_precision<fp32>} : vector<256x12xf32>, vector<12x768xf32>, vector<256x768xf32> -> vector<256x768xf32>
    %c0_3 = arith.constant 0 : index
    %c0_4 = arith.constant 0 : index
    %3 = vector.load %arg3[%c0_3, %c0_4] : memref<1x768xf32, #tpu.memory_space<vmem>>, vector<1x768xf32>
    %4 = vector.broadcast %3 : vector<1x768xf32> to vector<256x768xf32>
    %5 = arith.addf %2, %4 : vector<256x768xf32>
    %c0_5 = arith.constant 0 : index
    %c0_6 = arith.constant 0 : index
    %6 = vector.load %arg4[%c0_5, %c0_6] : memref<256x768xf32, #tpu.memory_space<vmem>>, vector<256x768xf32>
    tpu.vector_store %arg4[%c0_5, %c0_6], %5 {strides = array<i32>} : memref<256x768xf32, #tpu.memory_space<vmem>>, vector<256x768xf32>,
    return
  }
  func.func @transform_0(%arg0: i32) -> (i32, i32) {
    %c0_i32 = arith.constant 0 : i32
    %c0_i32_0 = arith.constant 0 : i32
    return %arg0, %c0_i32 : i32, i32
  }
  func.func @transform_1(%arg0: i32) -> (i32, i32) {
    %c0_i32 = arith.constant 0 : i32
    %c0_i32_0 = arith.constant 0 : i32
    %c0_i32_1 = arith.constant 0 : i32
    return %c0_i32, %c0_i32_0 : i32, i32
  }
  func.func @transform_2(%arg0: i32) -> (i32, i32) {
    %c0_i32 = arith.constant 0 : i32
    %c0_i32_0 = arith.constant 0 : i32
    %c0_i32_1 = arith.constant 0 : i32
    return %c0_i32, %c0_i32_0 : i32, i32
  }
  func.func @transform_3(%arg0: i32) -> (i32, i32) {
    %c0_i32 = arith.constant 0 : i32
    %c0_i32_0 = arith.constant 0 : i32
    return %arg0, %c0_i32 : i32, i32
  }
}

</mosaic_0001>

<bundles_post_ra>
// kernel: _lambda_.1
= control target key start
LH: loop header
LB: loop body
LE: loop exit
PB: predicated region body
PF: predicated region fallthrough
CT: control target
= control target key end

     0   :  { %8 = vsyncpa [#allocation3], 0  ;;  %s10367_s0 = inlined_call_operand.vmem [shape: f32[512,12], index: 0, kind: input, shape index: {}]   ;;  %s10368_s1 = inlined_call_operand.vmem [shape: f32[12,768], index: 1, kind: input, shape index: {}]   ;;  %s10369_s2 = inlined_call_operand.vmem [shape: f32[1,768], index: 2, kind: input, shape index: {}]   ;;  %s10370_s3 = inlined_call_operand.hbm [shape: f32[512,768], index: 3, kind: output, shape index: {}]  }
   0x1   :  { %10 = vsyncpa [#allocation3 + $0x1], 0  ;;  %s6806_s12 = smov 0   ;;  %s6808_s13 = smov 0  }
   0x2   :  { %s6810_s14 = smov 0   ;;  %s6812_s15 = smov 0  }
   0x3 LB: > { %s6827_s16 = sadd.s32 4294967295, %s6780_s15   ;;  %s6663_s17 = sadd.s32 4294967294, %s6780_s15   ;;  %s6780_s15 = sphi %s6812_s15, %s11518_s15   ;;  %s6776_s14 = sphi %s6810_s14, %s11517_s14   ;;  %s6772_s13 = sphi %s6808_s13, %s11516_s13   ;;  %s6768_s12 = sphi %s6806_s12, %s11515_s12  }
   0x4   : > { %s6831_s18 = sadd.s32 1, %s6780_s15   ;;  %s91_s19 = sadd.s32 1, %s6776_s14 }
   0x5   : > { %s88_s20 = ssub.s32 %s6780_s15, %s6831_s18  ;;  %p101_p0 = scmp.ne.s32.totalorder %s6776_s14, %s6772_s13 }
   0x6   : > { %p89_p1 = scmp.eq.s32.totalorder %s88_s20, 0  ;;  %p102_p2 = scmp.eq.s32.totalorder %s6827_s16, 1 }
   0x7   : > { %p107_p3 = scmp.ne.s32.totalorder %s6772_s13, %s6768_s12  ;;  %p108_p4 = scmp.eq.s32.totalorder %s6663_s17, 1 }
   0x8   : > { %s6842_s21 = scalar_select %p89_p1, %s6776_s14, %s91_s19  }
   0x9   : > { %p6844_p5 = por %p102_p2, %p101_p0  ;;  %p6848_p6 = por %p108_p4, %p107_p3 }
   0xa   : > { %p6666_p7 = scmp.ge.s32.totalorder %s6780_s15, 1  ;;  %p141_p8 = scmp.lt.s32.totalorder %s6780_s15, 3 }
   0xc   : > { %p142_p9 = pnand %p6666_p7, %p141_p8 }
   0xe   : > { %145 = sbr.rel (%p142_p9) target bundleno = 1400 (0x578), region = 32 }
  0x13   : > { %v211_v0 = vld [vmem:[%s10368_s1 + $0x38] sm:$0xf]  ;;  %vm345_vm0 = vcmask 1043456   ;;  %v210_v1 = vld [vmem:[%s10368_s1 + $0x30] sm:$0xf]  ;;  %v205_v2 = vld [vmem:[%s10368_s1 + $0x8] sm:$0xff] }
  0x14   : > { %v350_v3 = vsel %vm345_vm0, %v211_v0, 0  ;;  %v347_v4 = vsel %vm345_vm0, %v210_v1, 0  ;;  %v6865_v5 = vand.u32 4294901760, %v205_v2  ;;  %v204_v6 = vld [vmem:[%s10368_s1] sm:$0xff]  ;;  %s6667_s5 = sshll.u32 %s6827_s16, 5  ;;  %v10374_v10 = vmov 0.0  }
  0x15   : > { %v6871_v7 = vand.u32 4294901760, %v350_v3  ;;  %v6873_v8 = vand.u32 4294901760, %v347_v4  ;;  %v6875_v9 = vand.u32 4294901760, %v204_v6  ;;  %432 = vmatprep.mubr.f32.mxu0 %v10374_v10  ;;  %869 = vmatprep.mubr.f32.mxu1 %v10374_v10  ;;  %p166_p10 = scmp.lt.s32.totalorder %s6667_s5, 63  ;;  %vm248_vm1 = vcmask 97280   ;;  %s162_s29 = sand.u32 1, %s6772_s13  }
  0x16   : > { %v6880_v11 = vsub.f32 %v205_v2, %v6865_v5  ;;  %s6674_s30 = smul.u32 1536, %s162_s29  ;;  %s6783_s7 = smov [#allocation2]  }
  0x17   : > { %393 = vmatprep.subr.mxu0 %v6871_v7  ;;  %v6884_v12 = vsub.f32 %v350_v3, %v6871_v7  ;;  %v6887_v13 = vsub.f32 %v347_v4, %v6873_v8  ;;  %v6890_v14 = vsub.f32 %v204_v6, %v6875_v9  ;;  %s11520_s5 = smov (!%p166_p10, %s6667_s5), 63  ;;  %s6675_s26 = smul.u32 24576, %s6827_s16 }
  0x18   : > { %395 = vmatpush1.msra.mxu0 %v6873_v8  ;;  %v10372_v15 = vand.u32 4294901760, %v6880_v11  ;;  %s6668_s6 = sshll.u32 %s11520_s5, 3  ;;  %s8369_s4 = scalar_lea.vmem [#allocation2], %s6674_s30 }
  0x19   : > { %v815_v16 = vand.u32 4294901760, %v6884_v12  ;;  %397 = vmatprep.subr.mxu0 %v6865_v5  ;;  %v10373_v17 = vand.u32 4294901760, %v6887_v13  ;;  %v10371_v18 = vand.u32 4294901760, %v6890_v14  ;;  %s6905_s9 = scalar_lea.vmem %s10367_s0, %s6668_s6  ;;  %s6601_s27 = sshll.u32 %s8369_s4, 4  ;;  %s10321_s27 = int_to_ptr.vmem [resolvable:$true] %s6601_s27 }
  0x1a   : > { %399 = vmatpush1.msra.mxu0 %v6875_v9  ;;  %v828_v19 = vsub.f32 %v6880_v11, %v10372_v15  ;;  %v172_v23 = vld [vmem:[%s6905_s9] sm:$0xff]  ;;  %v173_v24 = vld [vmem:[%s6905_s9 + $0x8] sm:$0xff]  ;;  %v174_v25 = vld [vmem:[%s6905_s9 + $0x10] sm:$0xff]  ;;  %s10319_s5 = scalar_lea.hbm %s10370_s3, %s6675_s26  ;;  %s10327_s16 = scalar_lea.sflag [#allocation3], %s162_s29 }
  0x1b   : > { %v816_v20 = vsub.f32 %v6884_v12, %v815_v16  ;;  %v822_v21 = vsub.f32 %v6887_v13, %v10373_v17  ;;  %v834_v22 = vsub.f32 %v6890_v14, %v10371_v18  ;;  %1124 = vmatprep.subr.mxu0 %v6884_v12  ;;  %v250_v26 = vsel %vm248_vm1, %v172_v23, 0  ;;  %v175_v29 = vld [vmem:[%s6905_s9 + $0x18] sm:$0xff]  ;;  %v176_v30 = vld [vmem:[%s6905_s9 + $0x20] sm:$0xff]  ;;  %v177_v44 = vld [vmem:[%s6905_s9 + $0x28] sm:$0xff]  ;;  %s6720_s6 = scalar_lea.vmem %s10321_s27, 24576  ;;  %s6724_s8 = sshll.u32 %s6783_s7, 4  ;;  %s6725_s8 = int_to_ptr.vmem [resolvable:$false] %s6724_s8 }
  0x1c   : > { %v253_v27 = vsel %vm248_vm1, %v173_v24, 0  ;;  %v256_v28 = vsel %vm248_vm1, %v174_v25, 0  ;;  %v829_v33 = vand.u32 4294901760, %v828_v19  ;;  %v6925_v34 = vand.u32 4294901760, %v250_v26  ;;  %v178_v52 = vld [vmem:[%s6905_s9 + $0x30] sm:$0xff]  ;;  %v179_v61 = vld [vmem:[%s6905_s9 + $0x38] sm:$0xff]  ;;  %p6721_p11 = scmp.ne.s32.totalorder %s10321_s27, %s6720_s6  ;;  %p6727_p0 = scmp.lt.s32.totalorder %s10321_s27, %s6725_s8 }
  0x1d   : > { %v817_v31 = vand.u32 4294901760, %v816_v20  ;;  %v823_v32 = vand.u32 4294901760, %v822_v21  ;;  %v835_v35 = vand.u32 4294901760, %v834_v22  ;;  %v6927_v36 = vand.u32 4294901760, %v253_v27  ;;  %v180_v4 = vld [vmem:[%s6905_s9 + $0x40] sm:$0xff]  ;;  %v181_v22 = vld [vmem:[%s6905_s9 + $0x48] sm:$0xff] }
  0x1e   : > { %10692 = vst [vmem:[#allocation5_spill] sm:$0xff] %v6925_v34  ;;  %v6929_v37 = vand.u32 4294901760, %v256_v28  ;;  %v259_v38 = vsel %vm248_vm1, %v175_v29, 0  ;;  %v6933_v39 = vsub.f32 %v250_v26, %v6925_v34  ;;  %v262_v41 = vsel %vm248_vm1, %v176_v30, 0  ;;  %v188_v12 = vld [vmem:[%s6905_s9 + $0x80] sm:$0xff]  ;;  %v189_v23 = vld [vmem:[%s6905_s9 + $0x88] sm:$0xff]  ;;  %p6722_p12 = pnand %p6721_p11, %p6844_p5 }
  0x1f   : > { %10693 = vst [vmem:[#allocation6_spill] sm:$0xff] %v6927_v36  ;;  %818 = vmatprep.subr.mxu1 %v817_v31  ;;  %v6935_v40 = vand.u32 4294901760, %v259_v38  ;;  %v6939_v42 = vsub.f32 %v253_v27, %v6927_v36  ;;  %v6951_v47 = vand.u32 4294901760, %v262_v41  ;;  %v265_v51 = vsel %vm248_vm1, %v177_v44, 0  ;;  %v190_v24 = vld [vmem:[%s6905_s9 + $0x90] sm:$0xff]  ;;  %v191_v25 = vld [vmem:[%s6905_s9 + $0x98] sm:$0xff] }
  0x20   : > { %10694 = vst [vmem:[#allocation7_spill] sm:$0xff] %v6929_v37  ;;  %10695 = vst [vmem:[#allocation8_spill] sm:$0xff] %v6933_v39  ;;  %824 = vmatpush1.msra.mxu1 %v823_v32  ;;  %v6942_v43 = vsub.f32 %v256_v28, %v6929_v37  ;;  %v6946_v45 = vand.u32 4294901760, %v6933_v39  ;;  %v6972_v55 = vand.u32 4294901760, %v265_v51  ;;  %v268_v56 = vsel %vm248_vm1, %v178_v52, 0  ;;  %v193_v44 = vld [vmem:[%s6905_s9 + $0xa8] sm:$0xff]  ;;  %p6723_p13 = pneg %p6722_p12 }
  0x21   : > { %10696 = vst [vmem:[#allocation9_spill] sm:$0xff] %v6935_v40  ;;  %10697 = vst [vmem:[#allocation10_spill] sm:$0xff] %v6939_v42  ;;  %830 = vmatprep.subr.mxu1 %v829_v33  ;;  %v6949_v46 = vand.u32 4294901760, %v6939_v42  ;;  %v6961_v50 = vsub.f32 %v259_v38, %v6935_v40  ;;  %v6986_v60 = vsub.f32 %v262_v41, %v6951_v47  ;;  %v6996_v63 = vand.u32 4294901760, %v268_v56  ;;  %v192_v41 = vld [vmem:[%s6905_s9 + $0xa0] sm:$0xff]  ;;  %v199_v18 = vld [vmem:[%s6905_s9 + $0xd8] sm:$0xff] }
  0x22   : > { %10698 = vst [vmem:[#allocation11_spill] sm:$0xff] %v6942_v43  ;;  %10699 = vst [vmem:[#allocation12_spill] sm:$0xff] %v6946_v45  ;;  %836 = vmatpush1.msra.mxu1 %v835_v35  ;;  %v436_v48 = vsub.f32 %v6933_v39, %v6946_v45  ;;  %v6958_v49 = vand.u32 4294901760, %v6942_v43  ;;  %v6994_v62 = vsub.f32 %v265_v51, %v6972_v55  ;;  %v271_v3 = vsel %vm248_vm1, %v179_v61, 0 }
  0x23   : > { %10700 = vst [vmem:[#allocation13_spill] sm:$0xff] %v6949_v46  ;;  %10701 = vst [vmem:[#allocation14_spill] sm:$0xff] %v6951_v47  ;;  %871 = vmatmul.mubr.f32.vlgmr.msra.gmra.mxu1 %v6925_v34  ;;  %1452 = vmatprep.subr.mxu1 %v6871_v7  ;;  %v447_v53 = vsub.f32 %v6939_v42, %v6949_v46  ;;  %v6983_v59 = vand.u32 4294901760, %v6961_v50  ;;  %v7007_v2 = vand.u32 4294901760, %v6986_v60  ;;  %v7021_v19 = vand.u32 4294901760, %v271_v3 }
  0x24   : > { %10702 = vst [vmem:[#allocation15_spill] sm:$0xff] %v6958_v49  ;;  %10703 = vst [vmem:[#allocation16_spill] sm:$0xff] %v6961_v50  ;;  %1454 = vmatpush1.msra.mxu1 %v6873_v8  ;;  %876 = vmatprep.mubr.f32.mxu1 %v10374_v10  ;;  %v6969_v54 = vand.u32 4294901760, %v436_v48  ;;  %v458_v58 = vsub.f32 %v6942_v43, %v6958_v49  ;;  %v7016_v6 = vand.u32 4294901760, %v6994_v62  ;;  %v7046_v29 = vsel %vm248_vm1, %v188_v12, 0  ;;  %v182_v48 = vld [vmem:[%s6905_s9 + $0x50] sm:$0xff] }
  0x25   : > { %1456 = vmatprep.subr.mxu1 %v6865_v5  ;;  %10705 = vst [vmem:[#allocation18_spill] sm:$0xff] %v6972_v55  ;;  %v6977_v57 = vand.u32 4294901760, %v447_v53  ;;  %10707 = vst [vmem:[#allocation20_spill] sm:$0xff] %v6983_v59  ;;  %v469_v1 = vsub.f32 %v6961_v50, %v6983_v59  ;;  %v480_v21 = vsub.f32 %v6986_v60, %v7007_v2  ;;  %v277_v32 = vsel %vm248_vm1, %v181_v22, 0 }
  0x26   : > { %10704 = vst [vmem:[#allocation17_spill] sm:$0xff] %v6969_v54  ;;  %1458 = vmatpush1.msra.mxu1 %v6875_v9  ;;  %438 = vmatmul.mubr.f32.vlgmr.msra.gmra.mxu0 %v6969_v54  ;;  %10708 = vst [vmem:[#allocation21_spill] sm:$0xff] %v6986_v60  ;;  %v7001_v0 = vand.u32 4294901760, %v458_v58  ;;  %v491_v26 = vsub.f32 %v6994_v62, %v7016_v6  ;;  %v7043_v28 = vsub.f32 %v271_v3, %v7021_v19  ;;  %v195_v58 = vld [vmem:[%s6905_s9 + $0xb8] sm:$0xff] }
  0x27   : > { %10706 = vst [vmem:[#allocation19_spill] sm:$0xff] %v6977_v57  ;;  %878 = vmatmul.mubr.f32.gmra.mxu1 %v6927_v36  ;;  %1127 = vmatpush1.msra.mxu0 %v6887_v13  ;;  %10709 = vst [vmem:[#allocation22_spill] sm:$0xff] %v6994_v62  ;;  %v7024_v20 = vand.u32 4294901760, %v469_v1  ;;  %v7049_v30 = vand.u32 4294901760, %v480_v21  ;;  %v7058_v33 = vsel %vm248_vm1, %v189_v23, 0  ;;  %v7061_v35 = vsel %vm248_vm1, %v190_v24, 0 }
  0x28   : > { %443 = vmatprep.mubr.f32.mxu0 %v10374_v10  ;;  %883 = vmatprep.mubr.f32.mxu1 %v10374_v10  ;;  %10710 = vst [vmem:[#allocation23_spill] sm:$0xff] %v6996_v63  ;;  %10711 = vst [vmem:[#allocation24_spill] sm:$0xff] %v7001_v0  ;;  %v7064_v38 = vsel %vm248_vm1, %v191_v25, 0  ;;  %v7069_v51 = vand.u32 4294901760, %v491_v26  ;;  %v7074_v53 = vand.u32 4294901760, %v7043_v28  ;;  %v7083_v1 = vand.u32 4294901760, %v277_v32 }
  0x29   : > { %1130 = vmatprep.subr.mxu0 %v6880_v11  ;;  %2110 = vmatprep.subr.mxu1 %v6871_v7  ;;  %10712 = vst [vmem:[#allocation25_spill] sm:$0xff] %v7007_v2  ;;  %10713 = vst [vmem:[#allocation26_spill] sm:$0xff] %v7016_v6  ;;  %v7019_v7 = vsub.f32 %v268_v56, %v6996_v63  ;;  %v194_v56 = vld [vmem:[%s6905_s9 + $0xb0] sm:$0xff]  ;;  %v183_v3 = vld [vmem:[%s6905_s9 + $0x58] sm:$0xff]  ;;  %v7090_v21 = vsel %vm248_vm1, %v193_v44, 0  ;;  %v280_v12 = vsel %vm248_vm1, %v182_v48, 0 }
  0x2a   : > { %1133 = vmatpush1.msra.mxu0 %v6890_v14  ;;  %10715 = vst [vmem:[#allocation28_spill] sm:$0xff] %v7021_v19  ;;  %10716 = vst [vmem:[#allocation29_spill] sm:$0xff] %v7024_v20  ;;  %v7099_v22 = vsel %vm248_vm1, %v195_v58, 0  ;;  %v283_v24 = vsel %vm248_vm1, %v183_v3, 0  ;;  %v196_v25 = vld [vmem:[%s6905_s9 + $0xc0] sm:$0xff]  ;;  %v513_v26 = vsub.f32 %v7043_v28, %v7074_v53  ;;  %v7113_v44 = vsub.f32 %v277_v32, %v7083_v1  ;;  %v197_v58 = vld [vmem:[%s6905_s9 + $0xc8] sm:$0xff] }
  0x2b   : > { %449 = vmatmul.mubr.f32.gmra.mxu0 %v6977_v57  ;;  %885 = vmatmul.mubr.f32.gmra.mxu1 %v6929_v37  ;;  %10714 = vst [vmem:[#allocation27_spill] sm:$0xff] %v7019_v7  ;;  %v7040_v27 = vand.u32 4294901760, %v7019_v7  ;;  %10718 = vst [vmem:[#allocation31_spill] sm:$0xff] %v7043_v28  ;;  %v7115_v48 = vand.u32 4294901760, %v280_v12  ;;  %v198_v3 = vld [vmem:[%s6905_s9 + $0xd0] sm:$0xff]  ;;  %v7126_v15 = vand.u32 4294901760, %v283_v24 }
  0x2c   : > { %454 = vmatprep.mubr.f32.mxu0 %v10374_v10  ;;  %890 = vmatprep.mubr.f32.mxu1 %v10374_v10  ;;  %10719 = vst [vmem:[#allocation32_spill] sm:$0xff] %v7049_v30  ;;  %10721 = vst [vmem:[#allocation34_spill] sm:$0xff] %v7069_v51  ;;  %v7129_v32 = vand.u32 4294901760, %v513_v26  ;;  %v7152_v57 = vsel %vm248_vm1, %v199_v18, 0 }
  0x2d   : > { %1811 = vmatprep.subr.mxu0 %v815_v16  ;;  %v274_v16 = vsel %vm248_vm1, %v180_v4, 0  ;;  %10717 = vst [vmem:[#allocation30_spill] sm:$0xff] %v7040_v27  ;;  %v502_v52 = vsub.f32 %v7019_v7, %v7040_v27  ;;  %10722 = vst [vmem:[#allocation35_spill] sm:$0xff] %v7074_v53  ;;  %v7087_v4 = vsel %vm248_vm1, %v192_v41, 0  ;;  %v7156_v54 = vsub.f32 %v283_v24, %v7126_v15 }
  0x2e   : > { %v7052_v31 = vand.u32 4294901760, %v274_v16  ;;  %10724 = vst [vmem:[#allocation37_spill] sm:$0xff] %v7083_v1  ;;  %10727 = vst [vmem:[#allocation40_spill] sm:$0xff] %v7113_v44 }
  0x2f   : > { %460 = vmatmul.mubr.f32.gmra.mxu0 %v7001_v0  ;;  %892 = vmatmul.mubr.f32.gmra.mxu1 %v6935_v40  ;;  %v7101_v23 = vand.u32 4294901760, %v502_v52  ;;  %10728 = vst [vmem:[#allocation41_spill] sm:$0xff] %v7115_v48  ;;  %v184_v52 = vld [vmem:[%s6905_s9 + $0x60] sm:$0xff]  ;;  %10729 = vst [vmem:[#allocation42_spill] sm:$0xff] %v7126_v15  ;;  %v7149_v0 = vsel %vm248_vm1, %v198_v3, 0 }
  0x30   : > { %465 = vmatprep.mubr.f32.mxu0 %v10374_v10  ;;  %897 = vmatprep.mubr.f32.mxu1 %v10374_v10  ;;  %10720 = vst [vmem:[#allocation33_spill] sm:$0xff] %v7052_v31  ;;  %v7081_v61 = vsub.f32 %v274_v16, %v7052_v31  ;;  %v7096_v16 = vsel %vm248_vm1, %v194_v56, 0  ;;  %v7121_v56 = vsel %vm248_vm1, %v196_v25, 0  ;;  %10730 = vst [vmem:[#allocation43_spill] sm:$0xff] %v7129_v32  ;;  %v286_v26 = vsel %vm248_vm1, %v184_v52, 0  ;;  %v202_v52 = vld [vmem:[%s6905_s9 + $0xf0] sm:$0xff] }
  0x31   : > { %10725 = vst [vmem:[#allocation38_spill] sm:$0xff] %v7101_v23  ;;  %v7138_v25 = vsub.f32 %v280_v12, %v7115_v48  ;;  %v201_v12 = vld [vmem:[%s6905_s9 + $0xe8] sm:$0xff]  ;;  %10734 = vst [vmem:[#allocation46_spill] sm:$0xff] %v7156_v54  ;;  %v7172_v24 = vand.u32 4294901760, %v286_v26 }
  0x32   : > { %10723 = vst [vmem:[#allocation36_spill] sm:$0xff] %v7081_v61  ;;  %v7110_v41 = vand.u32 4294901760, %v7081_v61 }
  0x33   : > { %471 = vmatmul.mubr.f32.gmra.mxu0 %v7024_v20  ;;  %899 = vmatmul.mubr.f32.gmra.mxu1 %v6951_v47  ;;  %10732 = vst [vmem:[#allocation45_spill] sm:$0xff] %v7138_v25  ;;  %v10733_v20 = vmov 0.0   ;;  %v7170_v3 = vand.u32 4294901760, %v7138_v25  ;;  %10737 = vst [vmem:[#allocation49_spill] sm:$0xff] %v7172_v24  ;;  %v7197_v37 = vsub.f32 %v286_v26, %v7172_v24 }
  0x34   : > { %476 = vmatprep.mubr.f32.mxu0 %v10374_v10  ;;  %904 = vmatprep.mubr.f32.mxu1 %v10374_v10  ;;  %10726 = vst [vmem:[#allocation39_spill] sm:$0xff] %v7110_v41  ;;  %v524_v17 = vsub.f32 %v7081_v61, %v7110_v41 }
  0x35   : > { %10736 = vst [vmem:[#allocation48_spill] sm:$0xff] %v7170_v3  ;;  %10741 = vst [vmem:[#allocation53_spill] sm:$0xff] %v7197_v37 }
  0x37   : > { %482 = vmatmul.mubr.f32.gmra.mxu0 %v7049_v30  ;;  %906 = vmatmul.mubr.f32.gmra.mxu1 %v6972_v55  ;;  %v200_v30 = vld [vmem:[%s6905_s9 + $0xe0] sm:$0xff] }
  0x38   : > { %487 = vmatprep.mubr.f32.mxu0 %v10374_v10  ;;  %911 = vmatprep.mubr.f32.mxu1 %v10374_v10 }
  0x3b   : > { %493 = vmatmul.mubr.f32.gmra.mxu0 %v7069_v51  ;;  %913 = vmatmul.mubr.f32.gmra.mxu1 %v6996_v63  ;;  %v185_v51 = vld [vmem:[%s6905_s9 + $0x68] sm:$0xff]  ;;  %v7160_v63 = vsel %vm248_vm1, %v200_v30, 0  ;;  %v7178_v30 = vsel %vm248_vm1, %v201_v12, 0  ;;  %v546_v12 = vsub.f32 %v7138_v25, %v7170_v3 }
  0x3c   : > { %498 = vmatprep.mubr.f32.mxu0 %v10374_v10  ;;  %918 = vmatprep.mubr.f32.mxu1 %v10374_v10  ;;  %v7135_v10 = vand.u32 4294901760, %v7113_v44 }
  0x3e   : > { %10731 = vst [vmem:[#allocation44_spill] sm:$0xff] %v7135_v10  ;;  %v535_v18 = vsub.f32 %v7113_v44, %v7135_v10 }
  0x3f   : > { %504 = vmatmul.mubr.f32.gmra.mxu0 %v7101_v23  ;;  %920 = vmatmul.mubr.f32.gmra.mxu1 %v7021_v19  ;;  %v7146_v23 = vsel %vm248_vm1, %v197_v58, 0  ;;  %v289_v19 = vsel %vm248_vm1, %v185_v51, 0  ;;  %v7164_v58 = vand.u32 4294901760, %v524_v17  ;;  %v186_v51 = vld [vmem:[%s6905_s9 + $0x70] sm:$0xff]  ;;  %v203_v17 = vld [vmem:[%s6905_s9 + $0xf8] sm:$0xff] }
  0x40   : > { %509 = vmatprep.mubr.f32.mxu0 %v10733_v20  ;;  %925 = vmatprep.mubr.f32.mxu1 %v10733_v20  ;;  %v7187_v55 = vand.u32 4294901760, %v289_v19  ;;  %v292_v47 = vsel %vm248_vm1, %v186_v51, 0  ;;  %v7191_v40 = vand.u32 4294901760, %v535_v18  ;;  %v7201_v36 = vsel %vm248_vm1, %v203_v17, 0 }
  0x41   : > { %10735 = vst [vmem:[#allocation47_spill] sm:$0xff] %v7164_v58  ;;  %v7205_v51 = vand.u32 4294901760, %v292_v47  ;;  %v7215_v17 = vand.u32 4294901760, %v7197_v37 }
  0x42   : > { %10739 = vst [vmem:[#allocation51_spill] sm:$0xff] %v7187_v55  ;;  %10740 = vst [vmem:[#allocation52_spill] sm:$0xff] %v7191_v40 }
  0x43   : > { %515 = vmatmul.mubr.f32.gmra.mxu0 %v7129_v32  ;;  %927 = vmatmul.mubr.f32.gmra.mxu1 %v7052_v31  ;;  %v7182_v32 = vsel %vm248_vm1, %v202_v52, 0  ;;  %v7185_v31 = vand.u32 4294901760, %v7156_v54  ;;  %v187_v52 = vld [vmem:[%s6905_s9 + $0x78] sm:$0xff]  ;;  %10742 = vst [vmem:[#allocation54_spill] sm:$0xff] %v7205_v51  ;;  %10744 = vst [vmem:[#allocation56_spill] sm:$0xff] %v7215_v17  ;;  %s6726_s9 = scalar_lea.vmem %s6725_s8, 49152 }
  0x44   : > { %520 = vmatprep.mubr.f32.mxu0 %v10733_v20  ;;  %932 = vmatprep.mubr.f32.mxu1 %v10733_v20  ;;  %v295_v18 = vsel %vm248_vm1, %v187_v52, 0  ;;  %p6728_p1 = scmp.lt.s32.totalorder %s6726_s9, %s6720_s6 }
  0x45   : > { %10738 = vst [vmem:[#allocation50_spill] sm:$0xff] %v7185_v31  ;;  %v557_v26 = vsub.f32 %v7156_v54, %v7185_v31  ;;  %v7222_v52 = vand.u32 4294901760, %v295_v18 }
  0x46   : > { %p6729_p2 = por %p6728_p1, %p6727_p0 }
  0x47   : > { %526 = vmatmul.mubr.f32.gmra.mxu0 %v7164_v58  ;;  %934 = vmatmul.mubr.f32.gmra.mxu1 %v7083_v1  ;;  %v7209_v58 = vand.u32 4294901760, %v546_v12  ;;  %v7218_v1 = vsub.f32 %v289_v19, %v7187_v55  ;;  %10746 = vst [vmem:[#allocation58_spill] sm:$0xff] %v7222_v52  ;;  %v7225_v12 = vand.u32 4294901760, %v557_v26  ;;  %v7234_v19 = vsub.f32 %v292_v47, %v7205_v51 }
  0x48   : > { %531 = vmatprep.mubr.f32.mxu0 %v10733_v20  ;;  %939 = vmatprep.mubr.f32.mxu1 %v10733_v20  ;;  %v7239_v34 = vsub.f32 %v295_v18, %v7222_v52  ;;  %v7251_v47 = vand.u32 4294901760, %v7046_v29  ;;  %p6730_p3 = pnand %p6729_p2, %p6723_p13 }
  0x49   : > { %10743 = vst [vmem:[#allocation55_spill] sm:$0xff] %v7209_v58  ;;  %10745 = vst [vmem:[#allocation57_spill] sm:$0xff] %v7218_v1 }
  0x4a   : > { %10747 = vst [vmem:[#allocation59_spill] sm:$0xff] %v7225_v12  ;;  %10749 = vst [vmem:[#allocation61_spill] sm:$0xff] %v7234_v19  ;;  %v7256_v18 = vand.u32 4294901760, %v7239_v34 }
  0x4b   : > { %537 = vmatmul.mubr.f32.gmra.mxu0 %v7191_v40  ;;  %941 = vmatmul.mubr.f32.gmra.mxu1 %v7115_v48  ;;  %v568_v40 = vsub.f32 %v7197_v37, %v7215_v17  ;;  %v7231_v48 = vand.u32 4294901760, %v7218_v1  ;;  %10750 = vst [vmem:[#allocation62_spill] sm:$0xff] %v7239_v34  ;;  %10753 = vst [vmem:[#allocation65_spill] sm:$0xff] %v7251_v47 }
  0x4c   : > { %542 = vmatprep.mubr.f32.mxu0 %v10733_v20  ;;  %946 = vmatprep.mubr.f32.mxu1 %v10733_v20  ;;  %10754 = vst [vmem:[#allocation66_spill] sm:$0xff] %v7256_v18 }
  0x4d   : > { %10748 = vst [vmem:[#allocation60_spill] sm:$0xff] %v7231_v48  ;;  %v7242_v26 = vand.u32 4294901760, %v568_v40 }
  0x4f   : > { %548 = vmatmul.mubr.f32.gmra.mxu0 %v7209_v58  ;;  %948 = vmatmul.mubr.f32.gmra.mxu1 %v7126_v15  ;;  %10751 = vst [vmem:[#allocation63_spill] sm:$0xff] %v7242_v26  ;;  %v579_v58 = vsub.f32 %v7218_v1, %v7231_v48  ;;  %v7248_v15 = vand.u32 4294901760, %v7234_v19  ;;  %v7269_v1 = vand.u32 4294901760, %v7058_v33 }
  0x50   : > { %553 = vmatprep.mubr.f32.mxu0 %v10733_v20  ;;  %953 = vmatprep.mubr.f32.mxu1 %v10733_v20 }
  0x51   : > { %10752 = vst [vmem:[#allocation64_spill] sm:$0xff] %v7248_v15  ;;  %v7259_v40 = vand.u32 4294901760, %v579_v58  ;;  %10757 = vst [vmem:[#allocation69_spill] sm:$0xff] %v7269_v1  ;;  %v601_v58 = vsub.f32 %v7239_v34, %v7256_v18 }
  0x53   : > { %559 = vmatmul.mubr.f32.gmra.mxu0 %v7225_v12  ;;  %955 = vmatmul.mubr.f32.gmra.mxu1 %v7172_v24  ;;  %10755 = vst [vmem:[#allocation67_spill] sm:$0xff] %v7259_v40  ;;  %v590_v12 = vsub.f32 %v7234_v19, %v7248_v15  ;;  %v7266_v24 = vsub.f32 %v7046_v29, %v7251_v47  ;;  %v7287_v19 = vand.u32 4294901760, %v7061_v35 }
  0x54   : > { %564 = vmatprep.mubr.f32.mxu0 %v10733_v20  ;;  %960 = vmatprep.mubr.f32.mxu1 %v10733_v20  ;;  %v7284_v29 = vsub.f32 %v7058_v33, %v7269_v1 }
  0x55   : > { %10756 = vst [vmem:[#allocation68_spill] sm:$0xff] %v7266_v24  ;;  %10761 = vst [vmem:[#allocation73_spill] sm:$0xff] %v7287_v19  ;;  %v7305_v34 = vsub.f32 %v7061_v35, %v7287_v19 }
  0x56   : > { %10760 = vst [vmem:[#allocation72_spill] sm:$0xff] %v7284_v29 }
  0x57   : > { %570 = vmatmul.mubr.f32.gmra.mxu0 %v7242_v26  ;;  %962 = vmatmul.mubr.f32.gmra.mxu1 %v7187_v55  ;;  %v7276_v26 = vand.u32 4294901760, %v590_v12  ;;  %v7280_v55 = vand.u32 4294901760, %v7266_v24  ;;  %v7295_v12 = vand.u32 4294901760, %v601_v58  ;;  %10765 = vst [vmem:[#allocation77_spill] sm:$0xff] %v7305_v34  ;;  %v7320_v35 = vand.u32 4294901760, %v7305_v34 }
  0x58   : > { %575 = vmatprep.mubr.f32.mxu0 %v10733_v20  ;;  %967 = vmatprep.mubr.f32.mxu1 %v10733_v20 }
  0x59   : > { %10758 = vst [vmem:[#allocation70_spill] sm:$0xff] %v7276_v26  ;;  %10759 = vst [vmem:[#allocation71_spill] sm:$0xff] %v7280_v55  ;;  %v612_v33 = vsub.f32 %v7266_v24, %v7280_v55  ;;  %v7323_v24 = vand.u32 4294901760, %v7087_v4 }
  0x5a   : > { %10763 = vst [vmem:[#allocation75_spill] sm:$0xff] %v7295_v12  ;;  %10768 = vst [vmem:[#allocation80_spill] sm:$0xff] %v7320_v35 }
  0x5b   : > { %581 = vmatmul.mubr.f32.gmra.mxu0 %v7259_v40  ;;  %969 = vmatmul.mubr.f32.gmra.mxu1 %v7205_v51  ;;  %v7292_v40 = vand.u32 4294901760, %v7064_v38  ;;  %v7301_v51 = vand.u32 4294901760, %v7284_v29  ;;  %10769 = vst [vmem:[#allocation81_spill] sm:$0xff] %v7323_v24 }
  0x5c   : > { %586 = vmatprep.mubr.f32.mxu0 %v10733_v20  ;;  %974 = vmatprep.mubr.f32.mxu1 %v10733_v20 }
  0x5d   : > { %10762 = vst [vmem:[#allocation74_spill] sm:$0xff] %v7292_v40  ;;  %10764 = vst [vmem:[#allocation76_spill] sm:$0xff] %v7301_v51  ;;  %v7311_v58 = vsub.f32 %v7064_v38, %v7292_v40  ;;  %v7328_v38 = vand.u32 4294901760, %v7090_v21 }
  0x5f   : > { %592 = vmatmul.mubr.f32.gmra.mxu0 %v7276_v26  ;;  %976 = vmatmul.mubr.f32.gmra.mxu1 %v7222_v52  ;;  %10766 = vst [vmem:[#allocation78_spill] sm:$0xff] %v7311_v58  ;;  %v7314_v26 = vand.u32 4294901760, %v612_v33  ;;  %v623_v52 = vsub.f32 %v7284_v29, %v7301_v51  ;;  %10770 = vst [vmem:[#allocation82_spill] sm:$0xff] %v7328_v38  ;;  %v7341_v29 = vsub.f32 %v7087_v4, %v7323_v24 }
  0x60   : > { %597 = vmatprep.mubr.f32.mxu0 %v10733_v20  ;;  %981 = vmatprep.mubr.f32.mxu1 %v10733_v20 }
  0x61   : > { %10767 = vst [vmem:[#allocation79_spill] sm:$0xff] %v7314_v26  ;;  %v7331_v33 = vand.u32 4294901760, %v623_v52  ;;  %10773 = vst [vmem:[#allocation85_spill] sm:$0xff] %v7341_v29  ;;  %v7347_v52 = vsub.f32 %v7090_v21, %v7328_v38  ;;  %v7356_v4 = vand.u32 4294901760, %v7341_v29  ;;  %v7364_v21 = vand.u32 4294901760, %v7099_v22 }
  0x63   : > { %603 = vmatmul.mubr.f32.gmra.mxu0 %v7295_v12  ;;  %983 = vmatmul.mubr.f32.gmra.mxu1 %v7251_v47  ;;  %10771 = vst [vmem:[#allocation83_spill] sm:$0xff] %v7331_v33  ;;  %v634_v12 = vsub.f32 %v7305_v34, %v7320_v35  ;;  %v7337_v47 = vand.u32 4294901760, %v7311_v58  ;;  %10774 = vst [vmem:[#allocation86_spill] sm:$0xff] %v7347_v52  ;;  %v7359_v34 = vand.u32 4294901760, %v7096_v16 }
  0x64   : > { %608 = vmatprep.mubr.f32.mxu0 %v10733_v20  ;;  %988 = vmatprep.mubr.f32.mxu1 %v10733_v20  ;;  %10776 = vst [vmem:[#allocation88_spill] sm:$0xff] %v7356_v4  ;;  %10778 = vst [vmem:[#allocation90_spill] sm:$0xff] %v7364_v21 }
  0x65   : > { %10772 = vst [vmem:[#allocation84_spill] sm:$0xff] %v7337_v47  ;;  %10777 = vst [vmem:[#allocation89_spill] sm:$0xff] %v7359_v34 }
  0x67   : > { %614 = vmatmul.mubr.f32.gmra.mxu0 %v7314_v26  ;;  %990 = vmatmul.mubr.f32.gmra.mxu1 %v7269_v1  ;;  %v7350_v26 = vand.u32 4294901760, %v634_v12  ;;  %v645_v1 = vsub.f32 %v7311_v58, %v7337_v47  ;;  %v7377_v58 = vsub.f32 %v7096_v16, %v7359_v34 }
  0x68   : > { %619 = vmatprep.mubr.f32.mxu0 %v10733_v20  ;;  %995 = vmatprep.mubr.f32.mxu1 %v10733_v20 }
  0x69   : > { %10775 = vst [vmem:[#allocation87_spill] sm:$0xff] %v7350_v26  ;;  %v7367_v12 = vand.u32 4294901760, %v645_v1  ;;  %10781 = vst [vmem:[#allocation93_spill] sm:$0xff] %v7377_v58  ;;  %v7383_v1 = vsub.f32 %v7099_v22, %v7364_v21  ;;  %v7392_v16 = vand.u32 4294901760, %v7377_v58 }
  0x6b   : > { %625 = vmatmul.mubr.f32.gmra.mxu0 %v7331_v33  ;;  %997 = vmatmul.mubr.f32.gmra.mxu1 %v7287_v19  ;;  %10779 = vst [vmem:[#allocation91_spill] sm:$0xff] %v7367_v12  ;;  %v656_v33 = vsub.f32 %v7341_v29, %v7356_v4  ;;  %v7373_v19 = vand.u32 4294901760, %v7347_v52  ;;  %10782 = vst [vmem:[#allocation94_spill] sm:$0xff] %v7383_v1  ;;  %v7395_v29 = vand.u32 4294901760, %v7121_v56  ;;  %v7400_v22 = vand.u32 4294901760, %v7383_v1 }
  0x6c   : > { %630 = vmatprep.mubr.f32.mxu0 %v10733_v20  ;;  %1002 = vmatprep.mubr.f32.mxu1 %v10733_v20  ;;  %10784 = vst [vmem:[#allocation96_spill] sm:$0xff] %v7392_v16 }
  0x6d   : > { %10780 = vst [vmem:[#allocation92_spill] sm:$0xff] %v7373_v19  ;;  %10785 = vst [vmem:[#allocation97_spill] sm:$0xff] %v7395_v29 }
  0x6e   : > { %10786 = vst [vmem:[#allocation98_spill] sm:$0xff] %v7400_v22 }
  0x6f   : > { %636 = vmatmul.mubr.f32.gmra.mxu0 %v7350_v26  ;;  %1004 = vmatmul.mubr.f32.gmra.mxu1 %v7292_v40  ;;  %v7386_v26 = vand.u32 4294901760, %v656_v33  ;;  %v667_v40 = vsub.f32 %v7347_v52, %v7373_v19  ;;  %v7413_v52 = vand.u32 4294901760, %v7146_v23 }
  0x70   : > { %641 = vmatprep.mubr.f32.mxu0 %v10733_v20  ;;  %1009 = vmatprep.mubr.f32.mxu1 %v10733_v20 }
  0x71   : > { %10783 = vst [vmem:[#allocation95_spill] sm:$0xff] %v7386_v26  ;;  %v7403_v33 = vand.u32 4294901760, %v667_v40  ;;  %10789 = vst [vmem:[#allocation101_spill] sm:$0xff] %v7413_v52  ;;  %v689_v40 = vsub.f32 %v7383_v1, %v7400_v22 }
  0x73   : > { %647 = vmatmul.mubr.f32.gmra.mxu0 %v7367_v12  ;;  %1011 = vmatmul.mubr.f32.gmra.mxu1 %v7323_v24  ;;  %10787 = vst [vmem:[#allocation99_spill] sm:$0xff] %v7403_v33  ;;  %v678_v12 = vsub.f32 %v7377_v58, %v7392_v16  ;;  %v7410_v24 = vsub.f32 %v7121_v56, %v7395_v29  ;;  %v7431_v58 = vand.u32 4294901760, %v7149_v0 }
  0x74   : > { %652 = vmatprep.mubr.f32.mxu0 %v10733_v20  ;;  %1016 = vmatprep.mubr.f32.mxu1 %v10733_v20  ;;  %v7428_v56 = vsub.f32 %v7146_v23, %v7413_v52 }
  0x75   : > { %10788 = vst [vmem:[#allocation100_spill] sm:$0xff] %v7410_v24  ;;  %10793 = vst [vmem:[#allocation105_spill] sm:$0xff] %v7431_v58  ;;  %v7449_v1 = vsub.f32 %v7149_v0, %v7431_v58 }
  0x76   : > { %10792 = vst [vmem:[#allocation104_spill] sm:$0xff] %v7428_v56 }
  0x77   : > { %658 = vmatmul.mubr.f32.gmra.mxu0 %v7386_v26  ;;  %1018 = vmatmul.mubr.f32.gmra.mxu1 %v7328_v38  ;;  %v7420_v26 = vand.u32 4294901760, %v678_v12  ;;  %v7424_v38 = vand.u32 4294901760, %v7410_v24  ;;  %v7439_v12 = vand.u32 4294901760, %v689_v40  ;;  %10797 = vst [vmem:[#allocation109_spill] sm:$0xff] %v7449_v1 }
  0x78   : > { %663 = vmatprep.mubr.f32.mxu0 %v10733_v20  ;;  %1023 = vmatprep.mubr.f32.mxu1 %v10733_v20 }
  0x79   : > { %10790 = vst [vmem:[#allocation102_spill] sm:$0xff] %v7420_v26  ;;  %10791 = vst [vmem:[#allocation103_spill] sm:$0xff] %v7424_v38  ;;  %v700_v23 = vsub.f32 %v7410_v24, %v7424_v38  ;;  %v7463_v24 = vand.u32 4294901760, %v7449_v1 }
  0x7a   : > { %10795 = vst [vmem:[#allocation107_spill] sm:$0xff] %v7439_v12 }
  0x7b   : > { %669 = vmatmul.mubr.f32.gmra.mxu0 %v7403_v33  ;;  %1025 = vmatmul.mubr.f32.gmra.mxu1 %v7359_v34  ;;  %v7436_v33 = vand.u32 4294901760, %v7152_v57  ;;  %v7445_v34 = vand.u32 4294901760, %v7428_v56  ;;  %v7457_v40 = vand.u32 4294901760, %v700_v23  ;;  %10800 = vst [vmem:[#allocation112_spill] sm:$0xff] %v7463_v24 }
  0x7c   : > { %674 = vmatprep.mubr.f32.mxu0 %v10733_v20  ;;  %1030 = vmatprep.mubr.f32.mxu1 %v10733_v20 }
  0x7d   : > { %10794 = vst [vmem:[#allocation106_spill] sm:$0xff] %v7436_v33  ;;  %10796 = vst [vmem:[#allocation108_spill] sm:$0xff] %v7445_v34  ;;  %v7467_v0 = vsub.f32 %v7152_v57, %v7436_v33 }
  0x7e   : > { %10799 = vst [vmem:[#allocation111_spill] sm:$0xff] %v7457_v40 }
  0x7f   : > { %680 = vmatmul.mubr.f32.gmra.mxu0 %v7420_v26  ;;  %1032 = vmatmul.mubr.f32.gmra.mxu1 %v7364_v21  ;;  %v7454_v26 = vand.u32 4294901760, %v7160_v63  ;;  %v711_v21 = vsub.f32 %v7428_v56, %v7445_v34  ;;  %10801 = vst [vmem:[#allocation113_spill] sm:$0xff] %v7467_v0  ;;  %v7482_v57 = vand.u32 4294901760, %v7467_v0  ;;  %v7485_v56 = vand.u32 4294901760, %v7178_v30 }
  0x80   : > { %685 = vmatprep.mubr.f32.mxu0 %v10733_v20  ;;  %1037 = vmatprep.mubr.f32.mxu1 %v10733_v20 }
  0x81   : > { %10798 = vst [vmem:[#allocation110_spill] sm:$0xff] %v7454_v26  ;;  %v7473_v23 = vsub.f32 %v7160_v63, %v7454_v26  ;;  %10804 = vst [vmem:[#allocation116_spill] sm:$0xff] %v7482_v57  ;;  %v7490_v63 = vand.u32 4294901760, %v7182_v32 }
  0x82   : > { %10805 = vst [vmem:[#allocation117_spill] sm:$0xff] %v7485_v56 }
  0x83   : > { %691 = vmatmul.mubr.f32.gmra.mxu0 %v7439_v12  ;;  %1039 = vmatmul.mubr.f32.gmra.mxu1 %v7395_v29  ;;  %10802 = vst [vmem:[#allocation114_spill] sm:$0xff] %v7473_v23  ;;  %v7476_v12 = vand.u32 4294901760, %v711_v21  ;;  %v722_v29 = vsub.f32 %v7449_v1, %v7463_v24  ;;  %10806 = vst [vmem:[#allocation118_spill] sm:$0xff] %v7490_v63  ;;  %v7503_v1 = vsub.f32 %v7178_v30, %v7485_v56 }
  0x84   : > { %696 = vmatprep.mubr.f32.mxu0 %v10733_v20  ;;  %1044 = vmatprep.mubr.f32.mxu1 %v10733_v20  ;;  %v7521_v30 = vsub.f32 %v7182_v32, %v7490_v63 }
  0x85   : > { %10803 = vst [vmem:[#allocation115_spill] sm:$0xff] %v7476_v12  ;;  %v7493_v21 = vand.u32 4294901760, %v722_v29  ;;  %10809 = vst [vmem:[#allocation121_spill] sm:$0xff] %v7503_v1 }
  0x86   : > { %10813 = vst [vmem:[#allocation125_spill] sm:$0xff] %v7521_v30 }
  0x87   : > { %702 = vmatmul.mubr.f32.gmra.mxu0 %v7457_v40  ;;  %1046 = vmatmul.mubr.f32.gmra.mxu1 %v7413_v52  ;;  %10807 = vst [vmem:[#allocation119_spill] sm:$0xff] %v7493_v21  ;;  %v733_v40 = vsub.f32 %v7467_v0, %v7482_v57  ;;  %v7499_v52 = vand.u32 4294901760, %v7473_v23  ;;  %v7517_v0 = vand.u32 4294901760, %v7503_v1 }
  0x88   : > { %707 = vmatprep.mubr.f32.mxu0 %v10733_v20  ;;  %1051 = vmatprep.mubr.f32.mxu1 %v10733_v20 }
  0x89   : > { %10808 = vst [vmem:[#allocation120_spill] sm:$0xff] %v7499_v52  ;;  %v7511_v29 = vand.u32 4294901760, %v733_v40  ;;  %10812 = vst [vmem:[#allocation124_spill] sm:$0xff] %v7517_v0 }
  0x8b   : > { %713 = vmatmul.mubr.f32.gmra.mxu0 %v7476_v12  ;;  %1053 = vmatmul.mubr.f32.gmra.mxu1 %v7431_v58  ;;  %v7508_v12 = vand.u32 4294901760, %v7201_v36  ;;  %10811 = vst [vmem:[#allocation123_spill] sm:$0xff] %v7511_v29  ;;  %v744_v58 = vsub.f32 %v7473_v23, %v7499_v52 }
  0x8c   : > { %718 = vmatprep.mubr.f32.mxu0 %v10733_v20  ;;  %1058 = vmatprep.mubr.f32.mxu1 %v10733_v20 }
  0x8d   : > { %10810 = vst [vmem:[#allocation122_spill] sm:$0xff] %v7508_v12  ;;  %v7526_v40 = vand.u32 4294901760, %v744_v58  ;;  %v7536_v32 = vsub.f32 %v7201_v36, %v7508_v12 }
  0x8f   : > { %724 = vmatmul.mubr.f32.gmra.mxu0 %v7493_v21  ;;  %1060 = vmatmul.mubr.f32.gmra.mxu1 %v7436_v33  ;;  %10814 = vst [vmem:[#allocation126_spill] sm:$0xff] %v7526_v40  ;;  %v755_v21 = vsub.f32 %v7503_v1, %v7517_v0  ;;  %v7532_v33 = vand.u32 4294901760, %v7521_v30  ;;  %10816 = vst [vmem:[#allocation128_spill] sm:$0xff] %v7536_v32 }
  0x90   : > { %729 = vmatprep.mubr.f32.mxu0 %v10733_v20  ;;  %1065 = vmatprep.mubr.f32.mxu1 %v10733_v20 }
  0x91   : > { %10815 = vst [vmem:[#allocation127_spill] sm:$0xff] %v7532_v33  ;;  %v7541_v58 = vand.u32 4294901760, %v755_v21 }
  0x93   : > { %735 = vmatmul.mubr.f32.gmra.mxu0 %v7511_v29  ;;  %1067 = vmatmul.mubr.f32.gmra.mxu1 %v7454_v26  ;;  %10817 = vst [vmem:[#allocation129_spill] sm:$0xff] %v7541_v58  ;;  %v766_v29 = vsub.f32 %v7521_v30, %v7532_v33  ;;  %v7547_v26 = vand.u32 4294901760, %v7536_v32 }
  0x94   : > { %740 = vmatprep.mubr.f32.mxu0 %v10733_v20  ;;  %1072 = vmatprep.mubr.f32.mxu1 %v10733_v20 }
  0x95   : > { %10818 = vst [vmem:[#allocation130_spill] sm:$0xff] %v7547_v26  ;;  %v7552_v36 = vand.u32 4294901760, %v766_v29  ;;  %v777_v21 = vsub.f32 %v7536_v32, %v7547_v26  ;;  %v10821_v29 = vand.u32 4294901760, %v6887_v13 }
  0x97   : > { %746 = vmatmul.mubr.f32.gmra.mxu0 %v7526_v40  ;;  %1074 = vmatmul.mubr.f32.gmra.mxu1 %v7485_v56  ;;  %10819 = vst [vmem:[#allocation131_spill] sm:$0xff] %v7552_v36  ;;  %v7560_v40 = vand.u32 4294901760, %v777_v21  ;;  %v213_v21 = vld [vmem:[%s10368_s1 + $0x48] sm:$0xf] }
  0x98   : > { %751 = vmatprep.mubr.f32.mxu0 %v10733_v20  ;;  %1079 = vmatprep.mubr.f32.mxu1 %v10733_v20 }
  0x99   : > { %10820 = vst [vmem:[#allocation132_spill] sm:$0xff] %v7560_v40 }
  0x9b   : > { %757 = vmatmul.mubr.f32.gmra.mxu0 %v7541_v58  ;;  %1081 = vmatmul.mubr.f32.gmra.mxu1 %v7490_v63 }
  0x9c   : > { %762 = vmatprep.mubr.f32.mxu0 %v10733_v20  ;;  %1086 = vmatprep.mubr.f32.mxu1 %v10733_v20 }
  0x9f   : > { %768 = vmatmul.mubr.f32.gmra.mxu0 %v7552_v36  ;;  %1088 = vmatmul.mubr.f32.gmra.mxu1 %v7508_v12 }
  0xa0   : > { %773 = vmatprep.mubr.f32.mxu0 %v10733_v20  ;;  %1491 = vmatprep.mubr.f32.mxu1 %v10733_v20 }
  0xa3   : > { %779 = vmatmul.mubr.f32.gmra.mxu0 %v7560_v40  ;;  %1495 = vmatmul.mubr.f32.vlgmr.msra.gmra.mxu1 %v6946_v45 }
  0xa4   : > { %1166 = vmatprep.mubr.f32.mxu0 %v10733_v20  ;;  %2112 = vmatpush1.msra.mxu1 %v6873_v8  ;;  %v10822_v8 = vand.u32 4294901760, %v6880_v11 }
  0xa5   : > { %1500 = vmatprep.mubr.f32.mxu1 %v10733_v20  ;;  %2114 = vmatprep.subr.mxu1 %v6865_v5  ;;  %v356_v5 = vsel %vm345_vm0, %v213_v21, 0  ;;  %v218_v21 = vlaneseq }
  0xa6   : > { %2116 = vmatpush1.msra.mxu1 %v6875_v9  ;;  %v10823_v9 = vand.u32 4294901760, %v6890_v14 }
  0xa7   : > { %1169 = vmatmul.mubr.f32.vlgmr.msra.gmra.mxu0 %v6933_v39  ;;  %1504 = vmatmul.mubr.f32.gmra.mxu1 %v6949_v46  ;;  %v7586_v46 = vand.u32 4294901760, %v356_v5 }
  0xa8   : > { %1815 = vmatpush1.msra.mxu0 %v10821_v29  ;;  %1174 = vmatprep.mubr.f32.mxu0 %v10733_v20 }
  0xa9   : > { %1509 = vmatprep.mubr.f32.mxu1 %v10733_v20  ;;  %1819 = vmatprep.subr.mxu0 %v10822_v8  ;;  %10824 = vst [vmem:[#allocation133_spill] sm:$0xff] %v7586_v46  ;;  %v7593_v13 = vsub.f32 %v356_v5, %v7586_v46  ;;  %v10826_v8 = vld [vmem:[#allocation57_spill] sm:$0xff]  ;;  %v7648_v5 = vshrl.u32 %v218_v21, 7 }
  0xaa   : > { %1823 = vmatpush1.msra.mxu0 %v10823_v9  ;;  %v10828_v9 = vld [vmem:[#allocation61_spill] sm:$0xff] }
  0xab   : > { %1177 = vmatmul.mubr.f32.gmra.mxu0 %v6939_v42  ;;  %1513 = vmatmul.mubr.f32.gmra.mxu1 %v6958_v49  ;;  %10825 = vst [vmem:[#allocation134_spill] sm:$0xff] %v7593_v13  ;;  %v10524_v11 = vand.u32 4294901760, %v7593_v13  ;;  %10827 = vst [vmem:[#allocation135_spill] sm:$0xff] %v7648_v5 }
  0xac   : > { %1182 = vmatprep.mubr.f32.mxu0 %v10733_v20  ;;  %1518 = vmatprep.mubr.f32.mxu1 %v10733_v20 }
  0xad   : > { %2403 = vmatprep.subr.mxu0 %v7586_v46  ;;  %v2826_v14 = vsub.f32 %v7593_v13, %v10524_v11  ;;  %v224_v11 = vsub.s32 1, %v7648_v5 }
  0xaf   : > { %1185 = vmatmul.mubr.f32.gmra.mxu0 %v6942_v43  ;;  %1522 = vmatmul.mubr.f32.gmra.mxu1 %v6983_v59  ;;  %v2827_v29 = vand.u32 4294901760, %v2826_v14  ;;  %v220_v14 = vsub.s32 0, %v7648_v5 }
  0xb0   : > { %1190 = vmatprep.mubr.f32.mxu0 %v10733_v20  ;;  %1527 = vmatprep.mubr.f32.mxu1 %v10733_v20 }
  0xb1   : > { %2828 = vmatprep.subr.mxu1 %v2827_v29  ;;  %v216_v29 = vld [vmem:[%s10369_s2] sm:$0x3f] }
  0xb3   : > { %1193 = vmatmul.mubr.f32.gmra.mxu0 %v6961_v50  ;;  %1531 = vmatmul.mubr.f32.gmra.mxu1 %v7007_v2 }
  0xb4   : > { %1198 = vmatprep.mubr.f32.mxu0 %v10733_v20  ;;  %1536 = vmatprep.mubr.f32.mxu1 %v10733_v20 }
  0xb7   : > { %1201 = vmatmul.mubr.f32.gmra.mxu0 %v6986_v60  ;;  %1540 = vmatmul.mubr.f32.gmra.mxu1 %v7016_v6 }
  0xb8   : > { %1206 = vmatprep.mubr.f32.mxu0 %v10733_v20  ;;  %1545 = vmatprep.mubr.f32.mxu1 %v10733_v20 }
  0xbb   : > { %1209 = vmatmul.mubr.f32.gmra.mxu0 %v6994_v62  ;;  %1549 = vmatmul.mubr.f32.gmra.mxu1 %v7040_v27 }
  0xbc   : > { %1214 = vmatprep.mubr.f32.mxu0 %v10733_v20  ;;  %1554 = vmatprep.mubr.f32.mxu1 %v10733_v20 }
  0xbf   : > { %1217 = vmatmul.mubr.f32.gmra.mxu0 %v7019_v7  ;;  %1558 = vmatmul.mubr.f32.gmra.mxu1 %v7074_v53  ;;  %v10838_v53 = vld [vmem:[#allocation100_spill] sm:$0xff] }
  0xc0   : > { %1222 = vmatprep.mubr.f32.mxu0 %v10733_v20  ;;  %1563 = vmatprep.mubr.f32.mxu1 %v10733_v20 }
  0xc3   : > { %1225 = vmatmul.mubr.f32.gmra.mxu0 %v7043_v28  ;;  %1567 = vmatmul.mubr.f32.gmra.mxu1 %v7110_v41  ;;  %v10836_v41 = vld [vmem:[#allocation93_spill] sm:$0xff]  ;;  %v10837_v28 = vld [vmem:[#allocation94_spill] sm:$0xff] }
  0xc4   : > { %1230 = vmatprep.mubr.f32.mxu0 %v10733_v20  ;;  %1572 = vmatprep.mubr.f32.mxu1 %v10733_v20 }
  0xc7   : > { %1233 = vmatmul.mubr.f32.gmra.mxu0 %v7081_v61  ;;  %1576 = vmatmul.mubr.f32.gmra.mxu1 %v7135_v10  ;;  %v10834_v10 = vld [vmem:[#allocation85_spill] sm:$0xff]  ;;  %v10835_v61 = vld [vmem:[#allocation86_spill] sm:$0xff] }
  0xc8   : > { %1238 = vmatprep.mubr.f32.mxu0 %v10733_v20  ;;  %1581 = vmatprep.mubr.f32.mxu1 %v10733_v20 }
  0xcb   : > { %1241 = vmatmul.mubr.f32.gmra.mxu0 %v7113_v44  ;;  %1585 = vmatmul.mubr.f32.gmra.mxu1 %v7170_v3  ;;  %v10832_v3 = vld [vmem:[#allocation77_spill] sm:$0xff]  ;;  %v10833_v44 = vld [vmem:[#allocation78_spill] sm:$0xff] }
  0xcc   : > { %1246 = vmatprep.mubr.f32.mxu0 %v10733_v20  ;;  %1590 = vmatprep.mubr.f32.mxu1 %v10733_v20 }
  0xcf   : > { %1249 = vmatmul.mubr.f32.gmra.mxu0 %v7138_v25  ;;  %1594 = vmatmul.mubr.f32.gmra.mxu1 %v7185_v31 }
  0xd0   : > { %1254 = vmatprep.mubr.f32.mxu0 %v10733_v20  ;;  %1599 = vmatprep.mubr.f32.mxu1 %v10733_v20 }
  0xd3   : > { %1257 = vmatmul.mubr.f32.gmra.mxu0 %v7156_v54  ;;  %1603 = vmatmul.mubr.f32.gmra.mxu1 %v7215_v17 }
  0xd4   : > { %1262 = vmatprep.mubr.f32.mxu0 %v10733_v20  ;;  %1608 = vmatprep.mubr.f32.mxu1 %v10733_v20 }
  0xd7   : > { %1265 = vmatmul.mubr.f32.gmra.mxu0 %v7197_v37  ;;  %1612 = vmatmul.mubr.f32.gmra.mxu1 %v7231_v48  ;;  %v10830_v37 = vld [vmem:[#allocation68_spill] sm:$0xff] }
  0xd8   : > { %1270 = vmatprep.mubr.f32.mxu0 %v10733_v20  ;;  %1617 = vmatprep.mubr.f32.mxu1 %v10733_v20 }
  0xdb   : > { %1273 = vmatmul.mubr.f32.gmra.mxu0 %v10826_v8  ;;  %1621 = vmatmul.mubr.f32.gmra.mxu1 %v7248_v15  ;;  %v10829_v15 = vld [vmem:[#allocation62_spill] sm:$0xff]  ;;  %v7665_v8 = vrot.slane %v216_v29, %v224_v11 }
  0xdc   : > { %1278 = vmatprep.mubr.f32.mxu0 %v10733_v20  ;;  %1626 = vmatprep.mubr.f32.mxu1 %v10733_v20 }
  0xdf   : > { %1281 = vmatmul.mubr.f32.gmra.mxu0 %v10828_v9  ;;  %1630 = vmatmul.mubr.f32.gmra.mxu1 %v7256_v18  ;;  %v7662_v18 = vrot.slane %v216_v29, %v220_v14  ;;  %v10831_v29 = vld [vmem:[#allocation72_spill] sm:$0xff] }
  0xe0   : > { %1286 = vmatprep.mubr.f32.mxu0 %v10733_v20  ;;  %1635 = vmatprep.mubr.f32.mxu1 %v10733_v20 }
  0xe3   : > { %1289 = vmatmul.mubr.f32.gmra.mxu0 %v10829_v15  ;;  %v872_v21 = vpop.f32.mrf.mxu1  ;;  %1639 = vmatmul.mubr.f32.gmra.mxu1 %v7280_v55 }
  0xe4   : > { %1294 = vmatprep.mubr.f32.mxu0 %v10733_v20  ;;  %1644 = vmatprep.mubr.f32.mxu1 %v10733_v20 }
  0xe5   : > { %v874_v9 = vpop.f32.mrf.mxu1 }
  0xe6   : > { %v439_v48 = vpop.f32.mrf.mxu0 }
  0xe7   : > { %1297 = vmatmul.mubr.f32.gmra.mxu0 %v10830_v37  ;;  %v879_v17 = vpop.f32.mrf.mxu1  ;;  %1648 = vmatmul.mubr.f32.gmra.mxu1 %v7301_v51  ;;  %v440_v15 = vadd.f32 %v439_v48, %v7662_v18 }
  0xe8   : > { %1302 = vmatprep.mubr.f32.mxu0 %v10733_v20  ;;  %1653 = vmatprep.mubr.f32.mxu1 %v10733_v20  ;;  %v441_v55 = vpop.f32.mrf.mxu0 }
  0xe9   : > { %v881_v14 = vpop.f32.mrf.mxu1  ;;  %v7672_v5 = vadd.f32 %v872_v21, %v440_v15  ;;  %v442_v54 = vadd.f32 %v441_v55, %v7665_v8 }
  0xeb   : > { %v450_v11 = vpop.f32.mrf.mxu0  ;;  %1305 = vmatmul.mubr.f32.gmra.mxu0 %v10831_v29  ;;  %v886_v31 = vpop.f32.mrf.mxu1  ;;  %1657 = vmatmul.mubr.f32.gmra.mxu1 %v7320_v35  ;;  %v7677_v37 = vadd.f32 %v874_v9, %v442_v54 }
  0xec   : > { %v451_v48 = vadd.f32 %v450_v11, %v7662_v18  ;;  %1310 = vmatprep.mubr.f32.mxu0 %v10733_v20  ;;  %1662 = vmatprep.mubr.f32.mxu1 %v10733_v20 }
  0xed   : > { %v452_v51 = vpop.f32.mrf.mxu0  ;;  %v888_v25 = vpop.f32.mrf.mxu1 }
  0xee   : > { %v7682_v15 = vadd.f32 %v879_v17, %v451_v48  ;;  %v453_v55 = vadd.f32 %v452_v51, %v7665_v8 }
  0xef   : > { %v461_v21 = vpop.f32.mrf.mxu0  ;;  %1313 = vmatmul.mubr.f32.gmra.mxu0 %v10832_v3  ;;  %v893_v29 = vpop.f32.mrf.mxu1  ;;  %1666 = vmatmul.mubr.f32.gmra.mxu1 %v7337_v47 }
  0xf0   : > { %v7687_v54 = vadd.f32 %v881_v14, %v453_v55  ;;  %v462_v9 = vadd.f32 %v461_v21, %v7662_v18  ;;  %1318 = vmatprep.mubr.f32.mxu0 %v10733_v20  ;;  %1671 = vmatprep.mubr.f32.mxu1 %v10733_v20 }
  0xf1   : > { %v463_v11 = vpop.f32.mrf.mxu0  ;;  %v895_v35 = vpop.f32.mrf.mxu1 }
  0xf2   : > { %v7692_v17 = vadd.f32 %v886_v31, %v462_v9  ;;  %v464_v51 = vadd.f32 %v463_v11, %v7665_v8 }
  0xf3   : > { %v472_v48 = vpop.f32.mrf.mxu0  ;;  %1321 = vmatmul.mubr.f32.gmra.mxu0 %v10833_v44  ;;  %v900_v3 = vpop.f32.mrf.mxu1  ;;  %1675 = vmatmul.mubr.f32.gmra.mxu1 %v7356_v4 }
  0xf4   : > { %v7697_v14 = vadd.f32 %v888_v25, %v464_v51  ;;  %v473_v55 = vadd.f32 %v472_v48, %v7662_v18  ;;  %1326 = vmatprep.mubr.f32.mxu0 %v10733_v20  ;;  %1680 = vmatprep.mubr.f32.mxu1 %v10733_v20 }
  0xf5   : > { %v474_v21 = vpop.f32.mrf.mxu0  ;;  %v902_v47 = vpop.f32.mrf.mxu1 }
  0xf6   : > { %v7702_v31 = vadd.f32 %v893_v29, %v473_v55  ;;  %v475_v9 = vadd.f32 %v474_v21, %v7665_v8 }
  0xf7   : > { %v483_v11 = vpop.f32.mrf.mxu0  ;;  %1329 = vmatmul.mubr.f32.gmra.mxu0 %v10834_v10  ;;  %v907_v44 = vpop.f32.mrf.mxu1  ;;  %1684 = vmatmul.mubr.f32.gmra.mxu1 %v7373_v19 }
  0xf8   : > { %v7707_v25 = vadd.f32 %v895_v35, %v475_v9  ;;  %v484_v51 = vadd.f32 %v483_v11, %v7662_v18  ;;  %1334 = vmatprep.mubr.f32.mxu0 %v10733_v20  ;;  %1689 = vmatprep.mubr.f32.mxu1 %v10733_v20 }
  0xf9   : > { %v485_v48 = vpop.f32.mrf.mxu0  ;;  %v909_v4 = vpop.f32.mrf.mxu1 }
  0xfa   : > { %v7712_v29 = vadd.f32 %v900_v3, %v484_v51  ;;  %v486_v55 = vadd.f32 %v485_v48, %v7665_v8 }
  0xfb   : > { %v494_v21 = vpop.f32.mrf.mxu0  ;;  %1337 = vmatmul.mubr.f32.gmra.mxu0 %v10835_v61  ;;  %v914_v10 = vpop.f32.mrf.mxu1  ;;  %1693 = vmatmul.mubr.f32.gmra.mxu1 %v7392_v16 }
  0xfc   : > { %v7717_v35 = vadd.f32 %v902_v47, %v486_v55  ;;  %v495_v9 = vadd.f32 %v494_v21, %v7662_v18  ;;  %1342 = vmatprep.mubr.f32.mxu0 %v10733_v20  ;;  %1698 = vmatprep.mubr.f32.mxu1 %v10733_v20 }
  0xfd   : > { %v496_v11 = vpop.f32.mrf.mxu0  ;;  %v916_v19 = vpop.f32.mrf.mxu1 }
  0xfe   : > { %v7722_v3 = vadd.f32 %v907_v44, %v495_v9  ;;  %v497_v51 = vadd.f32 %v496_v11, %v7665_v8 }
  0xff   : > { %v505_v48 = vpop.f32.mrf.mxu0  ;;  %1345 = vmatmul.mubr.f32.gmra.mxu0 %v10836_v41  ;;  %v921_v61 = vpop.f32.mrf.mxu1  ;;  %1702 = vmatmul.mubr.f32.gmra.mxu1 %v7400_v22 }
 0x100   : > { %v7727_v47 = vadd.f32 %v909_v4, %v497_v51  ;;  %v506_v55 = vadd.f32 %v505_v48, %v7662_v18  ;;  %1350 = vmatprep.mubr.f32.mxu0 %v10733_v20  ;;  %1707 = vmatprep.mubr.f32.mxu1 %v10733_v20 }
 0x101   : > { %v507_v21 = vpop.f32.mrf.mxu0  ;;  %v923_v16 = vpop.f32.mrf.mxu1 }
 0x102   : > { %v7732_v44 = vadd.f32 %v914_v10, %v506_v55  ;;  %v508_v9 = vadd.f32 %v507_v21, %v7665_v8 }
 0x103   : > { %v516_v11 = vpop.f32.mrf.mxu0  ;;  %1353 = vmatmul.mubr.f32.gmra.mxu0 %v10837_v28  ;;  %v928_v41 = vpop.f32.mrf.mxu1  ;;  %1711 = vmatmul.mubr.f32.gmra.mxu1 %v7424_v38 }
 0x104   : > { %v7737_v4 = vadd.f32 %v916_v19, %v508_v9  ;;  %v517_v51 = vadd.f32 %v516_v11, %v7662_v18  ;;  %1358 = vmatprep.mubr.f32.mxu0 %v10733_v20  ;;  %1716 = vmatprep.mubr.f32.mxu1 %v10733_v20 }
 0x105   : > { %v518_v48 = vpop.f32.mrf.mxu0  ;;  %v930_v22 = vpop.f32.mrf.mxu1 }
 0x106   : > { %v7742_v10 = vadd.f32 %v921_v61, %v517_v51  ;;  %v519_v55 = vadd.f32 %v518_v48, %v7665_v8  ;;  %v212_v48 = vld [vmem:[%s10368_s1 + $0x40] sm:$0xf] }
 0x107   : > { %v527_v21 = vpop.f32.mrf.mxu0  ;;  %1361 = vmatmul.mubr.f32.gmra.mxu0 %v10838_v53  ;;  %v935_v28 = vpop.f32.mrf.mxu1  ;;  %1720 = vmatmul.mubr.f32.gmra.mxu1 %v7445_v34  ;;  %v10839_v34 = vld [vmem:[#allocation104_spill] sm:$0xff] }
 0x108   : > { %v7747_v19 = vadd.f32 %v923_v16, %v519_v55  ;;  %v528_v9 = vadd.f32 %v527_v21, %v7662_v18  ;;  %1366 = vmatprep.mubr.f32.mxu0 %v10733_v20  ;;  %1725 = vmatprep.mubr.f32.mxu1 %v10733_v20 }
 0x109   : > { %v529_v11 = vpop.f32.mrf.mxu0  ;;  %v937_v38 = vpop.f32.mrf.mxu1 }
 0x10a   : > { %v7752_v61 = vadd.f32 %v928_v41, %v528_v9  ;;  %v530_v51 = vadd.f32 %v529_v11, %v7665_v8  ;;  %v353_v11 = vsel %vm345_vm0, %v212_v48, 0 }
 0x10b   : > { %v538_v53 = vpop.f32.mrf.mxu0  ;;  %1369 = vmatmul.mubr.f32.gmra.mxu0 %v10839_v34  ;;  %v942_v16 = vpop.f32.mrf.mxu1  ;;  %1729 = vmatmul.mubr.f32.gmra.mxu1 %v7463_v24  ;;  %v207_v24 = vld [vmem:[%s10368_s1 + $0x18] sm:$0xff]  ;;  %v206_v34 = vld [vmem:[%s10368_s1 + $0x10] sm:$0xff]  ;;  %v7782_v48 = vand.u32 4294901760, %v353_v11 }
 0x10c   : > { %v7760_v55 = vadd.f32 %v930_v22, %v530_v51  ;;  %v539_v21 = vadd.f32 %v538_v53, %v7662_v18  ;;  %1374 = vmatprep.mubr.f32.mxu0 %v10733_v20  ;;  %1734 = vmatprep.mubr.f32.mxu1 %v10733_v20  ;;  %v10840_v51 = vld [vmem:[#allocation109_spill] sm:$0xff]  ;;  %v7789_v60 = vand.u32 4294901760, %v206_v34 }
 0x10d   : > { %v540_v41 = vpop.f32.mrf.mxu0  ;;  %v944_v9 = vpop.f32.mrf.mxu1 }
 0x10e   : > { %v7766_v7 = vadd.f32 %v935_v28, %v539_v21  ;;  %v541_v27 = vadd.f32 %v540_v41, %v7665_v8 }
 0x10f   : > { %v549_v22 = vpop.f32.mrf.mxu0  ;;  %1377 = vmatmul.mubr.f32.gmra.mxu0 %v10840_v51  ;;  %v949_v53 = vpop.f32.mrf.mxu1  ;;  %1738 = vmatmul.mubr.f32.gmra.mxu1 %v7482_v57  ;;  %v7784_v51 = vand.u32 4294901760, %v207_v24 }
 0x110   : > { %v7777_v62 = vadd.f32 %v937_v38, %v541_v27  ;;  %v550_v28 = vadd.f32 %v549_v22, %v7662_v18  ;;  %1382 = vmatprep.mubr.f32.mxu0 %v10733_v20  ;;  %1743 = vmatprep.mubr.f32.mxu1 %v10733_v20  ;;  %v10841_v38 = vld [vmem:[#allocation113_spill] sm:$0xff] }
 0x111   : > { %v551_v21 = vpop.f32.mrf.mxu0  ;;  %v951_v41 = vpop.f32.mrf.mxu1  ;;  %v7802_v59 = vsub.f32 %v207_v24, %v7784_v51 }
 0x112   : > { %v7786_v6 = vadd.f32 %v942_v16, %v550_v28  ;;  %v552_v57 = vadd.f32 %v551_v21, %v7665_v8  ;;  %v7799_v16 = vsub.f32 %v353_v11, %v7782_v48 }
 0x113   : > { %v560_v27 = vpop.f32.mrf.mxu0  ;;  %1385 = vmatmul.mubr.f32.gmra.mxu0 %v10841_v38  ;;  %v956_v22 = vpop.f32.mrf.mxu1  ;;  %1747 = vmatmul.mubr.f32.gmra.mxu1 %v7499_v52  ;;  %10843 = vst [vmem:[#allocation137_spill] sm:$0xff] %v7802_v59 }
 0x114   : > { %v7793_v2 = vadd.f32 %v944_v9, %v552_v57  ;;  %v561_v50 = vadd.f32 %v560_v27, %v7662_v18  ;;  %1390 = vmatprep.mubr.f32.mxu0 %v10733_v20  ;;  %1752 = vmatprep.mubr.f32.mxu1 %v10733_v20  ;;  %10842 = vst [vmem:[#allocation136_spill] sm:$0xff] %v7799_v16 }
 0x115   : > { %v562_v28 = vpop.f32.mrf.mxu0  ;;  %v958_v21 = vpop.f32.mrf.mxu1  ;;  %v7808_v57 = vsub.f32 %v206_v34, %v7789_v60  ;;  %v10615_v34 = vand.u32 4294901760, %v7802_v59 }
 0x116   : > { %v7804_v38 = vadd.f32 %v949_v53, %v561_v50  ;;  %v563_v52 = vadd.f32 %v562_v28, %v7665_v8 }
 0x117   : > { %10844 = vst [vmem:[#allocation138_spill] sm:$0xff] %v7808_v57  ;;  %v571_v9 = vpop.f32.mrf.mxu0  ;;  %1393 = vmatmul.mubr.f32.gmra.mxu0 %v7473_v23  ;;  %v963_v27 = vpop.f32.mrf.mxu1  ;;  %1756 = vmatmul.mubr.f32.gmra.mxu1 %v7517_v0 }
 0x118   : > { %v7812_v11 = vadd.f32 %v951_v41, %v563_v52  ;;  %v572_v43 = vadd.f32 %v571_v9, %v7662_v18  ;;  %1398 = vmatprep.mubr.f32.mxu0 %v10733_v20  ;;  %1761 = vmatprep.mubr.f32.mxu1 %v10733_v20 }
 0x119   : > { %v573_v24 = vpop.f32.mrf.mxu0  ;;  %v965_v53 = vpop.f32.mrf.mxu1 }
 0x11a   : > { %v7819_v28 = vadd.f32 %v956_v22, %v572_v43  ;;  %v574_v23 = vadd.f32 %v573_v24, %v7665_v8  ;;  %v10845_v43 = vand.u32 4294901760, %v7799_v16 }
 0x11b   : > { %v582_v52 = vpop.f32.mrf.mxu0  ;;  %1401 = vmatmul.mubr.f32.gmra.mxu0 %v7503_v1  ;;  %v970_v41 = vpop.f32.mrf.mxu1  ;;  %1765 = vmatmul.mubr.f32.gmra.mxu1 %v7532_v33  ;;  %v2838_v1 = vsub.f32 %v7802_v59, %v10615_v34 }
 0x11c   : > { %v7825_v9 = vadd.f32 %v958_v21, %v574_v23  ;;  %v583_v50 = vadd.f32 %v582_v52, %v7662_v18  ;;  %1406 = vmatprep.mubr.f32.mxu0 %v10733_v20  ;;  %1770 = vmatprep.mubr.f32.mxu1 %v10733_v20  ;;  %v2832_v22 = vsub.f32 %v7799_v16, %v10845_v43  ;;  %v10846_v21 = vand.u32 4294901760, %v7808_v57 }
 0x11d   : > { %v584_v24 = vpop.f32.mrf.mxu0  ;;  %v972_v0 = vpop.f32.mrf.mxu1  ;;  %v2839_v34 = vand.u32 4294901760, %v2838_v1 }
 0x11e   : > { %v7836_v49 = vadd.f32 %v963_v27, %v583_v50  ;;  %v585_v23 = vadd.f32 %v584_v24, %v7665_v8  ;;  %v2844_v52 = vsub.f32 %v7808_v57, %v10846_v21  ;;  %v2833_v27 = vand.u32 4294901760, %v2832_v22 }
 0x11f   : > { %v593_v33 = vpop.f32.mrf.mxu0  ;;  %1409 = vmatmul.mubr.f32.gmra.mxu0 %v7521_v30  ;;  %v977_v42 = vpop.f32.mrf.mxu1  ;;  %1774 = vmatmul.mubr.f32.gmra.mxu1 %v7547_v26 }
 0x120   : > { %v7844_v43 = vadd.f32 %v965_v53, %v585_v23  ;;  %v594_v39 = vadd.f32 %v593_v33, %v7662_v18  ;;  %1414 = vmatprep.mubr.f32.mxu0 %v10733_v20  ;;  %2149 = vmatprep.mubr.f32.mxu1 %v10733_v20  ;;  %v2845_v30 = vand.u32 4294901760, %v2844_v52  ;;  %v10847_v23 = vld [vmem:[#allocation5_spill] sm:$0xff] }
 0x121   : > { %v595_v50 = vpop.f32.mrf.mxu0  ;;  %v979_v24 = vpop.f32.mrf.mxu1 }
 0x122   : > { %v7849_v45 = vadd.f32 %v970_v41, %v594_v39  ;;  %v596_v21 = vadd.f32 %v595_v50, %v7665_v8  ;;  %v10848_v50 = vld [vmem:[#allocation6_spill] sm:$0xff] }
 0x123   : > { %v604_v40 = vpop.f32.mrf.mxu0  ;;  %1417 = vmatmul.mubr.f32.gmra.mxu0 %v7536_v32  ;;  %v984_v53 = vpop.f32.mrf.mxu1  ;;  %2151 = vmatmul.mubr.f32.vlgmr.msra.gmra.mxu1 %v10847_v23 }
 0x124   : > { %v7854_v33 = vadd.f32 %v972_v0, %v596_v21  ;;  %v605_v26 = vadd.f32 %v604_v40, %v7662_v18  ;;  %1856 = vmatprep.mubr.f32.mxu0 %v10733_v20  ;;  %2834 = vmatpush1.msra.mxu1 %v2833_v27 }
 0x125   : > { %v606_v22 = vpop.f32.mrf.mxu0  ;;  %v986_v1 = vpop.f32.mrf.mxu1  ;;  %2156 = vmatprep.mubr.f32.mxu1 %v10733_v20  ;;  %2840 = vmatprep.subr.mxu1 %v2839_v34 }
 0x126   : > { %v7859_v39 = vadd.f32 %v977_v42, %v605_v26  ;;  %v607_v41 = vadd.f32 %v606_v22, %v7665_v8  ;;  %2846 = vmatpush1.msra.mxu1 %v2845_v30  ;;  %v10849_v22 = vld [vmem:[#allocation7_spill] sm:$0xff] }
 0x127   : > { %v615_v52 = vpop.f32.mrf.mxu0  ;;  %1858 = vmatmul.mubr.f32.vlgmr.msra.gmra.mxu0 %v10847_v23  ;;  %v991_v0 = vpop.f32.mrf.mxu1  ;;  %2158 = vmatmul.mubr.f32.gmra.mxu1 %v10848_v50 }
 0x128   : > { %v7864_v40 = vadd.f32 %v979_v24, %v607_v41  ;;  %v616_v27 = vadd.f32 %v615_v52, %v7662_v18  ;;  %2405 = vmatpush1.msra.mxu0 %v7782_v48  ;;  %1863 = vmatprep.mubr.f32.mxu0 %v10733_v20 }
 0x129   : > { %v617_v34 = vpop.f32.mrf.mxu0  ;;  %v993_v42 = vpop.f32.mrf.mxu1  ;;  %2163 = vmatprep.mubr.f32.mxu1 %v10733_v20  ;;  %2407 = vmatprep.subr.mxu0 %v7784_v51 }
 0x12a   : > { %v7871_v26 = vadd.f32 %v984_v53, %v616_v27  ;;  %v618_v30 = vadd.f32 %v617_v34, %v7665_v8  ;;  %2409 = vmatpush1.msra.mxu0 %v7789_v60  ;;  %3462 = vmatprep.subr.mxu1 %v7586_v46 }
 0x12b   : > { %v626_v24 = vpop.f32.mrf.mxu0  ;;  %1865 = vmatmul.mubr.f32.gmra.mxu0 %v10848_v50  ;;  %v998_v21 = vpop.f32.mrf.mxu1  ;;  %2165 = vmatmul.mubr.f32.gmra.mxu1 %v10849_v22 }
 0x12c   : > { %v7878_v41 = vadd.f32 %v986_v1, %v618_v30  ;;  %v627_v52 = vadd.f32 %v626_v24, %v7662_v18  ;;  %1870 = vmatprep.mubr.f32.mxu0 %v10733_v20  ;;  %2170 = vmatprep.mubr.f32.mxu1 %v10733_v20  ;;  %v10851_v1 = vld [vmem:[#allocation9_spill] sm:$0xff] }
 0x12d   : > { %v628_v53 = vpop.f32.mrf.mxu0  ;;  %v1000_v27 = vpop.f32.mrf.mxu1  ;;  %3134 = vmatprep.subr.mxu0 %v7593_v13 }
 0x12e   : > { %v7884_v34 = vadd.f32 %v991_v0, %v627_v52  ;;  %v629_v32 = vadd.f32 %v628_v53, %v7665_v8 }
 0x12f   : > { %v637_v36 = vpop.f32.mrf.mxu0  ;;  %1872 = vmatmul.mubr.f32.gmra.mxu0 %v10849_v22  ;;  %v1005_v58 = vpop.f32.mrf.mxu1  ;;  %2172 = vmatmul.mubr.f32.gmra.mxu1 %v10851_v1  ;;  %v10854_v22 = vld [vmem:[#allocation14_spill] sm:$0xff] }
 0x130   : > { %10850 = vst [vmem:[#allocation139_spill] sm:$0xff] %v7884_v34  ;;  %v7889_v30 = vadd.f32 %v993_v42, %v629_v32  ;;  %v638_v24 = vadd.f32 %v637_v36, %v7662_v18  ;;  %1877 = vmatprep.mubr.f32.mxu0 %v10733_v20  ;;  %2177 = vmatprep.mubr.f32.mxu1 %v10733_v20 }
 0x131   : > { %v639_v46 = vpop.f32.mrf.mxu0  ;;  %v1007_v13 = vpop.f32.mrf.mxu1 }
 0x132   : > { %10852 = vst [vmem:[#allocation140_spill] sm:$0xff] %v7889_v30  ;;  %v7894_v0 = vadd.f32 %v998_v21, %v638_v24  ;;  %v640_v52 = vadd.f32 %v639_v46, %v7665_v8 }
 0x133   : > { %v648_v53 = vpop.f32.mrf.mxu0  ;;  %1879 = vmatmul.mubr.f32.gmra.mxu0 %v10851_v1  ;;  %v1012_v34 = vpop.f32.mrf.mxu1  ;;  %2179 = vmatmul.mubr.f32.gmra.mxu1 %v10854_v22  ;;  %v10857_v1 = vld [vmem:[#allocation18_spill] sm:$0xff] }
 0x134   : > { %10853 = vst [vmem:[#allocation141_spill] sm:$0xff] %v7894_v0  ;;  %v7899_v32 = vadd.f32 %v1000_v27, %v640_v52  ;;  %v649_v36 = vadd.f32 %v648_v53, %v7662_v18  ;;  %1884 = vmatprep.mubr.f32.mxu0 %v10733_v20  ;;  %2184 = vmatprep.mubr.f32.mxu1 %v10733_v20 }
 0x135   : > { %v650_v42 = vpop.f32.mrf.mxu0  ;;  %v1014_v30 = vpop.f32.mrf.mxu1 }
 0x136   : > { %10855 = vst [vmem:[#allocation142_spill] sm:$0xff] %v7899_v32  ;;  %v7904_v21 = vadd.f32 %v1005_v58, %v649_v36  ;;  %v651_v46 = vadd.f32 %v650_v42, %v7665_v8 }
 0x137   : > { %v659_v24 = vpop.f32.mrf.mxu0  ;;  %1886 = vmatmul.mubr.f32.gmra.mxu0 %v10854_v22  ;;  %v1019_v0 = vpop.f32.mrf.mxu1  ;;  %2186 = vmatmul.mubr.f32.gmra.mxu1 %v10857_v1  ;;  %v10860_v22 = vld [vmem:[#allocation23_spill] sm:$0xff] }
 0x138   : > { %10856 = vst [vmem:[#allocation143_spill] sm:$0xff] %v7904_v21  ;;  %v7909_v27 = vadd.f32 %v1007_v13, %v651_v46  ;;  %v660_v52 = vadd.f32 %v659_v24, %v7662_v18  ;;  %1891 = vmatprep.mubr.f32.mxu0 %v10733_v20  ;;  %2191 = vmatprep.mubr.f32.mxu1 %v10733_v20 }
 0x139   : > { %v661_v53 = vpop.f32.mrf.mxu0  ;;  %v1021_v32 = vpop.f32.mrf.mxu1 }
 0x13a   : > { %10858 = vst [vmem:[#allocation144_spill] sm:$0xff] %v7909_v27  ;;  %v7914_v58 = vadd.f32 %v1012_v34, %v660_v52  ;;  %v662_v36 = vadd.f32 %v661_v53, %v7665_v8 }
 0x13b   : > { %v670_v42 = vpop.f32.mrf.mxu0  ;;  %1893 = vmatmul.mubr.f32.gmra.mxu0 %v10857_v1  ;;  %v1026_v21 = vpop.f32.mrf.mxu1  ;;  %2193 = vmatmul.mubr.f32.gmra.mxu1 %v10860_v22  ;;  %v10863_v1 = vld [vmem:[#allocation28_spill] sm:$0xff] }
 0x13c   : > { %10859 = vst [vmem:[#allocation145_spill] sm:$0xff] %v7914_v58  ;;  %v7919_v13 = vadd.f32 %v1014_v30, %v662_v36  ;;  %v671_v46 = vadd.f32 %v670_v42, %v7662_v18  ;;  %1898 = vmatprep.mubr.f32.mxu0 %v10733_v20  ;;  %2198 = vmatprep.mubr.f32.mxu1 %v10733_v20 }
 0x13d   : > { %v672_v24 = vpop.f32.mrf.mxu0  ;;  %v1028_v27 = vpop.f32.mrf.mxu1 }
 0x13e   : > { %10861 = vst [vmem:[#allocation146_spill] sm:$0xff] %v7919_v13  ;;  %v7924_v34 = vadd.f32 %v1019_v0, %v671_v46  ;;  %v673_v52 = vadd.f32 %v672_v24, %v7665_v8 }
 0x13f   : > { %v681_v53 = vpop.f32.mrf.mxu0  ;;  %1900 = vmatmul.mubr.f32.gmra.mxu0 %v10860_v22  ;;  %v1033_v58 = vpop.f32.mrf.mxu1  ;;  %2200 = vmatmul.mubr.f32.gmra.mxu1 %v10863_v1  ;;  %v10866_v22 = vld [vmem:[#allocation33_spill] sm:$0xff] }
 0x140   : > { %10862 = vst [vmem:[#allocation147_spill] sm:$0xff] %v7924_v34  ;;  %v7929_v30 = vadd.f32 %v1021_v32, %v673_v52  ;;  %v682_v36 = vadd.f32 %v681_v53, %v7662_v18  ;;  %1905 = vmatprep.mubr.f32.mxu0 %v10733_v20  ;;  %2205 = vmatprep.mubr.f32.mxu1 %v10733_v20 }
 0x141   : > { %v683_v42 = vpop.f32.mrf.mxu0  ;;  %v1035_v13 = vpop.f32.mrf.mxu1 }
 0x142   : > { %10864 = vst [vmem:[#allocation148_spill] sm:$0xff] %v7929_v30  ;;  %v7934_v0 = vadd.f32 %v1026_v21, %v682_v36  ;;  %v684_v46 = vadd.f32 %v683_v42, %v7665_v8 }
 0x143   : > { %v692_v24 = vpop.f32.mrf.mxu0  ;;  %1907 = vmatmul.mubr.f32.gmra.mxu0 %v10863_v1  ;;  %v1040_v34 = vpop.f32.mrf.mxu1  ;;  %2207 = vmatmul.mubr.f32.gmra.mxu1 %v10866_v22  ;;  %v10869_v1 = vld [vmem:[#allocation37_spill] sm:$0xff] }
 0x144   : > { %10865 = vst [vmem:[#allocation149_spill] sm:$0xff] %v7934_v0  ;;  %v7939_v32 = vadd.f32 %v1028_v27, %v684_v46  ;;  %v693_v52 = vadd.f32 %v692_v24, %v7662_v18  ;;  %1912 = vmatprep.mubr.f32.mxu0 %v10733_v20  ;;  %2212 = vmatprep.mubr.f32.mxu1 %v10733_v20 }
 0x145   : > { %v694_v53 = vpop.f32.mrf.mxu0  ;;  %v1042_v30 = vpop.f32.mrf.mxu1 }
 0x146   : > { %10867 = vst [vmem:[#allocation150_spill] sm:$0xff] %v7939_v32  ;;  %v7944_v21 = vadd.f32 %v1033_v58, %v693_v52  ;;  %v695_v36 = vadd.f32 %v694_v53, %v7665_v8 }
 0x147   : > { %v703_v42 = vpop.f32.mrf.mxu0  ;;  %1914 = vmatmul.mubr.f32.gmra.mxu0 %v10866_v22  ;;  %v1047_v0 = vpop.f32.mrf.mxu1  ;;  %2214 = vmatmul.mubr.f32.gmra.mxu1 %v10869_v1  ;;  %v10872_v22 = vld [vmem:[#allocation41_spill] sm:$0xff] }
 0x148   : > { %10868 = vst [vmem:[#allocation151_spill] sm:$0xff] %v7944_v21  ;;  %v7949_v27 = vadd.f32 %v1035_v13, %v695_v36  ;;  %v704_v46 = vadd.f32 %v703_v42, %v7662_v18  ;;  %1919 = vmatprep.mubr.f32.mxu0 %v10733_v20  ;;  %2219 = vmatprep.mubr.f32.mxu1 %v10733_v20 }
 0x149   : > { %v705_v24 = vpop.f32.mrf.mxu0  ;;  %v1049_v32 = vpop.f32.mrf.mxu1 }
 0x14a   : > { %10870 = vst [vmem:[#allocation152_spill] sm:$0xff] %v7949_v27  ;;  %v7954_v58 = vadd.f32 %v1040_v34, %v704_v46  ;;  %v706_v52 = vadd.f32 %v705_v24, %v7665_v8 }
 0x14b   : > { %v714_v53 = vpop.f32.mrf.mxu0  ;;  %1921 = vmatmul.mubr.f32.gmra.mxu0 %v10869_v1  ;;  %v1054_v21 = vpop.f32.mrf.mxu1  ;;  %2221 = vmatmul.mubr.f32.gmra.mxu1 %v10872_v22  ;;  %v10875_v1 = vld [vmem:[#allocation42_spill] sm:$0xff] }
 0x14c   : > { %10871 = vst [vmem:[#allocation153_spill] sm:$0xff] %v7954_v58  ;;  %v7959_v13 = vadd.f32 %v1042_v30, %v706_v52  ;;  %v715_v36 = vadd.f32 %v714_v53, %v7662_v18  ;;  %1926 = vmatprep.mubr.f32.mxu0 %v10733_v20  ;;  %2226 = vmatprep.mubr.f32.mxu1 %v10733_v20 }
 0x14d   : > { %v716_v42 = vpop.f32.mrf.mxu0  ;;  %v1056_v27 = vpop.f32.mrf.mxu1 }
 0x14e   : > { %10873 = vst [vmem:[#allocation154_spill] sm:$0xff] %v7959_v13  ;;  %v7964_v34 = vadd.f32 %v1047_v0, %v715_v36  ;;  %v717_v46 = vadd.f32 %v716_v42, %v7665_v8 }
 0x14f   : > { %v725_v24 = vpop.f32.mrf.mxu0  ;;  %1928 = vmatmul.mubr.f32.gmra.mxu0 %v10872_v22  ;;  %v1061_v58 = vpop.f32.mrf.mxu1  ;;  %2228 = vmatmul.mubr.f32.gmra.mxu1 %v10875_v1  ;;  %v10878_v22 = vld [vmem:[#allocation49_spill] sm:$0xff] }
 0x150   : > { %10874 = vst [vmem:[#allocation155_spill] sm:$0xff] %v7964_v34  ;;  %v7969_v30 = vadd.f32 %v1049_v32, %v717_v46  ;;  %v726_v52 = vadd.f32 %v725_v24, %v7662_v18  ;;  %1933 = vmatprep.mubr.f32.mxu0 %v10733_v20  ;;  %2233 = vmatprep.mubr.f32.mxu1 %v10733_v20 }
 0x151   : > { %v727_v53 = vpop.f32.mrf.mxu0  ;;  %v1063_v13 = vpop.f32.mrf.mxu1 }
 0x152   : > { %10876 = vst [vmem:[#allocation156_spill] sm:$0xff] %v7969_v30  ;;  %v7974_v0 = vadd.f32 %v1054_v21, %v726_v52  ;;  %v728_v36 = vadd.f32 %v727_v53, %v7665_v8 }
 0x153   : > { %v736_v42 = vpop.f32.mrf.mxu0  ;;  %1935 = vmatmul.mubr.f32.gmra.mxu0 %v10875_v1  ;;  %v1068_v34 = vpop.f32.mrf.mxu1  ;;  %2235 = vmatmul.mubr.f32.gmra.mxu1 %v10878_v22  ;;  %v10881_v1 = vld [vmem:[#allocation51_spill] sm:$0xff] }
 0x154   : > { %10877 = vst [vmem:[#allocation157_spill] sm:$0xff] %v7974_v0  ;;  %v7979_v32 = vadd.f32 %v1056_v27, %v728_v36  ;;  %v737_v46 = vadd.f32 %v736_v42, %v7662_v18  ;;  %1940 = vmatprep.mubr.f32.mxu0 %v10733_v20  ;;  %2240 = vmatprep.mubr.f32.mxu1 %v10733_v20 }
 0x155   : > { %v738_v24 = vpop.f32.mrf.mxu0  ;;  %v1070_v30 = vpop.f32.mrf.mxu1 }
 0x156   : > { %10879 = vst [vmem:[#allocation158_spill] sm:$0xff] %v7979_v32  ;;  %v7984_v21 = vadd.f32 %v1061_v58, %v737_v46  ;;  %v739_v52 = vadd.f32 %v738_v24, %v7665_v8 }
 0x157   : > { %v747_v53 = vpop.f32.mrf.mxu0  ;;  %1942 = vmatmul.mubr.f32.gmra.mxu0 %v10878_v22  ;;  %v1075_v0 = vpop.f32.mrf.mxu1  ;;  %2242 = vmatmul.mubr.f32.gmra.mxu1 %v10881_v1  ;;  %v10884_v22 = vld [vmem:[#allocation54_spill] sm:$0xff] }
 0x158   : > { %10880 = vst [vmem:[#allocation159_spill] sm:$0xff] %v7984_v21  ;;  %v7989_v27 = vadd.f32 %v1063_v13, %v739_v52  ;;  %v748_v36 = vadd.f32 %v747_v53, %v7662_v18  ;;  %1947 = vmatprep.mubr.f32.mxu0 %v10733_v20  ;;  %2247 = vmatprep.mubr.f32.mxu1 %v10733_v20 }
 0x159   : > { %v749_v42 = vpop.f32.mrf.mxu0  ;;  %v1077_v32 = vpop.f32.mrf.mxu1 }
 0x15a   : > { %10882 = vst [vmem:[#allocation160_spill] sm:$0xff] %v7989_v27  ;;  %v7994_v58 = vadd.f32 %v1068_v34, %v748_v36  ;;  %v750_v46 = vadd.f32 %v749_v42, %v7665_v8 }
 0x15b   : > { %v758_v24 = vpop.f32.mrf.mxu0  ;;  %1949 = vmatmul.mubr.f32.gmra.mxu0 %v10881_v1  ;;  %v1082_v21 = vpop.f32.mrf.mxu1  ;;  %2249 = vmatmul.mubr.f32.gmra.mxu1 %v10884_v22  ;;  %v10887_v1 = vld [vmem:[#allocation58_spill] sm:$0xff] }
 0x15c   : > { %10883 = vst [vmem:[#allocation161_spill] sm:$0xff] %v7994_v58  ;;  %v7999_v13 = vadd.f32 %v1070_v30, %v750_v46  ;;  %v759_v52 = vadd.f32 %v758_v24, %v7662_v18  ;;  %1954 = vmatprep.mubr.f32.mxu0 %v10733_v20  ;;  %2254 = vmatprep.mubr.f32.mxu1 %v10733_v20 }
 0x15d   : > { %v760_v53 = vpop.f32.mrf.mxu0  ;;  %v1084_v27 = vpop.f32.mrf.mxu1 }
 0x15e   : > { %10885 = vst [vmem:[#allocation162_spill] sm:$0xff] %v7999_v13  ;;  %v8004_v34 = vadd.f32 %v1075_v0, %v759_v52  ;;  %v761_v36 = vadd.f32 %v760_v53, %v7665_v8 }
 0x15f   : > { %v769_v42 = vpop.f32.mrf.mxu0  ;;  %1956 = vmatmul.mubr.f32.gmra.mxu0 %v10884_v22  ;;  %v1089_v58 = vpop.f32.mrf.mxu1  ;;  %2256 = vmatmul.mubr.f32.gmra.mxu1 %v10887_v1  ;;  %v10890_v22 = vld [vmem:[#allocation65_spill] sm:$0xff] }
 0x160   : > { %10886 = vst [vmem:[#allocation163_spill] sm:$0xff] %v8004_v34  ;;  %v8009_v30 = vadd.f32 %v1077_v32, %v761_v36  ;;  %v770_v46 = vadd.f32 %v769_v42, %v7662_v18  ;;  %1961 = vmatprep.mubr.f32.mxu0 %v10733_v20  ;;  %2261 = vmatprep.mubr.f32.mxu1 %v10733_v20 }
 0x161   : > { %v771_v24 = vpop.f32.mrf.mxu0  ;;  %v1091_v13 = vpop.f32.mrf.mxu1 }
 0x162   : > { %10888 = vst [vmem:[#allocation164_spill] sm:$0xff] %v8009_v30  ;;  %v8014_v0 = vadd.f32 %v1082_v21, %v770_v46  ;;  %v772_v52 = vadd.f32 %v771_v24, %v7665_v8 }
 0x163   : > { %v780_v53 = vpop.f32.mrf.mxu0  ;;  %1963 = vmatmul.mubr.f32.gmra.mxu0 %v10887_v1  ;;  %v1496_v34 = vpop.f32.mrf.mxu1  ;;  %2263 = vmatmul.mubr.f32.gmra.mxu1 %v10890_v22  ;;  %v10892_v1 = vld [vmem:[#allocation69_spill] sm:$0xff] }
 0x164   : > { %10889 = vst [vmem:[#allocation165_spill] sm:$0xff] %v8014_v0  ;;  %v8019_v32 = vadd.f32 %v1084_v27, %v772_v52  ;;  %v781_v36 = vadd.f32 %v780_v53, %v7662_v18  ;;  %1968 = vmatprep.mubr.f32.mxu0 %v10733_v20  ;;  %2268 = vmatprep.mubr.f32.mxu1 %v10733_v20 }
 0x165   : > { %v782_v42 = vpop.f32.mrf.mxu0  ;;  %v1498_v30 = vpop.f32.mrf.mxu1 }
 0x166   : > { %v8024_v21 = vadd.f32 %v1089_v58, %v781_v36  ;;  %v783_v46 = vadd.f32 %v782_v42, %v7665_v8 }
 0x167   : > { %v1170_v24 = vpop.f32.mrf.mxu0  ;;  %1970 = vmatmul.mubr.f32.gmra.mxu0 %v10890_v22  ;;  %v1505_v0 = vpop.f32.mrf.mxu1  ;;  %2270 = vmatmul.mubr.f32.gmra.mxu1 %v10892_v1 }
 0x168   : > { %10891 = vst [vmem:[#allocation166_spill] sm:$0xff] %v8024_v21  ;;  %v8029_v27 = vadd.f32 %v1091_v13, %v783_v46  ;;  %v1171_v18 = vadd.f32 %v1170_v24, %v7672_v5  ;;  %1975 = vmatprep.mubr.f32.mxu0 %v10733_v20  ;;  %2275 = vmatprep.mubr.f32.mxu1 %v10733_v20  ;;  %v10894_v21 = vld [vmem:[#allocation73_spill] sm:$0xff] }
 0x169   : > { %v1172_v52 = vpop.f32.mrf.mxu0  ;;  %v1507_v53 = vpop.f32.mrf.mxu1 }
 0x16a   : > { %v8034_v58 = vadd.f32 %v1496_v34, %v1171_v18  ;;  %v1173_v8 = vadd.f32 %v1172_v52, %v7677_v37 }
 0x16b   : > { %v1178_v36 = vpop.f32.mrf.mxu0  ;;  %1977 = vmatmul.mubr.f32.gmra.mxu0 %v10892_v1  ;;  %v1514_v42 = vpop.f32.mrf.mxu1  ;;  %2277 = vmatmul.mubr.f32.gmra.mxu1 %v10894_v21 }
 0x16c   : > { %10893 = vst [vmem:[#allocation69_spill] sm:$0xff] %v8034_v58  ;;  %v8039_v13 = vadd.f32 %v1498_v30, %v1173_v8  ;;  %v1179_v5 = vadd.f32 %v1178_v36, %v7682_v15  ;;  %1982 = vmatprep.mubr.f32.mxu0 %v10733_v20  ;;  %2282 = vmatprep.mubr.f32.mxu1 %v10733_v20  ;;  %v10896_v58 = vld [vmem:[#allocation74_spill] sm:$0xff] }
 0x16d   : > { %v1180_v46 = vpop.f32.mrf.mxu0  ;;  %v1516_v24 = vpop.f32.mrf.mxu1 }
 0x16e   : > { %v8044_v34 = vadd.f32 %v1505_v0, %v1179_v5  ;;  %v1181_v37 = vadd.f32 %v1180_v46, %v7687_v54 }
 0x16f   : > { %v1186_v18 = vpop.f32.mrf.mxu0  ;;  %1984 = vmatmul.mubr.f32.gmra.mxu0 %v10894_v21  ;;  %v1523_v52 = vpop.f32.mrf.mxu1  ;;  %2284 = vmatmul.mubr.f32.gmra.mxu1 %v10896_v58 }
 0x170   : > { %10895 = vst [vmem:[#allocation167_spill] sm:$0xff] %v8044_v34  ;;  %v8049_v30 = vadd.f32 %v1507_v53, %v1181_v37  ;;  %v1187_v15 = vadd.f32 %v1186_v18, %v7692_v17  ;;  %1989 = vmatprep.mubr.f32.mxu0 %v10733_v20  ;;  %2289 = vmatprep.mubr.f32.mxu1 %v10733_v20  ;;  %v10898_v34 = vld [vmem:[#allocation81_spill] sm:$0xff] }
 0x171   : > { %v1188_v8 = vpop.f32.mrf.mxu0  ;;  %v1525_v36 = vpop.f32.mrf.mxu1 }
 0x172   : > { %v8054_v0 = vadd.f32 %v1514_v42, %v1187_v15  ;;  %v1189_v54 = vadd.f32 %v1188_v8, %v7697_v14 }
 0x173   : > { %v1194_v5 = vpop.f32.mrf.mxu0  ;;  %1991 = vmatmul.mubr.f32.gmra.mxu0 %v10896_v58  ;;  %v1532_v46 = vpop.f32.mrf.mxu1  ;;  %2291 = vmatmul.mubr.f32.gmra.mxu1 %v10898_v34 }
 0x174   : > { %10897 = vst [vmem:[#allocation74_spill] sm:$0xff] %v8054_v0  ;;  %v8059_v53 = vadd.f32 %v1516_v24, %v1189_v54  ;;  %v1195_v17 = vadd.f32 %v1194_v5, %v7702_v31  ;;  %1996 = vmatprep.mubr.f32.mxu0 %v10733_v20  ;;  %2296 = vmatprep.mubr.f32.mxu1 %v10733_v20  ;;  %v10900_v0 = vld [vmem:[#allocation82_spill] sm:$0xff] }
 0x175   : > { %v1196_v37 = vpop.f32.mrf.mxu0  ;;  %v1534_v18 = vpop.f32.mrf.mxu1 }
 0x176   : > { %v8064_v42 = vadd.f32 %v1523_v52, %v1195_v17  ;;  %v1197_v14 = vadd.f32 %v1196_v37, %v7707_v25 }
 0x177   : > { %v1202_v15 = vpop.f32.mrf.mxu0  ;;  %1998 = vmatmul.mubr.f32.gmra.mxu0 %v10898_v34  ;;  %v1541_v8 = vpop.f32.mrf.mxu1  ;;  %2298 = vmatmul.mubr.f32.gmra.mxu1 %v10900_v0 }
 0x178   : > { %10899 = vst [vmem:[#allocation81_spill] sm:$0xff] %v8064_v42  ;;  %v8069_v24 = vadd.f32 %v1525_v36, %v1197_v14  ;;  %v1203_v31 = vadd.f32 %v1202_v15, %v7712_v29  ;;  %2003 = vmatprep.mubr.f32.mxu0 %v10733_v20  ;;  %2303 = vmatprep.mubr.f32.mxu1 %v10733_v20  ;;  %v10902_v42 = vld [vmem:[#allocation89_spill] sm:$0xff] }
 0x179   : > { %v1204_v54 = vpop.f32.mrf.mxu0  ;;  %v1543_v5 = vpop.f32.mrf.mxu1 }
 0x17a   : > { %v8074_v52 = vadd.f32 %v1532_v46, %v1203_v31  ;;  %v1205_v25 = vadd.f32 %v1204_v54, %v7717_v35 }
 0x17b   : > { %v1210_v17 = vpop.f32.mrf.mxu0  ;;  %2005 = vmatmul.mubr.f32.gmra.mxu0 %v10900_v0  ;;  %v1550_v37 = vpop.f32.mrf.mxu1  ;;  %2305 = vmatmul.mubr.f32.gmra.mxu1 %v10902_v42 }
 0x17c   : > { %10901 = vst [vmem:[#allocation82_spill] sm:$0xff] %v8074_v52  ;;  %v8079_v36 = vadd.f32 %v1534_v18, %v1205_v25  ;;  %v1211_v29 = vadd.f32 %v1210_v17, %v7722_v3  ;;  %2010 = vmatprep.mubr.f32.mxu0 %v10733_v20  ;;  %2310 = vmatprep.mubr.f32.mxu1 %v10733_v20  ;;  %v10904_v52 = vld [vmem:[#allocation90_spill] sm:$0xff] }
 0x17d   : > { %v1212_v14 = vpop.f32.mrf.mxu0  ;;  %v1552_v15 = vpop.f32.mrf.mxu1 }
 0x17e   : > { %v8084_v46 = vadd.f32 %v1541_v8, %v1211_v29  ;;  %v1213_v35 = vadd.f32 %v1212_v14, %v7727_v47 }
 0x17f   : > { %v1218_v31 = vpop.f32.mrf.mxu0  ;;  %2012 = vmatmul.mubr.f32.gmra.mxu0 %v10902_v42  ;;  %v1559_v54 = vpop.f32.mrf.mxu1  ;;  %2312 = vmatmul.mubr.f32.gmra.mxu1 %v10904_v52 }
 0x180   : > { %10903 = vst [vmem:[#allocation89_spill] sm:$0xff] %v8084_v46  ;;  %v8089_v18 = vadd.f32 %v1543_v5, %v1213_v35  ;;  %v1219_v3 = vadd.f32 %v1218_v31, %v7732_v44  ;;  %2017 = vmatprep.mubr.f32.mxu0 %v10733_v20  ;;  %2317 = vmatprep.mubr.f32.mxu1 %v10733_v20  ;;  %v10906_v46 = vld [vmem:[#allocation97_spill] sm:$0xff] }
 0x181   : > { %v1220_v25 = vpop.f32.mrf.mxu0  ;;  %v1561_v17 = vpop.f32.mrf.mxu1 }
 0x182   : > { %v8094_v8 = vadd.f32 %v1550_v37, %v1219_v3  ;;  %v1221_v47 = vadd.f32 %v1220_v25, %v7737_v4 }
 0x183   : > { %v1226_v29 = vpop.f32.mrf.mxu0  ;;  %2019 = vmatmul.mubr.f32.gmra.mxu0 %v10904_v52  ;;  %v1568_v14 = vpop.f32.mrf.mxu1  ;;  %2319 = vmatmul.mubr.f32.gmra.mxu1 %v10906_v46 }
 0x184   : > { %10905 = vst [vmem:[#allocation90_spill] sm:$0xff] %v8094_v8  ;;  %v8099_v5 = vadd.f32 %v1552_v15, %v1221_v47  ;;  %v1227_v44 = vadd.f32 %v1226_v29, %v7742_v10  ;;  %2024 = vmatprep.mubr.f32.mxu0 %v10733_v20  ;;  %2324 = vmatprep.mubr.f32.mxu1 %v10733_v20  ;;  %v10908_v8 = vld [vmem:[#allocation101_spill] sm:$0xff] }
 0x185   : > { %v1228_v35 = vpop.f32.mrf.mxu0  ;;  %v1570_v31 = vpop.f32.mrf.mxu1 }
 0x186   : > { %v8104_v37 = vadd.f32 %v1559_v54, %v1227_v44  ;;  %v1229_v4 = vadd.f32 %v1228_v35, %v7747_v19 }
 0x187   : > { %v1234_v3 = vpop.f32.mrf.mxu0  ;;  %2026 = vmatmul.mubr.f32.gmra.mxu0 %v10906_v46  ;;  %v1577_v25 = vpop.f32.mrf.mxu1  ;;  %2326 = vmatmul.mubr.f32.gmra.mxu1 %v10908_v8 }
 0x188   : > { %10907 = vst [vmem:[#allocation97_spill] sm:$0xff] %v8104_v37  ;;  %v8109_v15 = vadd.f32 %v1561_v17, %v1229_v4  ;;  %v1235_v10 = vadd.f32 %v1234_v3, %v7752_v61  ;;  %2031 = vmatprep.mubr.f32.mxu0 %v10733_v20  ;;  %2331 = vmatprep.mubr.f32.mxu1 %v10733_v20  ;;  %v10910_v37 = vld [vmem:[#allocation105_spill] sm:$0xff] }
 0x189   : > { %v1236_v47 = vpop.f32.mrf.mxu0  ;;  %v1579_v29 = vpop.f32.mrf.mxu1 }
 0x18a   : > { %v8114_v54 = vadd.f32 %v1568_v14, %v1235_v10  ;;  %v1237_v19 = vadd.f32 %v1236_v47, %v7760_v55 }
 0x18b   : > { %v1242_v44 = vpop.f32.mrf.mxu0  ;;  %2033 = vmatmul.mubr.f32.gmra.mxu0 %v10908_v8  ;;  %v1586_v35 = vpop.f32.mrf.mxu1  ;;  %2333 = vmatmul.mubr.f32.gmra.mxu1 %v10910_v37 }
 0x18c   : > { %10909 = vst [vmem:[#allocation101_spill] sm:$0xff] %v8114_v54  ;;  %v8119_v17 = vadd.f32 %v1570_v31, %v1237_v19  ;;  %v1243_v61 = vadd.f32 %v1242_v44, %v7766_v7  ;;  %2038 = vmatprep.mubr.f32.mxu0 %v10733_v20  ;;  %2338 = vmatprep.mubr.f32.mxu1 %v10733_v20  ;;  %v10912_v54 = vld [vmem:[#allocation106_spill] sm:$0xff] }
 0x18d   : > { %v1244_v4 = vpop.f32.mrf.mxu0  ;;  %v1588_v3 = vpop.f32.mrf.mxu1 }
 0x18e   : > { %v8124_v14 = vadd.f32 %v1577_v25, %v1243_v61  ;;  %v1245_v55 = vadd.f32 %v1244_v4, %v7777_v62 }
 0x18f   : > { %v1250_v10 = vpop.f32.mrf.mxu0  ;;  %2040 = vmatmul.mubr.f32.gmra.mxu0 %v10910_v37  ;;  %v1595_v47 = vpop.f32.mrf.mxu1  ;;  %2340 = vmatmul.mubr.f32.gmra.mxu1 %v10912_v54 }
 0x190   : > { %10911 = vst [vmem:[#allocation105_spill] sm:$0xff] %v8124_v14  ;;  %v8129_v31 = vadd.f32 %v1579_v29, %v1245_v55  ;;  %v1251_v7 = vadd.f32 %v1250_v10, %v7786_v6  ;;  %2045 = vmatprep.mubr.f32.mxu0 %v10733_v20  ;;  %2345 = vmatprep.mubr.f32.mxu1 %v10733_v20  ;;  %v10913_v14 = vld [vmem:[#allocation110_spill] sm:$0xff] }
 0x191   : > { %v1252_v19 = vpop.f32.mrf.mxu0  ;;  %v1597_v44 = vpop.f32.mrf.mxu1 }
 0x192   : > { %v8134_v25 = vadd.f32 %v1586_v35, %v1251_v7  ;;  %v1253_v62 = vadd.f32 %v1252_v19, %v7793_v2 }
 0x193   : > { %v1258_v61 = vpop.f32.mrf.mxu0  ;;  %2047 = vmatmul.mubr.f32.gmra.mxu0 %v10912_v54  ;;  %v1604_v4 = vpop.f32.mrf.mxu1  ;;  %2347 = vmatmul.mubr.f32.gmra.mxu1 %v10913_v14 }
 0x194   : > { %v8139_v29 = vadd.f32 %v1588_v3, %v1253_v62  ;;  %v1259_v6 = vadd.f32 %v1258_v61, %v7804_v38  ;;  %2052 = vmatprep.mubr.f32.mxu0 %v10733_v20  ;;  %2352 = vmatprep.mubr.f32.mxu1 %v10733_v20 }
 0x195   : > { %v1260_v55 = vpop.f32.mrf.mxu0  ;;  %v1606_v10 = vpop.f32.mrf.mxu1 }
 0x196   : > { %v8144_v35 = vadd.f32 %v1595_v47, %v1259_v6  ;;  %v1261_v2 = vadd.f32 %v1260_v55, %v7812_v11 }
 0x197   : > { %v1266_v7 = vpop.f32.mrf.mxu0  ;;  %2054 = vmatmul.mubr.f32.gmra.mxu0 %v10913_v14  ;;  %v1613_v19 = vpop.f32.mrf.mxu1  ;;  %2354 = vmatmul.mubr.f32.gmra.mxu1 %v7485_v56 }
 0x198   : > { %v8149_v3 = vadd.f32 %v1597_v44, %v1261_v2  ;;  %v1267_v38 = vadd.f32 %v1266_v7, %v7819_v28  ;;  %2059 = vmatprep.mubr.f32.mxu0 %v10733_v20  ;;  %2359 = vmatprep.mubr.f32.mxu1 %v10733_v20 }
 0x199   : > { %v1268_v62 = vpop.f32.mrf.mxu0  ;;  %v1615_v61 = vpop.f32.mrf.mxu1 }
 0x19a   : > { %v8154_v47 = vadd.f32 %v1604_v4, %v1267_v38  ;;  %v1269_v11 = vadd.f32 %v1268_v62, %v7825_v9 }
 0x19b   : > { %v1274_v6 = vpop.f32.mrf.mxu0  ;;  %2061 = vmatmul.mubr.f32.gmra.mxu0 %v7485_v56  ;;  %v1622_v55 = vpop.f32.mrf.mxu1  ;;  %2361 = vmatmul.mubr.f32.gmra.mxu1 %v7490_v63 }
 0x19c   : > { %v8159_v44 = vadd.f32 %v1606_v10, %v1269_v11  ;;  %v1275_v28 = vadd.f32 %v1274_v6, %v7836_v49  ;;  %2066 = vmatprep.mubr.f32.mxu0 %v10733_v20  ;;  %2366 = vmatprep.mubr.f32.mxu1 %v10733_v20 }
 0x19d   : > { %v1276_v2 = vpop.f32.mrf.mxu0  ;;  %v1624_v7 = vpop.f32.mrf.mxu1 }
 0x19e   : > { %v8164_v4 = vadd.f32 %v1613_v19, %v1275_v28  ;;  %v1277_v9 = vadd.f32 %v1276_v2, %v7844_v43 }
 0x19f   : > { %v1282_v38 = vpop.f32.mrf.mxu0  ;;  %2068 = vmatmul.mubr.f32.gmra.mxu0 %v7490_v63  ;;  %v1631_v62 = vpop.f32.mrf.mxu1  ;;  %2368 = vmatmul.mubr.f32.gmra.mxu1 %v7508_v12 }
 0x1a0   : > { %v8169_v10 = vadd.f32 %v1615_v61, %v1277_v9  ;;  %v1283_v49 = vadd.f32 %v1282_v38, %v7849_v45  ;;  %2073 = vmatprep.mubr.f32.mxu0 %v10733_v20  ;;  %2879 = vmatprep.mubr.f32.mxu1 %v10733_v20 }
 0x1a1   : > { %v1284_v11 = vpop.f32.mrf.mxu0  ;;  %v1633_v6 = vpop.f32.mrf.mxu1 }
 0x1a2   : > { %v8174_v19 = vadd.f32 %v1622_v55, %v1283_v49  ;;  %v1285_v43 = vadd.f32 %v1284_v11, %v7854_v33  ;;  %v10914_v49 = vld [vmem:[#allocation17_spill] sm:$0xff] }
 0x1a3   : > { %v1290_v28 = vpop.f32.mrf.mxu0  ;;  %2075 = vmatmul.mubr.f32.gmra.mxu0 %v7508_v12  ;;  %v1640_v2 = vpop.f32.mrf.mxu1  ;;  %2881 = vmatmul.mubr.f32.vlgmr.msra.gmra.mxu1 %v10847_v23 }
 0x1a4   : > { %v8179_v61 = vadd.f32 %v1624_v7, %v1285_v43  ;;  %v1291_v45 = vadd.f32 %v1290_v28, %v7859_v39  ;;  %2442 = vmatprep.mubr.f32.mxu0 %v10733_v20  ;;  %3464 = vmatpush1.msra.mxu1 %v7782_v48 }
 0x1a5   : > { %v1292_v9 = vpop.f32.mrf.mxu0  ;;  %v1642_v38 = vpop.f32.mrf.mxu1  ;;  %2886 = vmatprep.mubr.f32.mxu1 %v10733_v20  ;;  %3466 = vmatprep.subr.mxu1 %v7784_v51 }
 0x1a6   : > { %v8186_v33 = vadd.f32 %v1631_v62, %v1291_v45  ;;  %v1293_v55 = vadd.f32 %v1292_v9, %v7864_v40  ;;  %3468 = vmatpush1.msra.mxu1 %v7789_v60 }
 0x1a7   : > { %v1298_v7 = vpop.f32.mrf.mxu0  ;;  %2448 = vmatmul.mubr.f32.vlgmr.msra.gmra.mxu0 %v10914_v49  ;;  %v1649_v39 = vpop.f32.mrf.mxu1  ;;  %2888 = vmatmul.mubr.f32.gmra.mxu1 %v10848_v50  ;;  %v10919_v50 = vld [vmem:[#allocation139_spill] sm:$0xff] }
 0x1a8   : > { %v8192_v11 = vadd.f32 %v1633_v6, %v1293_v55  ;;  %v1299_v43 = vadd.f32 %v1298_v7, %v7871_v26  ;;  %3137 = vmatpush1.msra.mxu0 %v7799_v16  ;;  %2453 = vmatprep.mubr.f32.mxu0 %v10733_v20  ;;  %v10915_v6 = vld [vmem:[#allocation133_spill] sm:$0xff]  ;;  %v10916_v26 = vld [vmem:[#allocation19_spill] sm:$0xff]  ;;  %v10924_v16 = vld [vmem:[#allocation24_spill] sm:$0xff] }
 0x1a9   : > { %v1300_v62 = vpop.f32.mrf.mxu0  ;;  %v1651_v28 = vpop.f32.mrf.mxu1  ;;  %2893 = vmatprep.mubr.f32.mxu1 %v10733_v20  ;;  %3140 = vmatprep.subr.mxu0 %v7802_v59  ;;  %v10917_v7 = vld [vmem:[#allocation7_spill] sm:$0xff] }
 0x1aa   : > { %v8199_v40 = vadd.f32 %v1640_v2, %v1299_v43  ;;  %v1301_v45 = vadd.f32 %v1300_v62, %v7878_v41  ;;  %3143 = vmatpush1.msra.mxu0 %v7808_v57  ;;  %4120 = vmatprep.subr.mxu1 %v10915_v6  ;;  %v10920_v43 = vld [vmem:[#allocation134_spill] sm:$0xff]  ;;  %v10923_v57 = vld [vmem:[#allocation140_spill] sm:$0xff] }
 0x1ab   : > { %v1306_v9 = vpop.f32.mrf.mxu0  ;;  %2459 = vmatmul.mubr.f32.gmra.mxu0 %v10916_v26  ;;  %v1658_v55 = vpop.f32.mrf.mxu1  ;;  %2895 = vmatmul.mubr.f32.gmra.mxu1 %v10917_v7  ;;  %v10921_v62 = vand.u32 4294901760, %v10920_v43 }
 0x1ac   : > { %v8206_v49 = vadd.f32 %v1642_v38, %v1301_v45  ;;  %v1307_v23 = vadd.f32 %v1306_v9, %v10919_v50  ;;  %2464 = vmatprep.mubr.f32.mxu0 %v10733_v20  ;;  %2900 = vmatprep.mubr.f32.mxu1 %v10733_v20  ;;  %v10925_v45 = vld [vmem:[#allocation9_spill] sm:$0xff] }
 0x1ad   : > { %v1308_v2 = vpop.f32.mrf.mxu0  ;;  %v1660_v41 = vpop.f32.mrf.mxu1  ;;  %3821 = vmatprep.subr.mxu0 %v10921_v62  ;;  %v10927_v9 = vld [vmem:[#allocation141_spill] sm:$0xff] }
 0x1ae   : > { %10918 = vst [vmem:[#allocation106_spill] sm:$0xff] %v8206_v49  ;;  %v8213_v6 = vadd.f32 %v1649_v39, %v1307_v23  ;;  %v1309_v26 = vadd.f32 %v1308_v2, %v10923_v57  ;;  %v10929_v39 = vld [vmem:[#allocation142_spill] sm:$0xff] }
 0x1af   : > { %v1314_v59 = vpop.f32.mrf.mxu0  ;;  %2470 = vmatmul.mubr.f32.gmra.mxu0 %v10924_v16  ;;  %v1667_v38 = vpop.f32.mrf.mxu1  ;;  %2902 = vmatmul.mubr.f32.gmra.mxu1 %v10925_v45  ;;  %v10931_v49 = vld [vmem:[#allocation14_spill] sm:$0xff] }
 0x1b0   : > { %10922 = vst [vmem:[#allocation133_spill] sm:$0xff] %v8213_v6  ;;  %v8218_v50 = vadd.f32 %v1651_v28, %v1309_v26  ;;  %v1315_v7 = vadd.f32 %v1314_v59, %v10927_v9  ;;  %2475 = vmatprep.mubr.f32.mxu0 %v10733_v20  ;;  %2907 = vmatprep.mubr.f32.mxu1 %v10733_v20  ;;  %v10930_v6 = vld [vmem:[#allocation29_spill] sm:$0xff]  ;;  %v10933_v26 = vld [vmem:[#allocation143_spill] sm:$0xff] }
 0x1b1   : > { %v1316_v43 = vpop.f32.mrf.mxu0  ;;  %v1669_v62 = vpop.f32.mrf.mxu1 }
 0x1b2   : > { %10926 = vst [vmem:[#allocation139_spill] sm:$0xff] %v8218_v50  ;;  %v8223_v23 = vadd.f32 %v1658_v55, %v1315_v7  ;;  %v1317_v57 = vadd.f32 %v1316_v43, %v10929_v39  ;;  %v10935_v7 = vld [vmem:[#allocation144_spill] sm:$0xff]  ;;  %v10937_v50 = vld [vmem:[#allocation18_spill] sm:$0xff] }
 0x1b3   : > { %v1322_v2 = vpop.f32.mrf.mxu0  ;;  %2481 = vmatmul.mubr.f32.gmra.mxu0 %v10930_v6  ;;  %v1676_v16 = vpop.f32.mrf.mxu1  ;;  %2909 = vmatmul.mubr.f32.gmra.mxu1 %v10931_v49 }
 0x1b4   : > { %10928 = vst [vmem:[#allocation134_spill] sm:$0xff] %v8223_v23  ;;  %v8228_v28 = vadd.f32 %v1660_v41, %v1317_v57  ;;  %v1323_v59 = vadd.f32 %v1322_v2, %v10933_v26  ;;  %2486 = vmatprep.mubr.f32.mxu0 %v10733_v20  ;;  %2914 = vmatprep.mubr.f32.mxu1 %v10733_v20  ;;  %v10936_v23 = vld [vmem:[#allocation32_spill] sm:$0xff]  ;;  %v10939_v57 = vld [vmem:[#allocation145_spill] sm:$0xff] }
 0x1b5   : > { %v1324_v9 = vpop.f32.mrf.mxu0  ;;  %v1678_v45 = vpop.f32.mrf.mxu1 }
 0x1b6   : > { %10932 = vst [vmem:[#allocation140_spill] sm:$0xff] %v8228_v28  ;;  %v8233_v55 = vadd.f32 %v1667_v38, %v1323_v59  ;;  %v1325_v43 = vadd.f32 %v1324_v9, %v10935_v7  ;;  %v10941_v59 = vld [vmem:[#allocation146_spill] sm:$0xff]  ;;  %v10943_v28 = vld [vmem:[#allocation23_spill] sm:$0xff] }
 0x1b7   : > { %v1330_v39 = vpop.f32.mrf.mxu0  ;;  %2492 = vmatmul.mubr.f32.gmra.mxu0 %v10936_v23  ;;  %v1685_v6 = vpop.f32.mrf.mxu1  ;;  %2916 = vmatmul.mubr.f32.gmra.mxu1 %v10937_v50 }
 0x1b8   : > { %10934 = vst [vmem:[#allocation141_spill] sm:$0xff] %v8233_v55  ;;  %v8238_v41 = vadd.f32 %v1669_v62, %v1325_v43  ;;  %v1331_v2 = vadd.f32 %v1330_v39, %v10939_v57  ;;  %2497 = vmatprep.mubr.f32.mxu0 %v10733_v20  ;;  %2921 = vmatprep.mubr.f32.mxu1 %v10733_v20  ;;  %v10942_v55 = vld [vmem:[#allocation34_spill] sm:$0xff]  ;;  %v10945_v43 = vld [vmem:[#allocation147_spill] sm:$0xff] }
 0x1b9   : > { %v1332_v26 = vpop.f32.mrf.mxu0  ;;  %v1687_v49 = vpop.f32.mrf.mxu1 }
 0x1ba   : > { %10938 = vst [vmem:[#allocation142_spill] sm:$0xff] %v8238_v41  ;;  %v8243_v38 = vadd.f32 %v1676_v16, %v1331_v2  ;;  %v1333_v9 = vadd.f32 %v1332_v26, %v10941_v59  ;;  %v10947_v2 = vld [vmem:[#allocation148_spill] sm:$0xff] }
 0x1bb   : > { %v1338_v7 = vpop.f32.mrf.mxu0  ;;  %2503 = vmatmul.mubr.f32.gmra.mxu0 %v10942_v55  ;;  %v1694_v23 = vpop.f32.mrf.mxu1  ;;  %2923 = vmatmul.mubr.f32.gmra.mxu1 %v10943_v28  ;;  %v10949_v41 = vld [vmem:[#allocation28_spill] sm:$0xff] }
 0x1bc   : > { %10940 = vst [vmem:[#allocation143_spill] sm:$0xff] %v8243_v38  ;;  %v8248_v62 = vadd.f32 %v1678_v45, %v1333_v9  ;;  %v1339_v39 = vadd.f32 %v1338_v7, %v10945_v43  ;;  %2508 = vmatprep.mubr.f32.mxu0 %v10733_v20  ;;  %2928 = vmatprep.mubr.f32.mxu1 %v10733_v20  ;;  %v10948_v38 = vld [vmem:[#allocation38_spill] sm:$0xff]  ;;  %v10951_v9 = vld [vmem:[#allocation149_spill] sm:$0xff] }
 0x1bd   : > { %v1340_v57 = vpop.f32.mrf.mxu0  ;;  %v1696_v50 = vpop.f32.mrf.mxu1 }
 0x1be   : > { %10944 = vst [vmem:[#allocation144_spill] sm:$0xff] %v8248_v62  ;;  %v8253_v16 = vadd.f32 %v1685_v6, %v1339_v39  ;;  %v1341_v26 = vadd.f32 %v1340_v57, %v10947_v2  ;;  %v10953_v39 = vld [vmem:[#allocation150_spill] sm:$0xff]  ;;  %v10955_v62 = vld [vmem:[#allocation33_spill] sm:$0xff] }
 0x1bf   : > { %v1346_v59 = vpop.f32.mrf.mxu0  ;;  %2514 = vmatmul.mubr.f32.gmra.mxu0 %v10948_v38  ;;  %v1703_v55 = vpop.f32.mrf.mxu1  ;;  %2930 = vmatmul.mubr.f32.gmra.mxu1 %v10949_v41 }
 0x1c0   : > { %10946 = vst [vmem:[#allocation145_spill] sm:$0xff] %v8253_v16  ;;  %v8258_v45 = vadd.f32 %v1687_v49, %v1341_v26  ;;  %v1347_v7 = vadd.f32 %v1346_v59, %v10951_v9  ;;  %2519 = vmatprep.mubr.f32.mxu0 %v10733_v20  ;;  %2935 = vmatprep.mubr.f32.mxu1 %v10733_v20  ;;  %v10954_v16 = vld [vmem:[#allocation43_spill] sm:$0xff] }
 0x1c1   : > { %v1348_v43 = vpop.f32.mrf.mxu0  ;;  %v1705_v28 = vpop.f32.mrf.mxu1  ;;  %v10957_v26 = vld [vmem:[#allocation151_spill] sm:$0xff] }
 0x1c2   : > { %10950 = vst [vmem:[#allocation146_spill] sm:$0xff] %v8258_v45  ;;  %v8263_v6 = vadd.f32 %v1694_v23, %v1347_v7  ;;  %v1349_v57 = vadd.f32 %v1348_v43, %v10953_v39  ;;  %v10959_v7 = vld [vmem:[#allocation152_spill] sm:$0xff]  ;;  %v10961_v45 = vld [vmem:[#allocation37_spill] sm:$0xff] }
 0x1c3   : > { %v1354_v2 = vpop.f32.mrf.mxu0  ;;  %2525 = vmatmul.mubr.f32.gmra.mxu0 %v10954_v16  ;;  %v1712_v38 = vpop.f32.mrf.mxu1  ;;  %2937 = vmatmul.mubr.f32.gmra.mxu1 %v10955_v62 }
 0x1c4   : > { %10952 = vst [vmem:[#allocation147_spill] sm:$0xff] %v8263_v6  ;;  %v8268_v49 = vadd.f32 %v1696_v50, %v1349_v57  ;;  %v1355_v59 = vadd.f32 %v1354_v2, %v10957_v26  ;;  %2530 = vmatprep.mubr.f32.mxu0 %v10733_v20  ;;  %2942 = vmatprep.mubr.f32.mxu1 %v10733_v20  ;;  %v10960_v6 = vld [vmem:[#allocation47_spill] sm:$0xff]  ;;  %v10963_v57 = vld [vmem:[#allocation153_spill] sm:$0xff] }
 0x1c5   : > { %v1356_v9 = vpop.f32.mrf.mxu0  ;;  %v1714_v41 = vpop.f32.mrf.mxu1 }
 0x1c6   : > { %10956 = vst [vmem:[#allocation148_spill] sm:$0xff] %v8268_v49  ;;  %v8273_v23 = vadd.f32 %v1703_v55, %v1355_v59  ;;  %v1357_v43 = vadd.f32 %v1356_v9, %v10959_v7  ;;  %v10965_v59 = vld [vmem:[#allocation154_spill] sm:$0xff]  ;;  %v10967_v49 = vld [vmem:[#allocation41_spill] sm:$0xff] }
 0x1c7   : > { %v1362_v39 = vpop.f32.mrf.mxu0  ;;  %2536 = vmatmul.mubr.f32.gmra.mxu0 %v10960_v6  ;;  %v1721_v16 = vpop.f32.mrf.mxu1  ;;  %2944 = vmatmul.mubr.f32.gmra.mxu1 %v10961_v45 }
 0x1c8   : > { %10958 = vst [vmem:[#allocation149_spill] sm:$0xff] %v8273_v23  ;;  %v8278_v50 = vadd.f32 %v1705_v28, %v1357_v43  ;;  %v1363_v2 = vadd.f32 %v1362_v39, %v10963_v57  ;;  %2541 = vmatprep.mubr.f32.mxu0 %v10733_v20  ;;  %2949 = vmatprep.mubr.f32.mxu1 %v10733_v20  ;;  %v10966_v23 = vld [vmem:[#allocation52_spill] sm:$0xff]  ;;  %v10969_v43 = vld [vmem:[#allocation155_spill] sm:$0xff] }
 0x1c9   : > { %v1364_v26 = vpop.f32.mrf.mxu0  ;;  %v1723_v62 = vpop.f32.mrf.mxu1 }
 0x1ca   : > { %10962 = vst [vmem:[#allocation150_spill] sm:$0xff] %v8278_v50  ;;  %v8283_v55 = vadd.f32 %v1712_v38, %v1363_v2  ;;  %v1365_v9 = vadd.f32 %v1364_v26, %v10965_v59  ;;  %v10971_v2 = vld [vmem:[#allocation156_spill] sm:$0xff]  ;;  %v10973_v50 = vld [vmem:[#allocation42_spill] sm:$0xff] }
 0x1cb   : > { %v1370_v7 = vpop.f32.mrf.mxu0  ;;  %2547 = vmatmul.mubr.f32.gmra.mxu0 %v10966_v23  ;;  %v1730_v6 = vpop.f32.mrf.mxu1  ;;  %2951 = vmatmul.mubr.f32.gmra.mxu1 %v10967_v49 }
 0x1cc   : > { %10964 = vst [vmem:[#allocation151_spill] sm:$0xff] %v8283_v55  ;;  %v8288_v28 = vadd.f32 %v1714_v41, %v1365_v9  ;;  %v1371_v39 = vadd.f32 %v1370_v7, %v10969_v43  ;;  %2552 = vmatprep.mubr.f32.mxu0 %v10733_v20  ;;  %2956 = vmatprep.mubr.f32.mxu1 %v10733_v20  ;;  %v10972_v55 = vld [vmem:[#allocation55_spill] sm:$0xff]  ;;  %v10975_v9 = vld [vmem:[#allocation157_spill] sm:$0xff] }
 0x1cd   : > { %v1372_v57 = vpop.f32.mrf.mxu0  ;;  %v1732_v45 = vpop.f32.mrf.mxu1 }
 0x1ce   : > { %10968 = vst [vmem:[#allocation152_spill] sm:$0xff] %v8288_v28  ;;  %v8293_v38 = vadd.f32 %v1721_v16, %v1371_v39  ;;  %v1373_v26 = vadd.f32 %v1372_v57, %v10971_v2  ;;  %v10977_v39 = vld [vmem:[#allocation158_spill] sm:$0xff]  ;;  %v10979_v28 = vld [vmem:[#allocation49_spill] sm:$0xff] }
 0x1cf   : > { %v1378_v59 = vpop.f32.mrf.mxu0  ;;  %2558 = vmatmul.mubr.f32.gmra.mxu0 %v10972_v55  ;;  %v1739_v23 = vpop.f32.mrf.mxu1  ;;  %2958 = vmatmul.mubr.f32.gmra.mxu1 %v10973_v50 }
 0x1d0   : > { %10970 = vst [vmem:[#allocation153_spill] sm:$0xff] %v8293_v38  ;;  %v8298_v41 = vadd.f32 %v1723_v62, %v1373_v26  ;;  %v1379_v7 = vadd.f32 %v1378_v59, %v10975_v9  ;;  %2563 = vmatprep.mubr.f32.mxu0 %v10733_v20  ;;  %2963 = vmatprep.mubr.f32.mxu1 %v10733_v20  ;;  %v10978_v38 = vld [vmem:[#allocation59_spill] sm:$0xff] }
 0x1d1   : > { %v1380_v43 = vpop.f32.mrf.mxu0  ;;  %v1741_v49 = vpop.f32.mrf.mxu1  ;;  %v10981_v26 = vld [vmem:[#allocation159_spill] sm:$0xff] }
 0x1d2   : > { %10974 = vst [vmem:[#allocation154_spill] sm:$0xff] %v8298_v41  ;;  %v8303_v16 = vadd.f32 %v1730_v6, %v1379_v7  ;;  %v1381_v57 = vadd.f32 %v1380_v43, %v10977_v39  ;;  %v10983_v7 = vld [vmem:[#allocation160_spill] sm:$0xff]  ;;  %v10985_v41 = vld [vmem:[#allocation51_spill] sm:$0xff] }
 0x1d3   : > { %v1386_v2 = vpop.f32.mrf.mxu0  ;;  %2569 = vmatmul.mubr.f32.gmra.mxu0 %v10978_v38  ;;  %v1748_v55 = vpop.f32.mrf.mxu1  ;;  %2965 = vmatmul.mubr.f32.gmra.mxu1 %v10979_v28 }
 0x1d4   : > { %10976 = vst [vmem:[#allocation155_spill] sm:$0xff] %v8303_v16  ;;  %v8308_v62 = vadd.f32 %v1732_v45, %v1381_v57  ;;  %v1387_v59 = vadd.f32 %v1386_v2, %v10981_v26  ;;  %2574 = vmatprep.mubr.f32.mxu0 %v10733_v20  ;;  %2970 = vmatprep.mubr.f32.mxu1 %v10733_v20  ;;  %v10984_v16 = vld [vmem:[#allocation63_spill] sm:$0xff]  ;;  %v10986_v57 = vld [vmem:[#allocation161_spill] sm:$0xff] }
 0x1d5   : > { %v1388_v9 = vpop.f32.mrf.mxu0  ;;  %v1750_v50 = vpop.f32.mrf.mxu1 }
 0x1d6   : > { %10980 = vst [vmem:[#allocation156_spill] sm:$0xff] %v8308_v62  ;;  %v8313_v6 = vadd.f32 %v1739_v23, %v1387_v59  ;;  %v1389_v43 = vadd.f32 %v1388_v9, %v10983_v7  ;;  %v10988_v59 = vld [vmem:[#allocation162_spill] sm:$0xff] }
 0x1d7   : > { %v1394_v39 = vpop.f32.mrf.mxu0  ;;  %2580 = vmatmul.mubr.f32.gmra.mxu0 %v10984_v16  ;;  %v1757_v38 = vpop.f32.mrf.mxu1  ;;  %2972 = vmatmul.mubr.f32.gmra.mxu1 %v10985_v41  ;;  %v10990_v62 = vld [vmem:[#allocation54_spill] sm:$0xff] }
 0x1d8   : > { %10982 = vst [vmem:[#allocation157_spill] sm:$0xff] %v8313_v6  ;;  %v8318_v45 = vadd.f32 %v1741_v49, %v1389_v43  ;;  %v1395_v2 = vadd.f32 %v1394_v39, %v10986_v57  ;;  %2585 = vmatprep.mubr.f32.mxu0 %v10733_v20  ;;  %2977 = vmatprep.mubr.f32.mxu1 %v10733_v20  ;;  %v10989_v6 = vld [vmem:[#allocation67_spill] sm:$0xff] }
 0x1d9   : > { %v1396_v26 = vpop.f32.mrf.mxu0  ;;  %v1759_v28 = vpop.f32.mrf.mxu1  ;;  %v10991_v43 = vld [vmem:[#allocation163_spill] sm:$0xff] }
 0x1da   : > { %v8323_v23 = vadd.f32 %v1748_v55, %v1395_v2  ;;  %v1397_v9 = vadd.f32 %v1396_v26, %v10988_v59  ;;  %v10992_v26 = vld [vmem:[#allocation164_spill] sm:$0xff] }
 0x1db   : > { %v1402_v7 = vpop.f32.mrf.mxu0  ;;  %2591 = vmatmul.mubr.f32.gmra.mxu0 %v10989_v6  ;;  %v1766_v16 = vpop.f32.mrf.mxu1  ;;  %2979 = vmatmul.mubr.f32.gmra.mxu1 %v10990_v62  ;;  %v10993_v6 = vld [vmem:[#allocation70_spill] sm:$0xff] }
 0x1dc   : > { %10987 = vst [vmem:[#allocation158_spill] sm:$0xff] %v8323_v23  ;;  %v8328_v49 = vadd.f32 %v1750_v50, %v1397_v9  ;;  %v1403_v39 = vadd.f32 %v1402_v7, %v10991_v43  ;;  %2596 = vmatprep.mubr.f32.mxu0 %v10733_v20  ;;  %2984 = vmatprep.mubr.f32.mxu1 %v10733_v20  ;;  %v10994_v62 = vld [vmem:[#allocation58_spill] sm:$0xff]  ;;  %v10995_v9 = vld [vmem:[#allocation165_spill] sm:$0xff] }
 0x1dd   : > { %v1404_v57 = vpop.f32.mrf.mxu0  ;;  %v1768_v55 = vpop.f32.mrf.mxu1 }
 0x1de   : > { %v8333_v2 = vadd.f32 %v1757_v38, %v1403_v39  ;;  %v1405_v59 = vadd.f32 %v1404_v57, %v10992_v26 }
 0x1df   : > { %v1410_v41 = vpop.f32.mrf.mxu0  ;;  %2602 = vmatmul.mubr.f32.gmra.mxu0 %v10993_v6  ;;  %v1775_v23 = vpop.f32.mrf.mxu1  ;;  %2986 = vmatmul.mubr.f32.gmra.mxu1 %v10994_v62  ;;  %v10996_v6 = vld [vmem:[#allocation75_spill] sm:$0xff] }
 0x1e0   : > { %v8338_v50 = vadd.f32 %v1759_v28, %v1405_v59  ;;  %v1411_v7 = vadd.f32 %v1410_v41, %v10995_v9  ;;  %2607 = vmatprep.mubr.f32.mxu0 %v10733_v20  ;;  %2991 = vmatprep.mubr.f32.mxu1 %v10733_v20  ;;  %v10998_v41 = vld [vmem:[#allocation166_spill] sm:$0xff] }
 0x1e1   : > { %v1412_v43 = vpop.f32.mrf.mxu0  ;;  %v1777_v38 = vpop.f32.mrf.mxu1 }
 0x1e2   : > { %v8343_v39 = vadd.f32 %v1766_v16, %v1411_v7  ;;  %v1413_v57 = vadd.f32 %v1412_v43, %v8019_v32 }
 0x1e3   : > { %v1418_v26 = vpop.f32.mrf.mxu0  ;;  %2613 = vmatmul.mubr.f32.gmra.mxu0 %v10996_v6  ;;  %v2152_v62 = vpop.f32.mrf.mxu1  ;;  %2993 = vmatmul.mubr.f32.gmra.mxu1 %v10890_v22  ;;  %v10999_v6 = vld [vmem:[#allocation79_spill] sm:$0xff] }
 0x1e4   : > { %v8349_v28 = vadd.f32 %v1768_v55, %v1413_v57  ;;  %v1419_v59 = vadd.f32 %v1418_v26, %v10998_v41  ;;  %2618 = vmatprep.mubr.f32.mxu0 %v10733_v20  ;;  %2998 = vmatprep.mubr.f32.mxu1 %v10733_v20  ;;  %v11000_v57 = vld [vmem:[#allocation69_spill] sm:$0xff] }
 0x1e5   : > { %v1420_v9 = vpop.f32.mrf.mxu0  ;;  %v2154_v16 = vpop.f32.mrf.mxu1 }
 0x1e6   : > { %10997 = vst [vmem:[#allocation159_spill] sm:$0xff] %v8349_v28  ;;  %v8356_v32 = vadd.f32 %v1775_v23, %v1419_v59  ;;  %v1421_v7 = vadd.f32 %v1420_v9, %v8029_v27  ;;  %v11001_v9 = vld [vmem:[#allocation83_spill] sm:$0xff] }
 0x1e7   : > { %v1859_v43 = vpop.f32.mrf.mxu0  ;;  %2624 = vmatmul.mubr.f32.gmra.mxu0 %v10999_v6  ;;  %v2159_v22 = vpop.f32.mrf.mxu1  ;;  %3000 = vmatmul.mubr.f32.gmra.mxu1 %v10892_v1 }
 0x1e8   : > { %v8361_v55 = vadd.f32 %v1777_v38, %v1421_v7  ;;  %v1860_v26 = vadd.f32 %v1859_v43, %v11000_v57  ;;  %2629 = vmatprep.mubr.f32.mxu0 %v10733_v20  ;;  %3005 = vmatprep.mubr.f32.mxu1 %v10733_v20  ;;  %v11002_v7 = vld [vmem:[#allocation167_spill] sm:$0xff] }
 0x1e9   : > { %v1861_v41 = vpop.f32.mrf.mxu0  ;;  %v2161_v28 = vpop.f32.mrf.mxu1 }
 0x1ea   : > { %v2153_v23 = vadd.f32 %v2152_v62, %v1860_v26  ;;  %v1862_v59 = vadd.f32 %v1861_v41, %v8039_v13 }
 0x1eb   : > { %v1866_v27 = vpop.f32.mrf.mxu0  ;;  %2635 = vmatmul.mubr.f32.gmra.mxu0 %v11001_v9  ;;  %v2166_v6 = vpop.f32.mrf.mxu1  ;;  %3007 = vmatmul.mubr.f32.gmra.mxu1 %v10894_v21  ;;  %v11003_v9 = vld [vmem:[#allocation87_spill] sm:$0xff] }
 0x1ec   : > { %6394 = vst [vmem:[%s8369_s4] sm:$0xff] %v2153_v23  ;;  %v2155_v38 = vadd.f32 %v2154_v16, %v1862_v59  ;;  %v1867_v43 = vadd.f32 %v1866_v27, %v11002_v7  ;;  %2640 = vmatprep.mubr.f32.mxu0 %v10733_v20  ;;  %3012 = vmatprep.mubr.f32.mxu1 %v10733_v20  ;;  %v11004_v23 = vld [vmem:[#allocation74_spill] sm:$0xff] }
 0x1ed   : > { %v1868_v13 = vpop.f32.mrf.mxu0  ;;  %v2168_v62 = vpop.f32.mrf.mxu1 }
 0x1ee   : > { %6395 = vst [vmem:[%s8369_s4 + $0x8] sm:$0xff] %v2155_v38  ;;  %v2160_v57 = vadd.f32 %v2159_v22, %v1867_v43  ;;  %v1869_v26 = vadd.f32 %v1868_v13, %v8049_v30  ;;  %v11005_v43 = vld [vmem:[#allocation91_spill] sm:$0xff] }
 0x1ef   : > { %v1873_v41 = vpop.f32.mrf.mxu0  ;;  %2646 = vmatmul.mubr.f32.gmra.mxu0 %v11003_v9  ;;  %v2173_v21 = vpop.f32.mrf.mxu1  ;;  %3014 = vmatmul.mubr.f32.gmra.mxu1 %v10896_v58  ;;  %v11125_v9 = vld [vmem:[#allocation127_spill] sm:$0xff] }
 0x1f0   : > { %6400 = vst [vmem:[%s8369_s4 + $0x30] sm:$0xff] %v2160_v57  ;;  %v2162_v16 = vadd.f32 %v2161_v28, %v1869_v26  ;;  %v1874_v59 = vadd.f32 %v1873_v41, %v11004_v23  ;;  %2651 = vmatprep.mubr.f32.mxu0 %v10733_v20  ;;  %3019 = vmatprep.mubr.f32.mxu1 %v10733_v20  ;;  %v11006_v57 = vld [vmem:[#allocation81_spill] sm:$0xff] }
 0x1f1   : > { %v1875_v27 = vpop.f32.mrf.mxu0  ;;  %v2175_v22 = vpop.f32.mrf.mxu1 }
 0x1f2   : > { %6401 = vst [vmem:[%s8369_s4 + $0x38] sm:$0xff] %v2162_v16  ;;  %v2167_v30 = vadd.f32 %v2166_v6, %v1874_v59  ;;  %v1876_v38 = vadd.f32 %v1875_v27, %v8059_v53  ;;  %v11007_v59 = vld [vmem:[#allocation95_spill] sm:$0xff] }
 0x1f3   : > { %v1880_v7 = vpop.f32.mrf.mxu0  ;;  %2657 = vmatmul.mubr.f32.gmra.mxu0 %v11005_v43  ;;  %v2180_v13 = vpop.f32.mrf.mxu1  ;;  %3021 = vmatmul.mubr.f32.gmra.mxu1 %v10898_v34 }
 0x1f4   : > { %6406 = vst [vmem:[%s8369_s4 + $0x60] sm:$0xff] %v2167_v30  ;;  %v2169_v28 = vadd.f32 %v2168_v62, %v1876_v38  ;;  %v1881_v26 = vadd.f32 %v1880_v7, %v11006_v57  ;;  %2662 = vmatprep.mubr.f32.mxu0 %v10733_v20  ;;  %3026 = vmatprep.mubr.f32.mxu1 %v10733_v20  ;;  %v11008_v30 = vld [vmem:[#allocation82_spill] sm:$0xff] }
 0x1f5   : > { %v1882_v41 = vpop.f32.mrf.mxu0  ;;  %v2182_v6 = vpop.f32.mrf.mxu1 }
 0x1f6   : > { %6407 = vst [vmem:[%s8369_s4 + $0x68] sm:$0xff] %v2169_v28  ;;  %v2174_v53 = vadd.f32 %v2173_v21, %v1881_v26  ;;  %v1883_v16 = vadd.f32 %v1882_v41, %v8069_v24  ;;  %v11009_v26 = vld [vmem:[#allocation99_spill] sm:$0xff] }
 0x1f7   : > { %v1887_v23 = vpop.f32.mrf.mxu0  ;;  %2668 = vmatmul.mubr.f32.gmra.mxu0 %v11007_v59  ;;  %v2187_v27 = vpop.f32.mrf.mxu1  ;;  %3028 = vmatmul.mubr.f32.gmra.mxu1 %v10900_v0  ;;  %v11122_v59 = vld [vmem:[#allocation124_spill] sm:$0xff] }
 0x1f8   : > { %6412 = vst [vmem:[%s8369_s4 + $0x90] sm:$0xff] %v2174_v53  ;;  %v2176_v62 = vadd.f32 %v2175_v22, %v1883_v16  ;;  %v1888_v38 = vadd.f32 %v1887_v23, %v11008_v30  ;;  %2673 = vmatprep.mubr.f32.mxu0 %v10733_v20  ;;  %3033 = vmatprep.mubr.f32.mxu1 %v10733_v20  ;;  %v11010_v53 = vld [vmem:[#allocation89_spill] sm:$0xff] }
 0x1f9   : > { %v1889_v7 = vpop.f32.mrf.mxu0  ;;  %v2189_v21 = vpop.f32.mrf.mxu1 }
 0x1fa   : > { %6413 = vst [vmem:[%s8369_s4 + $0x98] sm:$0xff] %v2176_v62  ;;  %v2181_v24 = vadd.f32 %v2180_v13, %v1888_v38  ;;  %v1890_v28 = vadd.f32 %v1889_v7, %v8079_v36  ;;  %v11011_v38 = vld [vmem:[#allocation102_spill] sm:$0xff] }
 0x1fb   : > { %v1894_v57 = vpop.f32.mrf.mxu0  ;;  %2679 = vmatmul.mubr.f32.gmra.mxu0 %v11009_v26  ;;  %v2194_v41 = vpop.f32.mrf.mxu1  ;;  %3035 = vmatmul.mubr.f32.gmra.mxu1 %v10902_v42 }
 0x1fc   : > { %6418 = vst [vmem:[%s8369_s4 + $0xc0] sm:$0xff] %v2181_v24  ;;  %v2183_v22 = vadd.f32 %v2182_v6, %v1890_v28  ;;  %v1895_v16 = vadd.f32 %v1894_v57, %v11010_v53  ;;  %2684 = vmatprep.mubr.f32.mxu0 %v10733_v20  ;;  %3040 = vmatprep.mubr.f32.mxu1 %v10733_v20  ;;  %v11012_v24 = vld [vmem:[#allocation90_spill] sm:$0xff] }
 0x1fd   : > { %v1896_v23 = vpop.f32.mrf.mxu0  ;;  %v2196_v13 = vpop.f32.mrf.mxu1 }
 0x1fe   : > { %6419 = vst [vmem:[%s8369_s4 + $0xc8] sm:$0xff] %v2183_v22  ;;  %v2188_v36 = vadd.f32 %v2187_v27, %v1895_v16  ;;  %v1897_v62 = vadd.f32 %v1896_v23, %v8089_v18  ;;  %v11013_v16 = vld [vmem:[#allocation107_spill] sm:$0xff] }
 0x1ff   : > { %v1901_v30 = vpop.f32.mrf.mxu0  ;;  %2690 = vmatmul.mubr.f32.gmra.mxu0 %v11011_v38  ;;  %v2201_v7 = vpop.f32.mrf.mxu1  ;;  %3042 = vmatmul.mubr.f32.gmra.mxu1 %v10904_v52 }
 0x200   : > { %6424 = vst [vmem:[%s8369_s4 + $0xf0] sm:$0xff] %v2188_v36  ;;  %v2190_v6 = vadd.f32 %v2189_v21, %v1897_v62  ;;  %v1902_v28 = vadd.f32 %v1901_v30, %v11012_v24  ;;  %2695 = vmatprep.mubr.f32.mxu0 %v10733_v20  ;;  %3047 = vmatprep.mubr.f32.mxu1 %v10733_v20  ;;  %v11014_v36 = vld [vmem:[#allocation97_spill] sm:$0xff] }
 0x201   : > { %v1903_v57 = vpop.f32.mrf.mxu0  ;;  %v2203_v27 = vpop.f32.mrf.mxu1 }
 0x202   : > { %6425 = vst [vmem:[%s8369_s4 + $0xf8] sm:$0xff] %v2190_v6  ;;  %v2195_v18 = vadd.f32 %v2194_v41, %v1902_v28  ;;  %v1904_v22 = vadd.f32 %v1903_v57, %v8099_v5  ;;  %v11015_v28 = vld [vmem:[#allocation111_spill] sm:$0xff] }
 0x203   : > { %v1908_v53 = vpop.f32.mrf.mxu0  ;;  %2701 = vmatmul.mubr.f32.gmra.mxu0 %v11013_v16  ;;  %v2208_v23 = vpop.f32.mrf.mxu1  ;;  %3049 = vmatmul.mubr.f32.gmra.mxu1 %v10906_v46 }
 0x204   : > { %6430 = vst [vmem:[%s8369_s4 + $0x120] sm:$0xff] %v2195_v18  ;;  %v2197_v21 = vadd.f32 %v2196_v13, %v1904_v22  ;;  %v1909_v62 = vadd.f32 %v1908_v53, %v11014_v36  ;;  %2706 = vmatprep.mubr.f32.mxu0 %v10733_v20  ;;  %3054 = vmatprep.mubr.f32.mxu1 %v10733_v20  ;;  %v11016_v18 = vld [vmem:[#allocation101_spill] sm:$0xff] }
 0x205   : > { %v1910_v30 = vpop.f32.mrf.mxu0  ;;  %v2210_v41 = vpop.f32.mrf.mxu1 }
 0x206   : > { %6431 = vst [vmem:[%s8369_s4 + $0x128] sm:$0xff] %v2197_v21  ;;  %v2202_v5 = vadd.f32 %v2201_v7, %v1909_v62  ;;  %v1911_v6 = vadd.f32 %v1910_v30, %v8109_v15  ;;  %v11017_v62 = vld [vmem:[#allocation115_spill] sm:$0xff] }
 0x207   : > { %v1915_v24 = vpop.f32.mrf.mxu0  ;;  %2712 = vmatmul.mubr.f32.gmra.mxu0 %v11015_v28  ;;  %v2215_v57 = vpop.f32.mrf.mxu1  ;;  %3056 = vmatmul.mubr.f32.gmra.mxu1 %v10908_v8 }
 0x208   : > { %6436 = vst [vmem:[%s8369_s4 + $0x150] sm:$0xff] %v2202_v5  ;;  %v2204_v13 = vadd.f32 %v2203_v27, %v1911_v6  ;;  %v1916_v22 = vadd.f32 %v1915_v24, %v11016_v18  ;;  %2717 = vmatprep.mubr.f32.mxu0 %v10733_v20  ;;  %3061 = vmatprep.mubr.f32.mxu1 %v10733_v20  ;;  %v11018_v5 = vld [vmem:[#allocation105_spill] sm:$0xff] }
 0x209   : > { %v1917_v53 = vpop.f32.mrf.mxu0  ;;  %v2217_v7 = vpop.f32.mrf.mxu1 }
 0x20a   : > { %6437 = vst [vmem:[%s8369_s4 + $0x158] sm:$0xff] %v2204_v13  ;;  %v2209_v15 = vadd.f32 %v2208_v23, %v1916_v22  ;;  %v1918_v21 = vadd.f32 %v1917_v53, %v8119_v17  ;;  %v11019_v22 = vld [vmem:[#allocation119_spill] sm:$0xff] }
 0x20b   : > { %v1922_v36 = vpop.f32.mrf.mxu0  ;;  %2723 = vmatmul.mubr.f32.gmra.mxu0 %v11017_v62  ;;  %v2222_v30 = vpop.f32.mrf.mxu1  ;;  %3063 = vmatmul.mubr.f32.gmra.mxu1 %v10910_v37  ;;  %v11117_v62 = vld [vmem:[#allocation120_spill] sm:$0xff] }
 0x20c   : > { %6442 = vst [vmem:[%s8369_s4 + $0x180] sm:$0xff] %v2209_v15  ;;  %v2211_v27 = vadd.f32 %v2210_v41, %v1918_v21  ;;  %v1923_v6 = vadd.f32 %v1922_v36, %v11018_v5  ;;  %2728 = vmatprep.mubr.f32.mxu0 %v10733_v20  ;;  %3068 = vmatprep.mubr.f32.mxu1 %v10733_v20  ;;  %v11020_v5 = vld [vmem:[#allocation123_spill] sm:$0xff] }
 0x20d   : > { %v1924_v24 = vpop.f32.mrf.mxu0  ;;  %v2224_v23 = vpop.f32.mrf.mxu1 }
 0x20e   : > { %6443 = vst [vmem:[%s8369_s4 + $0x188] sm:$0xff] %v2211_v27  ;;  %v2216_v17 = vadd.f32 %v2215_v57, %v1923_v6  ;;  %v1925_v13 = vadd.f32 %v1924_v24, %v8129_v31 }
 0x20f   : > { %v1929_v18 = vpop.f32.mrf.mxu0  ;;  %2734 = vmatmul.mubr.f32.gmra.mxu0 %v11019_v22  ;;  %v2229_v53 = vpop.f32.mrf.mxu1  ;;  %3070 = vmatmul.mubr.f32.gmra.mxu1 %v10912_v54 }
 0x210   : > { %6448 = vst [vmem:[%s8369_s4 + $0x1b0] sm:$0xff] %v2216_v17  ;;  %v2218_v41 = vadd.f32 %v2217_v7, %v1925_v13  ;;  %v1930_v15 = vadd.f32 %v1929_v18, %v8134_v25  ;;  %2739 = vmatprep.mubr.f32.mxu0 %v10733_v20  ;;  %3075 = vmatprep.mubr.f32.mxu1 %v10733_v20  ;;  %v11021_v18 = vld [vmem:[#allocation126_spill] sm:$0xff] }
 0x211   : > { %v1931_v21 = vpop.f32.mrf.mxu0  ;;  %v2231_v57 = vpop.f32.mrf.mxu1 }
 0x212   : > { %6449 = vst [vmem:[%s8369_s4 + $0x1b8] sm:$0xff] %v2218_v41  ;;  %v2223_v31 = vadd.f32 %v2222_v30, %v1930_v15  ;;  %v1932_v36 = vadd.f32 %v1931_v21, %v8139_v29 }
 0x213   : > { %v1936_v27 = vpop.f32.mrf.mxu0  ;;  %2745 = vmatmul.mubr.f32.gmra.mxu0 %v11020_v5  ;;  %v2236_v6 = vpop.f32.mrf.mxu1  ;;  %3077 = vmatmul.mubr.f32.gmra.mxu1 %v10913_v14 }
 0x214   : > { %6454 = vst [vmem:[%s8369_s4 + $0x1e0] sm:$0xff] %v2223_v31  ;;  %v2225_v25 = vadd.f32 %v2224_v23, %v1932_v36  ;;  %v1937_v7 = vadd.f32 %v1936_v27, %v8144_v35  ;;  %2750 = vmatprep.mubr.f32.mxu0 %v10733_v20  ;;  %3082 = vmatprep.mubr.f32.mxu1 %v10733_v20  ;;  %v11022_v36 = vld [vmem:[#allocation129_spill] sm:$0xff] }
 0x215   : > { %v1938_v24 = vpop.f32.mrf.mxu0  ;;  %v2238_v30 = vpop.f32.mrf.mxu1 }
 0x216   : > { %6455 = vst [vmem:[%s8369_s4 + $0x1e8] sm:$0xff] %v2225_v25  ;;  %v2230_v29 = vadd.f32 %v2229_v53, %v1937_v7  ;;  %v1939_v17 = vadd.f32 %v1938_v24, %v8149_v3 }
 0x217   : > { %v1943_v13 = vpop.f32.mrf.mxu0  ;;  %2756 = vmatmul.mubr.f32.gmra.mxu0 %v11021_v18  ;;  %v2243_v41 = vpop.f32.mrf.mxu1  ;;  %3084 = vmatmul.mubr.f32.gmra.mxu1 %v7485_v56  ;;  %v11131_v56 = vld [vmem:[#allocation130_spill] sm:$0xff] }
 0x218   : > { %6460 = vst [vmem:[%s8369_s4 + $0x210] sm:$0xff] %v2230_v29  ;;  %v2232_v35 = vadd.f32 %v2231_v57, %v1939_v17  ;;  %v1944_v23 = vadd.f32 %v1943_v13, %v8154_v47  ;;  %2761 = vmatprep.mubr.f32.mxu0 %v10733_v20  ;;  %3089 = vmatprep.mubr.f32.mxu1 %v10733_v20  ;;  %v11023_v29 = vld [vmem:[#allocation131_spill] sm:$0xff] }
 0x219   : > { %v1945_v15 = vpop.f32.mrf.mxu0  ;;  %v2245_v53 = vpop.f32.mrf.mxu1 }
 0x21a   : > { %6461 = vst [vmem:[%s8369_s4 + $0x218] sm:$0xff] %v2232_v35  ;;  %v2237_v3 = vadd.f32 %v2236_v6, %v1944_v23  ;;  %v1946_v21 = vadd.f32 %v1945_v15, %v8159_v44  ;;  %v11024_v15 = vld [vmem:[#allocation132_spill] sm:$0xff] }
 0x21b   : > { %v1950_v31 = vpop.f32.mrf.mxu0  ;;  %2767 = vmatmul.mubr.f32.gmra.mxu0 %v11022_v36  ;;  %v2250_v27 = vpop.f32.mrf.mxu1  ;;  %3091 = vmatmul.mubr.f32.gmra.mxu1 %v7490_v63  ;;  %v208_v36 = vld [vmem:[%s10368_s1 + $0x20] sm:$0xff] }
 0x21c   : > { %6466 = vst [vmem:[%s8369_s4 + $0x240] sm:$0xff] %v2237_v3  ;;  %v2239_v47 = vadd.f32 %v2238_v30, %v1946_v21  ;;  %v1951_v57 = vadd.f32 %v1950_v31, %v8164_v4  ;;  %2772 = vmatprep.mubr.f32.mxu0 %v10733_v20  ;;  %3096 = vmatprep.mubr.f32.mxu1 %v10733_v20  ;;  %v11025_v21 = vld [vmem:[#allocation12_spill] sm:$0xff]  ;;  %v8773_v22 = vand.u32 4294901760, %v208_v36 }
 0x21d   : > { %v1952_v25 = vpop.f32.mrf.mxu0  ;;  %v2252_v6 = vpop.f32.mrf.mxu1 }
 0x21e   : > { %6467 = vst [vmem:[%s8369_s4 + $0x248] sm:$0xff] %v2239_v47  ;;  %v2244_v44 = vadd.f32 %v2243_v41, %v1951_v57  ;;  %v1953_v7 = vadd.f32 %v1952_v25, %v8169_v10  ;;  %v11026_v25 = vld [vmem:[#allocation8_spill] sm:$0xff]  ;;  %11115 = vst [vmem:[#allocation164_spill] sm:$0xff] %v8773_v22 }
 0x21f   : > { %v1957_v24 = vpop.f32.mrf.mxu0  ;;  %2778 = vmatmul.mubr.f32.gmra.mxu0 %v11023_v29  ;;  %v2257_v17 = vpop.f32.mrf.mxu1  ;;  %3098 = vmatmul.mubr.f32.gmra.mxu1 %v7508_v12 }
 0x220   : > { %6472 = vst [vmem:[%s8369_s4 + $0x270] sm:$0xff] %v2244_v44  ;;  %v2246_v4 = vadd.f32 %v2245_v53, %v1953_v7  ;;  %v1958_v30 = vadd.f32 %v1957_v24, %v8174_v19  ;;  %2783 = vmatprep.mubr.f32.mxu0 %v10733_v20  ;;  %3501 = vmatprep.mubr.f32.mxu1 %v10733_v20  ;;  %v11028_v7 = vld [vmem:[#allocation136_spill] sm:$0xff] }
 0x221   : > { %v1959_v13 = vpop.f32.mrf.mxu0  ;;  %v2259_v35 = vpop.f32.mrf.mxu1  ;;  %v11029_v24 = vand.u32 4294901760, %v11028_v7 }
 0x222   : > { %6473 = vst [vmem:[%s8369_s4 + $0x278] sm:$0xff] %v2246_v4  ;;  %v2251_v10 = vadd.f32 %v2250_v27, %v1958_v30  ;;  %v1960_v41 = vadd.f32 %v1959_v13, %v8179_v61  ;;  %v11032_v13 = vld [vmem:[#allocation106_spill] sm:$0xff] }
 0x223   : > { %v1964_v23 = vpop.f32.mrf.mxu0  ;;  %2789 = vmatmul.mubr.f32.gmra.mxu0 %v11024_v15  ;;  %v2264_v3 = vpop.f32.mrf.mxu1  ;;  %3505 = vmatmul.mubr.f32.vlgmr.msra.gmra.mxu1 %v11025_v21 }
 0x224   : > { %6478 = vst [vmem:[%s8369_s4 + $0x2a0] sm:$0xff] %v2251_v10  ;;  %v2253_v53 = vadd.f32 %v2252_v6, %v1960_v41  ;;  %v1965_v19 = vadd.f32 %v1964_v23, %v8186_v33  ;;  %3176 = vmatprep.mubr.f32.mxu0 %v10733_v20  ;;  %4122 = vmatpush1.msra.mxu1 %v7782_v48  ;;  %v11027_v6 = vld [vmem:[#allocation13_spill] sm:$0xff]  ;;  %v11033_v10 = vld [vmem:[#allocation138_spill] sm:$0xff] }
 0x225   : > { %v1966_v31 = vpop.f32.mrf.mxu0  ;;  %v2266_v47 = vpop.f32.mrf.mxu1  ;;  %3510 = vmatprep.mubr.f32.mxu1 %v10733_v20  ;;  %4124 = vmatprep.subr.mxu1 %v7784_v51  ;;  %v11034_v41 = vand.u32 4294901760, %v11033_v10 }
 0x226   : > { %6479 = vst [vmem:[%s8369_s4 + $0x2a8] sm:$0xff] %v2253_v53  ;;  %v2258_v61 = vadd.f32 %v2257_v17, %v1965_v19  ;;  %v1967_v27 = vadd.f32 %v1966_v31, %v8192_v11  ;;  %4126 = vmatpush1.msra.mxu1 %v7789_v60  ;;  %v215_v60 = vld [vmem:[%s10368_s1 + $0x58] sm:$0xf]  ;;  %v11030_v17 = vld [vmem:[#allocation137_spill] sm:$0xff]  ;;  %v11036_v19 = vld [vmem:[#allocation10_spill] sm:$0xff] }
 0x227   : > { %v1971_v57 = vpop.f32.mrf.mxu0  ;;  %3179 = vmatmul.mubr.f32.vlgmr.msra.gmra.mxu0 %v11026_v25  ;;  %v2271_v33 = vpop.f32.mrf.mxu1  ;;  %3514 = vmatmul.mubr.f32.gmra.mxu1 %v11027_v6  ;;  %v11031_v4 = vand.u32 4294901760, %v11030_v17  ;;  %v362_v30 = vsel %vm345_vm0, %v215_v60, 0  ;;  %v11040_v60 = vld [vmem:[#allocation139_spill] sm:$0xff]  ;;  %v11107_v6 = vld [vmem:[#allocation100_spill] sm:$0xff] }
 0x228   : > { %6484 = vst [vmem:[%s8369_s4 + $0x2d0] sm:$0xff] %v2258_v61  ;;  %v2260_v48 = vadd.f32 %v2259_v35, %v1967_v27  ;;  %v1972_v44 = vadd.f32 %v1971_v57, %v8199_v40  ;;  %3825 = vmatpush1.msra.mxu0 %v11029_v24  ;;  %3184 = vmatprep.mubr.f32.mxu0 %v10733_v20  ;;  %v8510_v23 = vand.u32 4294901760, %v362_v30  ;;  %v11037_v61 = vld [vmem:[#allocation15_spill] sm:$0xff]  ;;  %v11038_v57 = vld [vmem:[#allocation133_spill] sm:$0xff]  ;;  %v11108_v25 = vld [vmem:[#allocation108_spill] sm:$0xff] }
 0x229   : > { %v1973_v51 = vpop.f32.mrf.mxu0  ;;  %v2273_v11 = vpop.f32.mrf.mxu1  ;;  %3519 = vmatprep.mubr.f32.mxu1 %v10733_v20  ;;  %3829 = vmatprep.subr.mxu0 %v11031_v4  ;;  %v11041_v4 = vld [vmem:[#allocation11_spill] sm:$0xff] }
 0x22a   : > { %6485 = vst [vmem:[%s8369_s4 + $0x2d8] sm:$0xff] %v2260_v48  ;;  %v2265_v40 = vadd.f32 %v2264_v3, %v1972_v44  ;;  %v1974_v35 = vadd.f32 %v1973_v51, %v11032_v13  ;;  %3833 = vmatpush1.msra.mxu0 %v11034_v41  ;;  %11035 = vst [vmem:[#allocation160_spill] sm:$0xff] %v8510_v23  ;;  %v8519_v3 = vsub.f32 %v362_v30, %v8510_v23  ;;  %v11042_v13 = vld [vmem:[#allocation20_spill] sm:$0xff] }
 0x22b   : > { %v1978_v53 = vpop.f32.mrf.mxu0  ;;  %3187 = vmatmul.mubr.f32.gmra.mxu0 %v11036_v19  ;;  %v2278_v31 = vpop.f32.mrf.mxu1  ;;  %3523 = vmatmul.mubr.f32.gmra.mxu1 %v11037_v61  ;;  %v11105_v61 = vld [vmem:[#allocation94_spill] sm:$0xff]  ;;  %v11106_v19 = vld [vmem:[#allocation103_spill] sm:$0xff] }
 0x22c   : > { %6490 = vst [vmem:[%s8369_s4 + $0x300] sm:$0xff] %v2265_v40  ;;  %v2267_v27 = vadd.f32 %v2266_v47, %v1974_v35  ;;  %v1979_v48 = vadd.f32 %v1978_v53, %v11038_v57  ;;  %3192 = vmatprep.mubr.f32.mxu0 %v10733_v20  ;;  %3528 = vmatprep.mubr.f32.mxu1 %v10733_v20  ;;  %11039 = vst [vmem:[#allocation161_spill] sm:$0xff] %v8519_v3  ;;  %v10653_v47 = vand.u32 4294901760, %v8519_v3  ;;  %v11043_v35 = vld [vmem:[#allocation134_spill] sm:$0xff]  ;;  %v11044_v57 = vld [vmem:[#allocation140_spill] sm:$0xff] }
 0x22d   : > { %v1980_v44 = vpop.f32.mrf.mxu0  ;;  %v2280_v7 = vpop.f32.mrf.mxu1  ;;  %4413 = vmatprep.subr.mxu0 %v8510_v23 }
 0x22e   : > { %6491 = vst [vmem:[%s8369_s4 + $0x308] sm:$0xff] %v2267_v27  ;;  %v2272_v24 = vadd.f32 %v2271_v33, %v1979_v48  ;;  %v1981_v51 = vadd.f32 %v1980_v44, %v11040_v60  ;;  %v4836_v33 = vsub.f32 %v8519_v3, %v10653_v47  ;;  %v11049_v47 = vld [vmem:[#allocation21_spill] sm:$0xff] }
 0x22f   : > { %v1985_v17 = vpop.f32.mrf.mxu0  ;;  %3195 = vmatmul.mubr.f32.gmra.mxu0 %v11041_v4  ;;  %v2285_v40 = vpop.f32.mrf.mxu1  ;;  %3532 = vmatmul.mubr.f32.gmra.mxu1 %v11042_v13  ;;  %v11104_v4 = vld [vmem:[#allocation98_spill] sm:$0xff] }
 0x230   : > { %6496 = vst [vmem:[%s8369_s4 + $0x330] sm:$0xff] %v2272_v24  ;;  %v2274_v30 = vadd.f32 %v2273_v11, %v1981_v51  ;;  %v1986_v10 = vadd.f32 %v1985_v17, %v11043_v35  ;;  %3200 = vmatprep.mubr.f32.mxu0 %v10733_v20  ;;  %3537 = vmatprep.mubr.f32.mxu1 %v10733_v20  ;;  %v4837_v44 = vand.u32 4294901760, %v4836_v33  ;;  %v11045_v11 = vld [vmem:[#allocation16_spill] sm:$0xff]  ;;  %v11046_v51 = vld [vmem:[#allocation25_spill] sm:$0xff]  ;;  %v11048_v33 = vld [vmem:[#allocation142_spill] sm:$0xff] }
 0x231   : > { %v1987_v41 = vpop.f32.mrf.mxu0  ;;  %v2287_v53 = vpop.f32.mrf.mxu1  ;;  %v11047_v35 = vld [vmem:[#allocation141_spill] sm:$0xff] }
 0x232   : > { %6497 = vst [vmem:[%s8369_s4 + $0x338] sm:$0xff] %v2274_v30  ;;  %v2279_v27 = vadd.f32 %v2278_v31, %v1986_v10  ;;  %v1988_v48 = vadd.f32 %v1987_v41, %v11044_v57  ;;  %4838 = vmatprep.subr.mxu1 %v4837_v44 }
 0x233   : > { %v1992_v24 = vpop.f32.mrf.mxu0  ;;  %3203 = vmatmul.mubr.f32.gmra.mxu0 %v11045_v11  ;;  %v2292_v60 = vpop.f32.mrf.mxu1  ;;  %3541 = vmatmul.mubr.f32.gmra.mxu1 %v11046_v51  ;;  %v11103_v11 = vld [vmem:[#allocation93_spill] sm:$0xff] }
 0x234   : > { %6502 = vst [vmem:[%s8369_s4 + $0x360] sm:$0xff] %v2279_v27  ;;  %v2281_v17 = vadd.f32 %v2280_v7, %v1988_v48  ;;  %v1993_v13 = vadd.f32 %v1992_v24, %v11047_v35  ;;  %3208 = vmatprep.mubr.f32.mxu0 %v10733_v20  ;;  %3546 = vmatprep.mubr.f32.mxu1 %v10733_v20  ;;  %v11050_v27 = vld [vmem:[#allocation26_spill] sm:$0xff]  ;;  %v11051_v48 = vld [vmem:[#allocation143_spill] sm:$0xff] }
 0x235   : > { %v1994_v30 = vpop.f32.mrf.mxu0  ;;  %v2294_v31 = vpop.f32.mrf.mxu1 }
 0x236   : > { %6503 = vst [vmem:[%s8369_s4 + $0x368] sm:$0xff] %v2281_v17  ;;  %v2286_v10 = vadd.f32 %v2285_v40, %v1993_v13  ;;  %v1995_v41 = vadd.f32 %v1994_v30, %v11048_v33  ;;  %v11052_v17 = vld [vmem:[#allocation144_spill] sm:$0xff]  ;;  %v11053_v33 = vld [vmem:[#allocation22_spill] sm:$0xff] }
 0x237   : > { %v1999_v57 = vpop.f32.mrf.mxu0  ;;  %3211 = vmatmul.mubr.f32.gmra.mxu0 %v11049_v47  ;;  %v2299_v51 = vpop.f32.mrf.mxu1  ;;  %3550 = vmatmul.mubr.f32.gmra.mxu1 %v11050_v27  ;;  %v11054_v27 = vld [vmem:[#allocation30_spill] sm:$0xff] }
 0x238   : > { %6508 = vst [vmem:[%s8369_s4 + $0x390] sm:$0xff] %v2286_v10  ;;  %v2288_v7 = vadd.f32 %v2287_v53, %v1995_v41  ;;  %v2000_v24 = vadd.f32 %v1999_v57, %v11051_v48  ;;  %3216 = vmatprep.mubr.f32.mxu0 %v10733_v20  ;;  %3555 = vmatprep.mubr.f32.mxu1 %v10733_v20  ;;  %v11055_v10 = vld [vmem:[#allocation145_spill] sm:$0xff]  ;;  %v11056_v48 = vld [vmem:[#allocation146_spill] sm:$0xff] }
 0x239   : > { %v2001_v44 = vpop.f32.mrf.mxu0  ;;  %v2301_v40 = vpop.f32.mrf.mxu1 }
 0x23a   : > { %6509 = vst [vmem:[%s8369_s4 + $0x398] sm:$0xff] %v2288_v7  ;;  %v2293_v13 = vadd.f32 %v2292_v60, %v2000_v24  ;;  %v2002_v35 = vadd.f32 %v2001_v44, %v11052_v17  ;;  %v11057_v17 = vld [vmem:[#allocation27_spill] sm:$0xff] }
 0x23b   : > { %v2006_v30 = vpop.f32.mrf.mxu0  ;;  %3219 = vmatmul.mubr.f32.gmra.mxu0 %v11053_v33  ;;  %v2306_v47 = vpop.f32.mrf.mxu1  ;;  %3559 = vmatmul.mubr.f32.gmra.mxu1 %v11054_v27  ;;  %v11058_v27 = vld [vmem:[#allocation35_spill] sm:$0xff] }
 0x23c   : > { %6514 = vst [vmem:[%s8369_s4 + $0x3c0] sm:$0xff] %v2293_v13  ;;  %v2295_v53 = vadd.f32 %v2294_v31, %v2002_v35  ;;  %v2007_v41 = vadd.f32 %v2006_v30, %v11055_v10  ;;  %3224 = vmatprep.mubr.f32.mxu0 %v10733_v20  ;;  %3564 = vmatprep.mubr.f32.mxu1 %v10733_v20  ;;  %v11059_v13 = vld [vmem:[#allocation147_spill] sm:$0xff]  ;;  %v11060_v10 = vld [vmem:[#allocation148_spill] sm:$0xff] }
 0x23d   : > { %v2008_v57 = vpop.f32.mrf.mxu0  ;;  %v2308_v60 = vpop.f32.mrf.mxu1 }
 0x23e   : > { %6515 = vst [vmem:[%s8369_s4 + $0x3c8] sm:$0xff] %v2295_v53  ;;  %v2300_v7 = vadd.f32 %v2299_v51, %v2007_v41  ;;  %v2009_v24 = vadd.f32 %v2008_v57, %v11056_v48  ;;  %v11061_v48 = vld [vmem:[#allocation31_spill] sm:$0xff] }
 0x23f   : > { %v2013_v44 = vpop.f32.mrf.mxu0  ;;  %3227 = vmatmul.mubr.f32.gmra.mxu0 %v11057_v17  ;;  %v2313_v33 = vpop.f32.mrf.mxu1  ;;  %3568 = vmatmul.mubr.f32.gmra.mxu1 %v11058_v27  ;;  %v11062_v27 = vld [vmem:[#allocation39_spill] sm:$0xff] }
 0x240   : > { %6520 = vst [vmem:[%s8369_s4 + $0x3f0] sm:$0xff] %v2300_v7  ;;  %v2302_v31 = vadd.f32 %v2301_v40, %v2009_v24  ;;  %v2014_v35 = vadd.f32 %v2013_v44, %v11059_v13  ;;  %3232 = vmatprep.mubr.f32.mxu0 %v10733_v20  ;;  %3573 = vmatprep.mubr.f32.mxu1 %v10733_v20  ;;  %v11063_v7 = vld [vmem:[#allocation149_spill] sm:$0xff]  ;;  %v11064_v13 = vld [vmem:[#allocation150_spill] sm:$0xff] }
 0x241   : > { %v2015_v30 = vpop.f32.mrf.mxu0  ;;  %v2315_v51 = vpop.f32.mrf.mxu1 }
 0x242   : > { %6521 = vst [vmem:[%s8369_s4 + $0x3f8] sm:$0xff] %v2302_v31  ;;  %v2307_v53 = vadd.f32 %v2306_v47, %v2014_v35  ;;  %v2016_v41 = vadd.f32 %v2015_v30, %v11060_v10  ;;  %v11065_v10 = vld [vmem:[#allocation36_spill] sm:$0xff] }
 0x243   : > { %v2020_v57 = vpop.f32.mrf.mxu0  ;;  %3235 = vmatmul.mubr.f32.gmra.mxu0 %v11061_v48  ;;  %v2320_v17 = vpop.f32.mrf.mxu1  ;;  %3577 = vmatmul.mubr.f32.gmra.mxu1 %v11062_v27  ;;  %v11066_v27 = vld [vmem:[#allocation44_spill] sm:$0xff] }
 0x244   : > { %6526 = vst [vmem:[%s8369_s4 + $0x420] sm:$0xff] %v2307_v53  ;;  %v2309_v40 = vadd.f32 %v2308_v60, %v2016_v41  ;;  %v2021_v24 = vadd.f32 %v2020_v57, %v11063_v7  ;;  %3240 = vmatprep.mubr.f32.mxu0 %v10733_v20  ;;  %3582 = vmatprep.mubr.f32.mxu1 %v10733_v20  ;;  %v11067_v53 = vld [vmem:[#allocation151_spill] sm:$0xff]  ;;  %v11068_v7 = vld [vmem:[#allocation152_spill] sm:$0xff] }
 0x245   : > { %v2022_v44 = vpop.f32.mrf.mxu0  ;;  %v2322_v47 = vpop.f32.mrf.mxu1 }
 0x246   : > { %6527 = vst [vmem:[%s8369_s4 + $0x428] sm:$0xff] %v2309_v40  ;;  %v2314_v31 = vadd.f32 %v2313_v33, %v2021_v24  ;;  %v2023_v35 = vadd.f32 %v2022_v44, %v11064_v13  ;;  %v11069_v13 = vld [vmem:[#allocation40_spill] sm:$0xff] }
 0x247   : > { %v2027_v30 = vpop.f32.mrf.mxu0  ;;  %3243 = vmatmul.mubr.f32.gmra.mxu0 %v11065_v10  ;;  %v2327_v48 = vpop.f32.mrf.mxu1  ;;  %3586 = vmatmul.mubr.f32.gmra.mxu1 %v11066_v27  ;;  %v11070_v27 = vld [vmem:[#allocation48_spill] sm:$0xff] }
 0x248   : > { %6532 = vst [vmem:[%s8369_s4 + $0x450] sm:$0xff] %v2314_v31  ;;  %v2316_v60 = vadd.f32 %v2315_v51, %v2023_v35  ;;  %v2028_v41 = vadd.f32 %v2027_v30, %v11067_v53  ;;  %3248 = vmatprep.mubr.f32.mxu0 %v10733_v20  ;;  %3591 = vmatprep.mubr.f32.mxu1 %v10733_v20  ;;  %v11071_v31 = vld [vmem:[#allocation153_spill] sm:$0xff]  ;;  %v11072_v53 = vld [vmem:[#allocation154_spill] sm:$0xff] }
 0x249   : > { %v2029_v57 = vpop.f32.mrf.mxu0  ;;  %v2329_v33 = vpop.f32.mrf.mxu1 }
 0x24a   : > { %6533 = vst [vmem:[%s8369_s4 + $0x458] sm:$0xff] %v2316_v60  ;;  %v2321_v40 = vadd.f32 %v2320_v17, %v2028_v41  ;;  %v2030_v24 = vadd.f32 %v2029_v57, %v11068_v7  ;;  %v11073_v7 = vld [vmem:[#allocation45_spill] sm:$0xff] }
 0x24b   : > { %v2034_v44 = vpop.f32.mrf.mxu0  ;;  %3251 = vmatmul.mubr.f32.gmra.mxu0 %v11069_v13  ;;  %v2334_v10 = vpop.f32.mrf.mxu1  ;;  %3595 = vmatmul.mubr.f32.gmra.mxu1 %v11070_v27  ;;  %v11074_v27 = vld [vmem:[#allocation50_spill] sm:$0xff] }
 0x24c   : > { %6538 = vst [vmem:[%s8369_s4 + $0x480] sm:$0xff] %v2321_v40  ;;  %v2323_v51 = vadd.f32 %v2322_v47, %v2030_v24  ;;  %v2035_v35 = vadd.f32 %v2034_v44, %v11071_v31  ;;  %3256 = vmatprep.mubr.f32.mxu0 %v10733_v20  ;;  %3600 = vmatprep.mubr.f32.mxu1 %v10733_v20  ;;  %v11075_v40 = vld [vmem:[#allocation155_spill] sm:$0xff]  ;;  %v11076_v31 = vld [vmem:[#allocation156_spill] sm:$0xff] }
 0x24d   : > { %v2036_v30 = vpop.f32.mrf.mxu0  ;;  %v2336_v17 = vpop.f32.mrf.mxu1 }
 0x24e   : > { %6539 = vst [vmem:[%s8369_s4 + $0x488] sm:$0xff] %v2323_v51  ;;  %v2328_v60 = vadd.f32 %v2327_v48, %v2035_v35  ;;  %v2037_v41 = vadd.f32 %v2036_v30, %v11072_v53  ;;  %v11077_v53 = vld [vmem:[#allocation46_spill] sm:$0xff] }
 0x24f   : > { %v2041_v57 = vpop.f32.mrf.mxu0  ;;  %3259 = vmatmul.mubr.f32.gmra.mxu0 %v11073_v7  ;;  %v2341_v13 = vpop.f32.mrf.mxu1  ;;  %3604 = vmatmul.mubr.f32.gmra.mxu1 %v11074_v27  ;;  %v11078_v27 = vld [vmem:[#allocation56_spill] sm:$0xff] }
 0x250   : > { %6544 = vst [vmem:[%s8369_s4 + $0x4b0] sm:$0xff] %v2328_v60  ;;  %v2330_v47 = vadd.f32 %v2329_v33, %v2037_v41  ;;  %v2042_v24 = vadd.f32 %v2041_v57, %v11075_v40  ;;  %3264 = vmatprep.mubr.f32.mxu0 %v10733_v20  ;;  %3609 = vmatprep.mubr.f32.mxu1 %v10733_v20  ;;  %v11079_v60 = vld [vmem:[#allocation157_spill] sm:$0xff] }
 0x251   : > { %v2043_v44 = vpop.f32.mrf.mxu0  ;;  %v2343_v48 = vpop.f32.mrf.mxu1 }
 0x252   : > { %6545 = vst [vmem:[%s8369_s4 + $0x4b8] sm:$0xff] %v2330_v47  ;;  %v2335_v51 = vadd.f32 %v2334_v10, %v2042_v24  ;;  %v2044_v35 = vadd.f32 %v2043_v44, %v11076_v31  ;;  %v11080_v44 = vld [vmem:[#allocation53_spill] sm:$0xff] }
 0x253   : > { %v2048_v30 = vpop.f32.mrf.mxu0  ;;  %3267 = vmatmul.mubr.f32.gmra.mxu0 %v11077_v53  ;;  %v2348_v7 = vpop.f32.mrf.mxu1  ;;  %3613 = vmatmul.mubr.f32.gmra.mxu1 %v11078_v27  ;;  %v11081_v27 = vld [vmem:[#allocation60_spill] sm:$0xff] }
 0x254   : > { %6550 = vst [vmem:[%s8369_s4 + $0x4e0] sm:$0xff] %v2335_v51  ;;  %v2337_v33 = vadd.f32 %v2336_v17, %v2044_v35  ;;  %v2049_v41 = vadd.f32 %v2048_v30, %v11079_v60  ;;  %3272 = vmatprep.mubr.f32.mxu0 %v10733_v20  ;;  %3618 = vmatprep.mubr.f32.mxu1 %v10733_v20  ;;  %v11082_v51 = vld [vmem:[#allocation158_spill] sm:$0xff]  ;;  %v11102_v53 = vld [vmem:[#allocation96_spill] sm:$0xff] }
 0x255   : > { %v2050_v57 = vpop.f32.mrf.mxu0  ;;  %v2350_v10 = vpop.f32.mrf.mxu1 }
 0x256   : > { %6551 = vst [vmem:[%s8369_s4 + $0x4e8] sm:$0xff] %v2337_v33  ;;  %v2342_v47 = vadd.f32 %v2341_v13, %v2049_v41  ;;  %v2051_v40 = vadd.f32 %v2050_v57, %v8318_v45  ;;  %v11083_v41 = vld [vmem:[#allocation57_spill] sm:$0xff] }
 0x257   : > { %v2055_v24 = vpop.f32.mrf.mxu0  ;;  %3275 = vmatmul.mubr.f32.gmra.mxu0 %v11080_v44  ;;  %v2355_v31 = vpop.f32.mrf.mxu1  ;;  %3622 = vmatmul.mubr.f32.gmra.mxu1 %v11081_v27  ;;  %v11084_v27 = vld [vmem:[#allocation64_spill] sm:$0xff]  ;;  %v11101_v44 = vld [vmem:[#allocation86_spill] sm:$0xff] }
 0x258   : > { %6556 = vst [vmem:[%s8369_s4 + $0x510] sm:$0xff] %v2342_v47  ;;  %v2344_v17 = vadd.f32 %v2343_v48, %v2051_v40  ;;  %v2056_v35 = vadd.f32 %v2055_v24, %v11082_v51  ;;  %3280 = vmatprep.mubr.f32.mxu0 %v10733_v20  ;;  %3627 = vmatprep.mubr.f32.mxu1 %v10733_v20  ;;  %v11085_v51 = vld [vmem:[#allocation61_spill] sm:$0xff] }
 0x259   : > { %v2057_v30 = vpop.f32.mrf.mxu0  ;;  %v2357_v13 = vpop.f32.mrf.mxu1 }
 0x25a   : > { %6557 = vst [vmem:[%s8369_s4 + $0x518] sm:$0xff] %v2344_v17  ;;  %v2349_v45 = vadd.f32 %v2348_v7, %v2056_v35  ;;  %v2058_v33 = vadd.f32 %v2057_v30, %v8328_v49  ;;  %v11086_v30 = vld [vmem:[#allocation66_spill] sm:$0xff] }
 0x25b   : > { %v2062_v60 = vpop.f32.mrf.mxu0  ;;  %3283 = vmatmul.mubr.f32.gmra.mxu0 %v11083_v41  ;;  %v2362_v57 = vpop.f32.mrf.mxu1  ;;  %3631 = vmatmul.mubr.f32.gmra.mxu1 %v11084_v27  ;;  %v11099_v27 = vld [vmem:[#allocation85_spill] sm:$0xff]  ;;  %v11100_v41 = vld [vmem:[#allocation92_spill] sm:$0xff] }
 0x25c   : > { %6562 = vst [vmem:[%s8369_s4 + $0x540] sm:$0xff] %v2349_v45  ;;  %v2351_v48 = vadd.f32 %v2350_v10, %v2058_v33  ;;  %v2063_v47 = vadd.f32 %v2062_v60, %v8333_v2  ;;  %3288 = vmatprep.mubr.f32.mxu0 %v10733_v20  ;;  %3636 = vmatprep.mubr.f32.mxu1 %v10733_v20  ;;  %v11087_v45 = vld [vmem:[#allocation135_spill] sm:$0xff] }
 0x25d   : > { %v2064_v40 = vpop.f32.mrf.mxu0  ;;  %v2364_v24 = vpop.f32.mrf.mxu1  ;;  %v228_v33 = vsub.s32 2, %v11087_v45 }
 0x25e   : > { %6563 = vst [vmem:[%s8369_s4 + $0x548] sm:$0xff] %v2351_v48  ;;  %v2356_v49 = vadd.f32 %v2355_v31, %v2063_v47  ;;  %v2065_v7 = vadd.f32 %v2064_v40, %v8338_v50  ;;  %v11088_v48 = vld [vmem:[#allocation159_spill] sm:$0xff]  ;;  %v232_v40 = vsub.s32 3, %v11087_v45  ;;  %v11097_v45 = vld [vmem:[#allocation78_spill] sm:$0xff] }
 0x25f   : > { %v2069_v17 = vpop.f32.mrf.mxu0  ;;  %3291 = vmatmul.mubr.f32.gmra.mxu0 %v11085_v51  ;;  %v2369_v35 = vpop.f32.mrf.mxu1  ;;  %3640 = vmatmul.mubr.f32.gmra.mxu1 %v11086_v30  ;;  %v11089_v30 = vld [vmem:[#allocation62_spill] sm:$0xff]  ;;  %v11098_v51 = vld [vmem:[#allocation88_spill] sm:$0xff] }
 0x260   : > { %6568 = vst [vmem:[%s8369_s4 + $0x570] sm:$0xff] %v2356_v49  ;;  %v2358_v2 = vadd.f32 %v2357_v13, %v2065_v7  ;;  %v2070_v10 = vadd.f32 %v2069_v17, %v8343_v39  ;;  %3296 = vmatprep.mubr.f32.mxu0 %v10733_v20  ;;  %3645 = vmatprep.mubr.f32.mxu1 %v10733_v20  ;;  %v11090_v39 = vld [vmem:[#allocation71_spill] sm:$0xff] }
 0x261   : > { %v2071_v31 = vpop.f32.mrf.mxu0  ;;  %v2371_v60 = vpop.f32.mrf.mxu1 }
 0x262   : > { %6569 = vst [vmem:[%s8369_s4 + $0x578] sm:$0xff] %v2358_v2  ;;  %v2363_v50 = vadd.f32 %v2362_v57, %v2070_v10  ;;  %v2072_v47 = vadd.f32 %v2071_v31, %v11088_v48  ;;  %v6718_v57 = vld [vmem:[%s10369_s2] sm:$0x3f] }
 0x263   : > { %v2076_v49 = vpop.f32.mrf.mxu0  ;;  %3299 = vmatmul.mubr.f32.gmra.mxu0 %v11089_v30  ;;  %v2882_v13 = vpop.f32.mrf.mxu1  ;;  %3649 = vmatmul.mubr.f32.gmra.mxu1 %v11090_v39  ;;  %v8642_v2 = vrot.slane %v6718_v57, %v228_v33  ;;  %v11092_v39 = vld [vmem:[#allocation76_spill] sm:$0xff] }
 0x264   : > { %6574 = vst [vmem:[%s8369_s4 + $0x5a0] sm:$0xff] %v2363_v50  ;;  %v2365_v7 = vadd.f32 %v2364_v24, %v2072_v47  ;;  %v2077_v17 = vadd.f32 %v2076_v49, %v8356_v32  ;;  %3304 = vmatprep.mubr.f32.mxu0 %v10733_v20  ;;  %3654 = vmatprep.mubr.f32.mxu1 %v10733_v20  ;;  %v11091_v47 = vld [vmem:[#allocation68_spill] sm:$0xff] }
 0x265   : > { %v2078_v10 = vpop.f32.mrf.mxu0  ;;  %v2884_v31 = vpop.f32.mrf.mxu1  ;;  %v8647_v50 = vrot.slane %v6718_v57, %v232_v40  ;;  %v11093_v57 = vld [vmem:[#allocation72_spill] sm:$0xff] }
 0x266   : > { %6575 = vst [vmem:[%s8369_s4 + $0x5a8] sm:$0xff] %v2365_v7  ;;  %v2370_v48 = vadd.f32 %v2369_v35, %v2077_v17  ;;  %v2079_v24 = vadd.f32 %v2078_v10, %v8361_v55 }
 0x267   : > { %v2449_v32 = vpop.f32.mrf.mxu0  ;;  %3307 = vmatmul.mubr.f32.gmra.mxu0 %v11091_v47  ;;  %v2889_v49 = vpop.f32.mrf.mxu1  ;;  %3658 = vmatmul.mubr.f32.gmra.mxu1 %v11092_v39  ;;  %v11094_v39 = vld [vmem:[#allocation80_spill] sm:$0xff] }
 0x268   : > { %6580 = vst [vmem:[%s8369_s4 + $0x5d0] sm:$0xff] %v2370_v48  ;;  %v2372_v33 = vadd.f32 %v2371_v60, %v2079_v24  ;;  %v2450_v30 = vadd.f32 %v2449_v32, %v8642_v2  ;;  %3312 = vmatprep.mubr.f32.mxu0 %v10733_v20  ;;  %3663 = vmatprep.mubr.f32.mxu1 %v10733_v20  ;;  %v11096_v47 = vld [vmem:[#allocation84_spill] sm:$0xff] }
 0x269   : > { %v2451_v7 = vpop.f32.mrf.mxu0  ;;  %v2891_v35 = vpop.f32.mrf.mxu1 }
 0x26a   : > { %6581 = vst [vmem:[%s8369_s4 + $0x5d8] sm:$0xff] %v2372_v33  ;;  %v8656_v55 = vadd.f32 %v2882_v13, %v2450_v30  ;;  %v2452_v40 = vadd.f32 %v2451_v7, %v8647_v50  ;;  %v11095_v7 = vld [vmem:[#allocation77_spill] sm:$0xff] }
 0x26b   : > { %v2460_v17 = vpop.f32.mrf.mxu0  ;;  %3315 = vmatmul.mubr.f32.gmra.mxu0 %v11093_v57  ;;  %v2896_v10 = vpop.f32.mrf.mxu1  ;;  %3667 = vmatmul.mubr.f32.gmra.mxu1 %v11094_v39 }
 0x26c   : > { %v8661_v60 = vadd.f32 %v2884_v31, %v2452_v40  ;;  %v2461_v48 = vadd.f32 %v2460_v17, %v8642_v2  ;;  %3320 = vmatprep.mubr.f32.mxu0 %v10733_v20  ;;  %3672 = vmatprep.mubr.f32.mxu1 %v10733_v20 }
 0x26d   : > { %v2462_v24 = vpop.f32.mrf.mxu0  ;;  %v2898_v32 = vpop.f32.mrf.mxu1 }
 0x26e   : > { %v8666_v30 = vadd.f32 %v2889_v49, %v2461_v48  ;;  %v2463_v13 = vadd.f32 %v2462_v24, %v8647_v50 }
 0x26f   : > { %v2471_v33 = vpop.f32.mrf.mxu0  ;;  %3323 = vmatmul.mubr.f32.gmra.mxu0 %v11095_v7  ;;  %v2903_v57 = vpop.f32.mrf.mxu1  ;;  %3676 = vmatmul.mubr.f32.gmra.mxu1 %v11096_v47 }
 0x270   : > { %v8671_v31 = vadd.f32 %v2891_v35, %v2463_v13  ;;  %v2472_v40 = vadd.f32 %v2471_v33, %v8642_v2  ;;  %3328 = vmatprep.mubr.f32.mxu0 %v10733_v20  ;;  %3681 = vmatprep.mubr.f32.mxu1 %v10733_v20 }
 0x271   : > { %v2473_v17 = vpop.f32.mrf.mxu0  ;;  %v2905_v39 = vpop.f32.mrf.mxu1 }
 0x272   : > { %v8676_v49 = vadd.f32 %v2896_v10, %v2472_v40  ;;  %v2474_v48 = vadd.f32 %v2473_v17, %v8647_v50 }
 0x273   : > { %v2482_v24 = vpop.f32.mrf.mxu0  ;;  %3331 = vmatmul.mubr.f32.gmra.mxu0 %v11097_v45  ;;  %v2910_v7 = vpop.f32.mrf.mxu1  ;;  %3685 = vmatmul.mubr.f32.gmra.mxu1 %v11098_v51 }
 0x274   : > { %v8681_v35 = vadd.f32 %v2898_v32, %v2474_v48  ;;  %v2483_v13 = vadd.f32 %v2482_v24, %v8642_v2  ;;  %3336 = vmatprep.mubr.f32.mxu0 %v10733_v20  ;;  %3690 = vmatprep.mubr.f32.mxu1 %v10733_v20 }
 0x275   : > { %v2484_v33 = vpop.f32.mrf.mxu0  ;;  %v2912_v47 = vpop.f32.mrf.mxu1 }
 0x276   : > { %v8686_v10 = vadd.f32 %v2903_v57, %v2483_v13  ;;  %v2485_v40 = vadd.f32 %v2484_v33, %v8647_v50 }
 0x277   : > { %v2493_v17 = vpop.f32.mrf.mxu0  ;;  %3339 = vmatmul.mubr.f32.gmra.mxu0 %v11099_v27  ;;  %v2917_v45 = vpop.f32.mrf.mxu1  ;;  %3694 = vmatmul.mubr.f32.gmra.mxu1 %v11100_v41 }
 0x278   : > { %v8691_v32 = vadd.f32 %v2905_v39, %v2485_v40  ;;  %v2494_v48 = vadd.f32 %v2493_v17, %v8642_v2  ;;  %3344 = vmatprep.mubr.f32.mxu0 %v10733_v20  ;;  %3699 = vmatprep.mubr.f32.mxu1 %v10733_v20 }
 0x279   : > { %v2495_v24 = vpop.f32.mrf.mxu0  ;;  %v2919_v51 = vpop.f32.mrf.mxu1 }
 0x27a   : > { %v8696_v57 = vadd.f32 %v2910_v7, %v2494_v48  ;;  %v2496_v13 = vadd.f32 %v2495_v24, %v8647_v50 }
 0x27b   : > { %v2504_v33 = vpop.f32.mrf.mxu0  ;;  %3347 = vmatmul.mubr.f32.gmra.mxu0 %v11101_v44  ;;  %v2924_v27 = vpop.f32.mrf.mxu1  ;;  %3703 = vmatmul.mubr.f32.gmra.mxu1 %v11102_v53 }
 0x27c   : > { %v8701_v39 = vadd.f32 %v2912_v47, %v2496_v13  ;;  %v2505_v40 = vadd.f32 %v2504_v33, %v8642_v2  ;;  %3352 = vmatprep.mubr.f32.mxu0 %v10733_v20  ;;  %3708 = vmatprep.mubr.f32.mxu1 %v10733_v20 }
 0x27d   : > { %v2506_v17 = vpop.f32.mrf.mxu0  ;;  %v2926_v41 = vpop.f32.mrf.mxu1 }
 0x27e   : > { %v8706_v7 = vadd.f32 %v2917_v45, %v2505_v40  ;;  %v2507_v48 = vadd.f32 %v2506_v17, %v8647_v50 }
 0x27f   : > { %v2515_v24 = vpop.f32.mrf.mxu0  ;;  %3355 = vmatmul.mubr.f32.gmra.mxu0 %v11103_v11  ;;  %v2931_v44 = vpop.f32.mrf.mxu1  ;;  %3712 = vmatmul.mubr.f32.gmra.mxu1 %v11104_v4 }
 0x280   : > { %v8711_v47 = vadd.f32 %v2919_v51, %v2507_v48  ;;  %v2516_v13 = vadd.f32 %v2515_v24, %v8642_v2  ;;  %3360 = vmatprep.mubr.f32.mxu0 %v10733_v20  ;;  %3717 = vmatprep.mubr.f32.mxu1 %v10733_v20 }
 0x281   : > { %v2517_v33 = vpop.f32.mrf.mxu0  ;;  %v2933_v53 = vpop.f32.mrf.mxu1 }
 0x282   : > { %v8716_v45 = vadd.f32 %v2924_v27, %v2516_v13  ;;  %v2518_v40 = vadd.f32 %v2517_v33, %v8647_v50 }
 0x283   : > { %v2526_v17 = vpop.f32.mrf.mxu0  ;;  %3363 = vmatmul.mubr.f32.gmra.mxu0 %v11105_v61  ;;  %v2938_v11 = vpop.f32.mrf.mxu1  ;;  %3721 = vmatmul.mubr.f32.gmra.mxu1 %v11106_v19 }
 0x284   : > { %v8721_v51 = vadd.f32 %v2926_v41, %v2518_v40  ;;  %v2527_v48 = vadd.f32 %v2526_v17, %v8642_v2  ;;  %3368 = vmatprep.mubr.f32.mxu0 %v10733_v20  ;;  %3726 = vmatprep.mubr.f32.mxu1 %v10733_v20 }
 0x285   : > { %v2528_v24 = vpop.f32.mrf.mxu0  ;;  %v2940_v4 = vpop.f32.mrf.mxu1 }
 0x286   : > { %v8726_v27 = vadd.f32 %v2931_v44, %v2527_v48  ;;  %v2529_v13 = vadd.f32 %v2528_v24, %v8647_v50  ;;  %v214_v24 = vld [vmem:[%s10368_s1 + $0x50] sm:$0xf] }
 0x287   : > { %v2537_v33 = vpop.f32.mrf.mxu0  ;;  %3371 = vmatmul.mubr.f32.gmra.mxu0 %v11107_v6  ;;  %v2945_v61 = vpop.f32.mrf.mxu1  ;;  %3730 = vmatmul.mubr.f32.gmra.mxu1 %v11108_v25  ;;  %v11109_v25 = vld [vmem:[#allocation104_spill] sm:$0xff] }
 0x288   : > { %v8731_v41 = vadd.f32 %v2933_v53, %v2529_v13  ;;  %v2538_v40 = vadd.f32 %v2537_v33, %v8642_v2  ;;  %3376 = vmatprep.mubr.f32.mxu0 %v10733_v20  ;;  %3735 = vmatprep.mubr.f32.mxu1 %v10733_v20  ;;  %v11110_v13 = vld [vmem:[#allocation112_spill] sm:$0xff] }
 0x289   : > { %v2539_v17 = vpop.f32.mrf.mxu0  ;;  %v2947_v19 = vpop.f32.mrf.mxu1 }
 0x28a   : > { %v8736_v44 = vadd.f32 %v2938_v11, %v2538_v40  ;;  %v2540_v48 = vadd.f32 %v2539_v17, %v8647_v50  ;;  %v359_v17 = vsel %vm345_vm0, %v214_v24, 0 }
 0x28b   : > { %v2548_v6 = vpop.f32.mrf.mxu0  ;;  %3379 = vmatmul.mubr.f32.gmra.mxu0 %v11109_v25  ;;  %v2952_v53 = vpop.f32.mrf.mxu1  ;;  %3739 = vmatmul.mubr.f32.gmra.mxu1 %v11110_v13  ;;  %v209_v13 = vld [vmem:[%s10368_s1 + $0x28] sm:$0xff]  ;;  %v11112_v25 = vld [vmem:[#allocation116_spill] sm:$0xff] }
 0x28c   : > { %v8744_v33 = vadd.f32 %v2940_v4, %v2540_v48  ;;  %v2549_v21 = vadd.f32 %v2548_v6, %v8642_v2  ;;  %3384 = vmatprep.mubr.f32.mxu0 %v10733_v20  ;;  %3744 = vmatprep.mubr.f32.mxu1 %v10733_v20  ;;  %v11111_v48 = vld [vmem:[#allocation109_spill] sm:$0xff] }
 0x28d   : > { %v2550_v11 = vpop.f32.mrf.mxu0  ;;  %v2954_v40 = vpop.f32.mrf.mxu1 }
 0x28e   : > { %v8750_v15 = vadd.f32 %v2945_v61, %v2549_v21  ;;  %v2551_v29 = vadd.f32 %v2550_v11, %v8647_v50  ;;  %v8766_v61 = vand.u32 4294901760, %v359_v17 }
 0x28f   : > { %v2559_v4 = vpop.f32.mrf.mxu0  ;;  %3387 = vmatmul.mubr.f32.gmra.mxu0 %v11111_v48  ;;  %v2959_v6 = vpop.f32.mrf.mxu1  ;;  %3748 = vmatmul.mubr.f32.gmra.mxu1 %v11112_v25  ;;  %v8768_v48 = vand.u32 4294901760, %v209_v13 }
 0x290   : > { %v8761_v18 = vadd.f32 %v2947_v19, %v2551_v29  ;;  %v2560_v21 = vadd.f32 %v2559_v4, %v8642_v2  ;;  %3392 = vmatprep.mubr.f32.mxu0 %v10733_v20  ;;  %3753 = vmatprep.mubr.f32.mxu1 %v10733_v20  ;;  %11113 = vst [vmem:[#allocation162_spill] sm:$0xff] %v8766_v61  ;;  %v11116_v19 = vld [vmem:[#allocation113_spill] sm:$0xff] }
 0x291   : > { %v2561_v24 = vpop.f32.mrf.mxu0  ;;  %v2961_v11 = vpop.f32.mrf.mxu1  ;;  %11114 = vst [vmem:[#allocation163_spill] sm:$0xff] %v8768_v48  ;;  %v8786_v38 = vsub.f32 %v209_v13, %v8768_v48 }
 0x292   : > { %v8770_v5 = vadd.f32 %v2952_v53, %v2560_v21  ;;  %v2562_v25 = vadd.f32 %v2561_v24, %v8647_v50  ;;  %v8783_v53 = vsub.f32 %v359_v17, %v8766_v61 }
 0x293   : > { %v2570_v29 = vpop.f32.mrf.mxu0  ;;  %3395 = vmatmul.mubr.f32.gmra.mxu0 %v11116_v19  ;;  %v2966_v4 = vpop.f32.mrf.mxu1  ;;  %3757 = vmatmul.mubr.f32.gmra.mxu1 %v11117_v62  ;;  %11119 = vst [vmem:[#allocation166_spill] sm:$0xff] %v8786_v38 }
 0x294   : > { %v8777_v28 = vadd.f32 %v2954_v40, %v2562_v25  ;;  %v2571_v16 = vadd.f32 %v2570_v29, %v8642_v2  ;;  %3400 = vmatprep.mubr.f32.mxu0 %v10733_v20  ;;  %3762 = vmatprep.mubr.f32.mxu1 %v10733_v20  ;;  %11118 = vst [vmem:[#allocation165_spill] sm:$0xff] %v8783_v53  ;;  %v11121_v29 = vld [vmem:[#allocation114_spill] sm:$0xff] }
 0x295   : > { %v2572_v21 = vpop.f32.mrf.mxu0  ;;  %v2968_v24 = vpop.f32.mrf.mxu1  ;;  %v8792_v25 = vsub.f32 %v208_v36, %v8773_v22  ;;  %v10663_v36 = vand.u32 4294901760, %v8786_v38 }
 0x296   : > { %v8788_v19 = vadd.f32 %v2959_v6, %v2571_v16  ;;  %v2573_v62 = vadd.f32 %v2572_v21, %v8647_v50 }
 0x297   : > { %11120 = vst [vmem:[#allocation69_spill] sm:$0xff] %v8792_v25  ;;  %v2581_v40 = vpop.f32.mrf.mxu0  ;;  %3403 = vmatmul.mubr.f32.gmra.mxu0 %v11121_v29  ;;  %v2973_v26 = vpop.f32.mrf.mxu1  ;;  %3766 = vmatmul.mubr.f32.gmra.mxu1 %v11122_v59 }
 0x298   : > { %v8796_v17 = vadd.f32 %v2961_v11, %v2573_v62  ;;  %v2582_v43 = vadd.f32 %v2581_v40, %v8642_v2  ;;  %3408 = vmatprep.mubr.f32.mxu0 %v10733_v20  ;;  %3771 = vmatprep.mubr.f32.mxu1 %v10733_v20  ;;  %v11124_v11 = vld [vmem:[#allocation121_spill] sm:$0xff] }
 0x299   : > { %v2583_v13 = vpop.f32.mrf.mxu0  ;;  %v2975_v6 = vpop.f32.mrf.mxu1 }
 0x29a   : > { %v8803_v21 = vadd.f32 %v2966_v4, %v2582_v43  ;;  %v2584_v29 = vadd.f32 %v2583_v13, %v8647_v50  ;;  %v11127_v43 = vand.u32 4294901760, %v8783_v53 }
 0x29b   : > { %v2592_v62 = vpop.f32.mrf.mxu0  ;;  %3411 = vmatmul.mubr.f32.gmra.mxu0 %v11124_v11  ;;  %v2980_v40 = vpop.f32.mrf.mxu1  ;;  %3775 = vmatmul.mubr.f32.gmra.mxu1 %v11125_v9  ;;  %v4848_v11 = vsub.f32 %v8786_v38, %v10663_v36 }
 0x29c   : > { %11123 = vst [vmem:[#allocation167_spill] sm:$0xff] %v8803_v21  ;;  %v8809_v12 = vadd.f32 %v2968_v24, %v2584_v29  ;;  %v2593_v16 = vadd.f32 %v2592_v62, %v8642_v2  ;;  %3416 = vmatprep.mubr.f32.mxu0 %v10733_v20  ;;  %3780 = vmatprep.mubr.f32.mxu1 %v10733_v20  ;;  %v11129_v29 = vand.u32 4294901760, %v8792_v25 }
 0x29d   : > { %v4842_v4 = vsub.f32 %v8783_v53, %v11127_v43  ;;  %v2594_v13 = vpop.f32.mrf.mxu0  ;;  %v2982_v59 = vpop.f32.mrf.mxu1  ;;  %v4849_v36 = vand.u32 4294901760, %v4848_v11 }
 0x29e   : > { %11126 = vst [vmem:[#allocation74_spill] sm:$0xff] %v8809_v12  ;;  %v8820_v63 = vadd.f32 %v2973_v26, %v2593_v16  ;;  %v2595_v24 = vadd.f32 %v2594_v13, %v8647_v50  ;;  %v4854_v62 = vsub.f32 %v8792_v25, %v11129_v29  ;;  %v11130_v12 = vld [vmem:[#allocation125_spill] sm:$0xff] }
 0x29f   : > { %v2603_v9 = vpop.f32.mrf.mxu0  ;;  %3419 = vmatmul.mubr.f32.gmra.mxu0 %v11130_v12  ;;  %v2987_v21 = vpop.f32.mrf.mxu1  ;;  %3784 = vmatmul.mubr.f32.gmra.mxu1 %v11131_v56  ;;  %v4843_v26 = vand.u32 4294901760, %v4842_v4 }
 0x2a0   : > { %11128 = vst [vmem:[#allocation81_spill] sm:$0xff] %v8820_v63  ;;  %v8828_v43 = vadd.f32 %v2975_v6, %v2595_v24  ;;  %v2604_v53 = vadd.f32 %v2603_v9, %v8642_v2  ;;  %3424 = vmatprep.mubr.f32.mxu0 %v10733_v20  ;;  %4159 = vmatprep.mubr.f32.mxu1 %v10733_v20  ;;  %v4855_v12 = vand.u32 4294901760, %v4854_v62  ;;  %v11132_v63 = vld [vmem:[#allocation128_spill] sm:$0xff]  ;;  %v11133_v24 = vld [vmem:[#allocation5_spill] sm:$0xff] }
 0x2a1   : > { %v2605_v16 = vpop.f32.mrf.mxu0  ;;  %v2989_v13 = vpop.f32.mrf.mxu1 }
 0x2a2   : > { %v8833_v38 = vadd.f32 %v2980_v40, %v2604_v53  ;;  %v2606_v29 = vadd.f32 %v2605_v16, %v8647_v50  ;;  %v11134_v16 = vld [vmem:[#allocation6_spill] sm:$0xff] }
 0x2a3   : > { %v2614_v25 = vpop.f32.mrf.mxu0  ;;  %3427 = vmatmul.mubr.f32.gmra.mxu0 %v11132_v63  ;;  %v2994_v6 = vpop.f32.mrf.mxu1  ;;  %4161 = vmatmul.mubr.f32.vlgmr.msra.gmra.mxu1 %v11133_v24 }
 0x2a4   : > { %v8838_v9 = vadd.f32 %v2982_v59, %v2606_v29  ;;  %v2615_v56 = vadd.f32 %v2614_v25, %v8642_v2  ;;  %3866 = vmatprep.mubr.f32.mxu0 %v10733_v20  ;;  %4844 = vmatpush1.msra.mxu1 %v4843_v26 }
 0x2a5   : > { %v2616_v4 = vpop.f32.mrf.mxu0  ;;  %v2996_v11 = vpop.f32.mrf.mxu1  ;;  %4166 = vmatprep.mubr.f32.mxu1 %v10733_v20  ;;  %4850 = vmatprep.subr.mxu1 %v4849_v36 }
 0x2a6   : > { %v8843_v53 = vadd.f32 %v2987_v21, %v2615_v56  ;;  %v2617_v40 = vadd.f32 %v2616_v4, %v8647_v50  ;;  %4856 = vmatpush1.msra.mxu1 %v4855_v12  ;;  %v11136_v4 = vld [vmem:[#allocation7_spill] sm:$0xff] }
 0x2a7   : > { %v2625_v62 = vpop.f32.mrf.mxu0  ;;  %3868 = vmatmul.mubr.f32.vlgmr.msra.gmra.mxu0 %v11133_v24  ;;  %v3001_v59 = vpop.f32.mrf.mxu1  ;;  %4168 = vmatmul.mubr.f32.gmra.mxu1 %v11134_v16 }
 0x2a8   : > { %v8848_v25 = vadd.f32 %v2989_v13, %v2617_v40  ;;  %v2626_v26 = vadd.f32 %v2625_v62, %v8642_v2  ;;  %4415 = vmatpush1.msra.mxu0 %v8766_v61  ;;  %3873 = vmatprep.mubr.f32.mxu0 %v10733_v20 }
 0x2a9   : > { %v2627_v36 = vpop.f32.mrf.mxu0  ;;  %v3003_v56 = vpop.f32.mrf.mxu1  ;;  %4173 = vmatprep.mubr.f32.mxu1 %v10733_v20  ;;  %4417 = vmatprep.subr.mxu0 %v8768_v48 }
 0x2aa   : > { %v8855_v12 = vadd.f32 %v2994_v6, %v2626_v26  ;;  %v2628_v21 = vadd.f32 %v2627_v36, %v8647_v50  ;;  %4419 = vmatpush1.msra.mxu0 %v8773_v22  ;;  %5472 = vmatprep.subr.mxu1 %v8510_v23 }
 0x2ab   : > { %v2636_v13 = vpop.f32.mrf.mxu0  ;;  %3875 = vmatmul.mubr.f32.gmra.mxu0 %v11134_v16  ;;  %v3008_v29 = vpop.f32.mrf.mxu1  ;;  %4175 = vmatmul.mubr.f32.gmra.mxu1 %v11136_v4 }
 0x2ac   : > { %11135 = vst [vmem:[#allocation82_spill] sm:$0xff] %v8855_v12  ;;  %v8862_v40 = vadd.f32 %v2996_v11, %v2628_v21  ;;  %v2637_v62 = vadd.f32 %v2636_v13, %v8642_v2  ;;  %3880 = vmatprep.mubr.f32.mxu0 %v10733_v20  ;;  %4180 = vmatprep.mubr.f32.mxu1 %v10733_v20  ;;  %v11139_v11 = vld [vmem:[#allocation9_spill] sm:$0xff] }
 0x2ad   : > { %v2638_v6 = vpop.f32.mrf.mxu0  ;;  %v3010_v26 = vpop.f32.mrf.mxu1  ;;  %5144 = vmatprep.subr.mxu0 %v8519_v3 }
 0x2ae   : > { %11137 = vst [vmem:[#allocation89_spill] sm:$0xff] %v8862_v40  ;;  %v8868_v36 = vadd.f32 %v3001_v59, %v2637_v62  ;;  %v2639_v63 = vadd.f32 %v2638_v6, %v8647_v50 }
 0x2af   : > { %v2647_v23 = vpop.f32.mrf.mxu0  ;;  %3882 = vmatmul.mubr.f32.gmra.mxu0 %v11136_v4  ;;  %v3015_v12 = vpop.f32.mrf.mxu1  ;;  %4182 = vmatmul.mubr.f32.gmra.mxu1 %v11139_v11  ;;  %v11142_v4 = vld [vmem:[#allocation14_spill] sm:$0xff] }
 0x2b0   : > { %11138 = vst [vmem:[#allocation90_spill] sm:$0xff] %v8868_v36  ;;  %v8873_v21 = vadd.f32 %v3003_v56, %v2639_v63  ;;  %v2648_v13 = vadd.f32 %v2647_v23, %v8642_v2  ;;  %3887 = vmatprep.mubr.f32.mxu0 %v10733_v20  ;;  %4187 = vmatprep.mubr.f32.mxu1 %v10733_v20 }
 0x2b1   : > { %v2649_v40 = vpop.f32.mrf.mxu0  ;;  %v3017_v3 = vpop.f32.mrf.mxu1 }
 0x2b2   : > { %11140 = vst [vmem:[#allocation97_spill] sm:$0xff] %v8873_v21  ;;  %v8878_v59 = vadd.f32 %v3008_v29, %v2648_v13  ;;  %v2650_v62 = vadd.f32 %v2649_v40, %v8647_v50 }
 0x2b3   : > { %v2658_v6 = vpop.f32.mrf.mxu0  ;;  %3889 = vmatmul.mubr.f32.gmra.mxu0 %v11139_v11  ;;  %v3022_v36 = vpop.f32.mrf.mxu1  ;;  %4189 = vmatmul.mubr.f32.gmra.mxu1 %v11142_v4  ;;  %v11145_v11 = vld [vmem:[#allocation18_spill] sm:$0xff] }
 0x2b4   : > { %11141 = vst [vmem:[#allocation101_spill] sm:$0xff] %v8878_v59  ;;  %v8883_v63 = vadd.f32 %v3010_v26, %v2650_v62  ;;  %v2659_v23 = vadd.f32 %v2658_v6, %v8642_v2  ;;  %3894 = vmatprep.mubr.f32.mxu0 %v10733_v20  ;;  %4194 = vmatprep.mubr.f32.mxu1 %v10733_v20 }
 0x2b5   : > { %v2660_v56 = vpop.f32.mrf.mxu0  ;;  %v3024_v21 = vpop.f32.mrf.mxu1 }
 0x2b6   : > { %11143 = vst [vmem:[#allocation105_spill] sm:$0xff] %v8883_v63  ;;  %v8888_v29 = vadd.f32 %v3015_v12, %v2659_v23  ;;  %v2661_v40 = vadd.f32 %v2660_v56, %v8647_v50 }
 0x2b7   : > { %v2669_v13 = vpop.f32.mrf.mxu0  ;;  %3896 = vmatmul.mubr.f32.gmra.mxu0 %v11142_v4  ;;  %v3029_v59 = vpop.f32.mrf.mxu1  ;;  %4196 = vmatmul.mubr.f32.gmra.mxu1 %v11145_v11  ;;  %v11148_v4 = vld [vmem:[#allocation23_spill] sm:$0xff] }
 0x2b8   : > { %11144 = vst [vmem:[#allocation136_spill] sm:$0xff] %v8888_v29  ;;  %v8893_v26 = vadd.f32 %v3017_v3, %v2661_v40  ;;  %v2670_v62 = vadd.f32 %v2669_v13, %v8642_v2  ;;  %3901 = vmatprep.mubr.f32.mxu0 %v10733_v20  ;;  %4201 = vmatprep.mubr.f32.mxu1 %v10733_v20 }
 0x2b9   : > { %v2671_v6 = vpop.f32.mrf.mxu0  ;;  %v3031_v63 = vpop.f32.mrf.mxu1 }
 0x2ba   : > { %11146 = vst [vmem:[#allocation137_spill] sm:$0xff] %v8893_v26  ;;  %v8898_v12 = vadd.f32 %v3022_v36, %v2670_v62  ;;  %v2672_v23 = vadd.f32 %v2671_v6, %v8647_v50 }
 0x2bb   : > { %v2680_v56 = vpop.f32.mrf.mxu0  ;;  %3903 = vmatmul.mubr.f32.gmra.mxu0 %v11145_v11  ;;  %v3036_v29 = vpop.f32.mrf.mxu1  ;;  %4203 = vmatmul.mubr.f32.gmra.mxu1 %v11148_v4  ;;  %v11151_v11 = vld [vmem:[#allocation28_spill] sm:$0xff] }
 0x2bc   : > { %11147 = vst [vmem:[#allocation106_spill] sm:$0xff] %v8898_v12  ;;  %v8903_v3 = vadd.f32 %v3024_v21, %v2672_v23  ;;  %v2681_v40 = vadd.f32 %v2680_v56, %v8642_v2  ;;  %3908 = vmatprep.mubr.f32.mxu0 %v10733_v20  ;;  %4208 = vmatprep.mubr.f32.mxu1 %v10733_v20 }
 0x2bd   : > { %v2682_v13 = vpop.f32.mrf.mxu0  ;;  %v3038_v26 = vpop.f32.mrf.mxu1 }
 0x2be   : > { %11149 = vst [vmem:[#allocation138_spill] sm:$0xff] %v8903_v3  ;;  %v8908_v36 = vadd.f32 %v3029_v59, %v2681_v40  ;;  %v2683_v62 = vadd.f32 %v2682_v13, %v8647_v50 }
 0x2bf   : > { %v2691_v6 = vpop.f32.mrf.mxu0  ;;  %3910 = vmatmul.mubr.f32.gmra.mxu0 %v11148_v4  ;;  %v3043_v12 = vpop.f32.mrf.mxu1  ;;  %4210 = vmatmul.mubr.f32.gmra.mxu1 %v11151_v11  ;;  %v11154_v4 = vld [vmem:[#allocation33_spill] sm:$0xff] }
 0x2c0   : > { %11150 = vst [vmem:[#allocation133_spill] sm:$0xff] %v8908_v36  ;;  %v8913_v21 = vadd.f32 %v3031_v63, %v2683_v62  ;;  %v2692_v23 = vadd.f32 %v2691_v6, %v8642_v2  ;;  %3915 = vmatprep.mubr.f32.mxu0 %v10733_v20  ;;  %4215 = vmatprep.mubr.f32.mxu1 %v10733_v20 }
 0x2c1   : > { %v2693_v56 = vpop.f32.mrf.mxu0  ;;  %v3045_v3 = vpop.f32.mrf.mxu1 }
 0x2c2   : > { %11152 = vst [vmem:[#allocation139_spill] sm:$0xff] %v8913_v21  ;;  %v8918_v59 = vadd.f32 %v3036_v29, %v2692_v23  ;;  %v2694_v40 = vadd.f32 %v2693_v56, %v8647_v50 }
 0x2c3   : > { %v2702_v13 = vpop.f32.mrf.mxu0  ;;  %3917 = vmatmul.mubr.f32.gmra.mxu0 %v11151_v11  ;;  %v3050_v36 = vpop.f32.mrf.mxu1  ;;  %4217 = vmatmul.mubr.f32.gmra.mxu1 %v11154_v4  ;;  %v11157_v11 = vld [vmem:[#allocation37_spill] sm:$0xff] }
 0x2c4   : > { %11153 = vst [vmem:[#allocation134_spill] sm:$0xff] %v8918_v59  ;;  %v8923_v63 = vadd.f32 %v3038_v26, %v2694_v40  ;;  %v2703_v62 = vadd.f32 %v2702_v13, %v8642_v2  ;;  %3922 = vmatprep.mubr.f32.mxu0 %v10733_v20  ;;  %4222 = vmatprep.mubr.f32.mxu1 %v10733_v20 }
 0x2c5   : > { %v2704_v6 = vpop.f32.mrf.mxu0  ;;  %v3052_v21 = vpop.f32.mrf.mxu1 }
 0x2c6   : > { %11155 = vst [vmem:[#allocation140_spill] sm:$0xff] %v8923_v63  ;;  %v8928_v29 = vadd.f32 %v3043_v12, %v2703_v62  ;;  %v2705_v23 = vadd.f32 %v2704_v6, %v8647_v50 }
 0x2c7   : > { %v2713_v56 = vpop.f32.mrf.mxu0  ;;  %3924 = vmatmul.mubr.f32.gmra.mxu0 %v11154_v4  ;;  %v3057_v59 = vpop.f32.mrf.mxu1  ;;  %4224 = vmatmul.mubr.f32.gmra.mxu1 %v11157_v11  ;;  %v11160_v4 = vld [vmem:[#allocation41_spill] sm:$0xff] }
 0x2c8   : > { %11156 = vst [vmem:[#allocation141_spill] sm:$0xff] %v8928_v29  ;;  %v8933_v26 = vadd.f32 %v3045_v3, %v2705_v23  ;;  %v2714_v40 = vadd.f32 %v2713_v56, %v8642_v2  ;;  %3929 = vmatprep.mubr.f32.mxu0 %v10733_v20  ;;  %4229 = vmatprep.mubr.f32.mxu1 %v10733_v20 }
 0x2c9   : > { %v2715_v13 = vpop.f32.mrf.mxu0  ;;  %v3059_v63 = vpop.f32.mrf.mxu1 }
 0x2ca   : > { %11158 = vst [vmem:[#allocation142_spill] sm:$0xff] %v8933_v26  ;;  %v8938_v12 = vadd.f32 %v3050_v36, %v2714_v40  ;;  %v2716_v62 = vadd.f32 %v2715_v13, %v8647_v50 }
 0x2cb   : > { %v2724_v6 = vpop.f32.mrf.mxu0  ;;  %3931 = vmatmul.mubr.f32.gmra.mxu0 %v11157_v11  ;;  %v3064_v29 = vpop.f32.mrf.mxu1  ;;  %4231 = vmatmul.mubr.f32.gmra.mxu1 %v11160_v4  ;;  %v11163_v11 = vld [vmem:[#allocation42_spill] sm:$0xff] }
 0x2cc   : > { %11159 = vst [vmem:[#allocation143_spill] sm:$0xff] %v8938_v12  ;;  %v8943_v3 = vadd.f32 %v3052_v21, %v2716_v62  ;;  %v2725_v23 = vadd.f32 %v2724_v6, %v8642_v2  ;;  %3936 = vmatprep.mubr.f32.mxu0 %v10733_v20  ;;  %4236 = vmatprep.mubr.f32.mxu1 %v10733_v20 }
 0x2cd   : > { %v2726_v56 = vpop.f32.mrf.mxu0  ;;  %v3066_v26 = vpop.f32.mrf.mxu1 }
 0x2ce   : > { %11161 = vst [vmem:[#allocation144_spill] sm:$0xff] %v8943_v3  ;;  %v8948_v36 = vadd.f32 %v3057_v59, %v2725_v23  ;;  %v2727_v40 = vadd.f32 %v2726_v56, %v8647_v50 }
 0x2cf   : > { %v2735_v13 = vpop.f32.mrf.mxu0  ;;  %3938 = vmatmul.mubr.f32.gmra.mxu0 %v11160_v4  ;;  %v3071_v12 = vpop.f32.mrf.mxu1  ;;  %4238 = vmatmul.mubr.f32.gmra.mxu1 %v11163_v11  ;;  %v11166_v4 = vld [vmem:[#allocation49_spill] sm:$0xff] }
 0x2d0   : > { %11162 = vst [vmem:[#allocation145_spill] sm:$0xff] %v8948_v36  ;;  %v8953_v21 = vadd.f32 %v3059_v63, %v2727_v40  ;;  %v2736_v62 = vadd.f32 %v2735_v13, %v8642_v2  ;;  %3943 = vmatprep.mubr.f32.mxu0 %v10733_v20  ;;  %4243 = vmatprep.mubr.f32.mxu1 %v10733_v20 }
 0x2d1   : > { %v2737_v6 = vpop.f32.mrf.mxu0  ;;  %v3073_v3 = vpop.f32.mrf.mxu1 }
 0x2d2   : > { %11164 = vst [vmem:[#allocation146_spill] sm:$0xff] %v8953_v21  ;;  %v8958_v59 = vadd.f32 %v3064_v29, %v2736_v62  ;;  %v2738_v23 = vadd.f32 %v2737_v6, %v8647_v50 }
 0x2d3   : > { %v2746_v56 = vpop.f32.mrf.mxu0  ;;  %3945 = vmatmul.mubr.f32.gmra.mxu0 %v11163_v11  ;;  %v3078_v36 = vpop.f32.mrf.mxu1  ;;  %4245 = vmatmul.mubr.f32.gmra.mxu1 %v11166_v4  ;;  %v11169_v11 = vld [vmem:[#allocation51_spill] sm:$0xff] }
 0x2d4   : > { %11165 = vst [vmem:[#allocation147_spill] sm:$0xff] %v8958_v59  ;;  %v8963_v63 = vadd.f32 %v3066_v26, %v2738_v23  ;;  %v2747_v40 = vadd.f32 %v2746_v56, %v8642_v2  ;;  %3950 = vmatprep.mubr.f32.mxu0 %v10733_v20  ;;  %4250 = vmatprep.mubr.f32.mxu1 %v10733_v20 }
 0x2d5   : > { %v2748_v13 = vpop.f32.mrf.mxu0  ;;  %v3080_v21 = vpop.f32.mrf.mxu1 }
 0x2d6   : > { %11167 = vst [vmem:[#allocation148_spill] sm:$0xff] %v8963_v63  ;;  %v8968_v29 = vadd.f32 %v3071_v12, %v2747_v40  ;;  %v2749_v62 = vadd.f32 %v2748_v13, %v8647_v50 }
 0x2d7   : > { %v2757_v6 = vpop.f32.mrf.mxu0  ;;  %3952 = vmatmul.mubr.f32.gmra.mxu0 %v11166_v4  ;;  %v3085_v59 = vpop.f32.mrf.mxu1  ;;  %4252 = vmatmul.mubr.f32.gmra.mxu1 %v11169_v11  ;;  %v11172_v4 = vld [vmem:[#allocation54_spill] sm:$0xff] }
 0x2d8   : > { %11168 = vst [vmem:[#allocation149_spill] sm:$0xff] %v8968_v29  ;;  %v8973_v26 = vadd.f32 %v3073_v3, %v2749_v62  ;;  %v2758_v23 = vadd.f32 %v2757_v6, %v8642_v2  ;;  %3957 = vmatprep.mubr.f32.mxu0 %v10733_v20  ;;  %4257 = vmatprep.mubr.f32.mxu1 %v10733_v20 }
 0x2d9   : > { %v2759_v56 = vpop.f32.mrf.mxu0  ;;  %v3087_v63 = vpop.f32.mrf.mxu1 }
 0x2da   : > { %11170 = vst [vmem:[#allocation150_spill] sm:$0xff] %v8973_v26  ;;  %v8978_v12 = vadd.f32 %v3078_v36, %v2758_v23  ;;  %v2760_v40 = vadd.f32 %v2759_v56, %v8647_v50 }
 0x2db   : > { %v2768_v13 = vpop.f32.mrf.mxu0  ;;  %3959 = vmatmul.mubr.f32.gmra.mxu0 %v11169_v11  ;;  %v3092_v29 = vpop.f32.mrf.mxu1  ;;  %4259 = vmatmul.mubr.f32.gmra.mxu1 %v11172_v4  ;;  %v11175_v11 = vld [vmem:[#allocation58_spill] sm:$0xff] }
 0x2dc   : > { %11171 = vst [vmem:[#allocation151_spill] sm:$0xff] %v8978_v12  ;;  %v8983_v3 = vadd.f32 %v3080_v21, %v2760_v40  ;;  %v2769_v62 = vadd.f32 %v2768_v13, %v8642_v2  ;;  %3964 = vmatprep.mubr.f32.mxu0 %v10733_v20  ;;  %4264 = vmatprep.mubr.f32.mxu1 %v10733_v20 }
 0x2dd   : > { %v2770_v6 = vpop.f32.mrf.mxu0  ;;  %v3094_v26 = vpop.f32.mrf.mxu1 }
 0x2de   : > { %11173 = vst [vmem:[#allocation152_spill] sm:$0xff] %v8983_v3  ;;  %v8988_v36 = vadd.f32 %v3085_v59, %v2769_v62  ;;  %v2771_v23 = vadd.f32 %v2770_v6, %v8647_v50 }
 0x2df   : > { %v2779_v56 = vpop.f32.mrf.mxu0  ;;  %3966 = vmatmul.mubr.f32.gmra.mxu0 %v11172_v4  ;;  %v3099_v12 = vpop.f32.mrf.mxu1  ;;  %4266 = vmatmul.mubr.f32.gmra.mxu1 %v11175_v11  ;;  %v11178_v4 = vld [vmem:[#allocation65_spill] sm:$0xff] }
 0x2e0   : > { %11174 = vst [vmem:[#allocation153_spill] sm:$0xff] %v8988_v36  ;;  %v8993_v21 = vadd.f32 %v3087_v63, %v2771_v23  ;;  %v2780_v40 = vadd.f32 %v2779_v56, %v8642_v2  ;;  %3971 = vmatprep.mubr.f32.mxu0 %v10733_v20  ;;  %4271 = vmatprep.mubr.f32.mxu1 %v10733_v20 }
 0x2e1   : > { %v2781_v13 = vpop.f32.mrf.mxu0  ;;  %v3101_v3 = vpop.f32.mrf.mxu1 }
 0x2e2   : > { %11176 = vst [vmem:[#allocation154_spill] sm:$0xff] %v8993_v21  ;;  %v8998_v59 = vadd.f32 %v3092_v29, %v2780_v40  ;;  %v2782_v62 = vadd.f32 %v2781_v13, %v8647_v50 }
 0x2e3   : > { %v2790_v6 = vpop.f32.mrf.mxu0  ;;  %3973 = vmatmul.mubr.f32.gmra.mxu0 %v11175_v11  ;;  %v3506_v36 = vpop.f32.mrf.mxu1  ;;  %4273 = vmatmul.mubr.f32.gmra.mxu1 %v11178_v4 }
 0x2e4   : > { %11177 = vst [vmem:[#allocation155_spill] sm:$0xff] %v8998_v59  ;;  %v9003_v63 = vadd.f32 %v3094_v26, %v2782_v62  ;;  %v2791_v23 = vadd.f32 %v2790_v6, %v8642_v2  ;;  %3978 = vmatprep.mubr.f32.mxu0 %v10733_v20  ;;  %4278 = vmatprep.mubr.f32.mxu1 %v10733_v20 }
 0x2e5   : > { %v2792_v56 = vpop.f32.mrf.mxu0  ;;  %v3508_v21 = vpop.f32.mrf.mxu1 }
 0x2e6   : > { %v9008_v29 = vadd.f32 %v3099_v12, %v2791_v23  ;;  %v2793_v40 = vadd.f32 %v2792_v56, %v8647_v50 }
 0x2e7   : > { %v3180_v13 = vpop.f32.mrf.mxu0  ;;  %3980 = vmatmul.mubr.f32.gmra.mxu0 %v11178_v4  ;;  %v3515_v59 = vpop.f32.mrf.mxu1  ;;  %4280 = vmatmul.mubr.f32.gmra.mxu1 %v10892_v1 }
 0x2e8   : > { %11179 = vst [vmem:[#allocation156_spill] sm:$0xff] %v9008_v29  ;;  %v9013_v26 = vadd.f32 %v3101_v3, %v2793_v40  ;;  %v3181_v2 = vadd.f32 %v3180_v13, %v8656_v55  ;;  %3985 = vmatprep.mubr.f32.mxu0 %v10733_v20  ;;  %4285 = vmatprep.mubr.f32.mxu1 %v10733_v20  ;;  %v11180_v29 = vld [vmem:[#allocation73_spill] sm:$0xff] }
 0x2e9   : > { %v3182_v62 = vpop.f32.mrf.mxu0  ;;  %v3517_v6 = vpop.f32.mrf.mxu1 }
 0x2ea   : > { %v9018_v12 = vadd.f32 %v3506_v36, %v3181_v2  ;;  %v3183_v50 = vadd.f32 %v3182_v62, %v8661_v60 }
 0x2eb   : > { %v3188_v23 = vpop.f32.mrf.mxu0  ;;  %3987 = vmatmul.mubr.f32.gmra.mxu0 %v10892_v1  ;;  %v3524_v56 = vpop.f32.mrf.mxu1  ;;  %4287 = vmatmul.mubr.f32.gmra.mxu1 %v11180_v29 }
 0x2ec   : > { %v9023_v3 = vadd.f32 %v3508_v21, %v3183_v50  ;;  %v3189_v55 = vadd.f32 %v3188_v23, %v8666_v30  ;;  %3992 = vmatprep.mubr.f32.mxu0 %v10733_v20  ;;  %4292 = vmatprep.mubr.f32.mxu1 %v10733_v20 }
 0x2ed   : > { %v3190_v40 = vpop.f32.mrf.mxu0  ;;  %v3526_v13 = vpop.f32.mrf.mxu1 }
 0x2ee   : > { %v9028_v36 = vadd.f32 %v3515_v59, %v3189_v55  ;;  %v3191_v60 = vadd.f32 %v3190_v40, %v8671_v31 }
 0x2ef   : > { %v3196_v2 = vpop.f32.mrf.mxu0  ;;  %3994 = vmatmul.mubr.f32.gmra.mxu0 %v11180_v29  ;;  %v3533_v62 = vpop.f32.mrf.mxu1  ;;  %4294 = vmatmul.mubr.f32.gmra.mxu1 %v10896_v58 }
 0x2f0   : > { %v9033_v21 = vadd.f32 %v3517_v6, %v3191_v60  ;;  %v3197_v30 = vadd.f32 %v3196_v2, %v8676_v49  ;;  %3999 = vmatprep.mubr.f32.mxu0 %v10733_v20  ;;  %4299 = vmatprep.mubr.f32.mxu1 %v10733_v20 }
 0x2f1   : > { %v3198_v50 = vpop.f32.mrf.mxu0  ;;  %v3535_v23 = vpop.f32.mrf.mxu1 }
 0x2f2   : > { %v9038_v59 = vadd.f32 %v3524_v56, %v3197_v30  ;;  %v3199_v31 = vadd.f32 %v3198_v50, %v8681_v35 }
 0x2f3   : > { %v3204_v55 = vpop.f32.mrf.mxu0  ;;  %4001 = vmatmul.mubr.f32.gmra.mxu0 %v10896_v58  ;;  %v3542_v40 = vpop.f32.mrf.mxu1  ;;  %4301 = vmatmul.mubr.f32.gmra.mxu1 %v10898_v34 }
 0x2f4   : > { %v9043_v6 = vadd.f32 %v3526_v13, %v3199_v31  ;;  %v3205_v49 = vadd.f32 %v3204_v55, %v8686_v10  ;;  %4006 = vmatprep.mubr.f32.mxu0 %v10733_v20  ;;  %4306 = vmatprep.mubr.f32.mxu1 %v10733_v20 }
 0x2f5   : > { %v3206_v60 = vpop.f32.mrf.mxu0  ;;  %v3544_v2 = vpop.f32.mrf.mxu1 }
 0x2f6   : > { %v9048_v56 = vadd.f32 %v3533_v62, %v3205_v49  ;;  %v3207_v35 = vadd.f32 %v3206_v60, %v8691_v32 }
 0x2f7   : > { %v3212_v30 = vpop.f32.mrf.mxu0  ;;  %4008 = vmatmul.mubr.f32.gmra.mxu0 %v10898_v34  ;;  %v3551_v50 = vpop.f32.mrf.mxu1  ;;  %4308 = vmatmul.mubr.f32.gmra.mxu1 %v10900_v0 }
 0x2f8   : > { %v9053_v13 = vadd.f32 %v3535_v23, %v3207_v35  ;;  %v3213_v10 = vadd.f32 %v3212_v30, %v8696_v57  ;;  %4013 = vmatprep.mubr.f32.mxu0 %v10733_v20  ;;  %4313 = vmatprep.mubr.f32.mxu1 %v10733_v20 }
 0x2f9   : > { %v3214_v31 = vpop.f32.mrf.mxu0  ;;  %v3553_v55 = vpop.f32.mrf.mxu1 }
 0x2fa   : > { %v9058_v62 = vadd.f32 %v3542_v40, %v3213_v10  ;;  %v3215_v32 = vadd.f32 %v3214_v31, %v8701_v39 }
 0x2fb   : > { %v3220_v49 = vpop.f32.mrf.mxu0  ;;  %4015 = vmatmul.mubr.f32.gmra.mxu0 %v10900_v0  ;;  %v3560_v60 = vpop.f32.mrf.mxu1  ;;  %4315 = vmatmul.mubr.f32.gmra.mxu1 %v10902_v42 }
 0x2fc   : > { %v9063_v23 = vadd.f32 %v3544_v2, %v3215_v32  ;;  %v3221_v57 = vadd.f32 %v3220_v49, %v8706_v7  ;;  %4020 = vmatprep.mubr.f32.mxu0 %v10733_v20  ;;  %4320 = vmatprep.mubr.f32.mxu1 %v10733_v20 }
 0x2fd   : > { %v3222_v35 = vpop.f32.mrf.mxu0  ;;  %v3562_v30 = vpop.f32.mrf.mxu1 }
 0x2fe   : > { %v9068_v40 = vadd.f32 %v3551_v50, %v3221_v57  ;;  %v3223_v39 = vadd.f32 %v3222_v35, %v8711_v47 }
 0x2ff   : > { %v3228_v10 = vpop.f32.mrf.mxu0  ;;  %4022 = vmatmul.mubr.f32.gmra.mxu0 %v10902_v42  ;;  %v3569_v31 = vpop.f32.mrf.mxu1  ;;  %4322 = vmatmul.mubr.f32.gmra.mxu1 %v10904_v52 }
 0x300   : > { %v9073_v2 = vadd.f32 %v3553_v55, %v3223_v39  ;;  %v3229_v7 = vadd.f32 %v3228_v10, %v8716_v45  ;;  %4027 = vmatprep.mubr.f32.mxu0 %v10733_v20  ;;  %4327 = vmatprep.mubr.f32.mxu1 %v10733_v20 }
 0x301   : > { %v3230_v32 = vpop.f32.mrf.mxu0  ;;  %v3571_v49 = vpop.f32.mrf.mxu1 }
 0x302   : > { %v9078_v50 = vadd.f32 %v3560_v60, %v3229_v7  ;;  %v3231_v47 = vadd.f32 %v3230_v32, %v8721_v51 }
 0x303   : > { %v3236_v57 = vpop.f32.mrf.mxu0  ;;  %4029 = vmatmul.mubr.f32.gmra.mxu0 %v10904_v52  ;;  %v3578_v35 = vpop.f32.mrf.mxu1  ;;  %4329 = vmatmul.mubr.f32.gmra.mxu1 %v10906_v46 }
 0x304   : > { %v9083_v55 = vadd.f32 %v3562_v30, %v3231_v47  ;;  %v3237_v45 = vadd.f32 %v3236_v57, %v8726_v27  ;;  %4034 = vmatprep.mubr.f32.mxu0 %v10733_v20  ;;  %4334 = vmatprep.mubr.f32.mxu1 %v10733_v20 }
 0x305   : > { %v3238_v39 = vpop.f32.mrf.mxu0  ;;  %v3580_v10 = vpop.f32.mrf.mxu1 }
 0x306   : > { %v9088_v60 = vadd.f32 %v3569_v31, %v3237_v45  ;;  %v3239_v51 = vadd.f32 %v3238_v39, %v8731_v41 }
 0x307   : > { %v3244_v7 = vpop.f32.mrf.mxu0  ;;  %4036 = vmatmul.mubr.f32.gmra.mxu0 %v10906_v46  ;;  %v3587_v32 = vpop.f32.mrf.mxu1  ;;  %4336 = vmatmul.mubr.f32.gmra.mxu1 %v10908_v8 }
 0x308   : > { %v9093_v30 = vadd.f32 %v3571_v49, %v3239_v51  ;;  %v3245_v27 = vadd.f32 %v3244_v7, %v8736_v44  ;;  %4041 = vmatprep.mubr.f32.mxu0 %v10733_v20  ;;  %4341 = vmatprep.mubr.f32.mxu1 %v10733_v20 }
 0x309   : > { %v3246_v47 = vpop.f32.mrf.mxu0  ;;  %v3589_v57 = vpop.f32.mrf.mxu1 }
 0x30a   : > { %v9098_v31 = vadd.f32 %v3578_v35, %v3245_v27  ;;  %v3247_v41 = vadd.f32 %v3246_v47, %v8744_v33 }
 0x30b   : > { %v3252_v45 = vpop.f32.mrf.mxu0  ;;  %4043 = vmatmul.mubr.f32.gmra.mxu0 %v10908_v8  ;;  %v3596_v39 = vpop.f32.mrf.mxu1  ;;  %4343 = vmatmul.mubr.f32.gmra.mxu1 %v10910_v37 }
 0x30c   : > { %v9103_v49 = vadd.f32 %v3580_v10, %v3247_v41  ;;  %v3253_v44 = vadd.f32 %v3252_v45, %v8750_v15  ;;  %4048 = vmatprep.mubr.f32.mxu0 %v10733_v20  ;;  %4348 = vmatprep.mubr.f32.mxu1 %v10733_v20 }
 0x30d   : > { %v3254_v51 = vpop.f32.mrf.mxu0  ;;  %v3598_v7 = vpop.f32.mrf.mxu1 }
 0x30e   : > { %v9108_v35 = vadd.f32 %v3587_v32, %v3253_v44  ;;  %v3255_v33 = vadd.f32 %v3254_v51, %v8761_v18 }
 0x30f   : > { %v3260_v27 = vpop.f32.mrf.mxu0  ;;  %4050 = vmatmul.mubr.f32.gmra.mxu0 %v10910_v37  ;;  %v3605_v47 = vpop.f32.mrf.mxu1  ;;  %4350 = vmatmul.mubr.f32.gmra.mxu1 %v10912_v54 }
 0x310   : > { %v9113_v10 = vadd.f32 %v3589_v57, %v3255_v33  ;;  %v3261_v15 = vadd.f32 %v3260_v27, %v8770_v5  ;;  %4055 = vmatprep.mubr.f32.mxu0 %v10733_v20  ;;  %4355 = vmatprep.mubr.f32.mxu1 %v10733_v20 }
 0x311   : > { %v3262_v41 = vpop.f32.mrf.mxu0  ;;  %v3607_v45 = vpop.f32.mrf.mxu1 }
 0x312   : > { %v9118_v32 = vadd.f32 %v3596_v39, %v3261_v15  ;;  %v3263_v18 = vadd.f32 %v3262_v41, %v8777_v28 }
 0x313   : > { %v3268_v44 = vpop.f32.mrf.mxu0  ;;  %4057 = vmatmul.mubr.f32.gmra.mxu0 %v10912_v54  ;;  %v3614_v51 = vpop.f32.mrf.mxu1  ;;  %4357 = vmatmul.mubr.f32.gmra.mxu1 %v10913_v14 }
 0x314   : > { %11181 = vst [vmem:[#allocation157_spill] sm:$0xff] %v9118_v32  ;;  %v9123_v57 = vadd.f32 %v3598_v7, %v3263_v18  ;;  %v3269_v5 = vadd.f32 %v3268_v44, %v8788_v19  ;;  %4062 = vmatprep.mubr.f32.mxu0 %v10733_v20  ;;  %4362 = vmatprep.mubr.f32.mxu1 %v10733_v20  ;;  %v11184_v32 = vld [vmem:[#allocation117_spill] sm:$0xff]  ;;  %v11186_v18 = vld [vmem:[#allocation167_spill] sm:$0xff] }
 0x315   : > { %v3270_v33 = vpop.f32.mrf.mxu0  ;;  %v3616_v27 = vpop.f32.mrf.mxu1 }
 0x316   : > { %11182 = vst [vmem:[#allocation158_spill] sm:$0xff] %v9123_v57  ;;  %v9128_v39 = vadd.f32 %v3605_v47, %v3269_v5  ;;  %v3271_v28 = vadd.f32 %v3270_v33, %v8796_v17  ;;  %v11188_v5 = vld [vmem:[#allocation74_spill] sm:$0xff] }
 0x317   : > { %v3276_v15 = vpop.f32.mrf.mxu0  ;;  %4064 = vmatmul.mubr.f32.gmra.mxu0 %v10913_v14  ;;  %v3623_v41 = vpop.f32.mrf.mxu1  ;;  %4364 = vmatmul.mubr.f32.gmra.mxu1 %v11184_v32  ;;  %v11189_v14 = vld [vmem:[#allocation118_spill] sm:$0xff] }
 0x318   : > { %11183 = vst [vmem:[#allocation159_spill] sm:$0xff] %v9128_v39  ;;  %v9133_v7 = vadd.f32 %v3607_v45, %v3271_v28  ;;  %v3277_v19 = vadd.f32 %v3276_v15, %v11186_v18  ;;  %4069 = vmatprep.mubr.f32.mxu0 %v10733_v20  ;;  %4369 = vmatprep.mubr.f32.mxu1 %v10733_v20  ;;  %v11190_v28 = vld [vmem:[#allocation81_spill] sm:$0xff] }
 0x319   : > { %v3278_v44 = vpop.f32.mrf.mxu0  ;;  %v3625_v57 = vpop.f32.mrf.mxu1 }
 0x31a   : > { %11185 = vst [vmem:[#allocation65_spill] sm:$0xff] %v9133_v7  ;;  %v9138_v47 = vadd.f32 %v3614_v51, %v3277_v19  ;;  %v3279_v17 = vadd.f32 %v3278_v44, %v11188_v5 }
 0x31b   : > { %v3284_v33 = vpop.f32.mrf.mxu0  ;;  %4071 = vmatmul.mubr.f32.gmra.mxu0 %v11184_v32  ;;  %v3632_v39 = vpop.f32.mrf.mxu1  ;;  %4371 = vmatmul.mubr.f32.gmra.mxu1 %v11189_v14 }
 0x31c   : > { %11187 = vst [vmem:[#allocation73_spill] sm:$0xff] %v9138_v47  ;;  %v9143_v45 = vadd.f32 %v3616_v27, %v3279_v17  ;;  %v3285_v15 = vadd.f32 %v3284_v33, %v11190_v28  ;;  %4076 = vmatprep.mubr.f32.mxu0 %v10733_v20  ;;  %4376 = vmatprep.mubr.f32.mxu1 %v10733_v20  ;;  %v11191_v47 = vld [vmem:[#allocation122_spill] sm:$0xff] }
 0x31d   : > { %v3286_v18 = vpop.f32.mrf.mxu0  ;;  %v3634_v7 = vpop.f32.mrf.mxu1 }
 0x31e   : > { %v9148_v51 = vadd.f32 %v3623_v41, %v3285_v15  ;;  %v3287_v19 = vadd.f32 %v3286_v18, %v8828_v43 }
 0x31f   : > { %v3292_v44 = vpop.f32.mrf.mxu0  ;;  %4078 = vmatmul.mubr.f32.gmra.mxu0 %v11189_v14  ;;  %v3641_v5 = vpop.f32.mrf.mxu1  ;;  %4378 = vmatmul.mubr.f32.gmra.mxu1 %v11191_v47 }
 0x320   : > { %v9153_v27 = vadd.f32 %v3625_v57, %v3287_v19  ;;  %v3293_v17 = vadd.f32 %v3292_v44, %v8833_v38  ;;  %4083 = vmatprep.mubr.f32.mxu0 %v10733_v20  ;;  %4889 = vmatprep.mubr.f32.mxu1 %v10733_v20 }
 0x321   : > { %v3294_v33 = vpop.f32.mrf.mxu0  ;;  %v3643_v28 = vpop.f32.mrf.mxu1 }
 0x322   : > { %v9158_v41 = vadd.f32 %v3632_v39, %v3293_v17  ;;  %v3295_v43 = vadd.f32 %v3294_v33, %v8838_v9  ;;  %v11192_v17 = vld [vmem:[#allocation17_spill] sm:$0xff] }
 0x323   : > { %v3300_v15 = vpop.f32.mrf.mxu0  ;;  %4085 = vmatmul.mubr.f32.gmra.mxu0 %v11191_v47  ;;  %v3650_v18 = vpop.f32.mrf.mxu1  ;;  %4891 = vmatmul.mubr.f32.vlgmr.msra.gmra.mxu1 %v11133_v24  ;;  %v11195_v24 = vld [vmem:[#allocation165_spill] sm:$0xff] }
 0x324   : > { %v9163_v57 = vadd.f32 %v3634_v7, %v3295_v43  ;;  %v3301_v38 = vadd.f32 %v3300_v15, %v8843_v53  ;;  %4452 = vmatprep.mubr.f32.mxu0 %v10733_v20  ;;  %5474 = vmatpush1.msra.mxu1 %v8766_v61  ;;  %v11194_v43 = vld [vmem:[#allocation82_spill] sm:$0xff] }
 0x325   : > { %v3302_v19 = vpop.f32.mrf.mxu0  ;;  %v3652_v44 = vpop.f32.mrf.mxu1  ;;  %4896 = vmatprep.mubr.f32.mxu1 %v10733_v20  ;;  %5476 = vmatprep.subr.mxu1 %v8768_v48  ;;  %v11199_v48 = vld [vmem:[#allocation69_spill] sm:$0xff] }
 0x326   : > { %v9170_v9 = vadd.f32 %v3641_v5, %v3301_v38  ;;  %v3303_v39 = vadd.f32 %v3302_v19, %v8848_v25  ;;  %5478 = vmatpush1.msra.mxu1 %v8773_v22  ;;  %v11196_v25 = vld [vmem:[#allocation166_spill] sm:$0xff] }
 0x327   : > { %v3308_v7 = vpop.f32.mrf.mxu0  ;;  %4458 = vmatmul.mubr.f32.vlgmr.msra.gmra.mxu0 %v11192_v17  ;;  %v3659_v53 = vpop.f32.mrf.mxu1  ;;  %4898 = vmatmul.mubr.f32.gmra.mxu1 %v11134_v16  ;;  %v11198_v17 = vld [vmem:[#allocation89_spill] sm:$0xff]  ;;  %v11202_v16 = vld [vmem:[#allocation7_spill] sm:$0xff] }
 0x328   : > { %v9176_v33 = vadd.f32 %v3643_v28, %v3303_v39  ;;  %v3309_v15 = vadd.f32 %v3308_v7, %v11194_v43  ;;  %5147 = vmatpush1.msra.mxu0 %v11195_v24  ;;  %4463 = vmatprep.mubr.f32.mxu0 %v10733_v20  ;;  %v11200_v28 = vld [vmem:[#allocation160_spill] sm:$0xff]  ;;  %v11201_v7 = vld [vmem:[#allocation19_spill] sm:$0xff] }
 0x329   : > { %v3310_v5 = vpop.f32.mrf.mxu0  ;;  %v3661_v38 = vpop.f32.mrf.mxu1  ;;  %4903 = vmatprep.mubr.f32.mxu1 %v10733_v20  ;;  %5150 = vmatprep.subr.mxu0 %v11196_v25 }
 0x32a   : > { %11193 = vst [vmem:[#allocation117_spill] sm:$0xff] %v9176_v33  ;;  %v9183_v19 = vadd.f32 %v3650_v18, %v3309_v15  ;;  %v3311_v22 = vadd.f32 %v3310_v5, %v11198_v17  ;;  %5153 = vmatpush1.msra.mxu0 %v11199_v48  ;;  %6130 = vmatprep.subr.mxu1 %v11200_v28  ;;  %v11204_v33 = vld [vmem:[#allocation90_spill] sm:$0xff]  ;;  %v11205_v5 = vld [vmem:[#allocation161_spill] sm:$0xff] }
 0x32b   : > { %v3316_v39 = vpop.f32.mrf.mxu0  ;;  %4469 = vmatmul.mubr.f32.gmra.mxu0 %v11201_v7  ;;  %v3668_v43 = vpop.f32.mrf.mxu1  ;;  %4905 = vmatmul.mubr.f32.gmra.mxu1 %v11202_v16  ;;  %v11206_v17 = vand.u32 4294901760, %v11205_v5  ;;  %v11208_v48 = vld [vmem:[#allocation97_spill] sm:$0xff] }
 0x32c   : > { %11197 = vst [vmem:[#allocation167_spill] sm:$0xff] %v9183_v19  ;;  %v9190_v24 = vadd.f32 %v3652_v44, %v3311_v22  ;;  %v3317_v61 = vadd.f32 %v3316_v39, %v11204_v33  ;;  %4474 = vmatprep.mubr.f32.mxu0 %v10733_v20  ;;  %4910 = vmatprep.mubr.f32.mxu1 %v10733_v20  ;;  %v11209_v19 = vld [vmem:[#allocation24_spill] sm:$0xff]  ;;  %v11210_v44 = vld [vmem:[#allocation9_spill] sm:$0xff] }
 0x32d   : > { %v3318_v18 = vpop.f32.mrf.mxu0  ;;  %v3670_v15 = vpop.f32.mrf.mxu1  ;;  %5831 = vmatprep.subr.mxu0 %v11206_v17  ;;  %v11212_v39 = vld [vmem:[#allocation101_spill] sm:$0xff] }
 0x32e   : > { %11203 = vst [vmem:[#allocation74_spill] sm:$0xff] %v9190_v24  ;;  %v9197_v28 = vadd.f32 %v3659_v53, %v3317_v61  ;;  %v3319_v7 = vadd.f32 %v3318_v18, %v11208_v48  ;;  %v11214_v53 = vld [vmem:[#allocation105_spill] sm:$0xff]  ;;  %v11216_v24 = vld [vmem:[#allocation14_spill] sm:$0xff] }
 0x32f   : > { %v3324_v25 = vpop.f32.mrf.mxu0  ;;  %4480 = vmatmul.mubr.f32.gmra.mxu0 %v11209_v19  ;;  %v3677_v22 = vpop.f32.mrf.mxu1  ;;  %4912 = vmatmul.mubr.f32.gmra.mxu1 %v11210_v44 }
 0x330   : > { %11207 = vst [vmem:[#allocation118_spill] sm:$0xff] %v9197_v28  ;;  %v9202_v33 = vadd.f32 %v3661_v38, %v3319_v7  ;;  %v3325_v16 = vadd.f32 %v3324_v25, %v11212_v39  ;;  %4485 = vmatprep.mubr.f32.mxu0 %v10733_v20  ;;  %4917 = vmatprep.mubr.f32.mxu1 %v10733_v20  ;;  %v11215_v28 = vld [vmem:[#allocation29_spill] sm:$0xff]  ;;  %v11218_v7 = vld [vmem:[#allocation136_spill] sm:$0xff] }
 0x331   : > { %v3326_v5 = vpop.f32.mrf.mxu0  ;;  %v3679_v17 = vpop.f32.mrf.mxu1 }
 0x332   : > { %11211 = vst [vmem:[#allocation81_spill] sm:$0xff] %v9202_v33  ;;  %v9207_v61 = vadd.f32 %v3668_v43, %v3325_v16  ;;  %v3327_v48 = vadd.f32 %v3326_v5, %v11214_v53  ;;  %v11220_v43 = vld [vmem:[#allocation137_spill] sm:$0xff]  ;;  %v11222_v33 = vld [vmem:[#allocation18_spill] sm:$0xff] }
 0x333   : > { %v3332_v18 = vpop.f32.mrf.mxu0  ;;  %4491 = vmatmul.mubr.f32.gmra.mxu0 %v11215_v28  ;;  %v3686_v19 = vpop.f32.mrf.mxu1  ;;  %4919 = vmatmul.mubr.f32.gmra.mxu1 %v11216_v24 }
 0x334   : > { %11213 = vst [vmem:[#allocation122_spill] sm:$0xff] %v9207_v61  ;;  %v9212_v38 = vadd.f32 %v3670_v15, %v3327_v48  ;;  %v3333_v25 = vadd.f32 %v3332_v18, %v11218_v7  ;;  %4496 = vmatprep.mubr.f32.mxu0 %v10733_v20  ;;  %4924 = vmatprep.mubr.f32.mxu1 %v10733_v20  ;;  %v11221_v61 = vld [vmem:[#allocation32_spill] sm:$0xff]  ;;  %v11224_v48 = vld [vmem:[#allocation106_spill] sm:$0xff] }
 0x335   : > { %v3334_v39 = vpop.f32.mrf.mxu0  ;;  %v3688_v44 = vpop.f32.mrf.mxu1 }
 0x336   : > { %11217 = vst [vmem:[#allocation17_spill] sm:$0xff] %v9212_v38  ;;  %v9217_v16 = vadd.f32 %v3677_v22, %v3333_v25  ;;  %v3335_v5 = vadd.f32 %v3334_v39, %v11220_v43  ;;  %v11226_v25 = vld [vmem:[#allocation138_spill] sm:$0xff]  ;;  %v11228_v38 = vld [vmem:[#allocation23_spill] sm:$0xff] }
 0x337   : > { %v3340_v53 = vpop.f32.mrf.mxu0  ;;  %4502 = vmatmul.mubr.f32.gmra.mxu0 %v11221_v61  ;;  %v3695_v28 = vpop.f32.mrf.mxu1  ;;  %4926 = vmatmul.mubr.f32.gmra.mxu1 %v11222_v33 }
 0x338   : > { %11219 = vst [vmem:[#allocation82_spill] sm:$0xff] %v9217_v16  ;;  %v9222_v15 = vadd.f32 %v3679_v17, %v3335_v5  ;;  %v3341_v18 = vadd.f32 %v3340_v53, %v11224_v48  ;;  %4507 = vmatprep.mubr.f32.mxu0 %v10733_v20  ;;  %4931 = vmatprep.mubr.f32.mxu1 %v10733_v20  ;;  %v11227_v16 = vld [vmem:[#allocation34_spill] sm:$0xff]  ;;  %v11230_v5 = vld [vmem:[#allocation133_spill] sm:$0xff] }
 0x339   : > { %v3342_v7 = vpop.f32.mrf.mxu0  ;;  %v3697_v24 = vpop.f32.mrf.mxu1 }
 0x33a   : > { %11223 = vst [vmem:[#allocation89_spill] sm:$0xff] %v9222_v15  ;;  %v9227_v22 = vadd.f32 %v3686_v19, %v3341_v18  ;;  %v3343_v39 = vadd.f32 %v3342_v7, %v11226_v25  ;;  %v11232_v18 = vld [vmem:[#allocation139_spill] sm:$0xff]  ;;  %v11234_v15 = vld [vmem:[#allocation28_spill] sm:$0xff] }
 0x33b   : > { %v3348_v43 = vpop.f32.mrf.mxu0  ;;  %4513 = vmatmul.mubr.f32.gmra.mxu0 %v11227_v16  ;;  %v3704_v61 = vpop.f32.mrf.mxu1  ;;  %4933 = vmatmul.mubr.f32.gmra.mxu1 %v11228_v38 }
 0x33c   : > { %11225 = vst [vmem:[#allocation160_spill] sm:$0xff] %v9227_v22  ;;  %v9232_v17 = vadd.f32 %v3688_v44, %v3343_v39  ;;  %v3349_v53 = vadd.f32 %v3348_v43, %v11230_v5  ;;  %4518 = vmatprep.mubr.f32.mxu0 %v10733_v20  ;;  %4938 = vmatprep.mubr.f32.mxu1 %v10733_v20  ;;  %v11233_v22 = vld [vmem:[#allocation38_spill] sm:$0xff] }
 0x33d   : > { %v3350_v48 = vpop.f32.mrf.mxu0  ;;  %v3706_v33 = vpop.f32.mrf.mxu1  ;;  %v11236_v39 = vld [vmem:[#allocation134_spill] sm:$0xff] }
 0x33e   : > { %11229 = vst [vmem:[#allocation19_spill] sm:$0xff] %v9232_v17  ;;  %v9237_v19 = vadd.f32 %v3695_v28, %v3349_v53  ;;  %v3351_v7 = vadd.f32 %v3350_v48, %v11232_v18  ;;  %v11238_v53 = vld [vmem:[#allocation140_spill] sm:$0xff]  ;;  %v11240_v17 = vld [vmem:[#allocation33_spill] sm:$0xff] }
 0x33f   : > { %v3356_v25 = vpop.f32.mrf.mxu0  ;;  %4524 = vmatmul.mubr.f32.gmra.mxu0 %v11233_v22  ;;  %v3713_v16 = vpop.f32.mrf.mxu1  ;;  %4940 = vmatmul.mubr.f32.gmra.mxu1 %v11234_v15 }
 0x340   : > { %11231 = vst [vmem:[#allocation90_spill] sm:$0xff] %v9237_v19  ;;  %v9242_v44 = vadd.f32 %v3697_v24, %v3351_v7  ;;  %v3357_v43 = vadd.f32 %v3356_v25, %v11236_v39  ;;  %4529 = vmatprep.mubr.f32.mxu0 %v10733_v20  ;;  %4945 = vmatprep.mubr.f32.mxu1 %v10733_v20  ;;  %v11239_v19 = vld [vmem:[#allocation43_spill] sm:$0xff]  ;;  %v11242_v7 = vld [vmem:[#allocation141_spill] sm:$0xff] }
 0x341   : > { %v3358_v5 = vpop.f32.mrf.mxu0  ;;  %v3715_v38 = vpop.f32.mrf.mxu1 }
 0x342   : > { %11235 = vst [vmem:[#allocation161_spill] sm:$0xff] %v9242_v44  ;;  %v9247_v28 = vadd.f32 %v3704_v61, %v3357_v43  ;;  %v3359_v48 = vadd.f32 %v3358_v5, %v11238_v53  ;;  %v11244_v43 = vld [vmem:[#allocation142_spill] sm:$0xff]  ;;  %v11246_v44 = vld [vmem:[#allocation37_spill] sm:$0xff] }
 0x343   : > { %v3364_v18 = vpop.f32.mrf.mxu0  ;;  %4535 = vmatmul.mubr.f32.gmra.mxu0 %v11239_v19  ;;  %v3722_v22 = vpop.f32.mrf.mxu1  ;;  %4947 = vmatmul.mubr.f32.gmra.mxu1 %v11240_v17 }
 0x344   : > { %11237 = vst [vmem:[#allocation97_spill] sm:$0xff] %v9247_v28  ;;  %v9252_v24 = vadd.f32 %v3706_v33, %v3359_v48  ;;  %v3365_v25 = vadd.f32 %v3364_v18, %v11242_v7  ;;  %4540 = vmatprep.mubr.f32.mxu0 %v10733_v20  ;;  %4952 = vmatprep.mubr.f32.mxu1 %v10733_v20  ;;  %v11245_v28 = vld [vmem:[#allocation47_spill] sm:$0xff] }
 0x345   : > { %v3366_v39 = vpop.f32.mrf.mxu0  ;;  %v3724_v15 = vpop.f32.mrf.mxu1  ;;  %v11248_v48 = vld [vmem:[#allocation143_spill] sm:$0xff] }
 0x346   : > { %11241 = vst [vmem:[#allocation24_spill] sm:$0xff] %v9252_v24  ;;  %v9257_v61 = vadd.f32 %v3713_v16, %v3365_v25  ;;  %v3367_v5 = vadd.f32 %v3366_v39, %v11244_v43  ;;  %v11250_v25 = vld [vmem:[#allocation144_spill] sm:$0xff]  ;;  %v11252_v24 = vld [vmem:[#allocation41_spill] sm:$0xff] }
 0x347   : > { %v3372_v53 = vpop.f32.mrf.mxu0  ;;  %4546 = vmatmul.mubr.f32.gmra.mxu0 %v11245_v28  ;;  %v3731_v19 = vpop.f32.mrf.mxu1  ;;  %4954 = vmatmul.mubr.f32.gmra.mxu1 %v11246_v44 }
 0x348   : > { %11243 = vst [vmem:[#allocation101_spill] sm:$0xff] %v9257_v61  ;;  %v9262_v33 = vadd.f32 %v3715_v38, %v3367_v5  ;;  %v3373_v18 = vadd.f32 %v3372_v53, %v11248_v48  ;;  %4551 = vmatprep.mubr.f32.mxu0 %v10733_v20  ;;  %4959 = vmatprep.mubr.f32.mxu1 %v10733_v20  ;;  %v11251_v61 = vld [vmem:[#allocation52_spill] sm:$0xff]  ;;  %v11254_v5 = vld [vmem:[#allocation145_spill] sm:$0xff] }
 0x349   : > { %v3374_v7 = vpop.f32.mrf.mxu0  ;;  %v3733_v17 = vpop.f32.mrf.mxu1 }
 0x34a   : > { %11247 = vst [vmem:[#allocation105_spill] sm:$0xff] %v9262_v33  ;;  %v9267_v16 = vadd.f32 %v3722_v22, %v3373_v18  ;;  %v3375_v39 = vadd.f32 %v3374_v7, %v11250_v25  ;;  %v11256_v18 = vld [vmem:[#allocation146_spill] sm:$0xff] }
 0x34b   : > { %v3380_v43 = vpop.f32.mrf.mxu0  ;;  %4557 = vmatmul.mubr.f32.gmra.mxu0 %v11251_v61  ;;  %v3740_v28 = vpop.f32.mrf.mxu1  ;;  %4961 = vmatmul.mubr.f32.gmra.mxu1 %v11252_v24  ;;  %v11258_v33 = vld [vmem:[#allocation42_spill] sm:$0xff] }
 0x34c   : > { %11249 = vst [vmem:[#allocation29_spill] sm:$0xff] %v9267_v16  ;;  %v9272_v38 = vadd.f32 %v3724_v15, %v3375_v39  ;;  %v3381_v53 = vadd.f32 %v3380_v43, %v11254_v5  ;;  %4562 = vmatprep.mubr.f32.mxu0 %v10733_v20  ;;  %4966 = vmatprep.mubr.f32.mxu1 %v10733_v20  ;;  %v11257_v16 = vld [vmem:[#allocation55_spill] sm:$0xff] }
 0x34d   : > { %v3382_v48 = vpop.f32.mrf.mxu0  ;;  %v3742_v44 = vpop.f32.mrf.mxu1  ;;  %v11260_v39 = vld [vmem:[#allocation147_spill] sm:$0xff] }
 0x34e   : > { %11253 = vst [vmem:[#allocation136_spill] sm:$0xff] %v9272_v38  ;;  %v9277_v22 = vadd.f32 %v3731_v19, %v3381_v53  ;;  %v3383_v7 = vadd.f32 %v3382_v48, %v11256_v18  ;;  %v11262_v53 = vld [vmem:[#allocation148_spill] sm:$0xff]  ;;  %v11264_v38 = vld [vmem:[#allocation49_spill] sm:$0xff] }
 0x34f   : > { %v3388_v25 = vpop.f32.mrf.mxu0  ;;  %4568 = vmatmul.mubr.f32.gmra.mxu0 %v11257_v16  ;;  %v3749_v61 = vpop.f32.mrf.mxu1  ;;  %4968 = vmatmul.mubr.f32.gmra.mxu1 %v11258_v33 }
 0x350   : > { %11255 = vst [vmem:[#allocation137_spill] sm:$0xff] %v9277_v22  ;;  %v9282_v15 = vadd.f32 %v3733_v17, %v3383_v7  ;;  %v3389_v43 = vadd.f32 %v3388_v25, %v11260_v39  ;;  %4573 = vmatprep.mubr.f32.mxu0 %v10733_v20  ;;  %4973 = vmatprep.mubr.f32.mxu1 %v10733_v20  ;;  %v11263_v22 = vld [vmem:[#allocation59_spill] sm:$0xff]  ;;  %v11266_v7 = vld [vmem:[#allocation149_spill] sm:$0xff] }
 0x351   : > { %v3390_v5 = vpop.f32.mrf.mxu0  ;;  %v3751_v24 = vpop.f32.mrf.mxu1 }
 0x352   : > { %11259 = vst [vmem:[#allocation32_spill] sm:$0xff] %v9282_v15  ;;  %v9287_v19 = vadd.f32 %v3740_v28, %v3389_v43  ;;  %v3391_v48 = vadd.f32 %v3390_v5, %v11262_v53  ;;  %v11268_v43 = vld [vmem:[#allocation150_spill] sm:$0xff]  ;;  %v11270_v15 = vld [vmem:[#allocation51_spill] sm:$0xff] }
 0x353   : > { %v3396_v18 = vpop.f32.mrf.mxu0  ;;  %4579 = vmatmul.mubr.f32.gmra.mxu0 %v11263_v22  ;;  %v3758_v16 = vpop.f32.mrf.mxu1  ;;  %4975 = vmatmul.mubr.f32.gmra.mxu1 %v11264_v38 }
 0x354   : > { %11261 = vst [vmem:[#allocation106_spill] sm:$0xff] %v9287_v19  ;;  %v9292_v17 = vadd.f32 %v3742_v44, %v3391_v48  ;;  %v3397_v25 = vadd.f32 %v3396_v18, %v11266_v7  ;;  %4584 = vmatprep.mubr.f32.mxu0 %v10733_v20  ;;  %4980 = vmatprep.mubr.f32.mxu1 %v10733_v20  ;;  %v11269_v19 = vld [vmem:[#allocation63_spill] sm:$0xff] }
 0x355   : > { %v3398_v39 = vpop.f32.mrf.mxu0  ;;  %v3760_v33 = vpop.f32.mrf.mxu1  ;;  %v11271_v48 = vld [vmem:[#allocation151_spill] sm:$0xff] }
 0x356   : > { %11265 = vst [vmem:[#allocation138_spill] sm:$0xff] %v9292_v17  ;;  %v9297_v28 = vadd.f32 %v3749_v61, %v3397_v25  ;;  %v3399_v5 = vadd.f32 %v3398_v39, %v11268_v43  ;;  %v11273_v25 = vld [vmem:[#allocation152_spill] sm:$0xff]  ;;  %v11275_v17 = vld [vmem:[#allocation54_spill] sm:$0xff] }
 0x357   : > { %v3404_v53 = vpop.f32.mrf.mxu0  ;;  %4590 = vmatmul.mubr.f32.gmra.mxu0 %v11269_v19  ;;  %v3767_v22 = vpop.f32.mrf.mxu1  ;;  %4982 = vmatmul.mubr.f32.gmra.mxu1 %v11270_v15 }
 0x358   : > { %11267 = vst [vmem:[#allocation34_spill] sm:$0xff] %v9297_v28  ;;  %v9302_v44 = vadd.f32 %v3751_v24, %v3399_v5  ;;  %v3405_v18 = vadd.f32 %v3404_v53, %v11271_v48  ;;  %4595 = vmatprep.mubr.f32.mxu0 %v10733_v20  ;;  %4987 = vmatprep.mubr.f32.mxu1 %v10733_v20  ;;  %v11274_v28 = vld [vmem:[#allocation67_spill] sm:$0xff]  ;;  %v11276_v5 = vld [vmem:[#allocation153_spill] sm:$0xff] }
 0x359   : > { %v3406_v7 = vpop.f32.mrf.mxu0  ;;  %v3769_v38 = vpop.f32.mrf.mxu1 }
 0x35a   : > { %v9307_v61 = vadd.f32 %v3758_v16, %v3405_v18  ;;  %v3407_v39 = vadd.f32 %v3406_v7, %v11273_v25  ;;  %v11277_v18 = vld [vmem:[#allocation154_spill] sm:$0xff] }
 0x35b   : > { %v3412_v43 = vpop.f32.mrf.mxu0  ;;  %4601 = vmatmul.mubr.f32.gmra.mxu0 %v11274_v28  ;;  %v3776_v19 = vpop.f32.mrf.mxu1  ;;  %4989 = vmatmul.mubr.f32.gmra.mxu1 %v11275_v17 }
 0x35c   : > { %11272 = vst [vmem:[#allocation133_spill] sm:$0xff] %v9307_v61  ;;  %v9312_v24 = vadd.f32 %v3760_v33, %v3407_v39  ;;  %v3413_v53 = vadd.f32 %v3412_v43, %v11276_v5  ;;  %4606 = vmatprep.mubr.f32.mxu0 %v10733_v20  ;;  %4994 = vmatprep.mubr.f32.mxu1 %v10733_v20  ;;  %v11278_v61 = vld [vmem:[#allocation70_spill] sm:$0xff]  ;;  %v11279_v39 = vld [vmem:[#allocation155_spill] sm:$0xff] }
 0x35d   : > { %v3414_v48 = vpop.f32.mrf.mxu0  ;;  %v3778_v15 = vpop.f32.mrf.mxu1 }
 0x35e   : > { %v9317_v16 = vadd.f32 %v3767_v22, %v3413_v53  ;;  %v3415_v7 = vadd.f32 %v3414_v48, %v11277_v18  ;;  %v11280_v18 = vld [vmem:[#allocation75_spill] sm:$0xff] }
 0x35f   : > { %v3420_v25 = vpop.f32.mrf.mxu0  ;;  %4612 = vmatmul.mubr.f32.gmra.mxu0 %v11278_v61  ;;  %v3785_v28 = vpop.f32.mrf.mxu1  ;;  %4996 = vmatmul.mubr.f32.gmra.mxu1 %v11175_v11 }
 0x360   : > { %v9322_v33 = vadd.f32 %v3769_v38, %v3415_v7  ;;  %v3421_v43 = vadd.f32 %v3420_v25, %v11279_v39  ;;  %4617 = vmatprep.mubr.f32.mxu0 %v10733_v20  ;;  %5001 = vmatprep.mubr.f32.mxu1 %v10733_v20  ;;  %v11281_v7 = vld [vmem:[#allocation156_spill] sm:$0xff] }
 0x361   : > { %v3422_v5 = vpop.f32.mrf.mxu0  ;;  %v3787_v17 = vpop.f32.mrf.mxu1 }
 0x362   : > { %v9327_v22 = vadd.f32 %v3776_v19, %v3421_v43  ;;  %v3423_v53 = vadd.f32 %v3422_v5, %v9003_v63  ;;  %v11282_v5 = vld [vmem:[#allocation79_spill] sm:$0xff] }
 0x363   : > { %v3428_v48 = vpop.f32.mrf.mxu0  ;;  %4623 = vmatmul.mubr.f32.gmra.mxu0 %v11280_v18  ;;  %v4162_v61 = vpop.f32.mrf.mxu1  ;;  %5003 = vmatmul.mubr.f32.gmra.mxu1 %v11178_v4 }
 0x364   : > { %v9332_v38 = vadd.f32 %v3778_v15, %v3423_v53  ;;  %v3429_v25 = vadd.f32 %v3428_v48, %v11281_v7  ;;  %4628 = vmatprep.mubr.f32.mxu0 %v10733_v20  ;;  %5008 = vmatprep.mubr.f32.mxu1 %v10733_v20 }
 0x365   : > { %v3430_v39 = vpop.f32.mrf.mxu0  ;;  %v4164_v11 = vpop.f32.mrf.mxu1 }
 0x366   : > { %v9337_v19 = vadd.f32 %v3785_v28, %v3429_v25  ;;  %v3431_v63 = vadd.f32 %v3430_v39, %v9013_v26  ;;  %v11283_v39 = vld [vmem:[#allocation83_spill] sm:$0xff] }
 0x367   : > { %v3869_v43 = vpop.f32.mrf.mxu0  ;;  %4634 = vmatmul.mubr.f32.gmra.mxu0 %v11282_v5  ;;  %v4169_v18 = vpop.f32.mrf.mxu1  ;;  %5010 = vmatmul.mubr.f32.gmra.mxu1 %v10892_v1 }
 0x368   : > { %v9342_v15 = vadd.f32 %v3787_v17, %v3431_v63  ;;  %v3870_v53 = vadd.f32 %v3869_v43, %v9018_v12  ;;  %4639 = vmatprep.mubr.f32.mxu0 %v10733_v20  ;;  %5015 = vmatprep.mubr.f32.mxu1 %v10733_v20 }
 0x369   : > { %v3871_v28 = vpop.f32.mrf.mxu0  ;;  %v4171_v48 = vpop.f32.mrf.mxu1 }
 0x36a   : > { %v4163_v7 = vadd.f32 %v4162_v61, %v3870_v53  ;;  %v3872_v26 = vadd.f32 %v3871_v28, %v9023_v3  ;;  %v11284_v28 = vld [vmem:[#allocation87_spill] sm:$0xff] }
 0x36b   : > { %v3876_v25 = vpop.f32.mrf.mxu0  ;;  %4645 = vmatmul.mubr.f32.gmra.mxu0 %v11283_v39  ;;  %v4176_v5 = vpop.f32.mrf.mxu1  ;;  %5017 = vmatmul.mubr.f32.gmra.mxu1 %v11180_v29 }
 0x36c   : > { %6396 = vst [vmem:[%s8369_s4 + $0x10] sm:$0xff] %v4163_v7  ;;  %v4165_v17 = vadd.f32 %v4164_v11, %v3872_v26  ;;  %v3877_v12 = vadd.f32 %v3876_v25, %v9028_v36  ;;  %4650 = vmatprep.mubr.f32.mxu0 %v10733_v20  ;;  %5022 = vmatprep.mubr.f32.mxu1 %v10733_v20 }
 0x36d   : > { %v3878_v63 = vpop.f32.mrf.mxu0  ;;  %v4178_v61 = vpop.f32.mrf.mxu1 }
 0x36e   : > { %6397 = vst [vmem:[%s8369_s4 + $0x18] sm:$0xff] %v4165_v17  ;;  %v4170_v3 = vadd.f32 %v4169_v18, %v3877_v12  ;;  %v3879_v43 = vadd.f32 %v3878_v63, %v9033_v21  ;;  %v11285_v17 = vld [vmem:[#allocation91_spill] sm:$0xff] }
 0x36f   : > { %v3883_v53 = vpop.f32.mrf.mxu0  ;;  %4656 = vmatmul.mubr.f32.gmra.mxu0 %v11284_v28  ;;  %v4183_v39 = vpop.f32.mrf.mxu1  ;;  %5024 = vmatmul.mubr.f32.gmra.mxu1 %v10896_v58 }
 0x370   : > { %6402 = vst [vmem:[%s8369_s4 + $0x40] sm:$0xff] %v4170_v3  ;;  %v4172_v11 = vadd.f32 %v4171_v48, %v3879_v43  ;;  %v3884_v36 = vadd.f32 %v3883_v53, %v9038_v59  ;;  %4661 = vmatprep.mubr.f32.mxu0 %v10733_v20  ;;  %5029 = vmatprep.mubr.f32.mxu1 %v10733_v20  ;;  %v11286_v53 = vld [vmem:[#allocation95_spill] sm:$0xff] }
 0x371   : > { %v3885_v7 = vpop.f32.mrf.mxu0  ;;  %v4185_v18 = vpop.f32.mrf.mxu1 }
 0x372   : > { %6403 = vst [vmem:[%s8369_s4 + $0x48] sm:$0xff] %v4172_v11  ;;  %v4177_v21 = vadd.f32 %v4176_v5, %v3884_v36  ;;  %v3886_v26 = vadd.f32 %v3885_v7, %v9043_v6 }
 0x373   : > { %v3890_v25 = vpop.f32.mrf.mxu0  ;;  %4667 = vmatmul.mubr.f32.gmra.mxu0 %v11285_v17  ;;  %v4190_v12 = vpop.f32.mrf.mxu1  ;;  %5031 = vmatmul.mubr.f32.gmra.mxu1 %v10898_v34 }
 0x374   : > { %6408 = vst [vmem:[%s8369_s4 + $0x70] sm:$0xff] %v4177_v21  ;;  %v4179_v59 = vadd.f32 %v4178_v61, %v3886_v26  ;;  %v3891_v48 = vadd.f32 %v3890_v25, %v9048_v56  ;;  %4672 = vmatprep.mubr.f32.mxu0 %v10733_v20  ;;  %5036 = vmatprep.mubr.f32.mxu1 %v10733_v20  ;;  %v11287_v21 = vld [vmem:[#allocation99_spill] sm:$0xff] }
 0x375   : > { %v3892_v63 = vpop.f32.mrf.mxu0  ;;  %v4192_v5 = vpop.f32.mrf.mxu1 }
 0x376   : > { %6409 = vst [vmem:[%s8369_s4 + $0x78] sm:$0xff] %v4179_v59  ;;  %v4184_v6 = vadd.f32 %v4183_v39, %v3891_v48  ;;  %v3893_v3 = vadd.f32 %v3892_v63, %v9053_v13  ;;  %v11288_v48 = vld [vmem:[#allocation102_spill] sm:$0xff] }
 0x377   : > { %v3897_v43 = vpop.f32.mrf.mxu0  ;;  %4678 = vmatmul.mubr.f32.gmra.mxu0 %v11286_v53  ;;  %v4197_v28 = vpop.f32.mrf.mxu1  ;;  %5038 = vmatmul.mubr.f32.gmra.mxu1 %v10900_v0 }
 0x378   : > { %6414 = vst [vmem:[%s8369_s4 + $0xa0] sm:$0xff] %v4184_v6  ;;  %v4186_v56 = vadd.f32 %v4185_v18, %v3893_v3  ;;  %v3898_v61 = vadd.f32 %v3897_v43, %v9058_v62  ;;  %4683 = vmatprep.mubr.f32.mxu0 %v10733_v20  ;;  %5043 = vmatprep.mubr.f32.mxu1 %v10733_v20 }
 0x379   : > { %v3899_v11 = vpop.f32.mrf.mxu0  ;;  %v4199_v39 = vpop.f32.mrf.mxu1 }
 0x37a   : > { %6415 = vst [vmem:[%s8369_s4 + $0xa8] sm:$0xff] %v4186_v56  ;;  %v4191_v13 = vadd.f32 %v4190_v12, %v3898_v61  ;;  %v3900_v36 = vadd.f32 %v3899_v11, %v9063_v23 }
 0x37b   : > { %v3904_v7 = vpop.f32.mrf.mxu0  ;;  %4689 = vmatmul.mubr.f32.gmra.mxu0 %v11287_v21  ;;  %v4204_v26 = vpop.f32.mrf.mxu1  ;;  %5045 = vmatmul.mubr.f32.gmra.mxu1 %v10902_v42 }
 0x37c   : > { %6420 = vst [vmem:[%s8369_s4 + $0xd0] sm:$0xff] %v4191_v13  ;;  %v4193_v62 = vadd.f32 %v4192_v5, %v3900_v36  ;;  %v3905_v18 = vadd.f32 %v3904_v7, %v9068_v40  ;;  %4694 = vmatprep.mubr.f32.mxu0 %v10733_v20  ;;  %5050 = vmatprep.mubr.f32.mxu1 %v10733_v20  ;;  %v11290_v7 = vld [vmem:[#allocation111_spill] sm:$0xff] }
 0x37d   : > { %v3906_v25 = vpop.f32.mrf.mxu0  ;;  %v4206_v17 = vpop.f32.mrf.mxu1 }
 0x37e   : > { %6421 = vst [vmem:[%s8369_s4 + $0xd8] sm:$0xff] %v4193_v62  ;;  %v4198_v23 = vadd.f32 %v4197_v28, %v3905_v18  ;;  %v3907_v12 = vadd.f32 %v3906_v25, %v9073_v2  ;;  %v11289_v28 = vld [vmem:[#allocation107_spill] sm:$0xff] }
 0x37f   : > { %v3911_v59 = vpop.f32.mrf.mxu0  ;;  %4700 = vmatmul.mubr.f32.gmra.mxu0 %v11288_v48  ;;  %v4211_v63 = vpop.f32.mrf.mxu1  ;;  %5052 = vmatmul.mubr.f32.gmra.mxu1 %v10904_v52 }
 0x380   : > { %6426 = vst [vmem:[%s8369_s4 + $0x100] sm:$0xff] %v4198_v23  ;;  %v4200_v40 = vadd.f32 %v4199_v39, %v3907_v12  ;;  %v3912_v5 = vadd.f32 %v3911_v59, %v9078_v50  ;;  %4705 = vmatprep.mubr.f32.mxu0 %v10733_v20  ;;  %5057 = vmatprep.mubr.f32.mxu1 %v10733_v20  ;;  %v11291_v23 = vld [vmem:[#allocation115_spill] sm:$0xff] }
 0x381   : > { %v3913_v6 = vpop.f32.mrf.mxu0  ;;  %v4213_v3 = vpop.f32.mrf.mxu1 }
 0x382   : > { %6427 = vst [vmem:[%s8369_s4 + $0x108] sm:$0xff] %v4200_v40  ;;  %v4205_v2 = vadd.f32 %v4204_v26, %v3912_v5  ;;  %v3914_v43 = vadd.f32 %v3913_v6, %v9083_v55  ;;  %v11292_v6 = vld [vmem:[#allocation119_spill] sm:$0xff] }
 0x383   : > { %v3918_v53 = vpop.f32.mrf.mxu0  ;;  %4711 = vmatmul.mubr.f32.gmra.mxu0 %v11289_v28  ;;  %v4218_v56 = vpop.f32.mrf.mxu1  ;;  %5059 = vmatmul.mubr.f32.gmra.mxu1 %v10906_v46 }
 0x384   : > { %6432 = vst [vmem:[%s8369_s4 + $0x130] sm:$0xff] %v4205_v2  ;;  %v4207_v50 = vadd.f32 %v4206_v17, %v3914_v43  ;;  %v3919_v61 = vadd.f32 %v3918_v53, %v9088_v60  ;;  %4716 = vmatprep.mubr.f32.mxu0 %v10733_v20  ;;  %5064 = vmatprep.mubr.f32.mxu1 %v10733_v20  ;;  %v11293_v2 = vld [vmem:[#allocation157_spill] sm:$0xff] }
 0x385   : > { %v3920_v11 = vpop.f32.mrf.mxu0  ;;  %v4220_v39 = vpop.f32.mrf.mxu1 }
 0x386   : > { %6433 = vst [vmem:[%s8369_s4 + $0x138] sm:$0xff] %v4207_v50  ;;  %v4212_v55 = vadd.f32 %v4211_v63, %v3919_v61  ;;  %v3921_v13 = vadd.f32 %v3920_v11, %v9093_v30  ;;  %v11295_v11 = vld [vmem:[#allocation123_spill] sm:$0xff] }
 0x387   : > { %v3925_v36 = vpop.f32.mrf.mxu0  ;;  %4722 = vmatmul.mubr.f32.gmra.mxu0 %v11290_v7  ;;  %v4225_v21 = vpop.f32.mrf.mxu1  ;;  %5066 = vmatmul.mubr.f32.gmra.mxu1 %v10908_v8 }
 0x388   : > { %6438 = vst [vmem:[%s8369_s4 + $0x160] sm:$0xff] %v4212_v55  ;;  %v4214_v60 = vadd.f32 %v4213_v3, %v3921_v13  ;;  %v3926_v26 = vadd.f32 %v3925_v36, %v9098_v31  ;;  %4727 = vmatprep.mubr.f32.mxu0 %v10733_v20  ;;  %5071 = vmatprep.mubr.f32.mxu1 %v10733_v20  ;;  %v11296_v55 = vld [vmem:[#allocation110_spill] sm:$0xff]  ;;  %v11297_v36 = vld [vmem:[#allocation159_spill] sm:$0xff] }
 0x389   : > { %v3927_v62 = vpop.f32.mrf.mxu0  ;;  %v4227_v18 = vpop.f32.mrf.mxu1 }
 0x38a   : > { %6439 = vst [vmem:[%s8369_s4 + $0x168] sm:$0xff] %v4214_v60  ;;  %v4219_v30 = vadd.f32 %v4218_v56, %v3926_v26  ;;  %v3928_v25 = vadd.f32 %v3927_v62, %v9103_v49  ;;  %v11294_v56 = vld [vmem:[#allocation158_spill] sm:$0xff]  ;;  %v11298_v62 = vld [vmem:[#allocation65_spill] sm:$0xff] }
 0x38b   : > { %v3932_v17 = vpop.f32.mrf.mxu0  ;;  %4733 = vmatmul.mubr.f32.gmra.mxu0 %v11291_v23  ;;  %v4232_v12 = vpop.f32.mrf.mxu1  ;;  %5073 = vmatmul.mubr.f32.gmra.mxu1 %v10910_v37 }
 0x38c   : > { %6444 = vst [vmem:[%s8369_s4 + $0x190] sm:$0xff] %v4219_v30  ;;  %v4221_v31 = vadd.f32 %v4220_v39, %v3928_v25  ;;  %v3933_v59 = vadd.f32 %v3932_v17, %v9108_v35  ;;  %4738 = vmatprep.mubr.f32.mxu0 %v10733_v20  ;;  %5078 = vmatprep.mubr.f32.mxu1 %v10733_v20  ;;  %v11299_v25 = vld [vmem:[#allocation126_spill] sm:$0xff] }
 0x38d   : > { %v3934_v48 = vpop.f32.mrf.mxu0  ;;  %v4234_v63 = vpop.f32.mrf.mxu1 }
 0x38e   : > { %6445 = vst [vmem:[%s8369_s4 + $0x198] sm:$0xff] %v4221_v31  ;;  %v4226_v49 = vadd.f32 %v4225_v21, %v3933_v59  ;;  %v3935_v40 = vadd.f32 %v3934_v48, %v9113_v10 }
 0x38f   : > { %v3939_v5 = vpop.f32.mrf.mxu0  ;;  %4744 = vmatmul.mubr.f32.gmra.mxu0 %v11292_v6  ;;  %v4239_v3 = vpop.f32.mrf.mxu1  ;;  %5080 = vmatmul.mubr.f32.gmra.mxu1 %v10912_v54 }
 0x390   : > { %6450 = vst [vmem:[%s8369_s4 + $0x1c0] sm:$0xff] %v4226_v49  ;;  %v4228_v35 = vadd.f32 %v4227_v18, %v3935_v40  ;;  %v3940_v43 = vadd.f32 %v3939_v5, %v11293_v2  ;;  %4749 = vmatprep.mubr.f32.mxu0 %v10733_v20  ;;  %5085 = vmatprep.mubr.f32.mxu1 %v10733_v20  ;;  %v11301_v5 = vld [vmem:[#allocation129_spill] sm:$0xff] }
 0x391   : > { %v3941_v53 = vpop.f32.mrf.mxu0  ;;  %v4241_v28 = vpop.f32.mrf.mxu1 }
 0x392   : > { %6451 = vst [vmem:[%s8369_s4 + $0x1c8] sm:$0xff] %v4228_v35  ;;  %v4233_v10 = vadd.f32 %v4232_v12, %v3940_v43  ;;  %v3942_v50 = vadd.f32 %v3941_v53, %v11294_v56  ;;  %v11300_v12 = vld [vmem:[#allocation73_spill] sm:$0xff] }
 0x393   : > { %v3946_v61 = vpop.f32.mrf.mxu0  ;;  %4755 = vmatmul.mubr.f32.gmra.mxu0 %v11295_v11  ;;  %v4246_v39 = vpop.f32.mrf.mxu1  ;;  %5087 = vmatmul.mubr.f32.gmra.mxu1 %v11296_v55 }
 0x394   : > { %6456 = vst [vmem:[%s8369_s4 + $0x1f0] sm:$0xff] %v4233_v10  ;;  %v4235_v13 = vadd.f32 %v4234_v63, %v3942_v50  ;;  %v3947_v7 = vadd.f32 %v3946_v61, %v11297_v36  ;;  %4760 = vmatprep.mubr.f32.mxu0 %v10733_v20  ;;  %5092 = vmatprep.mubr.f32.mxu1 %v10733_v20  ;;  %v11302_v10 = vld [vmem:[#allocation131_spill] sm:$0xff]  ;;  %v11303_v36 = vld [vmem:[#allocation132_spill] sm:$0xff] }
 0x395   : > { %v3948_v21 = vpop.f32.mrf.mxu0  ;;  %v4248_v60 = vpop.f32.mrf.mxu1 }
 0x396   : > { %6457 = vst [vmem:[%s8369_s4 + $0x1f8] sm:$0xff] %v4235_v13  ;;  %v4240_v26 = vadd.f32 %v4239_v3, %v3947_v7  ;;  %v3949_v18 = vadd.f32 %v3948_v21, %v11298_v62  ;;  %v11304_v21 = vld [vmem:[#allocation12_spill] sm:$0xff] }
 0x397   : > { %v3953_v30 = vpop.f32.mrf.mxu0  ;;  %4766 = vmatmul.mubr.f32.gmra.mxu0 %v11299_v25  ;;  %v4253_v17 = vpop.f32.mrf.mxu1  ;;  %5094 = vmatmul.mubr.f32.gmra.mxu1 %v11184_v32  ;;  %v11307_v25 = vld [vmem:[#allocation117_spill] sm:$0xff] }
 0x398   : > { %6462 = vst [vmem:[%s8369_s4 + $0x220] sm:$0xff] %v4240_v26  ;;  %v4242_v23 = vadd.f32 %v4241_v28, %v3949_v18  ;;  %v3954_v31 = vadd.f32 %v3953_v30, %v11300_v12  ;;  %4771 = vmatprep.mubr.f32.mxu0 %v10733_v20  ;;  %5099 = vmatprep.mubr.f32.mxu1 %v10733_v20  ;;  %v11305_v26 = vld [vmem:[#allocation162_spill] sm:$0xff] }
 0x399   : > { %v3955_v59 = vpop.f32.mrf.mxu0  ;;  %v4255_v48 = vpop.f32.mrf.mxu1 }
 0x39a   : > { %6463 = vst [vmem:[%s8369_s4 + $0x228] sm:$0xff] %v4242_v23  ;;  %v4247_v63 = vadd.f32 %v4246_v39, %v3954_v31  ;;  %v3956_v49 = vadd.f32 %v3955_v59, %v9143_v45  ;;  %v11308_v23 = vld [vmem:[#allocation164_spill] sm:$0xff]  ;;  %v11310_v59 = vld [vmem:[#allocation13_spill] sm:$0xff] }
 0x39b   : > { %v3960_v40 = vpop.f32.mrf.mxu0  ;;  %4777 = vmatmul.mubr.f32.gmra.mxu0 %v11301_v5  ;;  %v4260_v6 = vpop.f32.mrf.mxu1  ;;  %5101 = vmatmul.mubr.f32.gmra.mxu1 %v11189_v14  ;;  %v11309_v31 = vld [vmem:[#allocation8_spill] sm:$0xff] }
 0x39c   : > { %6468 = vst [vmem:[%s8369_s4 + $0x250] sm:$0xff] %v4247_v63  ;;  %v4249_v3 = vadd.f32 %v4248_v60, %v3956_v49  ;;  %v3961_v35 = vadd.f32 %v3960_v40, %v9148_v51  ;;  %4782 = vmatprep.mubr.f32.mxu0 %v10733_v20  ;;  %5106 = vmatprep.mubr.f32.mxu1 %v10733_v20  ;;  %v11311_v63 = vld [vmem:[#allocation167_spill] sm:$0xff]  ;;  %v11312_v40 = vld [vmem:[#allocation165_spill] sm:$0xff] }
 0x39d   : > { %v3962_v2 = vpop.f32.mrf.mxu0  ;;  %v4262_v43 = vpop.f32.mrf.mxu1  ;;  %v11313_v5 = vand.u32 4294901760, %v11312_v40 }
 0x39e   : > { %6469 = vst [vmem:[%s8369_s4 + $0x258] sm:$0xff] %v4249_v3  ;;  %v4254_v45 = vadd.f32 %v4253_v17, %v3961_v35  ;;  %v3963_v53 = vadd.f32 %v3962_v2, %v9153_v27  ;;  %v11314_v35 = vld [vmem:[#allocation166_spill] sm:$0xff] }
 0x39f   : > { %v3967_v28 = vpop.f32.mrf.mxu0  ;;  %4788 = vmatmul.mubr.f32.gmra.mxu0 %v11302_v10  ;;  %v4267_v56 = vpop.f32.mrf.mxu1  ;;  %5108 = vmatmul.mubr.f32.gmra.mxu1 %v11191_v47  ;;  %v11315_v2 = vand.u32 4294901760, %v11314_v35 }
 0x3a0   : > { %6474 = vst [vmem:[%s8369_s4 + $0x280] sm:$0xff] %v4254_v45  ;;  %v4256_v51 = vadd.f32 %v4255_v48, %v3963_v53  ;;  %v3968_v50 = vadd.f32 %v3967_v28, %v9158_v41  ;;  %4793 = vmatprep.mubr.f32.mxu0 %v10733_v20  ;;  %5511 = vmatprep.mubr.f32.mxu1 %v10733_v20  ;;  %v11316_v45 = vld [vmem:[#allocation74_spill] sm:$0xff]  ;;  %v11317_v28 = vld [vmem:[#allocation69_spill] sm:$0xff] }
 0x3a1   : > { %v3969_v61 = vpop.f32.mrf.mxu0  ;;  %v4269_v11 = vpop.f32.mrf.mxu1  ;;  %v11318_v10 = vand.u32 4294901760, %v11317_v28  ;;  %v11331_v28 = vld [vmem:[#allocation21_spill] sm:$0xff] }
 0x3a2   : > { %6475 = vst [vmem:[%s8369_s4 + $0x288] sm:$0xff] %v4256_v51  ;;  %v4261_v27 = vadd.f32 %v4260_v6, %v3968_v50  ;;  %v3970_v39 = vadd.f32 %v3969_v61, %v9163_v57  ;;  %v11306_v57 = vld [vmem:[#allocation163_spill] sm:$0xff]  ;;  %v11319_v51 = vld [vmem:[#allocation10_spill] sm:$0xff] }
 0x3a3   : > { %v3974_v13 = vpop.f32.mrf.mxu0  ;;  %4799 = vmatmul.mubr.f32.gmra.mxu0 %v11303_v36  ;;  %v4274_v7 = vpop.f32.mrf.mxu1  ;;  %5515 = vmatmul.mubr.f32.vlgmr.msra.gmra.mxu1 %v11304_v21  ;;  %v11320_v61 = vld [vmem:[#allocation15_spill] sm:$0xff]  ;;  %v11322_v21 = vld [vmem:[#allocation81_spill] sm:$0xff] }
 0x3a4   : > { %6480 = vst [vmem:[%s8369_s4 + $0x2b0] sm:$0xff] %v4261_v27  ;;  %v4263_v60 = vadd.f32 %v4262_v43, %v3970_v39  ;;  %v3975_v41 = vadd.f32 %v3974_v13, %v9170_v9  ;;  %5186 = vmatprep.mubr.f32.mxu0 %v10733_v20  ;;  %6132 = vmatpush1.msra.mxu1 %v11305_v26  ;;  %v11321_v27 = vld [vmem:[#allocation118_spill] sm:$0xff]  ;;  %v11323_v26 = vld [vmem:[#allocation11_spill] sm:$0xff] }
 0x3a5   : > { %v3976_v62 = vpop.f32.mrf.mxu0  ;;  %v4276_v18 = vpop.f32.mrf.mxu1  ;;  %5520 = vmatprep.mubr.f32.mxu1 %v10733_v20  ;;  %6134 = vmatprep.subr.mxu1 %v11306_v57  ;;  %v11324_v57 = vld [vmem:[#allocation20_spill] sm:$0xff] }
 0x3a6   : > { %6481 = vst [vmem:[%s8369_s4 + $0x2b8] sm:$0xff] %v4263_v60  ;;  %v4268_v30 = vadd.f32 %v4267_v56, %v3975_v41  ;;  %v3977_v17 = vadd.f32 %v3976_v62, %v11307_v25  ;;  %6136 = vmatpush1.msra.mxu1 %v11308_v23 }
 0x3a7   : > { %v3981_v12 = vpop.f32.mrf.mxu0  ;;  %5189 = vmatmul.mubr.f32.vlgmr.msra.gmra.mxu0 %v11309_v31  ;;  %v4281_v9 = vpop.f32.mrf.mxu1  ;;  %5524 = vmatmul.mubr.f32.gmra.mxu1 %v11310_v59  ;;  %v11326_v31 = vld [vmem:[#allocation17_spill] sm:$0xff] }
 0x3a8   : > { %6486 = vst [vmem:[%s8369_s4 + $0x2e0] sm:$0xff] %v4268_v30  ;;  %v4270_v48 = vadd.f32 %v4269_v11, %v3977_v17  ;;  %v3982_v49 = vadd.f32 %v3981_v12, %v11311_v63  ;;  %5835 = vmatpush1.msra.mxu0 %v11313_v5  ;;  %5194 = vmatprep.mubr.f32.mxu0 %v10733_v20  ;;  %v11325_v30 = vld [vmem:[#allocation122_spill] sm:$0xff] }
 0x3a9   : > { %v3983_v6 = vpop.f32.mrf.mxu0  ;;  %v4283_v3 = vpop.f32.mrf.mxu1  ;;  %5529 = vmatprep.mubr.f32.mxu1 %v10733_v20  ;;  %5839 = vmatprep.subr.mxu0 %v11315_v2  ;;  %v11329_v5 = vld [vmem:[#allocation82_spill] sm:$0xff] }
 0x3aa   : > { %6487 = vst [vmem:[%s8369_s4 + $0x2e8] sm:$0xff] %v4270_v48  ;;  %v4275_v43 = vadd.f32 %v4274_v7, %v3982_v49  ;;  %v3984_v53 = vadd.f32 %v3983_v6, %v11316_v45  ;;  %5843 = vmatpush1.msra.mxu0 %v11318_v10  ;;  %v11327_v48 = vld [vmem:[#allocation16_spill] sm:$0xff]  ;;  %v11328_v49 = vld [vmem:[#allocation25_spill] sm:$0xff] }
 0x3ab   : > { %v3988_v56 = vpop.f32.mrf.mxu0  ;;  %5197 = vmatmul.mubr.f32.gmra.mxu0 %v11319_v51  ;;  %v4288_v50 = vpop.f32.mrf.mxu1  ;;  %5533 = vmatmul.mubr.f32.gmra.mxu1 %v11320_v61 }
 0x3ac   : > { %6492 = vst [vmem:[%s8369_s4 + $0x310] sm:$0xff] %v4275_v43  ;;  %v4277_v11 = vadd.f32 %v4276_v18, %v3984_v53  ;;  %v3989_v39 = vadd.f32 %v3988_v56, %v11321_v27  ;;  %5202 = vmatprep.mubr.f32.mxu0 %v10733_v20  ;;  %5538 = vmatprep.mubr.f32.mxu1 %v10733_v20  ;;  %v11330_v43 = vld [vmem:[#allocation89_spill] sm:$0xff]  ;;  %v11332_v56 = vld [vmem:[#allocation26_spill] sm:$0xff] }
 0x3ad   : > { %v3990_v13 = vpop.f32.mrf.mxu0  ;;  %v4290_v36 = vpop.f32.mrf.mxu1 }
 0x3ae   : > { %6493 = vst [vmem:[%s8369_s4 + $0x318] sm:$0xff] %v4277_v11  ;;  %v4282_v7 = vadd.f32 %v4281_v9, %v3989_v39  ;;  %v3991_v60 = vadd.f32 %v3990_v13, %v11322_v21  ;;  %v11334_v13 = vld [vmem:[#allocation19_spill] sm:$0xff]  ;;  %v11335_v21 = vld [vmem:[#allocation22_spill] sm:$0xff] }
 0x3af   : > { %v3995_v41 = vpop.f32.mrf.mxu0  ;;  %5205 = vmatmul.mubr.f32.gmra.mxu0 %v11323_v26  ;;  %v4295_v62 = vpop.f32.mrf.mxu1  ;;  %5542 = vmatmul.mubr.f32.gmra.mxu1 %v11324_v57 }
 0x3b0   : > { %6498 = vst [vmem:[%s8369_s4 + $0x340] sm:$0xff] %v4282_v7  ;;  %v4284_v18 = vadd.f32 %v4283_v3, %v3991_v60  ;;  %v3996_v25 = vadd.f32 %v3995_v41, %v11325_v30  ;;  %5210 = vmatprep.mubr.f32.mxu0 %v10733_v20  ;;  %5547 = vmatprep.mubr.f32.mxu1 %v10733_v20  ;;  %v11336_v41 = vld [vmem:[#allocation30_spill] sm:$0xff] }
 0x3b1   : > { %v3997_v17 = vpop.f32.mrf.mxu0  ;;  %v4297_v23 = vpop.f32.mrf.mxu1 }
 0x3b2   : > { %6499 = vst [vmem:[%s8369_s4 + $0x348] sm:$0xff] %v4284_v18  ;;  %v4289_v12 = vadd.f32 %v4288_v50, %v3996_v25  ;;  %v3998_v9 = vadd.f32 %v3997_v17, %v11326_v31  ;;  %v11333_v50 = vld [vmem:[#allocation160_spill] sm:$0xff]  ;;  %v11338_v17 = vld [vmem:[#allocation161_spill] sm:$0xff]  ;;  %v11339_v31 = vld [vmem:[#allocation27_spill] sm:$0xff] }
 0x3b3   : > { %v4002_v59 = vpop.f32.mrf.mxu0  ;;  %5213 = vmatmul.mubr.f32.gmra.mxu0 %v11327_v48  ;;  %v4302_v63 = vpop.f32.mrf.mxu1  ;;  %5551 = vmatmul.mubr.f32.gmra.mxu1 %v11328_v49 }
 0x3b4   : > { %6504 = vst [vmem:[%s8369_s4 + $0x370] sm:$0xff] %v4289_v12  ;;  %v4291_v40 = vadd.f32 %v4290_v36, %v3998_v9  ;;  %v4003_v6 = vadd.f32 %v4002_v59, %v11329_v5  ;;  %5218 = vmatprep.mubr.f32.mxu0 %v10733_v20  ;;  %5556 = vmatprep.mubr.f32.mxu1 %v10733_v20  ;;  %v11340_v59 = vld [vmem:[#allocation35_spill] sm:$0xff] }
 0x3b5   : > { %v4004_v3 = vpop.f32.mrf.mxu0  ;;  %v4304_v35 = vpop.f32.mrf.mxu1 }
 0x3b6   : > { %6505 = vst [vmem:[%s8369_s4 + $0x378] sm:$0xff] %v4291_v40  ;;  %v4296_v2 = vadd.f32 %v4295_v62, %v4003_v6  ;;  %v4005_v45 = vadd.f32 %v4004_v3, %v11330_v43  ;;  %v11337_v62 = vld [vmem:[#allocation90_spill] sm:$0xff]  ;;  %v11342_v3 = vld [vmem:[#allocation24_spill] sm:$0xff]  ;;  %v11343_v43 = vld [vmem:[#allocation31_spill] sm:$0xff] }
 0x3b7   : > { %v4009_v53 = vpop.f32.mrf.mxu0  ;;  %5221 = vmatmul.mubr.f32.gmra.mxu0 %v11331_v28  ;;  %v4309_v10 = vpop.f32.mrf.mxu1  ;;  %5560 = vmatmul.mubr.f32.gmra.mxu1 %v11332_v56 }
 0x3b8   : > { %6510 = vst [vmem:[%s8369_s4 + $0x3a0] sm:$0xff] %v4296_v2  ;;  %v4298_v51 = vadd.f32 %v4297_v23, %v4005_v45  ;;  %v4010_v61 = vadd.f32 %v4009_v53, %v11333_v50  ;;  %5226 = vmatprep.mubr.f32.mxu0 %v10733_v20  ;;  %5565 = vmatprep.mubr.f32.mxu1 %v10733_v20  ;;  %v11344_v53 = vld [vmem:[#allocation39_spill] sm:$0xff] }
 0x3b9   : > { %v4011_v11 = vpop.f32.mrf.mxu0  ;;  %v4311_v27 = vpop.f32.mrf.mxu1 }
 0x3ba   : > { %6511 = vst [vmem:[%s8369_s4 + $0x3a8] sm:$0xff] %v4298_v51  ;;  %v4303_v39 = vadd.f32 %v4302_v63, %v4010_v61  ;;  %v4012_v36 = vadd.f32 %v4011_v11, %v11334_v13  ;;  %v11341_v63 = vld [vmem:[#allocation97_spill] sm:$0xff]  ;;  %v11347_v13 = vld [vmem:[#allocation36_spill] sm:$0xff] }
 0x3bb   : > { %v4016_v7 = vpop.f32.mrf.mxu0  ;;  %5229 = vmatmul.mubr.f32.gmra.mxu0 %v11335_v21  ;;  %v4316_v60 = vpop.f32.mrf.mxu1  ;;  %5569 = vmatmul.mubr.f32.gmra.mxu1 %v11336_v41  ;;  %v11346_v11 = vld [vmem:[#allocation105_spill] sm:$0xff] }
 0x3bc   : > { %6516 = vst [vmem:[%s8369_s4 + $0x3d0] sm:$0xff] %v4303_v39  ;;  %v4305_v26 = vadd.f32 %v4304_v35, %v4012_v36  ;;  %v4017_v57 = vadd.f32 %v4016_v7, %v11337_v62  ;;  %5234 = vmatprep.mubr.f32.mxu0 %v10733_v20  ;;  %5574 = vmatprep.mubr.f32.mxu1 %v10733_v20  ;;  %v11348_v7 = vld [vmem:[#allocation44_spill] sm:$0xff] }
 0x3bd   : > { %v4018_v18 = vpop.f32.mrf.mxu0  ;;  %v4318_v30 = vpop.f32.mrf.mxu1 }
 0x3be   : > { %6517 = vst [vmem:[%s8369_s4 + $0x3d8] sm:$0xff] %v4305_v26  ;;  %v4310_v25 = vadd.f32 %v4309_v10, %v4017_v57  ;;  %v4019_v23 = vadd.f32 %v4018_v18, %v11338_v17  ;;  %v11345_v10 = vld [vmem:[#allocation101_spill] sm:$0xff]  ;;  %v11350_v18 = vld [vmem:[#allocation136_spill] sm:$0xff] }
 0x3bf   : > { %v4023_v12 = vpop.f32.mrf.mxu0  ;;  %5237 = vmatmul.mubr.f32.gmra.mxu0 %v11339_v31  ;;  %v4323_v9 = vpop.f32.mrf.mxu1  ;;  %5578 = vmatmul.mubr.f32.gmra.mxu1 %v11340_v59  ;;  %v11351_v17 = vld [vmem:[#allocation40_spill] sm:$0xff] }
 0x3c0   : > { %6522 = vst [vmem:[%s8369_s4 + $0x400] sm:$0xff] %v4310_v25  ;;  %v4312_v48 = vadd.f32 %v4311_v27, %v4019_v23  ;;  %v4024_v49 = vadd.f32 %v4023_v12, %v11341_v63  ;;  %5242 = vmatprep.mubr.f32.mxu0 %v10733_v20  ;;  %5583 = vmatprep.mubr.f32.mxu1 %v10733_v20  ;;  %v11352_v12 = vld [vmem:[#allocation48_spill] sm:$0xff] }
 0x3c1   : > { %v4025_v40 = vpop.f32.mrf.mxu0  ;;  %v4325_v5 = vpop.f32.mrf.mxu1 }
 0x3c2   : > { %6523 = vst [vmem:[%s8369_s4 + $0x408] sm:$0xff] %v4312_v48  ;;  %v4317_v6 = vadd.f32 %v4316_v60, %v4024_v49  ;;  %v4026_v35 = vadd.f32 %v4025_v40, %v11342_v3  ;;  %v11349_v60 = vld [vmem:[#allocation29_spill] sm:$0xff]  ;;  %v11354_v40 = vld [vmem:[#allocation32_spill] sm:$0xff] }
 0x3c3   : > { %v4030_v2 = vpop.f32.mrf.mxu0  ;;  %5245 = vmatmul.mubr.f32.gmra.mxu0 %v11343_v43  ;;  %v4330_v45 = vpop.f32.mrf.mxu1  ;;  %5587 = vmatmul.mubr.f32.gmra.mxu1 %v11344_v53  ;;  %v11355_v3 = vld [vmem:[#allocation45_spill] sm:$0xff] }
 0x3c4   : > { %6528 = vst [vmem:[%s8369_s4 + $0x430] sm:$0xff] %v4317_v6  ;;  %v4319_v28 = vadd.f32 %v4318_v30, %v4026_v35  ;;  %v4031_v56 = vadd.f32 %v4030_v2, %v11345_v10  ;;  %5250 = vmatprep.mubr.f32.mxu0 %v10733_v20  ;;  %5592 = vmatprep.mubr.f32.mxu1 %v10733_v20  ;;  %v11356_v2 = vld [vmem:[#allocation50_spill] sm:$0xff] }
 0x3c5   : > { %v4032_v51 = vpop.f32.mrf.mxu0  ;;  %v4332_v50 = vpop.f32.mrf.mxu1 }
 0x3c6   : > { %6529 = vst [vmem:[%s8369_s4 + $0x438] sm:$0xff] %v4319_v28  ;;  %v4324_v61 = vadd.f32 %v4323_v9, %v4031_v56  ;;  %v4033_v27 = vadd.f32 %v4032_v51, %v11346_v11  ;;  %v11353_v9 = vld [vmem:[#allocation137_spill] sm:$0xff]  ;;  %v11358_v51 = vld [vmem:[#allocation138_spill] sm:$0xff] }
 0x3c7   : > { %v4037_v39 = vpop.f32.mrf.mxu0  ;;  %5253 = vmatmul.mubr.f32.gmra.mxu0 %v11347_v13  ;;  %v4337_v36 = vpop.f32.mrf.mxu1  ;;  %5596 = vmatmul.mubr.f32.gmra.mxu1 %v11348_v7  ;;  %v11359_v11 = vld [vmem:[#allocation46_spill] sm:$0xff] }
 0x3c8   : > { %6534 = vst [vmem:[%s8369_s4 + $0x460] sm:$0xff] %v4324_v61  ;;  %v4326_v21 = vadd.f32 %v4325_v5, %v4033_v27  ;;  %v4038_v41 = vadd.f32 %v4037_v39, %v11349_v60  ;;  %5258 = vmatprep.mubr.f32.mxu0 %v10733_v20  ;;  %5601 = vmatprep.mubr.f32.mxu1 %v10733_v20  ;;  %v11360_v39 = vld [vmem:[#allocation56_spill] sm:$0xff] }
 0x3c9   : > { %v4039_v26 = vpop.f32.mrf.mxu0  ;;  %v4339_v62 = vpop.f32.mrf.mxu1 }
 0x3ca   : > { %6535 = vst [vmem:[%s8369_s4 + $0x468] sm:$0xff] %v4326_v21  ;;  %v4331_v57 = vadd.f32 %v4330_v45, %v4038_v41  ;;  %v4040_v30 = vadd.f32 %v4039_v26, %v11350_v18  ;;  %v11357_v45 = vld [vmem:[#allocation106_spill] sm:$0xff] }
 0x3cb   : > { %v4044_v25 = vpop.f32.mrf.mxu0  ;;  %5261 = vmatmul.mubr.f32.gmra.mxu0 %v11351_v17  ;;  %v4344_v23 = vpop.f32.mrf.mxu1  ;;  %5605 = vmatmul.mubr.f32.gmra.mxu1 %v11352_v12  ;;  %v11364_v17 = vld [vmem:[#allocation133_spill] sm:$0xff] }
 0x3cc   : > { %6540 = vst [vmem:[%s8369_s4 + $0x490] sm:$0xff] %v4331_v57  ;;  %v4333_v31 = vadd.f32 %v4332_v50, %v4040_v30  ;;  %v4045_v59 = vadd.f32 %v4044_v25, %v11353_v9  ;;  %5266 = vmatprep.mubr.f32.mxu0 %v10733_v20  ;;  %5610 = vmatprep.mubr.f32.mxu1 %v10733_v20  ;;  %v11362_v57 = vld [vmem:[#allocation53_spill] sm:$0xff]  ;;  %v11363_v30 = vld [vmem:[#allocation60_spill] sm:$0xff] }
 0x3cd   : > { %v4046_v48 = vpop.f32.mrf.mxu0  ;;  %v4346_v63 = vpop.f32.mrf.mxu1 }
 0x3ce   : > { %6541 = vst [vmem:[%s8369_s4 + $0x498] sm:$0xff] %v4333_v31  ;;  %v4338_v49 = vadd.f32 %v4337_v36, %v4045_v59  ;;  %v4047_v5 = vadd.f32 %v4046_v48, %v11354_v40  ;;  %v11361_v36 = vld [vmem:[#allocation34_spill] sm:$0xff]  ;;  %v11365_v48 = vld [vmem:[#allocation57_spill] sm:$0xff] }
 0x3cf   : > { %v4051_v6 = vpop.f32.mrf.mxu0  ;;  %5269 = vmatmul.mubr.f32.gmra.mxu0 %v11355_v3  ;;  %v4351_v35 = vpop.f32.mrf.mxu1  ;;  %5614 = vmatmul.mubr.f32.gmra.mxu1 %v11356_v2 }
 0x3d0   : > { %6546 = vst [vmem:[%s8369_s4 + $0x4c0] sm:$0xff] %v4338_v49  ;;  %v4340_v43 = vadd.f32 %v4339_v62, %v4047_v5  ;;  %v4052_v53 = vadd.f32 %v4051_v6, %v11357_v45  ;;  %5274 = vmatprep.mubr.f32.mxu0 %v10733_v20  ;;  %5619 = vmatprep.mubr.f32.mxu1 %v10733_v20  ;;  %v11366_v49 = vld [vmem:[#allocation64_spill] sm:$0xff] }
 0x3d1   : > { %v4053_v28 = vpop.f32.mrf.mxu0  ;;  %v4353_v10 = vpop.f32.mrf.mxu1 }
 0x3d2   : > { %6547 = vst [vmem:[%s8369_s4 + $0x4c8] sm:$0xff] %v4340_v43  ;;  %v4345_v56 = vadd.f32 %v4344_v23, %v4052_v53  ;;  %v4054_v50 = vadd.f32 %v4053_v28, %v11358_v51  ;;  %v11367_v43 = vld [vmem:[#allocation61_spill] sm:$0xff]  ;;  %v11368_v53 = vld [vmem:[#allocation66_spill] sm:$0xff] }
 0x3d3   : > { %v4058_v61 = vpop.f32.mrf.mxu0  ;;  %5277 = vmatmul.mubr.f32.gmra.mxu0 %v11359_v11  ;;  %v4358_v27 = vpop.f32.mrf.mxu1  ;;  %5623 = vmatmul.mubr.f32.gmra.mxu1 %v11360_v39  ;;  %v11370_v39 = vld [vmem:[#allocation62_spill] sm:$0xff] }
 0x3d4   : > { %6552 = vst [vmem:[%s8369_s4 + $0x4f0] sm:$0xff] %v4345_v56  ;;  %v4347_v13 = vadd.f32 %v4346_v63, %v4054_v50  ;;  %v4059_v7 = vadd.f32 %v4058_v61, %v11361_v36  ;;  %5282 = vmatprep.mubr.f32.mxu0 %v10733_v20  ;;  %5628 = vmatprep.mubr.f32.mxu1 %v10733_v20 }
 0x3d5   : > { %v4060_v21 = vpop.f32.mrf.mxu0  ;;  %v4360_v60 = vpop.f32.mrf.mxu1 }
 0x3d6   : > { %6553 = vst [vmem:[%s8369_s4 + $0x4f8] sm:$0xff] %v4347_v13  ;;  %v4352_v41 = vadd.f32 %v4351_v35, %v4059_v7  ;;  %v4061_v26 = vadd.f32 %v4060_v21, %v9302_v44  ;;  %v6719_v21 = vld [vmem:[%s10369_s2] sm:$0x3f] }
 0x3d7   : > { %v4065_v62 = vpop.f32.mrf.mxu0  ;;  %5285 = vmatmul.mubr.f32.gmra.mxu0 %v11362_v57  ;;  %v4365_v18 = vpop.f32.mrf.mxu1  ;;  %5632 = vmatmul.mubr.f32.gmra.mxu1 %v11363_v30 }
 0x3d8   : > { %6558 = vst [vmem:[%s8369_s4 + $0x520] sm:$0xff] %v4352_v41  ;;  %v4354_v25 = vadd.f32 %v4353_v10, %v4061_v26  ;;  %v4066_v23 = vadd.f32 %v4065_v62, %v11364_v17  ;;  %5290 = vmatprep.mubr.f32.mxu0 %v10733_v20  ;;  %5637 = vmatprep.mubr.f32.mxu1 %v10733_v20  ;;  %v11369_v10 = vld [vmem:[#allocation135_spill] sm:$0xff] }
 0x3d9   : > { %v4067_v12 = vpop.f32.mrf.mxu0  ;;  %v4367_v31 = vpop.f32.mrf.mxu1  ;;  %v236_v56 = vsub.s32 4, %v11369_v10  ;;  %v240_v11 = vsub.s32 5, %v11369_v10 }
 0x3da   : > { %6559 = vst [vmem:[%s8369_s4 + $0x528] sm:$0xff] %v4354_v25  ;;  %v4359_v44 = vadd.f32 %v4358_v27, %v4066_v23  ;;  %v4068_v9 = vadd.f32 %v4067_v12, %v9312_v24  ;;  %v11373_v25 = vld [vmem:[#allocation76_spill] sm:$0xff] }
 0x3db   : > { %v4072_v59 = vpop.f32.mrf.mxu0  ;;  %5293 = vmatmul.mubr.f32.gmra.mxu0 %v11365_v48  ;;  %v4372_v63 = vpop.f32.mrf.mxu1  ;;  %5641 = vmatmul.mubr.f32.gmra.mxu1 %v11366_v49  ;;  %v9612_v57 = vrot.slane %v6719_v21, %v240_v11  ;;  %v11379_v11 = vld [vmem:[#allocation88_spill] sm:$0xff] }
 0x3dc   : > { %6564 = vst [vmem:[%s8369_s4 + $0x550] sm:$0xff] %v4359_v44  ;;  %v4361_v40 = vadd.f32 %v4360_v60, %v4068_v9  ;;  %v4073_v5 = vadd.f32 %v4072_v59, %v9317_v16  ;;  %5298 = vmatprep.mubr.f32.mxu0 %v10733_v20  ;;  %5646 = vmatprep.mubr.f32.mxu1 %v10733_v20  ;;  %v11374_v59 = vld [vmem:[#allocation72_spill] sm:$0xff] }
 0x3dd   : > { %v4074_v6 = vpop.f32.mrf.mxu0  ;;  %v4374_v3 = vpop.f32.mrf.mxu1 }
 0x3de   : > { %6565 = vst [vmem:[%s8369_s4 + $0x558] sm:$0xff] %v4361_v40  ;;  %v4366_v24 = vadd.f32 %v4365_v18, %v4073_v5  ;;  %v4075_v35 = vadd.f32 %v4074_v6, %v9322_v33  ;;  %v11372_v18 = vld [vmem:[#allocation68_spill] sm:$0xff] }
 0x3df   : > { %v4079_v2 = vpop.f32.mrf.mxu0  ;;  %5301 = vmatmul.mubr.f32.gmra.mxu0 %v11367_v43  ;;  %v4379_v45 = vpop.f32.mrf.mxu1  ;;  %5650 = vmatmul.mubr.f32.gmra.mxu1 %v11368_v53 }
 0x3e0   : > { %6570 = vst [vmem:[%s8369_s4 + $0x580] sm:$0xff] %v4366_v24  ;;  %v4368_v16 = vadd.f32 %v4367_v31, %v4075_v35  ;;  %v4080_v28 = vadd.f32 %v4079_v2, %v9327_v22  ;;  %5306 = vmatprep.mubr.f32.mxu0 %v10733_v20  ;;  %5655 = vmatprep.mubr.f32.mxu1 %v10733_v20  ;;  %v11371_v22 = vld [vmem:[#allocation71_spill] sm:$0xff]  ;;  %v11376_v2 = vld [vmem:[#allocation77_spill] sm:$0xff] }
 0x3e1   : > { %v4081_v51 = vpop.f32.mrf.mxu0  ;;  %v4381_v50 = vpop.f32.mrf.mxu1 }
 0x3e2   : > { %6571 = vst [vmem:[%s8369_s4 + $0x588] sm:$0xff] %v4368_v16  ;;  %v4373_v33 = vadd.f32 %v4372_v63, %v4080_v28  ;;  %v4082_v61 = vadd.f32 %v4081_v51, %v9332_v38  ;;  %v9607_v38 = vrot.slane %v6719_v21, %v236_v56  ;;  %v11375_v63 = vld [vmem:[#allocation80_spill] sm:$0xff] }
 0x3e3   : > { %v4086_v27 = vpop.f32.mrf.mxu0  ;;  %5309 = vmatmul.mubr.f32.gmra.mxu0 %v11370_v39  ;;  %v4892_v13 = vpop.f32.mrf.mxu1  ;;  %5659 = vmatmul.mubr.f32.gmra.mxu1 %v11371_v22 }
 0x3e4   : > { %6576 = vst [vmem:[%s8369_s4 + $0x5b0] sm:$0xff] %v4373_v33  ;;  %v4375_v36 = vadd.f32 %v4374_v3, %v4082_v61  ;;  %v4087_v7 = vadd.f32 %v4086_v27, %v9337_v19  ;;  %5314 = vmatprep.mubr.f32.mxu0 %v10733_v20  ;;  %5664 = vmatprep.mubr.f32.mxu1 %v10733_v20  ;;  %v11378_v33 = vld [vmem:[#allocation78_spill] sm:$0xff] }
 0x3e5   : > { %v4088_v60 = vpop.f32.mrf.mxu0  ;;  %v4894_v41 = vpop.f32.mrf.mxu1 }
 0x3e6   : > { %6577 = vst [vmem:[%s8369_s4 + $0x5b8] sm:$0xff] %v4375_v36  ;;  %v4380_v26 = vadd.f32 %v4379_v45, %v4087_v7  ;;  %v4089_v62 = vadd.f32 %v4088_v60, %v9342_v15  ;;  %v11377_v45 = vld [vmem:[#allocation84_spill] sm:$0xff]  ;;  %v11380_v60 = vld [vmem:[#allocation85_spill] sm:$0xff] }
 0x3e7   : > { %v4459_v19 = vpop.f32.mrf.mxu0  ;;  %5317 = vmatmul.mubr.f32.gmra.mxu0 %v11372_v18  ;;  %v4899_v30 = vpop.f32.mrf.mxu1  ;;  %5668 = vmatmul.mubr.f32.gmra.mxu1 %v11373_v25 }
 0x3e8   : > { %6582 = vst [vmem:[%s8369_s4 + $0x5e0] sm:$0xff] %v4380_v26  ;;  %v4382_v17 = vadd.f32 %v4381_v50, %v4089_v62  ;;  %v4460_v23 = vadd.f32 %v4459_v19, %v9607_v38  ;;  %5322 = vmatprep.mubr.f32.mxu0 %v10733_v20  ;;  %5673 = vmatprep.mubr.f32.mxu1 %v10733_v20  ;;  %v11381_v26 = vld [vmem:[#allocation92_spill] sm:$0xff] }
 0x3e9   : > { %v4461_v12 = vpop.f32.mrf.mxu0  ;;  %v4901_v31 = vpop.f32.mrf.mxu1 }
 0x3ea   : > { %6583 = vst [vmem:[%s8369_s4 + $0x5e8] sm:$0xff] %v4382_v17  ;;  %v9621_v15 = vadd.f32 %v4892_v13, %v4460_v23  ;;  %v4462_v44 = vadd.f32 %v4461_v12, %v9612_v57  ;;  %v11382_v12 = vld [vmem:[#allocation86_spill] sm:$0xff] }
 0x3eb   : > { %v4470_v9 = vpop.f32.mrf.mxu0  ;;  %5325 = vmatmul.mubr.f32.gmra.mxu0 %v11374_v59  ;;  %v4906_v48 = vpop.f32.mrf.mxu1  ;;  %5677 = vmatmul.mubr.f32.gmra.mxu1 %v11375_v63 }
 0x3ec   : > { %v9626_v49 = vadd.f32 %v4894_v41, %v4462_v44  ;;  %v4471_v40 = vadd.f32 %v4470_v9, %v9607_v38  ;;  %5330 = vmatprep.mubr.f32.mxu0 %v10733_v20  ;;  %5682 = vmatprep.mubr.f32.mxu1 %v10733_v20  ;;  %v11383_v44 = vld [vmem:[#allocation96_spill] sm:$0xff] }
 0x3ed   : > { %v4472_v5 = vpop.f32.mrf.mxu0  ;;  %v4908_v6 = vpop.f32.mrf.mxu1 }
 0x3ee   : > { %v9631_v3 = vadd.f32 %v4899_v30, %v4471_v40  ;;  %v4473_v24 = vadd.f32 %v4472_v5, %v9612_v57 }
 0x3ef   : > { %v4481_v35 = vpop.f32.mrf.mxu0  ;;  %5333 = vmatmul.mubr.f32.gmra.mxu0 %v11376_v2  ;;  %v4913_v43 = vpop.f32.mrf.mxu1  ;;  %5686 = vmatmul.mubr.f32.gmra.mxu1 %v11377_v45  ;;  %v11385_v2 = vld [vmem:[#allocation98_spill] sm:$0xff] }
 0x3f0   : > { %v9636_v53 = vadd.f32 %v4901_v31, %v4473_v24  ;;  %v4482_v16 = vadd.f32 %v4481_v35, %v9607_v38  ;;  %5338 = vmatprep.mubr.f32.mxu0 %v10733_v20  ;;  %5691 = vmatprep.mubr.f32.mxu1 %v10733_v20  ;;  %v11384_v24 = vld [vmem:[#allocation93_spill] sm:$0xff] }
 0x3f1   : > { %v4483_v28 = vpop.f32.mrf.mxu0  ;;  %v4915_v10 = vpop.f32.mrf.mxu1 }
 0x3f2   : > { %v9641_v56 = vadd.f32 %v4906_v48, %v4482_v16  ;;  %v4484_v51 = vadd.f32 %v4483_v28, %v9612_v57 }
 0x3f3   : > { %v4492_v50 = vpop.f32.mrf.mxu0  ;;  %5341 = vmatmul.mubr.f32.gmra.mxu0 %v11378_v33  ;;  %v4920_v61 = vpop.f32.mrf.mxu1  ;;  %5695 = vmatmul.mubr.f32.gmra.mxu1 %v11379_v11  ;;  %v11386_v33 = vld [vmem:[#allocation94_spill] sm:$0xff]  ;;  %v11387_v11 = vld [vmem:[#allocation103_spill] sm:$0xff] }
 0x3f4   : > { %v9646_v27 = vadd.f32 %v4908_v6, %v4484_v51  ;;  %v4493_v39 = vadd.f32 %v4492_v50, %v9607_v38  ;;  %5346 = vmatprep.mubr.f32.mxu0 %v10733_v20  ;;  %5700 = vmatprep.mubr.f32.mxu1 %v10733_v20 }
 0x3f5   : > { %v4494_v13 = vpop.f32.mrf.mxu0  ;;  %v4922_v22 = vpop.f32.mrf.mxu1 }
 0x3f6   : > { %v9651_v36 = vadd.f32 %v4913_v43, %v4493_v39  ;;  %v4495_v7 = vadd.f32 %v4494_v13, %v9612_v57 }
 0x3f7   : > { %v4503_v21 = vpop.f32.mrf.mxu0  ;;  %5349 = vmatmul.mubr.f32.gmra.mxu0 %v11380_v60  ;;  %v4927_v41 = vpop.f32.mrf.mxu1  ;;  %5704 = vmatmul.mubr.f32.gmra.mxu1 %v11381_v26  ;;  %v11388_v26 = vld [vmem:[#allocation100_spill] sm:$0xff] }
 0x3f8   : > { %v9656_v62 = vadd.f32 %v4915_v10, %v4495_v7  ;;  %v4504_v19 = vadd.f32 %v4503_v21, %v9607_v38  ;;  %5354 = vmatprep.mubr.f32.mxu0 %v10733_v20  ;;  %5709 = vmatprep.mubr.f32.mxu1 %v10733_v20 }
 0x3f9   : > { %v4505_v18 = vpop.f32.mrf.mxu0  ;;  %v4929_v30 = vpop.f32.mrf.mxu1 }
 0x3fa   : > { %v9661_v25 = vadd.f32 %v4920_v61, %v4504_v19  ;;  %v4506_v17 = vadd.f32 %v4505_v18, %v9612_v57  ;;  %v11389_v18 = vld [vmem:[#allocation108_spill] sm:$0xff] }
 0x3fb   : > { %v4514_v23 = vpop.f32.mrf.mxu0  ;;  %5357 = vmatmul.mubr.f32.gmra.mxu0 %v11382_v12  ;;  %v4934_v31 = vpop.f32.mrf.mxu1  ;;  %5713 = vmatmul.mubr.f32.gmra.mxu1 %v11383_v44 }
 0x3fc   : > { %v9666_v9 = vadd.f32 %v4922_v22, %v4506_v17  ;;  %v4515_v59 = vadd.f32 %v4514_v23, %v9607_v38  ;;  %5362 = vmatprep.mubr.f32.mxu0 %v10733_v20  ;;  %5718 = vmatprep.mubr.f32.mxu1 %v10733_v20 }
 0x3fd   : > { %v4516_v48 = vpop.f32.mrf.mxu0  ;;  %v4936_v63 = vpop.f32.mrf.mxu1 }
 0x3fe   : > { %v9671_v40 = vadd.f32 %v4927_v41, %v4515_v59  ;;  %v4517_v5 = vadd.f32 %v4516_v48, %v9612_v57  ;;  %v11390_v48 = vld [vmem:[#allocation104_spill] sm:$0xff] }
 0x3ff   : > { %v4525_v6 = vpop.f32.mrf.mxu0  ;;  %5365 = vmatmul.mubr.f32.gmra.mxu0 %v11384_v24  ;;  %v4941_v35 = vpop.f32.mrf.mxu1  ;;  %5722 = vmatmul.mubr.f32.gmra.mxu1 %v11385_v2 }
 0x400   : > { %v9676_v43 = vadd.f32 %v4929_v30, %v4517_v5  ;;  %v4526_v45 = vadd.f32 %v4525_v6, %v9607_v38  ;;  %5370 = vmatprep.mubr.f32.mxu0 %v10733_v20  ;;  %5727 = vmatprep.mubr.f32.mxu1 %v10733_v20  ;;  %v11391_v5 = vld [vmem:[#allocation112_spill] sm:$0xff] }
 0x401   : > { %v4527_v16 = vpop.f32.mrf.mxu0  ;;  %v4943_v28 = vpop.f32.mrf.mxu1 }
 0x402   : > { %v9681_v10 = vadd.f32 %v4934_v31, %v4526_v45  ;;  %v4528_v51 = vadd.f32 %v4527_v16, %v9612_v57 }
 0x403   : > { %v4536_v50 = vpop.f32.mrf.mxu0  ;;  %5373 = vmatmul.mubr.f32.gmra.mxu0 %v11386_v33  ;;  %v4948_v61 = vpop.f32.mrf.mxu1  ;;  %5731 = vmatmul.mubr.f32.gmra.mxu1 %v11387_v11  ;;  %v11393_v33 = vld [vmem:[#allocation116_spill] sm:$0xff] }
 0x404   : > { %v9686_v39 = vadd.f32 %v4936_v63, %v4528_v51  ;;  %v4537_v13 = vadd.f32 %v4536_v50, %v9607_v38  ;;  %5378 = vmatprep.mubr.f32.mxu0 %v10733_v20  ;;  %5736 = vmatprep.mubr.f32.mxu1 %v10733_v20  ;;  %v11392_v51 = vld [vmem:[#allocation109_spill] sm:$0xff] }
 0x405   : > { %v4538_v22 = vpop.f32.mrf.mxu0  ;;  %v4950_v7 = vpop.f32.mrf.mxu1 }
 0x406   : > { %v9691_v21 = vadd.f32 %v4941_v35, %v4537_v13  ;;  %v4539_v60 = vadd.f32 %v4538_v22, %v9612_v57 }
 0x407   : > { %v4547_v41 = vpop.f32.mrf.mxu0  ;;  %5381 = vmatmul.mubr.f32.gmra.mxu0 %v11388_v26  ;;  %v4955_v19 = vpop.f32.mrf.mxu1  ;;  %5740 = vmatmul.mubr.f32.gmra.mxu1 %v11389_v18  ;;  %v11394_v26 = vld [vmem:[#allocation113_spill] sm:$0xff]  ;;  %v11395_v18 = vld [vmem:[#allocation120_spill] sm:$0xff] }
 0x408   : > { %v9696_v30 = vadd.f32 %v4943_v28, %v4539_v60  ;;  %v4548_v17 = vadd.f32 %v4547_v41, %v9607_v38  ;;  %5386 = vmatprep.mubr.f32.mxu0 %v10733_v20  ;;  %5745 = vmatprep.mubr.f32.mxu1 %v10733_v20 }
 0x409   : > { %v4549_v23 = vpop.f32.mrf.mxu0  ;;  %v4957_v12 = vpop.f32.mrf.mxu1 }
 0x40a   : > { %v9701_v31 = vadd.f32 %v4948_v61, %v4548_v17  ;;  %v4550_v44 = vadd.f32 %v4549_v23, %v9612_v57 }
 0x40b   : > { %v4558_v59 = vpop.f32.mrf.mxu0  ;;  %5389 = vmatmul.mubr.f32.gmra.mxu0 %v11390_v48  ;;  %v4962_v63 = vpop.f32.mrf.mxu1  ;;  %5749 = vmatmul.mubr.f32.gmra.mxu1 %v11391_v5  ;;  %v11396_v5 = vld [vmem:[#allocation114_spill] sm:$0xff] }
 0x40c   : > { %v9706_v6 = vadd.f32 %v4950_v7, %v4550_v44  ;;  %v4559_v24 = vadd.f32 %v4558_v59, %v9607_v38  ;;  %5394 = vmatprep.mubr.f32.mxu0 %v10733_v20  ;;  %5754 = vmatprep.mubr.f32.mxu1 %v10733_v20 }
 0x40d   : > { %v4560_v35 = vpop.f32.mrf.mxu0  ;;  %v4964_v2 = vpop.f32.mrf.mxu1 }
 0x40e   : > { %v9711_v45 = vadd.f32 %v4955_v19, %v4559_v24  ;;  %v4561_v16 = vadd.f32 %v4560_v35, %v9612_v57  ;;  %v11397_v35 = vld [vmem:[#allocation124_spill] sm:$0xff] }
 0x40f   : > { %v4569_v28 = vpop.f32.mrf.mxu0  ;;  %5397 = vmatmul.mubr.f32.gmra.mxu0 %v11392_v51  ;;  %v4969_v50 = vpop.f32.mrf.mxu1  ;;  %5758 = vmatmul.mubr.f32.gmra.mxu1 %v11393_v33 }
 0x410   : > { %v9716_v61 = vadd.f32 %v4957_v12, %v4561_v16  ;;  %v4570_v11 = vadd.f32 %v4569_v28, %v9607_v38  ;;  %5402 = vmatprep.mubr.f32.mxu0 %v10733_v20  ;;  %5763 = vmatprep.mubr.f32.mxu1 %v10733_v20 }
 0x411   : > { %v4571_v13 = vpop.f32.mrf.mxu0  ;;  %v4971_v22 = vpop.f32.mrf.mxu1 }
 0x412   : > { %v9721_v7 = vadd.f32 %v4962_v63, %v4570_v11  ;;  %v4572_v60 = vadd.f32 %v4571_v13, %v9612_v57  ;;  %v11398_v13 = vld [vmem:[#allocation121_spill] sm:$0xff] }
 0x413   : > { %v4580_v41 = vpop.f32.mrf.mxu0  ;;  %5405 = vmatmul.mubr.f32.gmra.mxu0 %v11394_v26  ;;  %v4976_v19 = vpop.f32.mrf.mxu1  ;;  %5767 = vmatmul.mubr.f32.gmra.mxu1 %v11395_v18 }
 0x414   : > { %v9726_v17 = vadd.f32 %v4964_v2, %v4572_v60  ;;  %v4581_v23 = vadd.f32 %v4580_v41, %v9607_v38  ;;  %5410 = vmatprep.mubr.f32.mxu0 %v10733_v20  ;;  %5772 = vmatprep.mubr.f32.mxu1 %v10733_v20  ;;  %v11399_v41 = vld [vmem:[#allocation127_spill] sm:$0xff] }
 0x415   : > { %v4582_v12 = vpop.f32.mrf.mxu0  ;;  %v4978_v44 = vpop.f32.mrf.mxu1 }
 0x416   : > { %v9731_v59 = vadd.f32 %v4969_v50, %v4581_v23  ;;  %v4583_v48 = vadd.f32 %v4582_v12, %v9612_v57 }
 0x417   : > { %v4591_v63 = vpop.f32.mrf.mxu0  ;;  %5413 = vmatmul.mubr.f32.gmra.mxu0 %v11396_v5  ;;  %v4983_v24 = vpop.f32.mrf.mxu1  ;;  %5776 = vmatmul.mubr.f32.gmra.mxu1 %v11397_v35  ;;  %v11401_v35 = vld [vmem:[#allocation130_spill] sm:$0xff] }
 0x418   : > { %v9736_v2 = vadd.f32 %v4971_v22, %v4583_v48  ;;  %v4592_v16 = vadd.f32 %v4591_v63, %v9607_v38  ;;  %5418 = vmatprep.mubr.f32.mxu0 %v10733_v20  ;;  %5781 = vmatprep.mubr.f32.mxu1 %v10733_v20  ;;  %v11400_v63 = vld [vmem:[#allocation125_spill] sm:$0xff] }
 0x419   : > { %v4593_v28 = vpop.f32.mrf.mxu0  ;;  %v4985_v51 = vpop.f32.mrf.mxu1 }
 0x41a   : > { %v9741_v50 = vadd.f32 %v4976_v19, %v4592_v16  ;;  %v4594_v33 = vadd.f32 %v4593_v28, %v9612_v57 }
 0x41b   : > { %v4602_v11 = vpop.f32.mrf.mxu0  ;;  %5421 = vmatmul.mubr.f32.gmra.mxu0 %v11398_v13  ;;  %v4990_v60 = vpop.f32.mrf.mxu1  ;;  %5785 = vmatmul.mubr.f32.gmra.mxu1 %v11399_v41  ;;  %v11402_v41 = vld [vmem:[#allocation128_spill] sm:$0xff] }
 0x41c   : > { %v9746_v22 = vadd.f32 %v4978_v44, %v4594_v33  ;;  %v4603_v26 = vadd.f32 %v4602_v11, %v9607_v38  ;;  %5426 = vmatprep.mubr.f32.mxu0 %v10733_v20  ;;  %5790 = vmatprep.mubr.f32.mxu1 %v10733_v20 }
 0x41d   : > { %v4604_v18 = vpop.f32.mrf.mxu0  ;;  %v4992_v23 = vpop.f32.mrf.mxu1 }
 0x41e   : > { %v9751_v19 = vadd.f32 %v4983_v24, %v4603_v26  ;;  %v4605_v12 = vadd.f32 %v4604_v18, %v9612_v57  ;;  %v11403_v18 = vld [vmem:[#allocation5_spill] sm:$0xff] }
 0x41f   : > { %v4613_v48 = vpop.f32.mrf.mxu0  ;;  %5429 = vmatmul.mubr.f32.gmra.mxu0 %v11400_v63  ;;  %v4997_v5 = vpop.f32.mrf.mxu1  ;;  %5794 = vmatmul.mubr.f32.gmra.mxu1 %v11401_v35 }
 0x420   : > { %v9756_v44 = vadd.f32 %v4985_v51, %v4605_v12  ;;  %v4614_v16 = vadd.f32 %v4613_v48, %v9607_v38  ;;  %5434 = vmatprep.mubr.f32.mxu0 %v10733_v20  ;;  %6169 = vmatprep.mubr.f32.mxu1 %v10733_v20 }
 0x421   : > { %v4615_v28 = vpop.f32.mrf.mxu0  ;;  %v4999_v33 = vpop.f32.mrf.mxu1 }
 0x422   : > { %v9761_v24 = vadd.f32 %v4990_v60, %v4614_v16  ;;  %v4616_v11 = vadd.f32 %v4615_v28, %v9612_v57 }
 0x423   : > { %v4624_v13 = vpop.f32.mrf.mxu0  ;;  %5437 = vmatmul.mubr.f32.gmra.mxu0 %v11402_v41  ;;  %v5004_v26 = vpop.f32.mrf.mxu1  ;;  %6171 = vmatmul.mubr.f32.vlgmr.msra.gmra.mxu1 %v11403_v18  ;;  %v11406_v41 = vld [vmem:[#allocation6_spill] sm:$0xff] }
 0x424   : > { %v9766_v51 = vadd.f32 %v4992_v23, %v4616_v11  ;;  %v4625_v12 = vadd.f32 %v4624_v13, %v9607_v38  ;;  %5876 = vmatprep.mubr.f32.mxu0 %v10733_v20  ;;  %6176 = vmatprep.mubr.f32.mxu1 %v10733_v20 }
 0x425   : > { %v4626_v48 = vpop.f32.mrf.mxu0  ;;  %v5006_v63 = vpop.f32.mrf.mxu1 }
 0x426   : > { %11404 = vst [vmem:[#allocation139_spill] sm:$0xff] %v9766_v51  ;;  %v9771_v60 = vadd.f32 %v4997_v5, %v4625_v12  ;;  %v4627_v35 = vadd.f32 %v4626_v48, %v9612_v57 }
 0x427   : > { %v4635_v16 = vpop.f32.mrf.mxu0  ;;  %5878 = vmatmul.mubr.f32.vlgmr.msra.gmra.mxu0 %v11403_v18  ;;  %v5011_v28 = vpop.f32.mrf.mxu1  ;;  %6178 = vmatmul.mubr.f32.gmra.mxu1 %v11406_v41 }
 0x428   : > { %11405 = vst [vmem:[#allocation38_spill] sm:$0xff] %v9771_v60  ;;  %v9776_v23 = vadd.f32 %v4999_v33, %v4627_v35  ;;  %v4636_v11 = vadd.f32 %v4635_v16, %v9607_v38  ;;  %5883 = vmatprep.mubr.f32.mxu0 %v10733_v20  ;;  %6183 = vmatprep.mubr.f32.mxu1 %v10733_v20  ;;  %v11409_v60 = vld [vmem:[#allocation7_spill] sm:$0xff] }
 0x429   : > { %v4637_v13 = vpop.f32.mrf.mxu0  ;;  %v5013_v51 = vpop.f32.mrf.mxu1 }
 0x42a   : > { %11407 = vst [vmem:[#allocation134_spill] sm:$0xff] %v9776_v23  ;;  %v9781_v5 = vadd.f32 %v5004_v26, %v4636_v11  ;;  %v4638_v12 = vadd.f32 %v4637_v13, %v9612_v57 }
 0x42b   : > { %v4646_v48 = vpop.f32.mrf.mxu0  ;;  %5885 = vmatmul.mubr.f32.gmra.mxu0 %v11406_v41  ;;  %v5018_v18 = vpop.f32.mrf.mxu1  ;;  %6185 = vmatmul.mubr.f32.gmra.mxu1 %v11409_v60 }
 0x42c   : > { %11408 = vst [vmem:[#allocation140_spill] sm:$0xff] %v9781_v5  ;;  %v9786_v33 = vadd.f32 %v5006_v63, %v4638_v12  ;;  %v4647_v35 = vadd.f32 %v4646_v48, %v9607_v38  ;;  %5890 = vmatprep.mubr.f32.mxu0 %v10733_v20  ;;  %6190 = vmatprep.mubr.f32.mxu1 %v10733_v20  ;;  %v11412_v5 = vld [vmem:[#allocation9_spill] sm:$0xff] }
 0x42d   : > { %v4648_v16 = vpop.f32.mrf.mxu0  ;;  %v5020_v23 = vpop.f32.mrf.mxu1 }
 0x42e   : > { %11410 = vst [vmem:[#allocation43_spill] sm:$0xff] %v9786_v33  ;;  %v9791_v26 = vadd.f32 %v5011_v28, %v4647_v35  ;;  %v4649_v11 = vadd.f32 %v4648_v16, %v9612_v57 }
 0x42f   : > { %v4657_v13 = vpop.f32.mrf.mxu0  ;;  %5892 = vmatmul.mubr.f32.gmra.mxu0 %v11409_v60  ;;  %v5025_v41 = vpop.f32.mrf.mxu1  ;;  %6192 = vmatmul.mubr.f32.gmra.mxu1 %v11412_v5 }
 0x430   : > { %11411 = vst [vmem:[#allocation141_spill] sm:$0xff] %v9791_v26  ;;  %v9796_v63 = vadd.f32 %v5013_v51, %v4649_v11  ;;  %v4658_v12 = vadd.f32 %v4657_v13, %v9607_v38  ;;  %5897 = vmatprep.mubr.f32.mxu0 %v10733_v20  ;;  %6197 = vmatprep.mubr.f32.mxu1 %v10733_v20  ;;  %v11415_v26 = vld [vmem:[#allocation14_spill] sm:$0xff] }
 0x431   : > { %v4659_v48 = vpop.f32.mrf.mxu0  ;;  %v5027_v33 = vpop.f32.mrf.mxu1 }
 0x432   : > { %11413 = vst [vmem:[#allocation142_spill] sm:$0xff] %v9796_v63  ;;  %v9801_v28 = vadd.f32 %v5018_v18, %v4658_v12  ;;  %v4660_v35 = vadd.f32 %v4659_v48, %v9612_v57 }
 0x433   : > { %v4668_v16 = vpop.f32.mrf.mxu0  ;;  %5899 = vmatmul.mubr.f32.gmra.mxu0 %v11412_v5  ;;  %v5032_v60 = vpop.f32.mrf.mxu1  ;;  %6199 = vmatmul.mubr.f32.gmra.mxu1 %v11415_v26 }
 0x434   : > { %11414 = vst [vmem:[#allocation47_spill] sm:$0xff] %v9801_v28  ;;  %v9806_v51 = vadd.f32 %v5020_v23, %v4660_v35  ;;  %v4669_v11 = vadd.f32 %v4668_v16, %v9607_v38  ;;  %5904 = vmatprep.mubr.f32.mxu0 %v10733_v20  ;;  %6204 = vmatprep.mubr.f32.mxu1 %v10733_v20  ;;  %v11418_v28 = vld [vmem:[#allocation18_spill] sm:$0xff] }
 0x435   : > { %v4670_v13 = vpop.f32.mrf.mxu0  ;;  %v5034_v63 = vpop.f32.mrf.mxu1 }
 0x436   : > { %11416 = vst [vmem:[#allocation143_spill] sm:$0xff] %v9806_v51  ;;  %v9811_v18 = vadd.f32 %v5025_v41, %v4669_v11  ;;  %v4671_v12 = vadd.f32 %v4670_v13, %v9612_v57 }
 0x437   : > { %v4679_v48 = vpop.f32.mrf.mxu0  ;;  %5906 = vmatmul.mubr.f32.gmra.mxu0 %v11415_v26  ;;  %v5039_v5 = vpop.f32.mrf.mxu1  ;;  %6206 = vmatmul.mubr.f32.gmra.mxu1 %v11418_v28 }
 0x438   : > { %11417 = vst [vmem:[#allocation144_spill] sm:$0xff] %v9811_v18  ;;  %v9816_v23 = vadd.f32 %v5027_v33, %v4671_v12  ;;  %v4680_v35 = vadd.f32 %v4679_v48, %v9607_v38  ;;  %5911 = vmatprep.mubr.f32.mxu0 %v10733_v20  ;;  %6211 = vmatprep.mubr.f32.mxu1 %v10733_v20  ;;  %v11421_v18 = vld [vmem:[#allocation23_spill] sm:$0xff] }
 0x439   : > { %v4681_v16 = vpop.f32.mrf.mxu0  ;;  %v5041_v51 = vpop.f32.mrf.mxu1 }
 0x43a   : > { %11419 = vst [vmem:[#allocation52_spill] sm:$0xff] %v9816_v23  ;;  %v9821_v41 = vadd.f32 %v5032_v60, %v4680_v35  ;;  %v4682_v11 = vadd.f32 %v4681_v16, %v9612_v57 }
 0x43b   : > { %v4690_v13 = vpop.f32.mrf.mxu0  ;;  %5913 = vmatmul.mubr.f32.gmra.mxu0 %v11418_v28  ;;  %v5046_v26 = vpop.f32.mrf.mxu1  ;;  %6213 = vmatmul.mubr.f32.gmra.mxu1 %v11421_v18 }
 0x43c   : > { %11420 = vst [vmem:[#allocation145_spill] sm:$0xff] %v9821_v41  ;;  %v9826_v33 = vadd.f32 %v5034_v63, %v4682_v11  ;;  %v4691_v12 = vadd.f32 %v4690_v13, %v9607_v38  ;;  %5918 = vmatprep.mubr.f32.mxu0 %v10733_v20  ;;  %6218 = vmatprep.mubr.f32.mxu1 %v10733_v20  ;;  %v11424_v41 = vld [vmem:[#allocation28_spill] sm:$0xff] }
 0x43d   : > { %v4692_v48 = vpop.f32.mrf.mxu0  ;;  %v5048_v23 = vpop.f32.mrf.mxu1 }
 0x43e   : > { %11422 = vst [vmem:[#allocation146_spill] sm:$0xff] %v9826_v33  ;;  %v9831_v60 = vadd.f32 %v5039_v5, %v4691_v12  ;;  %v4693_v35 = vadd.f32 %v4692_v48, %v9612_v57 }
 0x43f   : > { %v4701_v16 = vpop.f32.mrf.mxu0  ;;  %5920 = vmatmul.mubr.f32.gmra.mxu0 %v11421_v18  ;;  %v5053_v28 = vpop.f32.mrf.mxu1  ;;  %6220 = vmatmul.mubr.f32.gmra.mxu1 %v11424_v41 }
 0x440   : > { %11423 = vst [vmem:[#allocation55_spill] sm:$0xff] %v9831_v60  ;;  %v9836_v63 = vadd.f32 %v5041_v51, %v4693_v35  ;;  %v4702_v11 = vadd.f32 %v4701_v16, %v9607_v38  ;;  %5925 = vmatprep.mubr.f32.mxu0 %v10733_v20  ;;  %6225 = vmatprep.mubr.f32.mxu1 %v10733_v20  ;;  %v11427_v60 = vld [vmem:[#allocation33_spill] sm:$0xff] }
 0x441   : > { %v4703_v13 = vpop.f32.mrf.mxu0  ;;  %v5055_v33 = vpop.f32.mrf.mxu1 }
 0x442   : > { %11425 = vst [vmem:[#allocation147_spill] sm:$0xff] %v9836_v63  ;;  %v9841_v5 = vadd.f32 %v5046_v26, %v4702_v11  ;;  %v4704_v12 = vadd.f32 %v4703_v13, %v9612_v57 }
 0x443   : > { %v4712_v48 = vpop.f32.mrf.mxu0  ;;  %5927 = vmatmul.mubr.f32.gmra.mxu0 %v11424_v41  ;;  %v5060_v18 = vpop.f32.mrf.mxu1  ;;  %6227 = vmatmul.mubr.f32.gmra.mxu1 %v11427_v60 }
 0x444   : > { %11426 = vst [vmem:[#allocation148_spill] sm:$0xff] %v9841_v5  ;;  %v9846_v51 = vadd.f32 %v5048_v23, %v4704_v12  ;;  %v4713_v35 = vadd.f32 %v4712_v48, %v9607_v38  ;;  %5932 = vmatprep.mubr.f32.mxu0 %v10733_v20  ;;  %6232 = vmatprep.mubr.f32.mxu1 %v10733_v20  ;;  %v11430_v5 = vld [vmem:[#allocation37_spill] sm:$0xff] }
 0x445   : > { %v4714_v16 = vpop.f32.mrf.mxu0  ;;  %v5062_v63 = vpop.f32.mrf.mxu1 }
 0x446   : > { %11428 = vst [vmem:[#allocation59_spill] sm:$0xff] %v9846_v51  ;;  %v9851_v26 = vadd.f32 %v5053_v28, %v4713_v35  ;;  %v4715_v11 = vadd.f32 %v4714_v16, %v9612_v57 }
 0x447   : > { %v4723_v13 = vpop.f32.mrf.mxu0  ;;  %5934 = vmatmul.mubr.f32.gmra.mxu0 %v11427_v60  ;;  %v5067_v41 = vpop.f32.mrf.mxu1  ;;  %6234 = vmatmul.mubr.f32.gmra.mxu1 %v11430_v5 }
 0x448   : > { %11429 = vst [vmem:[#allocation149_spill] sm:$0xff] %v9851_v26  ;;  %v9856_v23 = vadd.f32 %v5055_v33, %v4715_v11  ;;  %v4724_v12 = vadd.f32 %v4723_v13, %v9607_v38  ;;  %5939 = vmatprep.mubr.f32.mxu0 %v10733_v20  ;;  %6239 = vmatprep.mubr.f32.mxu1 %v10733_v20  ;;  %v11433_v26 = vld [vmem:[#allocation41_spill] sm:$0xff] }
 0x449   : > { %v4725_v48 = vpop.f32.mrf.mxu0  ;;  %v5069_v51 = vpop.f32.mrf.mxu1 }
 0x44a   : > { %11431 = vst [vmem:[#allocation150_spill] sm:$0xff] %v9856_v23  ;;  %v9861_v28 = vadd.f32 %v5060_v18, %v4724_v12  ;;  %v4726_v35 = vadd.f32 %v4725_v48, %v9612_v57 }
 0x44b   : > { %v4734_v16 = vpop.f32.mrf.mxu0  ;;  %5941 = vmatmul.mubr.f32.gmra.mxu0 %v11430_v5  ;;  %v5074_v60 = vpop.f32.mrf.mxu1  ;;  %6241 = vmatmul.mubr.f32.gmra.mxu1 %v11433_v26 }
 0x44c   : > { %11432 = vst [vmem:[#allocation63_spill] sm:$0xff] %v9861_v28  ;;  %v9866_v33 = vadd.f32 %v5062_v63, %v4726_v35  ;;  %v4735_v11 = vadd.f32 %v4734_v16, %v9607_v38  ;;  %5946 = vmatprep.mubr.f32.mxu0 %v10733_v20  ;;  %6246 = vmatprep.mubr.f32.mxu1 %v10733_v20  ;;  %v11436_v28 = vld [vmem:[#allocation42_spill] sm:$0xff] }
 0x44d   : > { %v4736_v13 = vpop.f32.mrf.mxu0  ;;  %v5076_v23 = vpop.f32.mrf.mxu1 }
 0x44e   : > { %11434 = vst [vmem:[#allocation151_spill] sm:$0xff] %v9866_v33  ;;  %v9871_v18 = vadd.f32 %v5067_v41, %v4735_v11  ;;  %v4737_v12 = vadd.f32 %v4736_v13, %v9612_v57 }
 0x44f   : > { %v4745_v48 = vpop.f32.mrf.mxu0  ;;  %5948 = vmatmul.mubr.f32.gmra.mxu0 %v11433_v26  ;;  %v5081_v5 = vpop.f32.mrf.mxu1  ;;  %6248 = vmatmul.mubr.f32.gmra.mxu1 %v11436_v28 }
 0x450   : > { %11435 = vst [vmem:[#allocation152_spill] sm:$0xff] %v9871_v18  ;;  %v9876_v63 = vadd.f32 %v5069_v51, %v4737_v12  ;;  %v4746_v35 = vadd.f32 %v4745_v48, %v9607_v38  ;;  %5953 = vmatprep.mubr.f32.mxu0 %v10733_v20  ;;  %6253 = vmatprep.mubr.f32.mxu1 %v10733_v20  ;;  %v11439_v18 = vld [vmem:[#allocation49_spill] sm:$0xff] }
 0x451   : > { %v4747_v16 = vpop.f32.mrf.mxu0  ;;  %v5083_v33 = vpop.f32.mrf.mxu1 }
 0x452   : > { %11437 = vst [vmem:[#allocation67_spill] sm:$0xff] %v9876_v63  ;;  %v9881_v41 = vadd.f32 %v5074_v60, %v4746_v35  ;;  %v4748_v11 = vadd.f32 %v4747_v16, %v9612_v57 }
 0x453   : > { %v4756_v13 = vpop.f32.mrf.mxu0  ;;  %5955 = vmatmul.mubr.f32.gmra.mxu0 %v11436_v28  ;;  %v5088_v26 = vpop.f32.mrf.mxu1  ;;  %6255 = vmatmul.mubr.f32.gmra.mxu1 %v11439_v18 }
 0x454   : > { %11438 = vst [vmem:[#allocation153_spill] sm:$0xff] %v9881_v41  ;;  %v9886_v51 = vadd.f32 %v5076_v23, %v4748_v11  ;;  %v4757_v12 = vadd.f32 %v4756_v13, %v9607_v38  ;;  %5960 = vmatprep.mubr.f32.mxu0 %v10733_v20  ;;  %6260 = vmatprep.mubr.f32.mxu1 %v10733_v20  ;;  %v11442_v41 = vld [vmem:[#allocation51_spill] sm:$0xff] }
 0x455   : > { %v4758_v48 = vpop.f32.mrf.mxu0  ;;  %v5090_v63 = vpop.f32.mrf.mxu1 }
 0x456   : > { %11440 = vst [vmem:[#allocation154_spill] sm:$0xff] %v9886_v51  ;;  %v9891_v60 = vadd.f32 %v5081_v5, %v4757_v12  ;;  %v4759_v35 = vadd.f32 %v4758_v48, %v9612_v57 }
 0x457   : > { %v4767_v16 = vpop.f32.mrf.mxu0  ;;  %5962 = vmatmul.mubr.f32.gmra.mxu0 %v11439_v18  ;;  %v5095_v28 = vpop.f32.mrf.mxu1  ;;  %6262 = vmatmul.mubr.f32.gmra.mxu1 %v11442_v41 }
 0x458   : > { %11441 = vst [vmem:[#allocation70_spill] sm:$0xff] %v9891_v60  ;;  %v9896_v23 = vadd.f32 %v5083_v33, %v4759_v35  ;;  %v4768_v11 = vadd.f32 %v4767_v16, %v9607_v38  ;;  %5967 = vmatprep.mubr.f32.mxu0 %v10733_v20  ;;  %6267 = vmatprep.mubr.f32.mxu1 %v10733_v20  ;;  %v11445_v60 = vld [vmem:[#allocation54_spill] sm:$0xff] }
 0x459   : > { %v4769_v13 = vpop.f32.mrf.mxu0  ;;  %v5097_v51 = vpop.f32.mrf.mxu1 }
 0x45a   : > { %11443 = vst [vmem:[#allocation155_spill] sm:$0xff] %v9896_v23  ;;  %v9901_v5 = vadd.f32 %v5088_v26, %v4768_v11  ;;  %v4770_v12 = vadd.f32 %v4769_v13, %v9612_v57 }
 0x45b   : > { %v4778_v48 = vpop.f32.mrf.mxu0  ;;  %5969 = vmatmul.mubr.f32.gmra.mxu0 %v11442_v41  ;;  %v5102_v18 = vpop.f32.mrf.mxu1  ;;  %6269 = vmatmul.mubr.f32.gmra.mxu1 %v11445_v60 }
 0x45c   : > { %11444 = vst [vmem:[#allocation75_spill] sm:$0xff] %v9901_v5  ;;  %v9906_v33 = vadd.f32 %v5090_v63, %v4770_v12  ;;  %v4779_v35 = vadd.f32 %v4778_v48, %v9607_v38  ;;  %5974 = vmatprep.mubr.f32.mxu0 %v10733_v20  ;;  %6274 = vmatprep.mubr.f32.mxu1 %v10733_v20  ;;  %v11447_v5 = vld [vmem:[#allocation58_spill] sm:$0xff] }
 0x45d   : > { %v4780_v16 = vpop.f32.mrf.mxu0  ;;  %v5104_v23 = vpop.f32.mrf.mxu1 }
 0x45e   : > { %11446 = vst [vmem:[#allocation156_spill] sm:$0xff] %v9906_v33  ;;  %v9911_v26 = vadd.f32 %v5095_v28, %v4779_v35  ;;  %v4781_v11 = vadd.f32 %v4780_v16, %v9612_v57 }
 0x45f   : > { %v4789_v13 = vpop.f32.mrf.mxu0  ;;  %5976 = vmatmul.mubr.f32.gmra.mxu0 %v11445_v60  ;;  %v5109_v41 = vpop.f32.mrf.mxu1  ;;  %6276 = vmatmul.mubr.f32.gmra.mxu1 %v11447_v5 }
 0x460   : > { %v9916_v63 = vadd.f32 %v5097_v51, %v4781_v11  ;;  %v4790_v12 = vadd.f32 %v4789_v13, %v9607_v38  ;;  %5981 = vmatprep.mubr.f32.mxu0 %v10733_v20  ;;  %6281 = vmatprep.mubr.f32.mxu1 %v10733_v20 }
 0x461   : > { %v4791_v48 = vpop.f32.mrf.mxu0  ;;  %v5111_v33 = vpop.f32.mrf.mxu1 }
 0x462   : > { %11448 = vst [vmem:[#allocation79_spill] sm:$0xff] %v9916_v63  ;;  %v9921_v28 = vadd.f32 %v5102_v18, %v4790_v12  ;;  %v4792_v35 = vadd.f32 %v4791_v48, %v9612_v57 }
 0x463   : > { %v4800_v16 = vpop.f32.mrf.mxu0  ;;  %5983 = vmatmul.mubr.f32.gmra.mxu0 %v11447_v5  ;;  %v5516_v60 = vpop.f32.mrf.mxu1  ;;  %6283 = vmatmul.mubr.f32.gmra.mxu1 %v11178_v4 }
 0x464   : > { %v9926_v51 = vadd.f32 %v5104_v23, %v4792_v35  ;;  %v4801_v11 = vadd.f32 %v4800_v16, %v9607_v38  ;;  %5988 = vmatprep.mubr.f32.mxu0 %v10733_v20  ;;  %6288 = vmatprep.mubr.f32.mxu1 %v10733_v20 }
 0x465   : > { %v4802_v13 = vpop.f32.mrf.mxu0  ;;  %v5518_v63 = vpop.f32.mrf.mxu1 }
 0x466   : > { %v9931_v18 = vadd.f32 %v5109_v41, %v4801_v11  ;;  %v4803_v12 = vadd.f32 %v4802_v13, %v9612_v57 }
 0x467   : > { %v5190_v48 = vpop.f32.mrf.mxu0  ;;  %5990 = vmatmul.mubr.f32.gmra.mxu0 %v11178_v4  ;;  %v5525_v5 = vpop.f32.mrf.mxu1  ;;  %6290 = vmatmul.mubr.f32.gmra.mxu1 %v10892_v1 }
 0x468   : > { %v9936_v23 = vadd.f32 %v5111_v33, %v4803_v12  ;;  %v5191_v38 = vadd.f32 %v5190_v48, %v9621_v15  ;;  %5995 = vmatprep.mubr.f32.mxu0 %v10733_v20  ;;  %6295 = vmatprep.mubr.f32.mxu1 %v10733_v20 }
 0x469   : > { %v5192_v35 = vpop.f32.mrf.mxu0  ;;  %v5527_v16 = vpop.f32.mrf.mxu1 }
 0x46a   : > { %v9941_v41 = vadd.f32 %v5516_v60, %v5191_v38  ;;  %v5193_v57 = vadd.f32 %v5192_v35, %v9626_v49 }
 0x46b   : > { %v5198_v11 = vpop.f32.mrf.mxu0  ;;  %5997 = vmatmul.mubr.f32.gmra.mxu0 %v10892_v1  ;;  %v5534_v4 = vpop.f32.mrf.mxu1  ;;  %6297 = vmatmul.mubr.f32.gmra.mxu1 %v11180_v29 }
 0x46c   : > { %v9946_v33 = vadd.f32 %v5518_v63, %v5193_v57  ;;  %v5199_v15 = vadd.f32 %v5198_v11, %v9631_v3  ;;  %6002 = vmatprep.mubr.f32.mxu0 %v10733_v20  ;;  %6302 = vmatprep.mubr.f32.mxu1 %v10733_v20 }
 0x46d   : > { %v5200_v13 = vpop.f32.mrf.mxu0  ;;  %v5536_v12 = vpop.f32.mrf.mxu1 }
 0x46e   : > { %v9951_v60 = vadd.f32 %v5525_v5, %v5199_v15  ;;  %v5201_v49 = vadd.f32 %v5200_v13, %v9636_v53 }
 0x46f   : > { %v5206_v48 = vpop.f32.mrf.mxu0  ;;  %6004 = vmatmul.mubr.f32.gmra.mxu0 %v11180_v29  ;;  %v5543_v1 = vpop.f32.mrf.mxu1  ;;  %6304 = vmatmul.mubr.f32.gmra.mxu1 %v10896_v58 }
 0x470   : > { %v9956_v63 = vadd.f32 %v5527_v16, %v5201_v49  ;;  %v5207_v3 = vadd.f32 %v5206_v48, %v9641_v56  ;;  %6009 = vmatprep.mubr.f32.mxu0 %v10733_v20  ;;  %6309 = vmatprep.mubr.f32.mxu1 %v10733_v20 }
 0x471   : > { %v5208_v38 = vpop.f32.mrf.mxu0  ;;  %v5545_v35 = vpop.f32.mrf.mxu1 }
 0x472   : > { %v9961_v5 = vadd.f32 %v5534_v4, %v5207_v3  ;;  %v5209_v53 = vadd.f32 %v5208_v38, %v9646_v27 }
 0x473   : > { %v5214_v57 = vpop.f32.mrf.mxu0  ;;  %6011 = vmatmul.mubr.f32.gmra.mxu0 %v10896_v58  ;;  %v5552_v29 = vpop.f32.mrf.mxu1  ;;  %6311 = vmatmul.mubr.f32.gmra.mxu1 %v10898_v34 }
 0x474   : > { %v9966_v16 = vadd.f32 %v5536_v12, %v5209_v53  ;;  %v5215_v56 = vadd.f32 %v5214_v57, %v9651_v36  ;;  %6016 = vmatprep.mubr.f32.mxu0 %v10733_v20  ;;  %6316 = vmatprep.mubr.f32.mxu1 %v10733_v20 }
 0x475   : > { %v5216_v11 = vpop.f32.mrf.mxu0  ;;  %v5554_v15 = vpop.f32.mrf.mxu1 }
 0x476   : > { %v9971_v4 = vadd.f32 %v5543_v1, %v5215_v56  ;;  %v5217_v27 = vadd.f32 %v5216_v11, %v9656_v62 }
 0x477   : > { %v5222_v13 = vpop.f32.mrf.mxu0  ;;  %6018 = vmatmul.mubr.f32.gmra.mxu0 %v10898_v34  ;;  %v5561_v58 = vpop.f32.mrf.mxu1  ;;  %6318 = vmatmul.mubr.f32.gmra.mxu1 %v10900_v0 }
 0x478   : > { %v9976_v12 = vadd.f32 %v5545_v35, %v5217_v27  ;;  %v5223_v36 = vadd.f32 %v5222_v13, %v9661_v25  ;;  %6023 = vmatprep.mubr.f32.mxu0 %v10733_v20  ;;  %6323 = vmatprep.mubr.f32.mxu1 %v10733_v20 }
 0x479   : > { %v5224_v49 = vpop.f32.mrf.mxu0  ;;  %v5563_v48 = vpop.f32.mrf.mxu1 }
 0x47a   : > { %v9981_v1 = vadd.f32 %v5552_v29, %v5223_v36  ;;  %v5225_v62 = vadd.f32 %v5224_v49, %v9666_v9 }
 0x47b   : > { %v5230_v3 = vpop.f32.mrf.mxu0  ;;  %6025 = vmatmul.mubr.f32.gmra.mxu0 %v10900_v0  ;;  %v5570_v34 = vpop.f32.mrf.mxu1  ;;  %6325 = vmatmul.mubr.f32.gmra.mxu1 %v10902_v42 }
 0x47c   : > { %v9986_v38 = vadd.f32 %v5554_v15, %v5225_v62  ;;  %v5231_v25 = vadd.f32 %v5230_v3, %v9671_v40  ;;  %6030 = vmatprep.mubr.f32.mxu0 %v10733_v20  ;;  %6330 = vmatprep.mubr.f32.mxu1 %v10733_v20 }
 0x47d   : > { %v5232_v35 = vpop.f32.mrf.mxu0  ;;  %v5572_v53 = vpop.f32.mrf.mxu1 }
 0x47e   : > { %v9991_v57 = vadd.f32 %v5561_v58, %v5231_v25  ;;  %v5233_v9 = vadd.f32 %v5232_v35, %v9676_v43 }
 0x47f   : > { %v5238_v29 = vpop.f32.mrf.mxu0  ;;  %6032 = vmatmul.mubr.f32.gmra.mxu0 %v10902_v42  ;;  %v5579_v0 = vpop.f32.mrf.mxu1  ;;  %6332 = vmatmul.mubr.f32.gmra.mxu1 %v10904_v52 }
 0x480   : > { %v9996_v56 = vadd.f32 %v5563_v48, %v5233_v9  ;;  %v5239_v40 = vadd.f32 %v5238_v29, %v9681_v10  ;;  %6037 = vmatprep.mubr.f32.mxu0 %v10733_v20  ;;  %6337 = vmatprep.mubr.f32.mxu1 %v10733_v20 }
 0x481   : > { %v5240_v11 = vpop.f32.mrf.mxu0  ;;  %v5581_v15 = vpop.f32.mrf.mxu1 }
 0x482   : > { %v10001_v27 = vadd.f32 %v5570_v34, %v5239_v40  ;;  %v5241_v43 = vadd.f32 %v5240_v11, %v9686_v39 }
 0x483   : > { %v5246_v13 = vpop.f32.mrf.mxu0  ;;  %6039 = vmatmul.mubr.f32.gmra.mxu0 %v10904_v52  ;;  %v5588_v42 = vpop.f32.mrf.mxu1  ;;  %6339 = vmatmul.mubr.f32.gmra.mxu1 %v10906_v46 }
 0x484   : > { %v10006_v58 = vadd.f32 %v5572_v53, %v5241_v43  ;;  %v5247_v10 = vadd.f32 %v5246_v13, %v9691_v21  ;;  %6044 = vmatprep.mubr.f32.mxu0 %v10733_v20  ;;  %6344 = vmatprep.mubr.f32.mxu1 %v10733_v20 }
 0x485   : > { %v5248_v36 = vpop.f32.mrf.mxu0  ;;  %v5590_v49 = vpop.f32.mrf.mxu1 }
 0x486   : > { %v10011_v48 = vadd.f32 %v5579_v0, %v5247_v10  ;;  %v5249_v39 = vadd.f32 %v5248_v36, %v9696_v30 }
 0x487   : > { %v5254_v62 = vpop.f32.mrf.mxu0  ;;  %6046 = vmatmul.mubr.f32.gmra.mxu0 %v10906_v46  ;;  %v5597_v52 = vpop.f32.mrf.mxu1  ;;  %6346 = vmatmul.mubr.f32.gmra.mxu1 %v10908_v8 }
 0x488   : > { %v10016_v3 = vadd.f32 %v5581_v15, %v5249_v39  ;;  %v5255_v21 = vadd.f32 %v5254_v62, %v9701_v31  ;;  %6051 = vmatprep.mubr.f32.mxu0 %v10733_v20  ;;  %6351 = vmatprep.mubr.f32.mxu1 %v10733_v20 }
 0x489   : > { %v5256_v34 = vpop.f32.mrf.mxu0  ;;  %v5599_v25 = vpop.f32.mrf.mxu1 }
 0x48a   : > { %v10021_v35 = vadd.f32 %v5588_v42, %v5255_v21  ;;  %v5257_v30 = vadd.f32 %v5256_v34, %v9706_v6 }
 0x48b   : > { %v5262_v53 = vpop.f32.mrf.mxu0  ;;  %6053 = vmatmul.mubr.f32.gmra.mxu0 %v10908_v8  ;;  %v5606_v46 = vpop.f32.mrf.mxu1  ;;  %6353 = vmatmul.mubr.f32.gmra.mxu1 %v10910_v37 }
 0x48c   : > { %v10026_v9 = vadd.f32 %v5590_v49, %v5257_v30  ;;  %v5263_v31 = vadd.f32 %v5262_v53, %v9711_v45  ;;  %6058 = vmatprep.mubr.f32.mxu0 %v10733_v20  ;;  %6358 = vmatprep.mubr.f32.mxu1 %v10733_v20 }
 0x48d   : > { %v5264_v29 = vpop.f32.mrf.mxu0  ;;  %v5608_v0 = vpop.f32.mrf.mxu1 }
 0x48e   : > { %v10031_v40 = vadd.f32 %v5597_v52, %v5263_v31  ;;  %v5265_v6 = vadd.f32 %v5264_v29, %v9716_v61 }
 0x48f   : > { %v5270_v11 = vpop.f32.mrf.mxu0  ;;  %6060 = vmatmul.mubr.f32.gmra.mxu0 %v10910_v37  ;;  %v5615_v8 = vpop.f32.mrf.mxu1  ;;  %6360 = vmatmul.mubr.f32.gmra.mxu1 %v10912_v54 }
 0x490   : > { %v10036_v15 = vadd.f32 %v5599_v25, %v5265_v6  ;;  %v5271_v45 = vadd.f32 %v5270_v11, %v9721_v7  ;;  %6065 = vmatprep.mubr.f32.mxu0 %v10733_v20  ;;  %6365 = vmatprep.mubr.f32.mxu1 %v10733_v20 }
 0x491   : > { %v5272_v43 = vpop.f32.mrf.mxu0  ;;  %v5617_v13 = vpop.f32.mrf.mxu1 }
 0x492   : > { %v10041_v42 = vadd.f32 %v5606_v46, %v5271_v45  ;;  %v5273_v61 = vadd.f32 %v5272_v43, %v9726_v17 }
 0x493   : > { %v5278_v10 = vpop.f32.mrf.mxu0  ;;  %6067 = vmatmul.mubr.f32.gmra.mxu0 %v10912_v54  ;;  %v5624_v37 = vpop.f32.mrf.mxu1  ;;  %6367 = vmatmul.mubr.f32.gmra.mxu1 %v11296_v55 }
 0x494   : > { %v10046_v36 = vadd.f32 %v5608_v0, %v5273_v61  ;;  %v5279_v7 = vadd.f32 %v5278_v10, %v9731_v59  ;;  %6072 = vmatprep.mubr.f32.mxu0 %v10733_v20  ;;  %6372 = vmatprep.mubr.f32.mxu1 %v10733_v20 }
 0x495   : > { %v5280_v49 = vpop.f32.mrf.mxu0  ;;  %v5626_v39 = vpop.f32.mrf.mxu1 }
 0x496   : > { %v10051_v62 = vadd.f32 %v5615_v8, %v5279_v7  ;;  %v5281_v17 = vadd.f32 %v5280_v49, %v9736_v2 }
 0x497   : > { %v5286_v52 = vpop.f32.mrf.mxu0  ;;  %6074 = vmatmul.mubr.f32.gmra.mxu0 %v11296_v55  ;;  %v5633_v54 = vpop.f32.mrf.mxu1  ;;  %6374 = vmatmul.mubr.f32.gmra.mxu1 %v11184_v32 }
 0x498   : > { %v10056_v21 = vadd.f32 %v5617_v13, %v5281_v17  ;;  %v5287_v59 = vadd.f32 %v5286_v52, %v9741_v50  ;;  %6079 = vmatprep.mubr.f32.mxu0 %v10733_v20  ;;  %6379 = vmatprep.mubr.f32.mxu1 %v10733_v20  ;;  %v11449_v13 = vld [vmem:[#allocation139_spill] sm:$0xff] }
 0x499   : > { %v5288_v34 = vpop.f32.mrf.mxu0  ;;  %v5635_v25 = vpop.f32.mrf.mxu1 }
 0x49a   : > { %v10061_v30 = vadd.f32 %v5624_v37, %v5287_v59  ;;  %v5289_v2 = vadd.f32 %v5288_v34, %v9746_v22  ;;  %v11450_v37 = vld [vmem:[#allocation38_spill] sm:$0xff]  ;;  %v11452_v34 = vld [vmem:[#allocation140_spill] sm:$0xff] }
 0x49b   : > { %v5294_v53 = vpop.f32.mrf.mxu0  ;;  %6081 = vmatmul.mubr.f32.gmra.mxu0 %v11184_v32  ;;  %v5642_v55 = vpop.f32.mrf.mxu1  ;;  %6381 = vmatmul.mubr.f32.gmra.mxu1 %v11189_v14 }
 0x49c   : > { %v10066_v46 = vadd.f32 %v5626_v39, %v5289_v2  ;;  %v5295_v50 = vadd.f32 %v5294_v53, %v9751_v19  ;;  %6086 = vmatprep.mubr.f32.mxu0 %v10733_v20  ;;  %6386 = vmatprep.mubr.f32.mxu1 %v10733_v20 }
 0x49d   : > { %v5296_v31 = vpop.f32.mrf.mxu0  ;;  %v5644_v29 = vpop.f32.mrf.mxu1 }
 0x49e   : > { %v10071_v0 = vadd.f32 %v5633_v54, %v5295_v50  ;;  %v5297_v22 = vadd.f32 %v5296_v31, %v9756_v44 }
 0x49f   : > { %v5302_v6 = vpop.f32.mrf.mxu0  ;;  %6088 = vmatmul.mubr.f32.gmra.mxu0 %v11189_v14  ;;  %v5651_v32 = vpop.f32.mrf.mxu1  ;;  %6388 = vmatmul.mubr.f32.gmra.mxu1 %v11191_v47 }
 0x4a0   : > { %v10076_v11 = vadd.f32 %v5635_v25, %v5297_v22  ;;  %v5303_v19 = vadd.f32 %v5302_v6, %v9761_v24  ;;  %6093 = vmatprep.mubr.f32.mxu0 %v10733_v20  ;;  %v11451_v24 = vld [vmem:[#allocation134_spill] sm:$0xff]  ;;  %v11454_v6 = vld [vmem:[#allocation141_spill] sm:$0xff] }
 0x4a1   : > { %v5304_v8 = vpop.f32.mrf.mxu0  ;;  %v5653_v45 = vpop.f32.mrf.mxu1 }
 0x4a2   : > { %v10080_v43 = vadd.f32 %v5642_v55, %v5303_v19  ;;  %v5305_v61 = vadd.f32 %v5304_v8, %v11449_v13  ;;  %v11453_v55 = vld [vmem:[#allocation43_spill] sm:$0xff] }
 0x4a3   : > { %v5310_v10 = vpop.f32.mrf.mxu0  ;;  %6095 = vmatmul.mubr.f32.gmra.mxu0 %v11191_v47  ;;  %v5660_v44 = vpop.f32.mrf.mxu1 }
 0x4a4   : > { %v10084_v14 = vadd.f32 %v5644_v29, %v5305_v61  ;;  %v5311_v7 = vadd.f32 %v5310_v10, %v11450_v37 }
 0x4a5   : > { %v5312_v49 = vpop.f32.mrf.mxu0  ;;  %v5662_v39 = vpop.f32.mrf.mxu1 }
 0x4a6   : > { %v10087_v17 = vadd.f32 %v5651_v32, %v5311_v7  ;;  %v5313_v20 = vadd.f32 %v5312_v49, %v11451_v24 }
 0x4a7   : > { %v5318_v52 = vpop.f32.mrf.mxu0  ;;  %v5669_v54 = vpop.f32.mrf.mxu1 }
 0x4a8   : > { %v10090_v59 = vadd.f32 %v5653_v45, %v5313_v20  ;;  %v5319_v25 = vadd.f32 %v5318_v52, %v11452_v34  ;;  %v11455_v45 = vld [vmem:[#allocation142_spill] sm:$0xff] }
 0x4a9   : > { %v5320_v2 = vpop.f32.mrf.mxu0  ;;  %v5671_v53 = vpop.f32.mrf.mxu1 }
 0x4aa   : > { %v10093_v47 = vadd.f32 %v5660_v44, %v5319_v25  ;;  %v5321_v50 = vadd.f32 %v5320_v2, %v11453_v55  ;;  %v11456_v44 = vld [vmem:[#allocation47_spill] sm:$0xff] }
 0x4ab   : > { %v5326_v31 = vpop.f32.mrf.mxu0  ;;  %v5678_v29 = vpop.f32.mrf.mxu1 }
 0x4ac   : > { %v10096_v22 = vadd.f32 %v5662_v39, %v5321_v50  ;;  %v5327_v32 = vadd.f32 %v5326_v31, %v11454_v6  ;;  %v11457_v39 = vld [vmem:[#allocation143_spill] sm:$0xff] }
 0x4ad   : > { %v5328_v19 = vpop.f32.mrf.mxu0  ;;  %v5680_v8 = vpop.f32.mrf.mxu1 }
 0x4ae   : > { %v10099_v13 = vadd.f32 %v5669_v54, %v5327_v32  ;;  %v5329_v61 = vadd.f32 %v5328_v19, %v11455_v45  ;;  %v11459_v54 = vld [vmem:[#allocation144_spill] sm:$0xff] }
 0x4af   : > { %v5334_v10 = vpop.f32.mrf.mxu0  ;;  %v5687_v37 = vpop.f32.mrf.mxu1 }
 0x4b0   : > { %v10102_v7 = vadd.f32 %v5671_v53, %v5329_v61  ;;  %v5335_v49 = vadd.f32 %v5334_v10, %v11456_v44  ;;  %v11461_v53 = vld [vmem:[#allocation52_spill] sm:$0xff] }
 0x4b1   : > { %v5336_v24 = vpop.f32.mrf.mxu0  ;;  %v5689_v20 = vpop.f32.mrf.mxu1 }
 0x4b2   : > { %v10105_v52 = vadd.f32 %v5678_v29, %v5335_v49  ;;  %v5337_v34 = vadd.f32 %v5336_v24, %v11457_v39  ;;  %v11463_v29 = vld [vmem:[#allocation145_spill] sm:$0xff] }
 0x4b3   : > { %v5342_v25 = vpop.f32.mrf.mxu0  ;;  %v5696_v2 = vpop.f32.mrf.mxu1 }
 0x4b4   : > { %v10108_v55 = vadd.f32 %v5680_v8, %v5337_v34  ;;  %v5343_v50 = vadd.f32 %v5342_v25, %v11459_v54  ;;  %v11465_v8 = vld [vmem:[#allocation146_spill] sm:$0xff] }
 0x4b5   : > { %v5344_v31 = vpop.f32.mrf.mxu0  ;;  %v5698_v6 = vpop.f32.mrf.mxu1 }
 0x4b6   : > { %11458 = vst [vmem:[#allocation83_spill] sm:$0xff] %v10108_v55  ;;  %v10111_v32 = vadd.f32 %v5687_v37, %v5343_v50  ;;  %v5345_v19 = vadd.f32 %v5344_v31, %v11461_v53  ;;  %v11467_v37 = vld [vmem:[#allocation55_spill] sm:$0xff] }
 0x4b7   : > { %v5350_v45 = vpop.f32.mrf.mxu0  ;;  %v5705_v61 = vpop.f32.mrf.mxu1 }
 0x4b8   : > { %11460 = vst [vmem:[#allocation87_spill] sm:$0xff] %v10111_v32  ;;  %v10114_v10 = vadd.f32 %v5689_v20, %v5345_v19  ;;  %v5351_v44 = vadd.f32 %v5350_v45, %v11463_v29  ;;  %v11469_v20 = vld [vmem:[#allocation147_spill] sm:$0xff] }
 0x4b9   : > { %v5352_v49 = vpop.f32.mrf.mxu0  ;;  %v5707_v24 = vpop.f32.mrf.mxu1 }
 0x4ba   : > { %11462 = vst [vmem:[#allocation91_spill] sm:$0xff] %v10114_v10  ;;  %v10117_v39 = vadd.f32 %v5696_v2, %v5351_v44  ;;  %v5353_v34 = vadd.f32 %v5352_v49, %v11465_v8  ;;  %v11471_v2 = vld [vmem:[#allocation148_spill] sm:$0xff] }
 0x4bb   : > { %v5358_v55 = vpop.f32.mrf.mxu0  ;;  %v5714_v25 = vpop.f32.mrf.mxu1 }
 0x4bc   : > { %11464 = vst [vmem:[#allocation95_spill] sm:$0xff] %v10117_v39  ;;  %v10120_v54 = vadd.f32 %v5698_v6, %v5353_v34  ;;  %v5359_v50 = vadd.f32 %v5358_v55, %v11467_v37  ;;  %v11473_v6 = vld [vmem:[#allocation59_spill] sm:$0xff] }
 0x4bd   : > { %v5360_v32 = vpop.f32.mrf.mxu0  ;;  %v5716_v31 = vpop.f32.mrf.mxu1 }
 0x4be   : > { %11466 = vst [vmem:[#allocation99_spill] sm:$0xff] %v10120_v54  ;;  %v10123_v53 = vadd.f32 %v5705_v61, %v5359_v50  ;;  %v5361_v19 = vadd.f32 %v5360_v32, %v11469_v20  ;;  %v11475_v61 = vld [vmem:[#allocation149_spill] sm:$0xff] }
 0x4bf   : > { %v5366_v10 = vpop.f32.mrf.mxu0  ;;  %v5723_v45 = vpop.f32.mrf.mxu1 }
 0x4c0   : > { %11468 = vst [vmem:[#allocation102_spill] sm:$0xff] %v10123_v53  ;;  %v10126_v29 = vadd.f32 %v5707_v24, %v5361_v19  ;;  %v5367_v44 = vadd.f32 %v5366_v10, %v11471_v2  ;;  %v11477_v24 = vld [vmem:[#allocation150_spill] sm:$0xff] }
 0x4c1   : > { %v5368_v39 = vpop.f32.mrf.mxu0  ;;  %v5725_v49 = vpop.f32.mrf.mxu1 }
 0x4c2   : > { %11470 = vst [vmem:[#allocation107_spill] sm:$0xff] %v10126_v29  ;;  %v10129_v8 = vadd.f32 %v5714_v25, %v5367_v44  ;;  %v5369_v34 = vadd.f32 %v5368_v39, %v11473_v6  ;;  %v11479_v25 = vld [vmem:[#allocation63_spill] sm:$0xff] }
 0x4c3   : > { %v5374_v54 = vpop.f32.mrf.mxu0  ;;  %v5732_v55 = vpop.f32.mrf.mxu1 }
 0x4c4   : > { %11472 = vst [vmem:[#allocation111_spill] sm:$0xff] %v10129_v8  ;;  %v10132_v37 = vadd.f32 %v5716_v31, %v5369_v34  ;;  %v5375_v50 = vadd.f32 %v5374_v54, %v11475_v61  ;;  %v11481_v31 = vld [vmem:[#allocation151_spill] sm:$0xff] }
 0x4c5   : > { %v5376_v53 = vpop.f32.mrf.mxu0  ;;  %v5734_v32 = vpop.f32.mrf.mxu1 }
 0x4c6   : > { %11474 = vst [vmem:[#allocation115_spill] sm:$0xff] %v10132_v37  ;;  %v10135_v20 = vadd.f32 %v5723_v45, %v5375_v50  ;;  %v5377_v19 = vadd.f32 %v5376_v53, %v11477_v24  ;;  %v11483_v45 = vld [vmem:[#allocation152_spill] sm:$0xff] }
 0x4c7   : > { %v5382_v29 = vpop.f32.mrf.mxu0  ;;  %v5741_v10 = vpop.f32.mrf.mxu1 }
 0x4c8   : > { %11476 = vst [vmem:[#allocation119_spill] sm:$0xff] %v10135_v20  ;;  %v10138_v2 = vadd.f32 %v5725_v49, %v5377_v19  ;;  %v5383_v44 = vadd.f32 %v5382_v29, %v11479_v25  ;;  %v11485_v49 = vld [vmem:[#allocation67_spill] sm:$0xff] }
 0x4c9   : > { %v5384_v8 = vpop.f32.mrf.mxu0  ;;  %v5743_v39 = vpop.f32.mrf.mxu1 }
 0x4ca   : > { %11478 = vst [vmem:[#allocation157_spill] sm:$0xff] %v10138_v2  ;;  %v10141_v6 = vadd.f32 %v5732_v55, %v5383_v44  ;;  %v5385_v34 = vadd.f32 %v5384_v8, %v11481_v31  ;;  %v11487_v55 = vld [vmem:[#allocation153_spill] sm:$0xff] }
 0x4cb   : > { %v5390_v37 = vpop.f32.mrf.mxu0  ;;  %v5750_v54 = vpop.f32.mrf.mxu1 }
 0x4cc   : > { %11480 = vst [vmem:[#allocation158_spill] sm:$0xff] %v10141_v6  ;;  %v10144_v61 = vadd.f32 %v5734_v32, %v5385_v34  ;;  %v5391_v50 = vadd.f32 %v5390_v37, %v11483_v45  ;;  %v11489_v32 = vld [vmem:[#allocation154_spill] sm:$0xff] }
 0x4cd   : > { %v5392_v20 = vpop.f32.mrf.mxu0  ;;  %v5752_v53 = vpop.f32.mrf.mxu1 }
 0x4ce   : > { %11482 = vst [vmem:[#allocation123_spill] sm:$0xff] %v10144_v61  ;;  %v10147_v24 = vadd.f32 %v5741_v10, %v5391_v50  ;;  %v5393_v19 = vadd.f32 %v5392_v20, %v11485_v49  ;;  %v11491_v10 = vld [vmem:[#allocation70_spill] sm:$0xff] }
 0x4cf   : > { %v5398_v2 = vpop.f32.mrf.mxu0  ;;  %v5759_v29 = vpop.f32.mrf.mxu1 }
 0x4d0   : > { %11484 = vst [vmem:[#allocation110_spill] sm:$0xff] %v10147_v24  ;;  %v10150_v25 = vadd.f32 %v5743_v39, %v5393_v19  ;;  %v5399_v44 = vadd.f32 %v5398_v2, %v11487_v55  ;;  %v11492_v39 = vld [vmem:[#allocation155_spill] sm:$0xff] }
 0x4d1   : > { %v5400_v6 = vpop.f32.mrf.mxu0  ;;  %v5761_v8 = vpop.f32.mrf.mxu1 }
 0x4d2   : > { %11486 = vst [vmem:[#allocation159_spill] sm:$0xff] %v10150_v25  ;;  %v10153_v31 = vadd.f32 %v5750_v54, %v5399_v44  ;;  %v5401_v34 = vadd.f32 %v5400_v6, %v11489_v32  ;;  %v11494_v54 = vld [vmem:[#allocation75_spill] sm:$0xff] }
 0x4d3   : > { %v5406_v61 = vpop.f32.mrf.mxu0  ;;  %v5768_v37 = vpop.f32.mrf.mxu1 }
 0x4d4   : > { %11488 = vst [vmem:[#allocation65_spill] sm:$0xff] %v10153_v31  ;;  %v10156_v45 = vadd.f32 %v5752_v53, %v5401_v34  ;;  %v5407_v50 = vadd.f32 %v5406_v61, %v11491_v10  ;;  %v11495_v53 = vld [vmem:[#allocation156_spill] sm:$0xff] }
 0x4d5   : > { %v5408_v24 = vpop.f32.mrf.mxu0  ;;  %v5770_v20 = vpop.f32.mrf.mxu1 }
 0x4d6   : > { %11490 = vst [vmem:[#allocation126_spill] sm:$0xff] %v10156_v45  ;;  %v10159_v49 = vadd.f32 %v5759_v29, %v5407_v50  ;;  %v5409_v19 = vadd.f32 %v5408_v24, %v11492_v39 }
 0x4d7   : > { %v5414_v25 = vpop.f32.mrf.mxu0  ;;  %v5777_v2 = vpop.f32.mrf.mxu1 }
 0x4d8   : > { %v10162_v55 = vadd.f32 %v5761_v8, %v5409_v19  ;;  %v5415_v44 = vadd.f32 %v5414_v25, %v11494_v54  ;;  %v11496_v8 = vld [vmem:[#allocation79_spill] sm:$0xff] }
 0x4d9   : > { %v5416_v31 = vpop.f32.mrf.mxu0  ;;  %v5779_v6 = vpop.f32.mrf.mxu1 }
 0x4da   : > { %11493 = vst [vmem:[#allocation73_spill] sm:$0xff] %v10162_v55  ;;  %v10165_v32 = vadd.f32 %v5768_v37, %v5415_v44  ;;  %v5417_v34 = vadd.f32 %v5416_v31, %v11495_v53 }
 0x4db   : > { %v5422_v45 = vpop.f32.mrf.mxu0  ;;  %v5786_v61 = vpop.f32.mrf.mxu1 }
 0x4dc   : > { %v10168_v10 = vadd.f32 %v5770_v20, %v5417_v34  ;;  %v5423_v29 = vadd.f32 %v5422_v45, %v9911_v26 }
 0x4dd   : > { %v5424_v50 = vpop.f32.mrf.mxu0  ;;  %v5788_v24 = vpop.f32.mrf.mxu1 }
 0x4de   : > { %v10171_v39 = vadd.f32 %v5777_v2, %v5423_v29  ;;  %v5425_v19 = vadd.f32 %v5424_v50, %v11496_v8 }
 0x4df   : > { %v5430_v55 = vpop.f32.mrf.mxu0  ;;  %v5795_v25 = vpop.f32.mrf.mxu1 }
 0x4e0   : > { %v10174_v54 = vadd.f32 %v5779_v6, %v5425_v19  ;;  %v5431_v37 = vadd.f32 %v5430_v55, %v9921_v28 }
 0x4e1   : > { %v5432_v44 = vpop.f32.mrf.mxu0  ;;  %v5797_v31 = vpop.f32.mrf.mxu1 }
 0x4e2   : > { %v10177_v53 = vadd.f32 %v5786_v61, %v5431_v37  ;;  %v5433_v20 = vadd.f32 %v5432_v44, %v9926_v51 }
 0x4e3   : > { %v5438_v34 = vpop.f32.mrf.mxu0  ;;  %v6172_v26 = vpop.f32.mrf.mxu1 }
 0x4e4   : > { %v10180_v45 = vadd.f32 %v5788_v24, %v5433_v20  ;;  %v5439_v2 = vadd.f32 %v5438_v34, %v9931_v18 }
 0x4e5   : > { %v5440_v29 = vpop.f32.mrf.mxu0  ;;  %v6174_v50 = vpop.f32.mrf.mxu1 }
 0x4e6   : > { %v10183_v8 = vadd.f32 %v5795_v25, %v5439_v2  ;;  %v5441_v6 = vadd.f32 %v5440_v29, %v9936_v23 }
 0x4e7   : > { %v5879_v28 = vpop.f32.mrf.mxu0  ;;  %v6179_v55 = vpop.f32.mrf.mxu1 }
 0x4e8   : > { %v10186_v61 = vadd.f32 %v5797_v31, %v5441_v6  ;;  %v5880_v51 = vadd.f32 %v5879_v28, %v9941_v41 }
 0x4e9   : > { %v5881_v19 = vpop.f32.mrf.mxu0  ;;  %v6181_v24 = vpop.f32.mrf.mxu1 }
 0x4ea   : > { %v6173_v37 = vadd.f32 %v6172_v26, %v5880_v51  ;;  %v5882_v44 = vadd.f32 %v5881_v19, %v9946_v33 }
 0x4eb   : > { %v5886_v18 = vpop.f32.mrf.mxu0  ;;  %v6186_v20 = vpop.f32.mrf.mxu1 }
 0x4ec   : > { %6398 = vst [vmem:[%s8369_s4 + $0x20] sm:$0xff] %v6173_v37  ;;  %v6175_v25 = vadd.f32 %v6174_v50, %v5882_v44  ;;  %v5887_v23 = vadd.f32 %v5886_v18, %v9951_v60 }
 0x4ed   : > { %v5888_v34 = vpop.f32.mrf.mxu0  ;;  %v6188_v2 = vpop.f32.mrf.mxu1 }
 0x4ee   : > { %6399 = vst [vmem:[%s8369_s4 + $0x28] sm:$0xff] %v6175_v25  ;;  %v6180_v31 = vadd.f32 %v6179_v55, %v5887_v23  ;;  %v5889_v41 = vadd.f32 %v5888_v34, %v9956_v63 }
 0x4ef   : > { %v5893_v29 = vpop.f32.mrf.mxu0  ;;  %v6193_v6 = vpop.f32.mrf.mxu1 }
 0x4f0   : > { %6404 = vst [vmem:[%s8369_s4 + $0x50] sm:$0xff] %v6180_v31  ;;  %v6182_v26 = vadd.f32 %v6181_v24, %v5889_v41  ;;  %v5894_v33 = vadd.f32 %v5893_v29, %v9961_v5 }
 0x4f1   : > { %v5895_v28 = vpop.f32.mrf.mxu0  ;;  %v6195_v51 = vpop.f32.mrf.mxu1 }
 0x4f2   : > { %6405 = vst [vmem:[%s8369_s4 + $0x58] sm:$0xff] %v6182_v26  ;;  %v6187_v50 = vadd.f32 %v6186_v20, %v5894_v33  ;;  %v5896_v60 = vadd.f32 %v5895_v28, %v9966_v16 }
 0x4f3   : > { %v5900_v19 = vpop.f32.mrf.mxu0  ;;  %v6200_v37 = vpop.f32.mrf.mxu1 }
 0x4f4   : > { %6410 = vst [vmem:[%s8369_s4 + $0x80] sm:$0xff] %v6187_v50  ;;  %v6189_v55 = vadd.f32 %v6188_v2, %v5896_v60  ;;  %v5901_v63 = vadd.f32 %v5900_v19, %v9971_v4 }
 0x4f5   : > { %v5902_v44 = vpop.f32.mrf.mxu0  ;;  %v6202_v18 = vpop.f32.mrf.mxu1 }
 0x4f6   : > { %6411 = vst [vmem:[%s8369_s4 + $0x88] sm:$0xff] %v6189_v55  ;;  %v6194_v24 = vadd.f32 %v6193_v6, %v5901_v63  ;;  %v5903_v5 = vadd.f32 %v5902_v44, %v9976_v12 }
 0x4f7   : > { %v5907_v25 = vpop.f32.mrf.mxu0  ;;  %v6207_v23 = vpop.f32.mrf.mxu1 }
 0x4f8   : > { %6416 = vst [vmem:[%s8369_s4 + $0xb0] sm:$0xff] %v6194_v24  ;;  %v6196_v20 = vadd.f32 %v6195_v51, %v5903_v5  ;;  %v5908_v16 = vadd.f32 %v5907_v25, %v9981_v1 }
 0x4f9   : > { %v5909_v34 = vpop.f32.mrf.mxu0  ;;  %v6209_v31 = vpop.f32.mrf.mxu1 }
 0x4fa   : > { %6417 = vst [vmem:[%s8369_s4 + $0xb8] sm:$0xff] %v6196_v20  ;;  %v6201_v2 = vadd.f32 %v6200_v37, %v5908_v16  ;;  %v5910_v4 = vadd.f32 %v5909_v34, %v9986_v38 }
 0x4fb   : > { %v5914_v41 = vpop.f32.mrf.mxu0  ;;  %v6214_v29 = vpop.f32.mrf.mxu1 }
 0x4fc   : > { %6422 = vst [vmem:[%s8369_s4 + $0xe0] sm:$0xff] %v6201_v2  ;;  %v6203_v6 = vadd.f32 %v6202_v18, %v5910_v4  ;;  %v5915_v12 = vadd.f32 %v5914_v41, %v9991_v57 }
 0x4fd   : > { %v5916_v26 = vpop.f32.mrf.mxu0  ;;  %v6216_v33 = vpop.f32.mrf.mxu1 }
 0x4fe   : > { %6423 = vst [vmem:[%s8369_s4 + $0xe8] sm:$0xff] %v6203_v6  ;;  %v6208_v28 = vadd.f32 %v6207_v23, %v5915_v12  ;;  %v5917_v1 = vadd.f32 %v5916_v26, %v9996_v56 }
 0x4ff   : > { %v5921_v51 = vpop.f32.mrf.mxu0  ;;  %v6221_v50 = vpop.f32.mrf.mxu1 }
 0x500   : > { %6428 = vst [vmem:[%s8369_s4 + $0x110] sm:$0xff] %v6208_v28  ;;  %v6210_v60 = vadd.f32 %v6209_v31, %v5917_v1  ;;  %v5922_v38 = vadd.f32 %v5921_v51, %v10001_v27 }
 0x501   : > { %v5923_v19 = vpop.f32.mrf.mxu0  ;;  %v6223_v37 = vpop.f32.mrf.mxu1 }
 0x502   : > { %6429 = vst [vmem:[%s8369_s4 + $0x118] sm:$0xff] %v6210_v60  ;;  %v6215_v55 = vadd.f32 %v6214_v29, %v5922_v38  ;;  %v5924_v57 = vadd.f32 %v5923_v19, %v10006_v58 }
 0x503   : > { %v5928_v63 = vpop.f32.mrf.mxu0  ;;  %v6228_v44 = vpop.f32.mrf.mxu1 }
 0x504   : > { %6434 = vst [vmem:[%s8369_s4 + $0x140] sm:$0xff] %v6215_v55  ;;  %v6217_v18 = vadd.f32 %v6216_v33, %v5924_v57  ;;  %v5929_v56 = vadd.f32 %v5928_v63, %v10011_v48 }
 0x505   : > { %v5930_v24 = vpop.f32.mrf.mxu0  ;;  %v6230_v5 = vpop.f32.mrf.mxu1 }
 0x506   : > { %6435 = vst [vmem:[%s8369_s4 + $0x148] sm:$0xff] %v6217_v18  ;;  %v6222_v25 = vadd.f32 %v6221_v50, %v5929_v56  ;;  %v5931_v27 = vadd.f32 %v5930_v24, %v10016_v3 }
 0x507   : > { %v5935_v23 = vpop.f32.mrf.mxu0  ;;  %v6235_v20 = vpop.f32.mrf.mxu1 }
 0x508   : > { %6440 = vst [vmem:[%s8369_s4 + $0x170] sm:$0xff] %v6222_v25  ;;  %v6224_v16 = vadd.f32 %v6223_v37, %v5931_v27  ;;  %v5936_v58 = vadd.f32 %v5935_v23, %v10021_v35 }
 0x509   : > { %v5937_v34 = vpop.f32.mrf.mxu0  ;;  %v6237_v31 = vpop.f32.mrf.mxu1 }
 0x50a   : > { %6441 = vst [vmem:[%s8369_s4 + $0x178] sm:$0xff] %v6224_v16  ;;  %v6229_v2 = vadd.f32 %v6228_v44, %v5936_v58  ;;  %v5938_v48 = vadd.f32 %v5937_v34, %v10026_v9 }
 0x50b   : > { %v5942_v4 = vpop.f32.mrf.mxu0  ;;  %v6242_v41 = vpop.f32.mrf.mxu1 }
 0x50c   : > { %6446 = vst [vmem:[%s8369_s4 + $0x1a0] sm:$0xff] %v6229_v2  ;;  %v6231_v29 = vadd.f32 %v6230_v5, %v5938_v48  ;;  %v5943_v3 = vadd.f32 %v5942_v4, %v10031_v40 }
 0x50d   : > { %v5944_v6 = vpop.f32.mrf.mxu0  ;;  %v6244_v12 = vpop.f32.mrf.mxu1 }
 0x50e   : > { %6447 = vst [vmem:[%s8369_s4 + $0x1a8] sm:$0xff] %v6231_v29  ;;  %v6236_v26 = vadd.f32 %v6235_v20, %v5943_v3  ;;  %v5945_v35 = vadd.f32 %v5944_v6, %v10036_v15 }
 0x50f   : > { %v5949_v33 = vpop.f32.mrf.mxu0  ;;  %v6249_v28 = vpop.f32.mrf.mxu1 }
 0x510   : > { %6452 = vst [vmem:[%s8369_s4 + $0x1d0] sm:$0xff] %v6236_v26  ;;  %v6238_v1 = vadd.f32 %v6237_v31, %v5945_v35  ;;  %v5950_v9 = vadd.f32 %v5949_v33, %v10041_v42 }
 0x511   : > { %v5951_v51 = vpop.f32.mrf.mxu0  ;;  %v6251_v50 = vpop.f32.mrf.mxu1 }
 0x512   : > { %6453 = vst [vmem:[%s8369_s4 + $0x1d8] sm:$0xff] %v6238_v1  ;;  %v6243_v60 = vadd.f32 %v6242_v41, %v5950_v9  ;;  %v5952_v40 = vadd.f32 %v5951_v51, %v10046_v36 }
 0x513   : > { %v5956_v38 = vpop.f32.mrf.mxu0  ;;  %v6256_v19 = vpop.f32.mrf.mxu1 }
 0x514   : > { %6458 = vst [vmem:[%s8369_s4 + $0x200] sm:$0xff] %v6243_v60  ;;  %v6245_v37 = vadd.f32 %v6244_v12, %v5952_v40  ;;  %v5957_v15 = vadd.f32 %v5956_v38, %v10051_v62 }
 0x515   : > { %v5958_v55 = vpop.f32.mrf.mxu0  ;;  %v6258_v57 = vpop.f32.mrf.mxu1 }
 0x516   : > { %6459 = vst [vmem:[%s8369_s4 + $0x208] sm:$0xff] %v6245_v37  ;;  %v6250_v63 = vadd.f32 %v6249_v28, %v5957_v15  ;;  %v5959_v42 = vadd.f32 %v5958_v55, %v10056_v21 }
 0x517   : > { %v5963_v44 = vpop.f32.mrf.mxu0  ;;  %v6263_v18 = vpop.f32.mrf.mxu1 }
 0x518   : > { %6464 = vst [vmem:[%s8369_s4 + $0x230] sm:$0xff] %v6250_v63  ;;  %v6252_v56 = vadd.f32 %v6251_v50, %v5959_v42  ;;  %v5964_v36 = vadd.f32 %v5963_v44, %v10061_v30 }
 0x519   : > { %v5965_v24 = vpop.f32.mrf.mxu0  ;;  %v6265_v5 = vpop.f32.mrf.mxu1 }
 0x51a   : > { %6465 = vst [vmem:[%s8369_s4 + $0x238] sm:$0xff] %v6252_v56  ;;  %v6257_v25 = vadd.f32 %v6256_v19, %v5964_v36  ;;  %v5966_v62 = vadd.f32 %v5965_v24, %v10066_v46 }
 0x51b   : > { %v5970_v27 = vpop.f32.mrf.mxu0  ;;  %v6270_v23 = vpop.f32.mrf.mxu1 }
 0x51c   : > { %6470 = vst [vmem:[%s8369_s4 + $0x260] sm:$0xff] %v6257_v25  ;;  %v6259_v20 = vadd.f32 %v6258_v57, %v5966_v62  ;;  %v5971_v21 = vadd.f32 %v5970_v27, %v10071_v0 }
 0x51d   : > { %v5972_v16 = vpop.f32.mrf.mxu0  ;;  %v6272_v58 = vpop.f32.mrf.mxu1 }
 0x51e   : > { %6471 = vst [vmem:[%s8369_s4 + $0x268] sm:$0xff] %v6259_v20  ;;  %v6264_v34 = vadd.f32 %v6263_v18, %v5971_v21  ;;  %v5973_v30 = vadd.f32 %v5972_v16, %v10076_v11 }
 0x51f   : > { %v5977_v31 = vpop.f32.mrf.mxu0  ;;  %v6277_v2 = vpop.f32.mrf.mxu1 }
 0x520   : > { %6476 = vst [vmem:[%s8369_s4 + $0x290] sm:$0xff] %v6264_v34  ;;  %v6266_v48 = vadd.f32 %v6265_v5, %v5973_v30  ;;  %v5978_v46 = vadd.f32 %v5977_v31, %v10080_v43  ;;  %v11500_v30 = vld [vmem:[#allocation95_spill] sm:$0xff] }
 0x521   : > { %v5979_v4 = vpop.f32.mrf.mxu0  ;;  %v6279_v41 = vpop.f32.mrf.mxu1 }
 0x522   : > { %6477 = vst [vmem:[%s8369_s4 + $0x298] sm:$0xff] %v6266_v48  ;;  %v6271_v29 = vadd.f32 %v6270_v23, %v5978_v46  ;;  %v5980_v0 = vadd.f32 %v5979_v4, %v10084_v14  ;;  %v11501_v4 = vld [vmem:[#allocation99_spill] sm:$0xff] }
 0x523   : > { %v5984_v3 = vpop.f32.mrf.mxu0  ;;  %v6284_v6 = vpop.f32.mrf.mxu1 }
 0x524   : > { %6482 = vst [vmem:[%s8369_s4 + $0x2c0] sm:$0xff] %v6271_v29  ;;  %v6273_v12 = vadd.f32 %v6272_v58, %v5980_v0  ;;  %v5985_v11 = vadd.f32 %v5984_v3, %v10087_v17 }
 0x525   : > { %v5986_v26 = vpop.f32.mrf.mxu0  ;;  %v6286_v35 = vpop.f32.mrf.mxu1 }
 0x526   : > { %6483 = vst [vmem:[%s8369_s4 + $0x2c8] sm:$0xff] %v6273_v12  ;;  %v6278_v33 = vadd.f32 %v6277_v2, %v5985_v11  ;;  %v5987_v43 = vadd.f32 %v5986_v26, %v10090_v59 }
 0x527   : > { %v5991_v28 = vpop.f32.mrf.mxu0  ;;  %v6291_v1 = vpop.f32.mrf.mxu1 }
 0x528   : > { %6488 = vst [vmem:[%s8369_s4 + $0x2f0] sm:$0xff] %v6278_v33  ;;  %v6280_v9 = vadd.f32 %v6279_v41, %v5987_v43  ;;  %v5992_v14 = vadd.f32 %v5991_v28, %v10093_v47  ;;  %v11503_v33 = vld [vmem:[#allocation107_spill] sm:$0xff] }
 0x529   : > { %v5993_v51 = vpop.f32.mrf.mxu0  ;;  %v6293_v50 = vpop.f32.mrf.mxu1 }
 0x52a   : > { %6489 = vst [vmem:[%s8369_s4 + $0x2f8] sm:$0xff] %v6280_v9  ;;  %v6285_v60 = vadd.f32 %v6284_v6, %v5992_v14  ;;  %v5994_v17 = vadd.f32 %v5993_v51, %v10096_v22  ;;  %v11502_v6 = vld [vmem:[#allocation102_spill] sm:$0xff]  ;;  %v11504_v14 = vld [vmem:[#allocation111_spill] sm:$0xff] }
 0x52b   : > { %v5998_v40 = vpop.f32.mrf.mxu0  ;;  %v6298_v38 = vpop.f32.mrf.mxu1 }
 0x52c   : > { %6494 = vst [vmem:[%s8369_s4 + $0x320] sm:$0xff] %v6285_v60  ;;  %v6287_v19 = vadd.f32 %v6286_v35, %v5994_v17  ;;  %v5999_v59 = vadd.f32 %v5998_v40, %v10099_v13  ;;  %v11497_v13 = vld [vmem:[#allocation83_spill] sm:$0xff] }
 0x52d   : > { %v6000_v37 = vpop.f32.mrf.mxu0  ;;  %v6300_v15 = vpop.f32.mrf.mxu1  ;;  %v11505_v40 = vld [vmem:[#allocation115_spill] sm:$0xff] }
 0x52e   : > { %6495 = vst [vmem:[%s8369_s4 + $0x328] sm:$0xff] %v6287_v19  ;;  %v6292_v55 = vadd.f32 %v6291_v1, %v5999_v59  ;;  %v6001_v47 = vadd.f32 %v6000_v37, %v10102_v7  ;;  %v11498_v7 = vld [vmem:[#allocation87_spill] sm:$0xff] }
 0x52f   : > { %v6005_v57 = vpop.f32.mrf.mxu0  ;;  %v6305_v63 = vpop.f32.mrf.mxu1 }
 0x530   : > { %6500 = vst [vmem:[%s8369_s4 + $0x350] sm:$0xff] %v6292_v55  ;;  %v6294_v42 = vadd.f32 %v6293_v50, %v6001_v47  ;;  %v6006_v22 = vadd.f32 %v6005_v57, %v10105_v52  ;;  %v11499_v52 = vld [vmem:[#allocation91_spill] sm:$0xff] }
 0x531   : > { %v6007_v44 = vpop.f32.mrf.mxu0  ;;  %v6307_v18 = vpop.f32.mrf.mxu1 }
 0x532   : > { %6501 = vst [vmem:[%s8369_s4 + $0x358] sm:$0xff] %v6294_v42  ;;  %v6299_v56 = vadd.f32 %v6298_v38, %v6006_v22  ;;  %v6008_v36 = vadd.f32 %v6007_v44, %v11497_v13  ;;  %v11507_v42 = vld [vmem:[#allocation157_spill] sm:$0xff]  ;;  %v11508_v13 = vld [vmem:[#allocation158_spill] sm:$0xff] }
 0x533   : > { %v6012_v24 = vpop.f32.mrf.mxu0  ;;  %v6312_v5 = vpop.f32.mrf.mxu1 }
 0x534   : > { %6506 = vst [vmem:[%s8369_s4 + $0x380] sm:$0xff] %v6299_v56  ;;  %v6301_v25 = vadd.f32 %v6300_v15, %v6008_v36  ;;  %v6013_v62 = vadd.f32 %v6012_v24, %v11498_v7  ;;  %v11506_v15 = vld [vmem:[#allocation119_spill] sm:$0xff] }
 0x535   : > { %v6014_v27 = vpop.f32.mrf.mxu0  ;;  %v6314_v23 = vpop.f32.mrf.mxu1  ;;  %v11509_v7 = vld [vmem:[#allocation123_spill] sm:$0xff] }
 0x536   : > { %6507 = vst [vmem:[%s8369_s4 + $0x388] sm:$0xff] %v6301_v25  ;;  %v6306_v20 = vadd.f32 %v6305_v63, %v6013_v62  ;;  %v6015_v21 = vadd.f32 %v6014_v27, %v11499_v52  ;;  %v11510_v52 = vld [vmem:[#allocation110_spill] sm:$0xff] }
 0x537   : > { %v6019_v16 = vpop.f32.mrf.mxu0  ;;  %v6319_v58 = vpop.f32.mrf.mxu1 }
 0x538   : > { %6512 = vst [vmem:[%s8369_s4 + $0x3b0] sm:$0xff] %v6306_v20  ;;  %v6308_v34 = vadd.f32 %v6307_v18, %v6015_v21  ;;  %v6020_v31 = vadd.f32 %v6019_v16, %v11500_v30  ;;  %v11511_v30 = vld [vmem:[#allocation159_spill] sm:$0xff] }
 0x539   : > { %v6021_v2 = vpop.f32.mrf.mxu0  ;;  %v6321_v48 = vpop.f32.mrf.mxu1 }
 0x53a   : > { %6513 = vst [vmem:[%s8369_s4 + $0x3b8] sm:$0xff] %v6308_v34  ;;  %v6313_v46 = vadd.f32 %v6312_v5, %v6020_v31  ;;  %v6022_v41 = vadd.f32 %v6021_v2, %v11501_v4  ;;  %v11512_v4 = vld [vmem:[#allocation65_spill] sm:$0xff] }
 0x53b   : > { %v6026_v29 = vpop.f32.mrf.mxu0  ;;  %v6326_v0 = vpop.f32.mrf.mxu1 }
 0x53c   : > { %6518 = vst [vmem:[%s8369_s4 + $0x3e0] sm:$0xff] %v6313_v46  ;;  %v6315_v3 = vadd.f32 %v6314_v23, %v6022_v41  ;;  %v6027_v12 = vadd.f32 %v6026_v29, %v11502_v6  ;;  %v11513_v6 = vld [vmem:[#allocation126_spill] sm:$0xff] }
 0x53d   : > { %v6028_v11 = vpop.f32.mrf.mxu0  ;;  %v6328_v26 = vpop.f32.mrf.mxu1 }
 0x53e   : > { %6519 = vst [vmem:[%s8369_s4 + $0x3e8] sm:$0xff] %v6315_v3  ;;  %v6320_v35 = vadd.f32 %v6319_v58, %v6027_v12  ;;  %v6029_v43 = vadd.f32 %v6028_v11, %v11503_v33 }
 0x53f   : > { %v6033_v28 = vpop.f32.mrf.mxu0  ;;  %v6333_v1 = vpop.f32.mrf.mxu1 }
 0x540   : > { %6524 = vst [vmem:[%s8369_s4 + $0x410] sm:$0xff] %v6320_v35  ;;  %v6322_v9 = vadd.f32 %v6321_v48, %v6029_v43  ;;  %v6034_v51 = vadd.f32 %v6033_v28, %v11504_v14 }
 0x541   : > { %v6035_v50 = vpop.f32.mrf.mxu0  ;;  %v6335_v60 = vpop.f32.mrf.mxu1 }
 0x542   : > { %6525 = vst [vmem:[%s8369_s4 + $0x418] sm:$0xff] %v6322_v9  ;;  %v6327_v17 = vadd.f32 %v6326_v0, %v6034_v51  ;;  %v6036_v38 = vadd.f32 %v6035_v50, %v11505_v40  ;;  %v11514_v9 = vld [vmem:[#allocation73_spill] sm:$0xff] }
 0x543   : > { %v6040_v19 = vpop.f32.mrf.mxu0  ;;  %v6340_v59 = vpop.f32.mrf.mxu1 }
 0x544   : > { %6530 = vst [vmem:[%s8369_s4 + $0x440] sm:$0xff] %v6327_v17  ;;  %v6329_v37 = vadd.f32 %v6328_v26, %v6036_v38  ;;  %v6041_v55 = vadd.f32 %v6040_v19, %v11506_v15 }
 0x545   : > { %v6042_v47 = vpop.f32.mrf.mxu0  ;;  %v6342_v57 = vpop.f32.mrf.mxu1 }
 0x546   : > { %6531 = vst [vmem:[%s8369_s4 + $0x448] sm:$0xff] %v6329_v37  ;;  %v6334_v63 = vadd.f32 %v6333_v1, %v6041_v55  ;;  %v6043_v22 = vadd.f32 %v6042_v47, %v11507_v42 }
 0x547   : > { %v6047_v44 = vpop.f32.mrf.mxu0  ;;  %v6347_v18 = vpop.f32.mrf.mxu1 }
 0x548   : > { %6536 = vst [vmem:[%s8369_s4 + $0x470] sm:$0xff] %v6334_v63  ;;  %v6336_v56 = vadd.f32 %v6335_v60, %v6043_v22  ;;  %v6048_v36 = vadd.f32 %v6047_v44, %v11508_v13 }
 0x549   : > { %v6049_v24 = vpop.f32.mrf.mxu0  ;;  %v6349_v5 = vpop.f32.mrf.mxu1 }
 0x54a   : > { %6537 = vst [vmem:[%s8369_s4 + $0x478] sm:$0xff] %v6336_v56  ;;  %v6341_v25 = vadd.f32 %v6340_v59, %v6048_v36  ;;  %v6050_v62 = vadd.f32 %v6049_v24, %v11509_v7 }
 0x54b   : > { %v6054_v27 = vpop.f32.mrf.mxu0  ;;  %v6354_v23 = vpop.f32.mrf.mxu1 }
 0x54c   : > { %6542 = vst [vmem:[%s8369_s4 + $0x4a0] sm:$0xff] %v6341_v25  ;;  %v6343_v20 = vadd.f32 %v6342_v57, %v6050_v62  ;;  %v6055_v21 = vadd.f32 %v6054_v27, %v11510_v52 }
 0x54d   : > { %v6056_v16 = vpop.f32.mrf.mxu0  ;;  %v6356_v58 = vpop.f32.mrf.mxu1 }
 0x54e   : > { %6543 = vst [vmem:[%s8369_s4 + $0x4a8] sm:$0xff] %v6343_v20  ;;  %v6348_v34 = vadd.f32 %v6347_v18, %v6055_v21  ;;  %v6057_v31 = vadd.f32 %v6056_v16, %v11511_v30 }
 0x54f   : > { %v6061_v2 = vpop.f32.mrf.mxu0  ;;  %v6361_v48 = vpop.f32.mrf.mxu1 }
 0x550   : > { %6548 = vst [vmem:[%s8369_s4 + $0x4d0] sm:$0xff] %v6348_v34  ;;  %v6350_v46 = vadd.f32 %v6349_v5, %v6057_v31  ;;  %v6062_v41 = vadd.f32 %v6061_v2, %v11512_v4 }
 0x551   : > { %v6063_v29 = vpop.f32.mrf.mxu0  ;;  %v6363_v0 = vpop.f32.mrf.mxu1 }
 0x552   : > { %6549 = vst [vmem:[%s8369_s4 + $0x4d8] sm:$0xff] %v6350_v46  ;;  %v6355_v3 = vadd.f32 %v6354_v23, %v6062_v41  ;;  %v6064_v12 = vadd.f32 %v6063_v29, %v11513_v6 }
 0x553   : > { %v6068_v11 = vpop.f32.mrf.mxu0  ;;  %v6368_v26 = vpop.f32.mrf.mxu1 }
 0x554   : > { %6554 = vst [vmem:[%s8369_s4 + $0x500] sm:$0xff] %v6355_v3  ;;  %v6357_v35 = vadd.f32 %v6356_v58, %v6064_v12  ;;  %v6069_v33 = vadd.f32 %v6068_v11, %v10159_v49 }
 0x555   : > { %v6070_v43 = vpop.f32.mrf.mxu0  ;;  %v6370_v28 = vpop.f32.mrf.mxu1 }
 0x556   : > { %6555 = vst [vmem:[%s8369_s4 + $0x508] sm:$0xff] %v6357_v35  ;;  %v6362_v1 = vadd.f32 %v6361_v48, %v6069_v33  ;;  %v6071_v14 = vadd.f32 %v6070_v43, %v11514_v9 }
 0x557   : > { %v6075_v51 = vpop.f32.mrf.mxu0  ;;  %v6375_v50 = vpop.f32.mrf.mxu1 }
 0x558   : > { %6560 = vst [vmem:[%s8369_s4 + $0x530] sm:$0xff] %v6362_v1  ;;  %v6364_v60 = vadd.f32 %v6363_v0, %v6071_v14  ;;  %v6076_v17 = vadd.f32 %v6075_v51, %v10165_v32 }
 0x559   : > { %v6077_v40 = vpop.f32.mrf.mxu0  ;;  %v6377_v38 = vpop.f32.mrf.mxu1 }
 0x55a   : > { %6561 = vst [vmem:[%s8369_s4 + $0x538] sm:$0xff] %v6364_v60  ;;  %v6369_v19 = vadd.f32 %v6368_v26, %v6076_v17  ;;  %v6078_v49 = vadd.f32 %v6077_v40, %v10168_v10 }
 0x55b   : > { %v6082_v59 = vpop.f32.mrf.mxu0  ;;  %v6382_v37 = vpop.f32.mrf.mxu1 }
 0x55c   : > { %6566 = vst [vmem:[%s8369_s4 + $0x560] sm:$0xff] %v6369_v19  ;;  %v6371_v15 = vadd.f32 %v6370_v28, %v6078_v49  ;;  %v6083_v55 = vadd.f32 %v6082_v59, %v10171_v39 }
 0x55d   : > { %v6084_v47 = vpop.f32.mrf.mxu0  ;;  %v6384_v42 = vpop.f32.mrf.mxu1 }
 0x55e   : > { %6567 = vst [vmem:[%s8369_s4 + $0x568] sm:$0xff] %v6371_v15  ;;  %v6376_v57 = vadd.f32 %v6375_v50, %v6083_v55  ;;  %v6085_v32 = vadd.f32 %v6084_v47, %v10174_v54 }
 0x55f   : > { %v6089_v63 = vpop.f32.mrf.mxu0  ;;  %v6389_v13 = vpop.f32.mrf.mxu1 }
 0x560   : > { %6572 = vst [vmem:[%s8369_s4 + $0x590] sm:$0xff] %v6376_v57  ;;  %v6378_v10 = vadd.f32 %v6377_v38, %v6085_v32  ;;  %v6090_v22 = vadd.f32 %v6089_v63, %v10177_v53 }
 0x561   : > { %v6091_v44 = vpop.f32.mrf.mxu0  ;;  %v6391_v25 = vpop.f32.mrf.mxu1 }
 0x562   : > { %6573 = vst [vmem:[%s8369_s4 + $0x598] sm:$0xff] %v6378_v10  ;;  %v6383_v18 = vadd.f32 %v6382_v37, %v6090_v22  ;;  %v6092_v39 = vadd.f32 %v6091_v44, %v10180_v45 }
 0x563   : > { %v6096_v56 = vpop.f32.mrf.mxu0 }
 0x564   : > { %6578 = vst [vmem:[%s8369_s4 + $0x5c0] sm:$0xff] %v6383_v18  ;;  %v6385_v54 = vadd.f32 %v6384_v42, %v6092_v39  ;;  %v6097_v36 = vadd.f32 %v6096_v56, %v10183_v8 }
 0x565   : > { %v6098_v24 = vpop.f32.mrf.mxu0 }
 0x566   : > { %6579 = vst [vmem:[%s8369_s4 + $0x5c8] sm:$0xff] %v6385_v54  ;;  %v6390_v53 = vadd.f32 %v6389_v13, %v6097_v36  ;;  %v6099_v5 = vadd.f32 %v6098_v24, %v10186_v61 }
 0x568   : > { %6584 = vst [vmem:[%s8369_s4 + $0x5f0] sm:$0xff] %v6390_v53  ;;  %v6392_v45 = vadd.f32 %v6391_v25, %v6099_v5 }
 0x56a   : > { %6585 = vst [vmem:[%s8369_s4 + $0x5f8] sm:$0xff] %v6392_v45 }
 0x56b   : > { %6733 = shalt.err (!%p6730_p3)
}
 0x56c   : > { %s6734_s29 = scalar_lea.hbm %s10319_s5, 24576  ;;  %s6738_s11 = scalar_lea.hbm %s10370_s3, 49152 }
 0x56d   : > { %p6735_p4 = scmp.ne.s32.totalorder %s10319_s5, %s6734_s29  ;;  %p6739_p9 = scmp.lt.s32.totalorder %s10319_s5, %s10370_s3 }
 0x56e   : > { %p6740_p10 = scmp.lt.s32.totalorder %s6738_s11, %s6734_s29 }
 0x56f   : > { %p6736_p7 = pnand %p6735_p4, %p6844_p5 }
 0x570   : > { %p6741_p11 = por %p6740_p10, %p6739_p9 }
 0x571   : > { %p6737_p8 = pneg %p6736_p7 }
 0x573   : > { %p6742_p12 = pnand %p6741_p11, %p6737_p8 }
 0x575   : > { %6745 = shalt.err (!%p6742_p12)
}
 0x576   : > { %s6784_s20 = smov 768   ;;  %s6785_s24 = smov 48  }
 0x577   : > { %6676 = dma.vmem_to_hbm [thread:$0]  (%p6844_p5), %s10321_s27, 24576, %s10319_s5, %s10327_s16, %s6784_s20, %s6784_s20, %s6785_s24  }
 0x578 PF: > { %p6682_p13 = scmp.ge.s32.totalorder %s6780_s15, 2  ;;  %s6616_s25 = sand.u32 1, %s6768_s12  }
 0x579   : > { %s6617_s26 = scalar_lea.sflag [#allocation3], %s6616_s25 }
 0x57a   : > { %p6679_p0 = pnand %p6682_p13, %p6848_p6 }
 0x57c   : > { %p6680_p1 = pneg %p6679_p0 }
 0x57e   : > { %6763 = dma.done.wait (%p6680_p1), %s6617_s26, 24576  }
 0x57f   : > { %6765 = vsyncadd (%p6680_p1), %s6617_s26, 4294942720  ;;  %p13_p2 = scmp.ge.s32.totalorder %s6831_s18, 4   ;;  %s11515_s12 = smov %s6772_s13 }
 0x580   : > { %s11516_s13 = smov %s6776_s14  ;;  %s11517_s14 = smov %s6842_s21 }
 0x581   : > { %s11518_s15 = smov %s6831_s18  ;;  %15 = sbr.rel (!%p13_p2) target bundleno = 3 (0x3), region = 67 }
 0x586   :  { %6622 = vsyncpa [#allocation3], 1 }
 0x587   :  { %6624 = vsyncpa [#allocation3 + $0x1], 1 }

</bundles_post_ra>
